<compile_context>
chip_gen: v5e
topology: v5e:2x2
jax: 0.10.0
libtpu: 0.0.40
codegen_flags: <defaults>
</compile_context>

<pallas_src>
import jax
import jax.numpy as jnp
from jax.experimental import pallas as pl
from jax.experimental.pallas import tpu as pltpu

d_model = 512
d_ff = 2048


def ffn_kernel(x_ref, w1_ref, b1_ref, w2_ref, b2_ref, o_ref):
    # x_ref: (TM, d_model) f32   w1_ref: (d_model, d_ff) bf16  b1_ref: (1, d_ff) f32
    # w2_ref: (d_ff, d_model) bf16  b2_ref: (1, d_model) f32   o_ref: (TM, d_model) f32
    x_bf = x_ref[...].astype(jnp.bfloat16)
    h = jnp.dot(x_bf, w1_ref[...], preferred_element_type=jnp.float32)
    h = jnp.maximum(h + b1_ref[...], 0.0)                      # bias + ReLU in f32 (VPU)
    y = jnp.dot(h.astype(jnp.bfloat16), w2_ref[...],
                preferred_element_type=jnp.float32)
    o_ref[...] = (y + b2_ref[...]).astype(o_ref.dtype)


def _round_up(n, m):
    return -(-n // m) * m


def _default_tm():
    # 512 is safe on all generations (v7x: 64 MiB VMEM); 1024 is comfortable
    # on v5e/v6e (128 MiB VMEM) and cuts the grid-step count further.
    try:
        vmem = pltpu.get_tpu_info().vmem_capacity_bytes
        return 1024 if vmem >= (100 << 20) else 512
    except Exception:
        return 512


def prepare_params(w1, b1, w2, b2):
    """One-time parameter prep (call once, outside the per-step function).

    Weights -> bf16 (MXU input rate), biases -> f32 row vectors.
    w1: (d_model, d_ff), b1: (d_ff,), w2: (d_ff, d_model), b2: (d_model,)
    (weights stored as [in, out], i.e. PyTorch's weight transposed).
    """
    return (w1.astype(jnp.bfloat16),
            b1.reshape(1, d_ff).astype(jnp.float32),
            w2.astype(jnp.bfloat16),
            b2.reshape(1, d_model).astype(jnp.float32))


def feed_forward(x, params, *, tm=None):
    """x: (B, S, d_model) float32 -> (B, S, d_model) float32.

    params: output of prepare_params() (bf16 weights, f32 biases).
    """
    w1_bf, b1_2, w2_bf, b2_2 = params
    B, S, D = x.shape
    assert D == d_model
    M = B * S

    if tm is None:
        tm = _default_tm()
    # Effective row tile: as large as requested but never larger than the
    # (8-aligned) row count. Ragged M is handled by Pallas's partial final
    # block (OOB reads are row-local garbage, OOB writes are discarded) —
    # no full-array pad/slice copies in HBM.
    tm_eff = min(tm, max(8, _round_up(M, 8)))

    x2 = x.reshape(M, D)
    grid = (pl.cdiv(M, tm_eff),)

    flops = 4 * M * d_model * d_ff                           # 2 matmuls, 2 flop/MAC
    bytes_accessed = (2 * (d_model * d_ff + d_ff * d_model)  # bf16 weights
                      + 4 * (d_ff + d_model)                 # f32 biases
                      + 4 * 2 * M * d_model)                 # f32 x + out

    def resident(shape):
        # Constant index_map -> loaded once; single buffer (no pointless
        # double-buffering of the resident weights/biases).
        return pl.BlockSpec(shape, lambda i: (0, 0), pipeline_mode=pl.Buffered(1))

    out = pl.pallas_call(
        ffn_kernel,
        out_shape=jax.ShapeDtypeStruct((M, D), x.dtype),
        grid_spec=pltpu.PrefetchScalarGridSpec(
            num_scalar_prefetch=0,
            grid=grid,
            in_specs=[
                pl.BlockSpec((tm_eff, D), lambda i: (i, 0)),   # x rows (pipelined)
                resident((d_model, d_ff)),                     # W1 (resident)
                resident((1, d_ff)),                           # b1
                resident((d_ff, d_model)),                     # W2 (resident)
                resident((1, d_model)),                        # b2
            ],
            out_specs=pl.BlockSpec((tm_eff, D), lambda i: (i, 0)),
        ),
        compiler_params=pltpu.CompilerParams(
            dimension_semantics=("parallel",),      # shard M-steps across TCs (v7x)
            vmem_limit_bytes=48 << 20,              # headroom under v7x's 64 MiB VMEM
        ),
        cost_estimate=pl.CostEstimate(
            flops=flops, transcendentals=0, bytes_accessed=bytes_accessed),
    )(x2, w1_bf, b1_2, w2_bf, b2_2)

    return out.reshape(B, S, D)


def init_params(key):
    """Deterministic init mimicking nn.Linear (uniform(-1/sqrt(fan_in), +))."""
    k1, k2, k3, k4 = jax.random.split(key, 4)
    bound1 = 1.0 / (d_model ** 0.5)
    bound2 = 1.0 / (d_ff ** 0.5)
    # stored as [in, out] (transposed relative to PyTorch's [out, in])
    w1 = jax.random.uniform(k1, (d_model, d_ff), jnp.float32, -bound1, bound1)
    b1 = jax.random.uniform(k2, (d_ff,), jnp.float32, -bound1, bound1)
    w2 = jax.random.uniform(k3, (d_ff, d_model), jnp.float32, -bound2, bound2)
    b2 = jax.random.uniform(k4, (d_model,), jnp.float32, -bound2, bound2)
    return w1, b1, w2, b2


if __name__ == "__main__":
    key = jax.random.PRNGKey(0)
    kx, kp = jax.random.split(key)

    B, S = 2, 8                      # batch=2, seq=8 -> M=16 token rows
    x = jax.random.normal(kx, (B, S, d_model), jnp.float32)
    w1, b1, w2, b2 = init_params(kp)

    # Cast weights to bf16 exactly once (not per forward call).
    params = prepare_params(w1, b1, w2, b2)

    out = feed_forward(x, params)
    out = jax.block_until_ready(out)
    assert out.shape == (B, S, d_model)

    # Reference with the same bf16-input / f32-accumulate mixed precision.
    x2 = x.reshape(-1, d_model)
    h_ref = jnp.dot(x2.astype(jnp.bfloat16), w1.astype(jnp.bfloat16),
                    preferred_element_type=jnp.float32) + b1
    h_ref = jnp.maximum(h_ref, 0.0)
    ref = (jnp.dot(h_ref.astype(jnp.bfloat16), w2.astype(jnp.bfloat16),
                   preferred_element_type=jnp.float32) + b2).reshape(B, S, d_model)
    assert jnp.allclose(out, ref, atol=5e-3, rtol=5e-3)

    # Loose sanity check against the pure-f32 forward (expected bf16-level error).
    ref_f32 = jnp.maximum(x @ w1 + b1, 0.0) @ w2 + b2
    assert jnp.allclose(out, ref_f32, atol=1e-1, rtol=5e-2)

    print("KERNEL_OK")
</pallas_src>

<mosaic_0001>
module attributes {stable_mosaic.version = 11 : i64} {
  func.func @ffn_kernel(%arg0: i32, %arg1: memref<16x512xf32, #tpu.memory_space<vmem>>, %arg2: memref<512x2048xbf16, #tpu.memory_space<vmem>>, %arg3: memref<1x2048xf32, #tpu.memory_space<vmem>>, %arg4: memref<2048x512xbf16, #tpu.memory_space<vmem>>, %arg5: memref<1x512xf32, #tpu.memory_space<vmem>>, %arg6: memref<16x512xf32, #tpu.memory_space<vmem>>) attributes {dimension_semantics = [#tpu.dimension_semantics<parallel>], iteration_bounds = array<i64: 1>, scalar_prefetch = 0 : i64, scratch_operands = 0 : i64, tpu.core_type = #tpu.core_type<tc>, window_params = [{transform_indices = @transform_0, window_bounds = array<i64: 16, 512>}, {pipeline_mode = #tpu.pipeline_mode<synchronous>, transform_indices = @transform_1, window_bounds = array<i64: 512, 2048>}, {pipeline_mode = #tpu.pipeline_mode<synchronous>, transform_indices = @transform_2, window_bounds = array<i64: 1, 2048>}, {pipeline_mode = #tpu.pipeline_mode<synchronous>, transform_indices = @transform_3, window_bounds = array<i64: 2048, 512>}, {pipeline_mode = #tpu.pipeline_mode<synchronous>, transform_indices = @transform_4, window_bounds = array<i64: 1, 512>}, {transform_indices = @transform_5, window_bounds = array<i64: 16, 512>}]} {
    %c0 = arith.constant 0 : index
    %c0_0 = arith.constant 0 : index
    %0 = vector.load %arg1[%c0, %c0_0] : memref<16x512xf32, #tpu.memory_space<vmem>>, vector<16x512xf32>
    %1 = arith.truncf %0 : vector<16x512xf32> to vector<16x512xbf16>
    %c0_1 = arith.constant 0 : index
    %c0_2 = arith.constant 0 : index
    %2 = vector.load %arg2[%c0_1, %c0_2] : memref<512x2048xbf16, #tpu.memory_space<vmem>>, vector<512x2048xbf16>
    %cst = arith.constant dense<0.000000e+00> : vector<16x2048xf32>
    %3 = tpu.matmul %1, %2, %cst {dimension_numbers = #tpu.dot_dimension_numbers<[1], [0], [0], [1], [0, 0, 1, 1], [], []>} : vector<16x512xbf16>, vector<512x2048xbf16>, vector<16x2048xf32> -> vector<16x2048xf32>
    %c0_3 = arith.constant 0 : index
    %c0_4 = arith.constant 0 : index
    %4 = vector.load %arg3[%c0_3, %c0_4] : memref<1x2048xf32, #tpu.memory_space<vmem>>, vector<1x2048xf32>
    %5 = vector.broadcast %4 : vector<1x2048xf32> to vector<16x2048xf32>
    %6 = arith.addf %3, %5 : vector<16x2048xf32>
    %cst_5 = arith.constant 0.000000e+00 : f32
    %7 = vector.broadcast %cst_5 : f32 to vector<16x2048xf32>
    %8 = arith.maximumf %6, %7 : vector<16x2048xf32>
    %9 = arith.truncf %8 : vector<16x2048xf32> to vector<16x2048xbf16>
    %c0_6 = arith.constant 0 : index
    %c0_7 = arith.constant 0 : index
    %10 = vector.load %arg4[%c0_6, %c0_7] : memref<2048x512xbf16, #tpu.memory_space<vmem>>, vector<2048x512xbf16>
    %cst_8 = arith.constant dense<0.000000e+00> : vector<16x512xf32>
    %11 = tpu.matmul %9, %10, %cst_8 {dimension_numbers = #tpu.dot_dimension_numbers<[1], [0], [0], [1], [0, 0, 1, 1], [], []>} : vector<16x2048xbf16>, vector<2048x512xbf16>, vector<16x512xf32> -> vector<16x512xf32>
    %c0_9 = arith.constant 0 : index
    %c0_10 = arith.constant 0 : index
    %12 = vector.load %arg5[%c0_9, %c0_10] : memref<1x512xf32, #tpu.memory_space<vmem>>, vector<1x512xf32>
    %13 = vector.broadcast %12 : vector<1x512xf32> to vector<16x512xf32>
    %14 = arith.addf %11, %13 : vector<16x512xf32>
    %c0_11 = arith.constant 0 : index
    %c0_12 = arith.constant 0 : index
    %15 = vector.load %arg6[%c0_11, %c0_12] : memref<16x512xf32, #tpu.memory_space<vmem>>, vector<16x512xf32>
    tpu.vector_store %arg6[%c0_11, %c0_12], %14 {strides = array<i32>} : memref<16x512xf32, #tpu.memory_space<vmem>>, vector<16x512xf32>,
    return
  }
  func.func @transform_0(%arg0: i32) -> (i32, i32) {
    %c0_i32 = arith.constant 0 : i32
    %c0_i32_0 = arith.constant 0 : i32
    return %arg0, %c0_i32 : i32, i32
  }
  func.func @transform_1(%arg0: i32) -> (i32, i32) {
    %c0_i32 = arith.constant 0 : i32
    %c0_i32_0 = arith.constant 0 : i32
    %c0_i32_1 = arith.constant 0 : i32
    return %c0_i32, %c0_i32_0 : i32, i32
  }
  func.func @transform_2(%arg0: i32) -> (i32, i32) {
    %c0_i32 = arith.constant 0 : i32
    %c0_i32_0 = arith.constant 0 : i32
    %c0_i32_1 = arith.constant 0 : i32
    return %c0_i32, %c0_i32_0 : i32, i32
  }
  func.func @transform_3(%arg0: i32) -> (i32, i32) {
    %c0_i32 = arith.constant 0 : i32
    %c0_i32_0 = arith.constant 0 : i32
    %c0_i32_1 = arith.constant 0 : i32
    return %c0_i32, %c0_i32_0 : i32, i32
  }
  func.func @transform_4(%arg0: i32) -> (i32, i32) {
    %c0_i32 = arith.constant 0 : i32
    %c0_i32_0 = arith.constant 0 : i32
    %c0_i32_1 = arith.constant 0 : i32
    return %c0_i32, %c0_i32_0 : i32, i32
  }
  func.func @transform_5(%arg0: i32) -> (i32, i32) {
    %c0_i32 = arith.constant 0 : i32
    %c0_i32_0 = arith.constant 0 : i32
    return %arg0, %c0_i32 : i32, i32
  }
}

</mosaic_0001>

<bundles_post_ra>
// kernel: tpu_custom_call.1
= control target key start
LH: loop header
LB: loop body
LE: loop exit
PB: predicated region body
PF: predicated region fallthrough
CT: control target
= control target key end

     0   :  { %10 = vsyncpa [#allocation3], 0  ;;  %s14221_s0 = inlined_call_operand.hbm [shape: f32[16,512], index: 0, kind: input, shape index: {}]   ;;  %s14222_s1 = inlined_call_operand.hbm [shape: bf16[512,2048], index: 1, kind: input, shape index: {}]   ;;  %s14223_s2 = inlined_call_operand.hbm [shape: f32[1,2048], index: 2, kind: input, shape index: {}]   ;;  %s14224_s3 = inlined_call_operand.hbm [shape: bf16[2048,512], index: 3, kind: input, shape index: {}]   ;;  %s14225_s4 = inlined_call_operand.hbm [shape: f32[1,512], index: 4, kind: input, shape index: {}]   ;;  %s14226_s5 = inlined_call_operand.hbm [shape: f32[16,512], index: 5, kind: output, shape index: {}]  }
   0x1   :  { %11 = vsyncpa [#allocation6], 0 }
   0x2   :  { %12 = vsyncpa [#allocation9], 0  ;;  %s31_s20 = sshll.u32 %s14222_s1, 4  ;;  %s32_s20 = int_to_ptr.hbm [resolvable:$true] %s31_s20 }
   0x3   :  { %13 = vsyncpa [#allocation4], 0  ;;  %s13455_s21 = smov [#allocation5]   ;;  %s55_s25 = sshll.u32 %s14224_s3, 4  ;;  %s56_s25 = int_to_ptr.hbm [resolvable:$true] %s55_s25 }
   0x4   :  { %s33_s22 = sshll.u32 %s13455_s21, 4  ;;  %s13456_s26 = smov 1024   ;;  %s34_s22 = int_to_ptr.vmem [resolvable:$true] %s33_s22 }
   0x5   :  { %s13457_s27 = smov 64   ;;  %s13458_s28 = smov [#allocation8]  }
   0x6   :  { %39 = dma.hbm_to_vmem [thread:$0]  %s32_s20, 65536, %s34_s22, [#allocation6], %s13456_s26, %s13456_s26, %s13457_s27  }
   0x7   :  { %s57_s29 = sshll.u32 %s13458_s28, 4  ;;  %s13459_s30 = smov 256   ;;  %s58_s29 = int_to_ptr.vmem [resolvable:$true] %s57_s29 }
   0x8   :  { %s13460_s6 = smov 16   ;;  %s18_s8 = sshll.u32 %s14221_s0, 4  ;;  %s19_s8 = int_to_ptr.hbm [resolvable:$true] %s18_s8 }
   0x9   :  { %63 = dma.hbm_to_vmem [thread:$0]  %s56_s25, 65536, %s58_s29, [#allocation9], %s13459_s30, %s13459_s30, %s13460_s6  }
   0xa   :  { %s13461_s9 = smov [#allocation2]   ;;  %s45_s12 = sshll.u32 %s14223_s2, 4  ;;  %s46_s12 = int_to_ptr.hbm [resolvable:$true] %s45_s12 }
   0xb   :  { %s20_s10 = sshll.u32 %s13461_s9, 4  ;;  %s13462_s13 = smov 512   ;;  %s21_s10 = int_to_ptr.vmem [resolvable:$true] %s20_s10 }
   0xc   :  { %s13463_s14 = smov 32   ;;  %s13464_s15 = smov [#allocation7]  }
   0xd   :  { %26 = dma.hbm_to_vmem [thread:$0]  %s19_s8, 1024, %s21_s10, [#allocation3], %s13462_s13, %s13462_s13, %s13463_s14  }
   0xe   :  { %s47_s16 = sshll.u32 %s13464_s15, 4  ;;  %s69_s0 = sshll.u32 %s14225_s4, 4  ;;  %s48_s16 = int_to_ptr.vmem [resolvable:$true] %s47_s16  ;;  %s70_s0 = int_to_ptr.hbm [resolvable:$true] %s69_s0 }
   0xf   :  { %50 = dma.hbm_to_vmem [thread:$0]  %s46_s12, 256, %s48_s16, [#allocation6]  }
  0x10   :  { %s13465_s19 = smov [#allocation10]  }
  0x11   :  { %s71_s20 = sshll.u32 %s13465_s19, 4  ;;  %s72_s20 = int_to_ptr.vmem [resolvable:$true] %s71_s20 }
  0x12   :  { %74 = dma.hbm_to_vmem [thread:$0]  %s70_s0, 64, %s72_s20, [#allocation9]  }
  0x13   :  { %13447 = dma.done.wait [#allocation3], 1024  }
  0x14   :  { %13448 = vsyncadd [#allocation3], 4294966272 }
  0x15   :  { %13449 = dma.done.wait [#allocation6], 65792  }
  0x16   :  { %13450 = vsyncadd [#allocation6], 4294901504 }
  0x17   :  { %13451 = dma.done.wait [#allocation9], 65600  }
  0x18   :  { %13452 = vsyncadd [#allocation9], 4294901696  ;;  %v8616_v0 = vld [vmem:[#allocation5 + $0x380] sm:$0xf]  ;;  %s13466_s2 = smov [#allocation11]   ;;  %s8151_s23 = sshll.u32 %s14226_s5, 4  ;;  %s8152_s23 = int_to_ptr.hbm [resolvable:$true] %s8151_s23 }
  0x19   :  { %v12382_v1 = vld [vmem:[#allocation5 + $0x3bc] sm:$0xf0]  ;;  %s8149_s4 = sshll.u32 %s13466_s2, 4  ;;  %s8150_s4 = int_to_ptr.vmem [resolvable:$true] %s8149_s4 }
  0x1a   :  { %v9128_v2 = vld [vmem:[#allocation5 + $0x780] sm:$0xf]  ;;  %v8617_v3 = vor.u32 %v12382_v1, %v8616_v0 }
  0x1b   :  { %v12510_v4 = vld [vmem:[#allocation5 + $0x7bc] sm:$0xf0] }
  0x1c   :  { %v9640_v5 = vld [vmem:[#allocation5 + $0xb80] sm:$0xf]  ;;  %v9129_v7 = vor.u32 %v12510_v4, %v9128_v2  ;;  %3215 = vmatpush.bf16.msra.mxu0 %v8617_v3 }
  0x1d   :  { %v12638_v6 = vld [vmem:[#allocation5 + $0xbbc] sm:$0xf0] }
  0x1e   :  { %v9641_v8 = vor.u32 %v12638_v6, %v9640_v5  ;;  %v10152_v9 = vld [vmem:[#allocation5 + $0xf80] sm:$0xf]  ;;  %3229 = vmatpush.bf16.msra.mxu1 %v9129_v7 }
  0x1f   :  { %v12766_v10 = vld [vmem:[#allocation5 + $0xfbc] sm:$0xf0] }
  0x20   :  { %v8552_v11 = vld [vmem:[#allocation5 + $0x300] sm:$0xf]  ;;  %v10153_v12 = vor.u32 %v12766_v10, %v10152_v9  ;;  %3243 = vmatpush.bf16.msra.mxu2 %v9641_v8 }
  0x21   :  { %v12366_v13 = vld [vmem:[#allocation5 + $0x33c] sm:$0xf0] }
  0x22   :  { %v9064_v14 = vld [vmem:[#allocation5 + $0x700] sm:$0xf]  ;;  %v8553_v16 = vor.u32 %v12366_v13, %v8552_v11  ;;  %3257 = vmatpush.bf16.msra.mxu3 %v10153_v12 }
  0x23   :  { %v12494_v15 = vld [vmem:[#allocation5 + $0x73c] sm:$0xf0] }
  0x24   :  { %v9065_v17 = vor.u32 %v12494_v15, %v9064_v14  ;;  %v9576_v18 = vld [vmem:[#allocation5 + $0xb00] sm:$0xf]  ;;  %3216 = vmatpush.bf16.msra.mxu0 %v8553_v16 }
  0x25   :  { %v12622_v19 = vld [vmem:[#allocation5 + $0xb3c] sm:$0xf0] }
  0x26   :  { %v10088_v20 = vld [vmem:[#allocation5 + $0xf00] sm:$0xf]  ;;  %v9577_v21 = vor.u32 %v12622_v19, %v9576_v18  ;;  %3230 = vmatpush.bf16.msra.mxu1 %v9065_v17 }
  0x27   :  { %v12750_v22 = vld [vmem:[#allocation5 + $0xf3c] sm:$0xf0] }
  0x28   :  { %v8488_v23 = vld [vmem:[#allocation5 + $0x280] sm:$0xf]  ;;  %v10089_v25 = vor.u32 %v12750_v22, %v10088_v20  ;;  %3244 = vmatpush.bf16.msra.mxu2 %v9577_v21 }
  0x29   :  { %v12350_v24 = vld [vmem:[#allocation5 + $0x2bc] sm:$0xf0] }
  0x2a   :  { %v9000_v26 = vld [vmem:[#allocation5 + $0x680] sm:$0xf]  ;;  %v8489_v29 = vor.u32 %v12350_v24, %v8488_v23  ;;  %3258 = vmatpush.bf16.msra.mxu3 %v10089_v25 }
  0x2b   :  { %v12478_v27 = vld [vmem:[#allocation5 + $0x6bc] sm:$0xf0] }
  0x2c   :  { %v9512_v28 = vld [vmem:[#allocation5 + $0xa80] sm:$0xf]  ;;  %v9001_v33 = vor.u32 %v12478_v27, %v9000_v26  ;;  %3217 = vmatpush.bf16.msra.mxu0 %v8489_v29  ;;  %v8618_v29 = vld [vmem:[#allocation5 + $0x3c0] sm:$0xf0] }
  0x2d   :  { %v12606_v30 = vld [vmem:[#allocation5 + $0xabc] sm:$0xf0] }
  0x2e   :  { %v10024_v31 = vld [vmem:[#allocation5 + $0xe80] sm:$0xf]  ;;  %v9513_v34 = vor.u32 %v12606_v30, %v9512_v28  ;;  %3231 = vmatpush.bf16.msra.mxu1 %v9001_v33  ;;  %v12374_v28 = vld [vmem:[#allocation5 + $0x384] sm:$0xf] }
  0x2f   :  { %v12734_v32 = vld [vmem:[#allocation5 + $0xebc] sm:$0xf0]  ;;  %v12502_v30 = vld [vmem:[#allocation5 + $0x784] sm:$0xf] }
  0x30   :  { %v8424_v35 = vld [vmem:[#allocation5 + $0x200] sm:$0xf]  ;;  %v10025_v38 = vor.u32 %v12734_v32, %v10024_v31  ;;  %3245 = vmatpush.bf16.msra.mxu2 %v9513_v34  ;;  %v9130_v32 = vld [vmem:[#allocation5 + $0x7c0] sm:$0xf0] }
  0x31   :  { %v12334_v36 = vld [vmem:[#allocation5 + $0x23c] sm:$0xf0]  ;;  %v12630_v33 = vld [vmem:[#allocation5 + $0xb84] sm:$0xf] }
  0x32   :  { %v8936_v37 = vld [vmem:[#allocation5 + $0x600] sm:$0xf]  ;;  %v8425_v44 = vor.u32 %v12334_v36, %v8424_v35  ;;  %3259 = vmatpush.bf16.msra.mxu3 %v10025_v38  ;;  %v9642_v34 = vld [vmem:[#allocation5 + $0xbc0] sm:$0xf0] }
  0x33   :  { %v12462_v39 = vld [vmem:[#allocation5 + $0x63c] sm:$0xf0]  ;;  %v10154_v38 = vld [vmem:[#allocation5 + $0xfc0] sm:$0xf0] }
  0x34   :  { %v9448_v40 = vld [vmem:[#allocation5 + $0xa00] sm:$0xf]  ;;  %v8937_v45 = vor.u32 %v12462_v39, %v8936_v37  ;;  %3218 = vmatpush.bf16.msra.mxu0 %v8425_v44  ;;  %v12758_v37 = vld [vmem:[#allocation5 + $0xf84] sm:$0xf] }
  0x35   :  { %v12590_v41 = vld [vmem:[#allocation5 + $0xa3c] sm:$0xf0]  ;;  %v8554_v44 = vld [vmem:[#allocation5 + $0x340] sm:$0xf0] }
  0x36   :  { %v9960_v42 = vld [vmem:[#allocation5 + $0xe00] sm:$0xf]  ;;  %v9449_v46 = vor.u32 %v12590_v41, %v9448_v40  ;;  %3232 = vmatpush.bf16.msra.mxu1 %v8937_v45  ;;  %v8621_v40 = vor.u32 %v12374_v28, %v8618_v29  ;;  %v9133_v41 = vor.u32 %v12502_v30, %v9130_v32  ;;  %v12486_v45 = vld [vmem:[#allocation5 + $0x704] sm:$0xf]  ;;  %v100_v28 = vld [vmem:[#allocation2 + $0x28] sm:$0xff] }
  0x37   :  { %v12718_v43 = vld [vmem:[#allocation5 + $0xe3c] sm:$0xf0]  ;;  %v8874_v30 = vld [vmem:[#allocation5 + $0x5c0] sm:$0xf0] }
  0x38   :  { %v8360_v47 = vld [vmem:[#allocation5 + $0x180] sm:$0xf]  ;;  %v9961_v50 = vor.u32 %v12718_v43, %v9960_v42  ;;  %3246 = vmatpush.bf16.msra.mxu2 %v9449_v46  ;;  %v9645_v42 = vor.u32 %v12630_v33, %v9642_v34  ;;  %v12358_v43 = vld [vmem:[#allocation5 + $0x304] sm:$0xf]  ;;  %v10157_v46 = vor.u32 %v12758_v37, %v10154_v38 }
  0x39   :  { %v12318_v48 = vld [vmem:[#allocation5 + $0x1bc] sm:$0xf0]  ;;  %v9386_v32 = vld [vmem:[#allocation5 + $0x9c0] sm:$0xf0] }
  0x3a   :  { %v8872_v49 = vld [vmem:[#allocation5 + $0x580] sm:$0xf]  ;;  %v8361_v56 = vor.u32 %v12318_v48, %v8360_v47  ;;  %3260 = vmatpush.bf16.msra.mxu3 %v9961_v50  ;;  %v9066_v47 = vld [vmem:[#allocation5 + $0x740] sm:$0xf0] }
  0x3b   :  { %v12446_v51 = vld [vmem:[#allocation5 + $0x5bc] sm:$0xf0]  ;;  %v12614_v48 = vld [vmem:[#allocation5 + $0xb04] sm:$0xf] }
  0x3c   :  { %v9384_v52 = vld [vmem:[#allocation5 + $0x980] sm:$0xf]  ;;  %v8873_v57 = vor.u32 %v12446_v51, %v8872_v49  ;;  %3219 = vmatpush.bf16.msra.mxu0 %v8361_v56  ;;  %v9578_v49 = vld [vmem:[#allocation5 + $0xb40] sm:$0xf0] }
  0x3d   :  { %v12574_v53 = vld [vmem:[#allocation5 + $0x9bc] sm:$0xf0]  ;;  %v12742_v50 = vld [vmem:[#allocation5 + $0xf04] sm:$0xf] }
  0x3e   :  { %v9896_v54 = vld [vmem:[#allocation5 + $0xd80] sm:$0xf]  ;;  %v9385_v58 = vor.u32 %v12574_v53, %v9384_v52  ;;  %3233 = vmatpush.bf16.msra.mxu1 %v8873_v57  ;;  %v10090_v51 = vld [vmem:[#allocation5 + $0xf40] sm:$0xf0]  ;;  %v8557_v52 = vor.u32 %v12358_v43, %v8554_v44 }
  0x3f   :  { %v12702_v55 = vld [vmem:[#allocation5 + $0xdbc] sm:$0xf0]  ;;  %v12342_v53 = vld [vmem:[#allocation5 + $0x284] sm:$0xf] }
  0x40   :  { %v8296_v59 = vld [vmem:[#allocation5 + $0x100] sm:$0xf]  ;;  %v9897_v62 = vor.u32 %v12702_v55, %v9896_v54  ;;  %3247 = vmatpush.bf16.msra.mxu2 %v9385_v58  ;;  %v9069_v54 = vor.u32 %v12486_v45, %v9066_v47  ;;  %v9581_v55 = vor.u32 %v12614_v48, %v9578_v49  ;;  %v8490_v56 = vld [vmem:[#allocation5 + $0x2c0] sm:$0xf0] }
  0x41   :  { %v12302_v60 = vld [vmem:[#allocation5 + $0x13c] sm:$0xf0]  ;;  %v12470_v57 = vld [vmem:[#allocation5 + $0x684] sm:$0xf] }
  0x42   :  { %v8808_v61 = vld [vmem:[#allocation5 + $0x500] sm:$0xf]  ;;  %v8297_v4 = vor.u32 %v12302_v60, %v8296_v59  ;;  %3261 = vmatpush.bf16.msra.mxu3 %v9897_v62  ;;  %v9002_v58 = vld [vmem:[#allocation5 + $0x6c0] sm:$0xf0]  ;;  %v10093_v59 = vor.u32 %v12742_v50, %v10090_v51 }
  0x43   :  { %v12430_v63 = vld [vmem:[#allocation5 + $0x53c] sm:$0xf0]  ;;  %v12598_v60 = vld [vmem:[#allocation5 + $0xa84] sm:$0xf] }
  0x44   :  { %v9320_v0 = vld [vmem:[#allocation5 + $0x900] sm:$0xf]  ;;  %v8809_v5 = vor.u32 %v12430_v63, %v8808_v61  ;;  %3220 = vmatpush.bf16.msra.mxu0 %v8297_v4  ;;  %v9514_v61 = vld [vmem:[#allocation5 + $0xac0] sm:$0xf0] }
  0x45   :  { %v12558_v1 = vld [vmem:[#allocation5 + $0x93c] sm:$0xf0]  ;;  %v12726_v62 = vld [vmem:[#allocation5 + $0xe84] sm:$0xf] }
  0x46   :  { %v9832_v2 = vld [vmem:[#allocation5 + $0xd00] sm:$0xf]  ;;  %v9321_v6 = vor.u32 %v12558_v1, %v9320_v0  ;;  %3234 = vmatpush.bf16.msra.mxu1 %v8809_v5  ;;  %v10026_v63 = vld [vmem:[#allocation5 + $0xec0] sm:$0xf0]  ;;  %v97_v5 = vld [vmem:[#allocation2 + $0x10] sm:$0xff] }
  0x47   :  { %v12686_v3 = vld [vmem:[#allocation5 + $0xd3c] sm:$0xf0]  ;;  %v12326_v0 = vld [vmem:[#allocation5 + $0x204] sm:$0xf] }
  0x48   :  { %v8232_v7 = vld [vmem:[#allocation5 + $0x80] sm:$0xf]  ;;  %v9833_v10 = vor.u32 %v12686_v3, %v9832_v2  ;;  %3248 = vmatpush.bf16.msra.mxu2 %v9321_v6  ;;  %v8426_v1 = vld [vmem:[#allocation5 + $0x240] sm:$0xf0]  ;;  %v8493_v2 = vor.u32 %v12342_v53, %v8490_v56  ;;  %v101_v6 = vld [vmem:[#allocation2 + $0x30] sm:$0xff] }
  0x49   :  { %v12286_v8 = vld [vmem:[#allocation5 + $0xbc] sm:$0xf0]  ;;  %v12454_v3 = vld [vmem:[#allocation5 + $0x604] sm:$0xf] }
  0x4a   :  { %v8744_v9 = vld [vmem:[#allocation5 + $0x480] sm:$0xf]  ;;  %v8233_v16 = vor.u32 %v12286_v8, %v8232_v7  ;;  %3262 = vmatpush.bf16.msra.mxu3 %v9833_v10  ;;  %v8938_v4 = vld [vmem:[#allocation5 + $0x640] sm:$0xf0]  ;;  %v9005_v7 = vor.u32 %v12470_v57, %v9002_v58  ;;  %v9517_v8 = vor.u32 %v12598_v60, %v9514_v61 }
  0x4b   :  { %v12414_v11 = vld [vmem:[#allocation5 + $0x4bc] sm:$0xf0]  ;;  %v12694_v34 = vld [vmem:[#allocation5 + $0xd84] sm:$0xf] }
  0x4c   :  { %v9256_v12 = vld [vmem:[#allocation5 + $0x880] sm:$0xf]  ;;  %v8745_v19 = vor.u32 %v12414_v11, %v8744_v9  ;;  %3221 = vmatpush.bf16.msra.mxu0 %v8233_v16  ;;  %v13515_v9 = vpack.c.bf16 %v101_v6, %v97_v5  ;;  %v8810_v43 = vld [vmem:[#allocation5 + $0x540] sm:$0xf0] }
  0x4d   :  { %v12542_v13 = vld [vmem:[#allocation5 + $0x8bc] sm:$0xf0]  ;;  %v12550_v44 = vld [vmem:[#allocation5 + $0x904] sm:$0xf] }
  0x4e   :  { %v9768_v14 = vld [vmem:[#allocation5 + $0xc80] sm:$0xf]  ;;  %v9257_v20 = vor.u32 %v12542_v13, %v9256_v12  ;;  %3235 = vmatpush.bf16.msra.mxu1 %v8745_v19  ;;  %v98_v12 = vld [vmem:[#allocation2 + $0x18] sm:$0xff]  ;;  %v10029_v13 = vor.u32 %v12726_v62, %v10026_v63  ;;  %v9962_v19 = vld [vmem:[#allocation5 + $0xe40] sm:$0xf0] }
  0x4f   :  { %v12670_v15 = vld [vmem:[#allocation5 + $0xcbc] sm:$0xf0]  ;;  %v9322_v45 = vld [vmem:[#allocation5 + $0x940] sm:$0xf0] }
  0x50   :  { %v8168_v17 = vld [vmem:[#allocation5] sm:$0xf]  ;;  %v9769_v24 = vor.u32 %v12670_v15, %v9768_v14  ;;  %3249 = vmatpush.bf16.msra.mxu2 %v9257_v20  ;;  %v12582_v14 = vld [vmem:[#allocation5 + $0xa04] sm:$0xf]  ;;  %v9325_v50 = vor.u32 %v12550_v44, %v9322_v45  ;;  %v9520_v44 = vld [vmem:[#allocation5 + $0xa88] sm:$0xf] }
  0x51   :  { %v12270_v18 = vld [vmem:[#allocation5 + $0x3c] sm:$0xf0]  ;;  %v9450_v15 = vld [vmem:[#allocation5 + $0xa40] sm:$0xf0]  ;;  %v12607_v45 = vld [vmem:[#allocation5 + $0xac4] sm:$0xf0] }
  0x52   :  { %v8680_v21 = vld [vmem:[#allocation5 + $0x400] sm:$0xf]  ;;  %v8169_v31 = vor.u32 %v12270_v18, %v8168_v17  ;;  %3263 = vmatpush.bf16.msra.mxu3 %v9769_v24  ;;  %v102_v17 = vld [vmem:[#allocation2 + $0x38] sm:$0xff]  ;;  %v12710_v18 = vld [vmem:[#allocation5 + $0xe04] sm:$0xf]  ;;  %v8941_v24 = vor.u32 %v12454_v3, %v8938_v4 }
  0x53   :  { %v12398_v22 = vld [vmem:[#allocation5 + $0x43c] sm:$0xf0]  ;;  %v13520_v20 = vpack.c.bf16 %v102_v17, %v98_v12  ;;  %v9965_v29 = vor.u32 %v12710_v18, %v9962_v19  ;;  %v9834_v47 = vld [vmem:[#allocation5 + $0xd40] sm:$0xf0]  ;;  %v10160_v19 = vld [vmem:[#allocation5 + $0xf88] sm:$0xf] }
  0x54   :  { %v9192_v23 = vld [vmem:[#allocation5 + $0x800] sm:$0xf]  ;;  %v8681_v35 = vor.u32 %v12398_v22, %v8680_v21  ;;  %3222 = vmatpush.bf16.msra.mxu0 %v8169_v31  ;;  %v8429_v21 = vor.u32 %v12326_v0, %v8426_v1  ;;  %v12310_v22 = vld [vmem:[#allocation5 + $0x184] sm:$0xf] }
  0x55   :  { %v12526_v25 = vld [vmem:[#allocation5 + $0x83c] sm:$0xf0]  ;;  %v12566_v31 = vld [vmem:[#allocation5 + $0x984] sm:$0xf] }
  0x56   :  { %v9704_v26 = vld [vmem:[#allocation5 + $0xc00] sm:$0xf]  ;;  %v9193_v36 = vor.u32 %v12526_v25, %v9192_v23  ;;  %3236 = vmatpush.bf16.msra.mxu1 %v8681_v35  ;;  %v8362_v23 = vld [vmem:[#allocation5 + $0x1c0] sm:$0xf0]  ;;  %v9453_v25 = vor.u32 %v12582_v14, %v9450_v15  ;;  %v9389_v38 = vor.u32 %v12566_v31, %v9386_v32  ;;  %v9648_v14 = vld [vmem:[#allocation5 + $0xb88] sm:$0xf] }
  0x57   :  { %v12654_v27 = vld [vmem:[#allocation5 + $0xc3c] sm:$0xf0]  ;;  %v9898_v35 = vld [vmem:[#allocation5 + $0xdc0] sm:$0xf0]  ;;  %v12639_v15 = vld [vmem:[#allocation5 + $0xbc4] sm:$0xf0] }
  0x58   :  { %v9705_v39 = vor.u32 %v12654_v27, %v9704_v26  ;;  %3250 = vmatpush.bf16.msra.mxu2 %v9193_v36  ;;  %3271 = vmatpush.bf16.msrb.mxu0 %v8621_v40  ;;  %v95_v10 = vld [vmem:[#allocation2] sm:$0xff]  ;;  %v96_v27 = vld [vmem:[#allocation2 + $0x8] sm:$0xff]  ;;  %v8365_v36 = vor.u32 %v12310_v22, %v8362_v23 }
  0x59   :  { %v99_v11 = vld [vmem:[#allocation2 + $0x20] sm:$0xff]  ;;  %v13523_v33 = vpack.c.bf16 %v100_v28, %v96_v27  ;;  %v12367_v27 = vld [vmem:[#allocation5 + $0x344] sm:$0xf0] }
  0x5a   :  { %3264 = vmatpush.bf16.msra.mxu3 %v9705_v39  ;;  %3285 = vmatpush.bf16.msrb.mxu1 %v9133_v41  ;;  %v13517_v16 = vpack.c.bf16 %v99_v11, %v95_v10  ;;  %v12438_v26 = vld [vmem:[#allocation5 + $0x584] sm:$0xf]  ;;  %v12383_v10 = vld [vmem:[#allocation5 + $0x3c4] sm:$0xf0] }
  0x5b   :  { %3251 = vmatmul.bf16.vlgmr.msra.gmra.mxu2 %v13515_v9  ;;  %3237 = vmatmul.bf16.vlgmr.msra.gmra.mxu1 %v13523_v33  ;;  %v8877_v37 = vor.u32 %v12438_v26, %v8874_v30  ;;  %v12294_v39 = vld [vmem:[#allocation5 + $0x104] sm:$0xf]  ;;  %v9136_v11 = vld [vmem:[#allocation5 + $0x788] sm:$0xf] }
  0x5c   :  { %3299 = vmatpush.bf16.msrb.mxu2 %v9645_v42  ;;  %3272 = vmatpush.bf16.msrb.mxu0 %v8557_v52  ;;  %v8298_v40 = vld [vmem:[#allocation5 + $0x140] sm:$0xf0]  ;;  %v9901_v42 = vor.u32 %v12694_v34, %v9898_v35  ;;  %v8560_v26 = vld [vmem:[#allocation5 + $0x308] sm:$0xf] }
  0x5d   :  { %3223 = vmatmul.bf16.vlgmr.msra.gmra.mxu0 %v13517_v16  ;;  %3265 = vmatmul.bf16.vlgmr.msra.gmra.mxu3 %v13520_v20  ;;  %v12422_v41 = vld [vmem:[#allocation5 + $0x504] sm:$0xf]  ;;  %v8301_v48 = vor.u32 %v12294_v39, %v8298_v40  ;;  %v9072_v28 = vld [vmem:[#allocation5 + $0x708] sm:$0xf] }
  0x5e   :  { %3313 = vmatpush.bf16.msrb.mxu3 %v10157_v46  ;;  %3286 = vmatpush.bf16.msrb.mxu1 %v9069_v54  ;;  %v12678_v46 = vld [vmem:[#allocation5 + $0xd04] sm:$0xf]  ;;  %v8813_v49 = vor.u32 %v12422_v41, %v8810_v43  ;;  %v12495_v30 = vld [vmem:[#allocation5 + $0x744] sm:$0xf0] }
  0x5f   :  { %v12278_v51 = vld [vmem:[#allocation5 + $0x84] sm:$0xf]  ;;  %v9837_v54 = vor.u32 %v12678_v46, %v9834_v47  ;;  %v9584_v31 = vld [vmem:[#allocation5 + $0xb08] sm:$0xf] }
  0x60   :  { %3300 = vmatpush.bf16.msrb.mxu2 %v9581_v55  ;;  %3273 = vmatpush.bf16.msrb.mxu0 %v8493_v2  ;;  %v8234_v52 = vld [vmem:[#allocation5 + $0xc0] sm:$0xf0]  ;;  %v12623_v32 = vld [vmem:[#allocation5 + $0xb44] sm:$0xf0] }
  0x61   :  { %v12406_v53 = vld [vmem:[#allocation5 + $0x484] sm:$0xf]  ;;  %v8237_v60 = vor.u32 %v12278_v51, %v8234_v52  ;;  %v10096_v34 = vld [vmem:[#allocation5 + $0xf08] sm:$0xf] }
  0x62   :  { %3314 = vmatpush.bf16.msrb.mxu3 %v10093_v59  ;;  %3287 = vmatpush.bf16.msrb.mxu1 %v9005_v7  ;;  %v8746_v55 = vld [vmem:[#allocation5 + $0x4c0] sm:$0xf0]  ;;  %v12751_v35 = vld [vmem:[#allocation5 + $0xf44] sm:$0xf0] }
  0x63   :  { %v12534_v56 = vld [vmem:[#allocation5 + $0x884] sm:$0xf]  ;;  %v8749_v63 = vor.u32 %v12406_v53, %v8746_v55  ;;  %v8496_v39 = vld [vmem:[#allocation5 + $0x288] sm:$0xf] }
  0x64   :  { %3301 = vmatpush.bf16.msrb.mxu2 %v9517_v8  ;;  %3274 = vmatpush.bf16.msrb.mxu0 %v8429_v21  ;;  %v9258_v57 = vld [vmem:[#allocation5 + $0x8c0] sm:$0xf0]  ;;  %v8624_v8 = vld [vmem:[#allocation5 + $0x388] sm:$0xf] }
  0x65   :  { %v12662_v58 = vld [vmem:[#allocation5 + $0xc84] sm:$0xf]  ;;  %v9261_v0 = vor.u32 %v12534_v56, %v9258_v57  ;;  %v12767_v21 = vld [vmem:[#allocation5 + $0xfc4] sm:$0xf0]  ;;  %v8625_v23 = vor.u32 %v12383_v10, %v8624_v8 }
  0x66   :  { %3315 = vmatpush.bf16.msrb.mxu3 %v10029_v13  ;;  %3288 = vmatpush.bf16.msrb.mxu1 %v8941_v24  ;;  %v9770_v59 = vld [vmem:[#allocation5 + $0xcc0] sm:$0xf0]  ;;  %v12511_v13 = vld [vmem:[#allocation5 + $0x7c4] sm:$0xf0] }
  0x67   :  { %v12262_v61 = vld [vmem:[#allocation5 + $0x4] sm:$0xf]  ;;  %v9773_v4 = vor.u32 %v12662_v58, %v9770_v59  ;;  %v9137_v24 = vor.u32 %v12511_v13, %v9136_v11  ;;  %v12351_v40 = vld [vmem:[#allocation5 + $0x2c4] sm:$0xf0] }
  0x68   :  { %3302 = vmatpush.bf16.msrb.mxu2 %v9453_v25  ;;  %3275 = vmatpush.bf16.msrb.mxu0 %v8365_v36  ;;  %v8170_v62 = vld [vmem:[#allocation5 + $0x40] sm:$0xf0]  ;;  %v9649_v25 = vor.u32 %v12639_v15, %v9648_v14  ;;  %v8561_v36 = vor.u32 %v12367_v27, %v8560_v26  ;;  %v9008_v41 = vld [vmem:[#allocation5 + $0x688] sm:$0xf] }
  0x69   :  { %v12390_v1 = vld [vmem:[#allocation5 + $0x404] sm:$0xf]  ;;  %v8173_v12 = vor.u32 %v12262_v61, %v8170_v62  ;;  %v12479_v43 = vld [vmem:[#allocation5 + $0x6c4] sm:$0xf0] }
  0x6a   :  { %3316 = vmatpush.bf16.msrb.mxu3 %v9965_v29  ;;  %3289 = vmatpush.bf16.msrb.mxu1 %v8877_v37  ;;  %v8682_v2 = vld [vmem:[#allocation5 + $0x440] sm:$0xf0]  ;;  %v10161_v29 = vor.u32 %v12767_v21, %v10160_v19  ;;  %v9073_v37 = vor.u32 %v12495_v30, %v9072_v28  ;;  %v10032_v46 = vld [vmem:[#allocation5 + $0xe88] sm:$0xf] }
  0x6b   :  { %v12518_v3 = vld [vmem:[#allocation5 + $0x804] sm:$0xf]  ;;  %v8685_v17 = vor.u32 %v12390_v1, %v8682_v2  ;;  %v12735_v47 = vld [vmem:[#allocation5 + $0xec4] sm:$0xf0] }
  0x6c   :  { %3303 = vmatpush.bf16.msrb.mxu2 %v9389_v38  ;;  %3276 = vmatpush.bf16.msrb.mxu0 %v8301_v48  ;;  %v9194_v5 = vld [vmem:[#allocation5 + $0x840] sm:$0xf0]  ;;  %v9585_v38 = vor.u32 %v12623_v32, %v9584_v31  ;;  %v8497_v48 = vor.u32 %v12351_v40, %v8496_v39  ;;  %v8432_v51 = vld [vmem:[#allocation5 + $0x208] sm:$0xf] }
  0x6d   :  { %v12646_v6 = vld [vmem:[#allocation5 + $0xc04] sm:$0xf]  ;;  %v9197_v18 = vor.u32 %v12518_v3, %v9194_v5  ;;  %v12335_v52 = vld [vmem:[#allocation5 + $0x244] sm:$0xf0] }
  0x6e   :  { %3317 = vmatpush.bf16.msrb.mxu3 %v9901_v42  ;;  %3290 = vmatpush.bf16.msrb.mxu1 %v8813_v49  ;;  %v9706_v7 = vld [vmem:[#allocation5 + $0xc40] sm:$0xf0]  ;;  %v10097_v42 = vor.u32 %v12751_v35, %v10096_v34  ;;  %v9009_v49 = vor.u32 %v12479_v43, %v9008_v41  ;;  %v8944_v53 = vld [vmem:[#allocation5 + $0x608] sm:$0xf] }
  0x6f   :  { %v9709_v22 = vor.u32 %v12646_v6, %v9706_v7  ;;  %v12463_v55 = vld [vmem:[#allocation5 + $0x644] sm:$0xf0] }
  0x70   :  { %3304 = vmatpush.bf16.msrb.mxu2 %v9325_v50  ;;  %3277 = vmatpush.bf16.msrb.mxu0 %v8237_v60  ;;  %v9521_v50 = vor.u32 %v12607_v45, %v9520_v44  ;;  %v9456_v56 = vld [vmem:[#allocation5 + $0xa08] sm:$0xf]  ;;  %v8433_v60 = vor.u32 %v12335_v52, %v8432_v51  ;;  %v8945_v61 = vor.u32 %v12463_v55, %v8944_v53  ;;  %v9138_v52 = vld [vmem:[#allocation5 + $0x7c8] sm:$0xf0] }
  0x71   :  { %v12591_v57 = vld [vmem:[#allocation5 + $0xa44] sm:$0xf0]  ;;  %v12631_v53 = vld [vmem:[#allocation5 + $0xb8c] sm:$0xf] }
  0x72   :  { %3318 = vmatpush.bf16.msrb.mxu3 %v9837_v54  ;;  %3291 = vmatpush.bf16.msrb.mxu1 %v8749_v63  ;;  %v10033_v54 = vor.u32 %v12735_v47, %v10032_v46  ;;  %v9968_v58 = vld [vmem:[#allocation5 + $0xe08] sm:$0xf]  ;;  %v9457_v62 = vor.u32 %v12591_v57, %v9456_v56  ;;  %v12759_v57 = vld [vmem:[#allocation5 + $0xf8c] sm:$0xf] }
  0x73   :  { %v12719_v59 = vld [vmem:[#allocation5 + $0xe44] sm:$0xf0] }
  0x74   :  { %3305 = vmatpush.bf16.msrb.mxu2 %v9261_v0  ;;  %3278 = vmatpush.bf16.msrb.mxu0 %v8173_v12  ;;  %v8368_v63 = vld [vmem:[#allocation5 + $0x188] sm:$0xf]  ;;  %v9969_v2 = vor.u32 %v12719_v59, %v9968_v58  ;;  %v10162_v58 = vld [vmem:[#allocation5 + $0xfc8] sm:$0xf0] }
  0x75   :  { %v12319_v0 = vld [vmem:[#allocation5 + $0x1c4] sm:$0xf0] }
  0x76   :  { %3319 = vmatpush.bf16.msrb.mxu3 %v9773_v4  ;;  %3292 = vmatpush.bf16.msrb.mxu1 %v8685_v17  ;;  %v8880_v1 = vld [vmem:[#allocation5 + $0x588] sm:$0xf]  ;;  %v8369_v8 = vor.u32 %v12319_v0, %v8368_v63  ;;  %v12359_v63 = vld [vmem:[#allocation5 + $0x30c] sm:$0xf] }
  0x77   :  { %3279 = vmatmul.bf16.vlgmr.msrb.gmra.mxu0 %v13517_v16  ;;  %v12447_v3 = vld [vmem:[#allocation5 + $0x5c4] sm:$0xf0]  ;;  %v8562_v0 = vld [vmem:[#allocation5 + $0x348] sm:$0xf0] }
  0x78   :  { %3306 = vmatpush.bf16.msrb.mxu2 %v9197_v18  ;;  %3327 = vmatpush.bf16.msra.mxu0 %v8625_v23  ;;  %v9392_v4 = vld [vmem:[#allocation5 + $0x988] sm:$0xf]  ;;  %v8881_v10 = vor.u32 %v12447_v3, %v8880_v1  ;;  %v12487_v1 = vld [vmem:[#allocation5 + $0x70c] sm:$0xf] }
  0x79   :  { %3293 = vmatmul.bf16.vlgmr.msrb.gmra.mxu1 %v13523_v33  ;;  %v12575_v5 = vld [vmem:[#allocation5 + $0x9c4] sm:$0xf0]  ;;  %v9074_v3 = vld [vmem:[#allocation5 + $0x748] sm:$0xf0] }
  0x7a   :  { %3320 = vmatpush.bf16.msrb.mxu3 %v9709_v22  ;;  %3341 = vmatpush.bf16.msra.mxu1 %v9137_v24  ;;  %v9904_v6 = vld [vmem:[#allocation5 + $0xd88] sm:$0xf]  ;;  %v9393_v11 = vor.u32 %v12575_v5, %v9392_v4  ;;  %v12615_v4 = vld [vmem:[#allocation5 + $0xb0c] sm:$0xf] }
  0x7b   :  { %3307 = vmatmul.bf16.vlgmr.msrb.gmra.mxu2 %v13515_v9  ;;  %v12703_v7 = vld [vmem:[#allocation5 + $0xdc4] sm:$0xf0]  ;;  %v9586_v5 = vld [vmem:[#allocation5 + $0xb48] sm:$0xf0] }
  0x7c   :  { %3355 = vmatpush.bf16.msra.mxu2 %v9649_v25  ;;  %3328 = vmatpush.bf16.msra.mxu0 %v8561_v36  ;;  %v8304_v12 = vld [vmem:[#allocation5 + $0x108] sm:$0xf]  ;;  %v9905_v15 = vor.u32 %v12703_v7, %v9904_v6  ;;  %v12743_v6 = vld [vmem:[#allocation5 + $0xf0c] sm:$0xf] }
  0x7d   :  { %3321 = vmatmul.bf16.vlgmr.msrb.gmra.mxu3 %v13520_v20  ;;  %v12303_v13 = vld [vmem:[#allocation5 + $0x144] sm:$0xf0]  ;;  %v10098_v7 = vld [vmem:[#allocation5 + $0xf48] sm:$0xf0] }
  0x7e   :  { %3369 = vmatpush.bf16.msra.mxu3 %v10161_v29  ;;  %3342 = vmatpush.bf16.msra.mxu1 %v9073_v37  ;;  %v8816_v14 = vld [vmem:[#allocation5 + $0x508] sm:$0xf]  ;;  %v8305_v23 = vor.u32 %v12303_v13, %v8304_v12  ;;  %v12343_v12 = vld [vmem:[#allocation5 + $0x28c] sm:$0xf] }
  0x7f   :  { %v12431_v17 = vld [vmem:[#allocation5 + $0x544] sm:$0xf0]  ;;  %v8498_v13 = vld [vmem:[#allocation5 + $0x2c8] sm:$0xf0] }
  0x80   :  { %3356 = vmatpush.bf16.msra.mxu2 %v9585_v38  ;;  %3329 = vmatpush.bf16.msra.mxu0 %v8497_v48  ;;  %v9328_v18 = vld [vmem:[#allocation5 + $0x908] sm:$0xf]  ;;  %v8817_v24 = vor.u32 %v12431_v17, %v8816_v14  ;;  %v12375_v48 = vld [vmem:[#allocation5 + $0x38c] sm:$0xf] }
  0x81   :  { %v12559_v19 = vld [vmem:[#allocation5 + $0x944] sm:$0xf0]  ;;  %v12471_v14 = vld [vmem:[#allocation5 + $0x68c] sm:$0xf] }
  0x82   :  { %3370 = vmatpush.bf16.msra.mxu3 %v10097_v42  ;;  %3343 = vmatpush.bf16.msra.mxu1 %v9009_v49  ;;  %v9840_v21 = vld [vmem:[#allocation5 + $0xd08] sm:$0xf]  ;;  %v9329_v25 = vor.u32 %v12559_v19, %v9328_v18  ;;  %v8626_v49 = vld [vmem:[#allocation5 + $0x3c8] sm:$0xf0] }
  0x83   :  { %v12687_v22 = vld [vmem:[#allocation5 + $0xd44] sm:$0xf0]  ;;  %v9010_v17 = vld [vmem:[#allocation5 + $0x6c8] sm:$0xf0] }
  0x84   :  { %3357 = vmatpush.bf16.msra.mxu2 %v9521_v50  ;;  %3330 = vmatpush.bf16.msra.mxu0 %v8433_v60  ;;  %v8240_v26 = vld [vmem:[#allocation5 + $0x88] sm:$0xf]  ;;  %v9841_v29 = vor.u32 %v12687_v22, %v9840_v21  ;;  %v12503_v50 = vld [vmem:[#allocation5 + $0x78c] sm:$0xf]  ;;  %v8629_v60 = vor.u32 %v12375_v48, %v8626_v49 }
  0x85   :  { %v12287_v27 = vld [vmem:[#allocation5 + $0xc4] sm:$0xf0]  ;;  %v12599_v18 = vld [vmem:[#allocation5 + $0xa8c] sm:$0xf] }
  0x86   :  { %3371 = vmatpush.bf16.msra.mxu3 %v10033_v54  ;;  %3344 = vmatpush.bf16.msra.mxu1 %v8945_v61  ;;  %v8752_v28 = vld [vmem:[#allocation5 + $0x488] sm:$0xf]  ;;  %v8241_v36 = vor.u32 %v12287_v27, %v8240_v26  ;;  %v9650_v54 = vld [vmem:[#allocation5 + $0xbc8] sm:$0xf0]  ;;  %v9141_v61 = vor.u32 %v12503_v50, %v9138_v52 }
  0x87   :  { %v12415_v30 = vld [vmem:[#allocation5 + $0x4c4] sm:$0xf0]  ;;  %v9522_v19 = vld [vmem:[#allocation5 + $0xac8] sm:$0xf0] }
  0x88   :  { %3358 = vmatpush.bf16.msra.mxu2 %v9457_v62  ;;  %3331 = vmatpush.bf16.msra.mxu0 %v8369_v8  ;;  %v9264_v31 = vld [vmem:[#allocation5 + $0x888] sm:$0xf]  ;;  %v8753_v39 = vor.u32 %v12415_v30, %v8752_v28  ;;  %v9653_v62 = vor.u32 %v12631_v53, %v9650_v54  ;;  %v8565_v8 = vor.u32 %v12359_v63, %v8562_v0  ;;  %v12727_v21 = vld [vmem:[#allocation5 + $0xe8c] sm:$0xf] }
  0x89   :  { %v12543_v32 = vld [vmem:[#allocation5 + $0x8c4] sm:$0xf0]  ;;  %v10034_v22 = vld [vmem:[#allocation5 + $0xec8] sm:$0xf0] }
  0x8a   :  { %3372 = vmatpush.bf16.msra.mxu3 %v9969_v2  ;;  %3345 = vmatpush.bf16.msra.mxu1 %v8881_v10  ;;  %v9776_v34 = vld [vmem:[#allocation5 + $0xc88] sm:$0xf]  ;;  %v9265_v40 = vor.u32 %v12543_v32, %v9264_v31  ;;  %v10165_v2 = vor.u32 %v12759_v57, %v10162_v58  ;;  %v9077_v10 = vor.u32 %v12487_v1, %v9074_v3  ;;  %v12327_v26 = vld [vmem:[#allocation5 + $0x20c] sm:$0xf] }
  0x8b   :  { %v12671_v35 = vld [vmem:[#allocation5 + $0xcc4] sm:$0xf0]  ;;  %v8434_v27 = vld [vmem:[#allocation5 + $0x248] sm:$0xf0] }
  0x8c   :  { %3359 = vmatpush.bf16.msra.mxu2 %v9393_v11  ;;  %3332 = vmatpush.bf16.msra.mxu0 %v8305_v23  ;;  %v8176_v37 = vld [vmem:[#allocation5 + $0x8] sm:$0xf]  ;;  %v9777_v44 = vor.u32 %v12671_v35, %v9776_v34  ;;  %v9589_v11 = vor.u32 %v12615_v4, %v9586_v5  ;;  %v8501_v23 = vor.u32 %v12343_v12, %v8498_v13  ;;  %v12455_v28 = vld [vmem:[#allocation5 + $0x60c] sm:$0xf] }
  0x8d   :  { %v12271_v38 = vld [vmem:[#allocation5 + $0x44] sm:$0xf0]  ;;  %v8946_v30 = vld [vmem:[#allocation5 + $0x648] sm:$0xf0] }
  0x8e   :  { %3373 = vmatpush.bf16.msra.mxu3 %v9905_v15  ;;  %3346 = vmatpush.bf16.msra.mxu1 %v8817_v24  ;;  %v8688_v41 = vld [vmem:[#allocation5 + $0x408] sm:$0xf]  ;;  %v8177_v51 = vor.u32 %v12271_v38, %v8176_v37  ;;  %v10101_v15 = vor.u32 %v12743_v6, %v10098_v7  ;;  %v9013_v24 = vor.u32 %v12471_v14, %v9010_v17  ;;  %v12583_v31 = vld [vmem:[#allocation5 + $0xa0c] sm:$0xf] }
  0x8f   :  { %v12399_v42 = vld [vmem:[#allocation5 + $0x444] sm:$0xf0]  ;;  %v9458_v32 = vld [vmem:[#allocation5 + $0xa48] sm:$0xf0]  ;;  %v8949_v37 = vor.u32 %v12455_v28, %v8946_v30  ;;  %v9656_v28 = vld [vmem:[#allocation5 + $0xb90] sm:$0xf] }
  0x90   :  { %3360 = vmatpush.bf16.msra.mxu2 %v9329_v25  ;;  %v9200_v43 = vld [vmem:[#allocation5 + $0x808] sm:$0xf]  ;;  %3333 = vmatpush.bf16.msra.mxu0 %v8241_v36  ;;  %v8689_v55 = vor.u32 %v12399_v42, %v8688_v41  ;;  %v9525_v25 = vor.u32 %v12599_v18, %v9522_v19  ;;  %v12711_v34 = vld [vmem:[#allocation5 + $0xe0c] sm:$0xf]  ;;  %v8437_v36 = vor.u32 %v12327_v26, %v8434_v27  ;;  %v12512_v27 = vld [vmem:[#allocation5 + $0x7cc] sm:$0xf0] }
  0x91   :  { %v12527_v45 = vld [vmem:[#allocation5 + $0x844] sm:$0xf0]  ;;  %v9970_v35 = vld [vmem:[#allocation5 + $0xe48] sm:$0xf0]  ;;  %v9461_v38 = vor.u32 %v12583_v31, %v9458_v32  ;;  %v10168_v32 = vld [vmem:[#allocation5 + $0xf90] sm:$0xf] }
  0x92   :  { %3374 = vmatpush.bf16.msra.mxu3 %v9841_v29  ;;  %v9712_v46 = vld [vmem:[#allocation5 + $0xc08] sm:$0xf]  ;;  %3347 = vmatpush.bf16.msra.mxu1 %v8753_v39  ;;  %v9201_v56 = vor.u32 %v12527_v45, %v9200_v43  ;;  %v10037_v29 = vor.u32 %v12727_v21, %v10034_v22  ;;  %v12311_v39 = vld [vmem:[#allocation5 + $0x18c] sm:$0xf]  ;;  %v9973_v42 = vor.u32 %v12711_v34, %v9970_v35  ;;  %v12768_v34 = vld [vmem:[#allocation5 + $0xfcc] sm:$0xf0] }
  0x93   :  { %v12655_v47 = vld [vmem:[#allocation5 + $0xc44] sm:$0xf0]  ;;  %v12439_v41 = vld [vmem:[#allocation5 + $0x58c] sm:$0xf] }
  0x94   :  { %3361 = vmatpush.bf16.msra.mxu2 %v9265_v40  ;;  %v9713_v59 = vor.u32 %v12655_v47, %v9712_v46  ;;  %3334 = vmatpush.bf16.msra.mxu0 %v8177_v51  ;;  %v8370_v40 = vld [vmem:[#allocation5 + $0x1c8] sm:$0xf0] }
  0x95   :  { %v8882_v43 = vld [vmem:[#allocation5 + $0x5c8] sm:$0xf0]  ;;  %v8373_v48 = vor.u32 %v12311_v39, %v8370_v40  ;;  %v8568_v39 = vld [vmem:[#allocation5 + $0x310] sm:$0xf] }
  0x96   :  { %3375 = vmatpush.bf16.msra.mxu3 %v9777_v44  ;;  %3348 = vmatpush.bf16.msra.mxu1 %v8689_v55  ;;  %v12567_v44 = vld [vmem:[#allocation5 + $0x98c] sm:$0xf]  ;;  %v8885_v49 = vor.u32 %v12439_v41, %v8882_v43  ;;  %v12368_v40 = vld [vmem:[#allocation5 + $0x34c] sm:$0xf0] }
  0x97   :  { %3335 = vmatmul.bf16.vlgmr.msra.gmra.mxu0 %v13517_v16  ;;  %v9394_v45 = vld [vmem:[#allocation5 + $0x9c8] sm:$0xf0]  ;;  %v9080_v41 = vld [vmem:[#allocation5 + $0x710] sm:$0xf] }
  0x98   :  { %3362 = vmatpush.bf16.msra.mxu2 %v9201_v56  ;;  %3383 = vmatpush.bf16.msrb.mxu0 %v8629_v60  ;;  %v12695_v46 = vld [vmem:[#allocation5 + $0xd8c] sm:$0xf]  ;;  %v9397_v50 = vor.u32 %v12567_v44, %v9394_v45  ;;  %v12496_v43 = vld [vmem:[#allocation5 + $0x74c] sm:$0xf0] }
  0x99   :  { %3349 = vmatmul.bf16.vlgmr.msra.gmra.mxu1 %v13523_v33  ;;  %v9906_v47 = vld [vmem:[#allocation5 + $0xdc8] sm:$0xf0]  ;;  %v9592_v44 = vld [vmem:[#allocation5 + $0xb10] sm:$0xf] }
  0x9a   :  { %3376 = vmatpush.bf16.msra.mxu3 %v9713_v59  ;;  %3397 = vmatpush.bf16.msrb.mxu1 %v9141_v61  ;;  %v12295_v51 = vld [vmem:[#allocation5 + $0x10c] sm:$0xf]  ;;  %v9909_v54 = vor.u32 %v12695_v46, %v9906_v47  ;;  %v12624_v45 = vld [vmem:[#allocation5 + $0xb4c] sm:$0xf0] }
  0x9b   :  { %3363 = vmatmul.bf16.vlgmr.msra.gmra.mxu2 %v13515_v9  ;;  %v8306_v52 = vld [vmem:[#allocation5 + $0x148] sm:$0xf0]  ;;  %v10104_v46 = vld [vmem:[#allocation5 + $0xf10] sm:$0xf] }
  0x9c   :  { %3411 = vmatpush.bf16.msrb.mxu2 %v9653_v62  ;;  %3384 = vmatpush.bf16.msrb.mxu0 %v8565_v8  ;;  %v12423_v53 = vld [vmem:[#allocation5 + $0x50c] sm:$0xf]  ;;  %v8309_v60 = vor.u32 %v12295_v51, %v8306_v52  ;;  %v12752_v47 = vld [vmem:[#allocation5 + $0xf4c] sm:$0xf0] }
  0x9d   :  { %3377 = vmatmul.bf16.vlgmr.msra.gmra.mxu3 %v13520_v20  ;;  %v8818_v55 = vld [vmem:[#allocation5 + $0x548] sm:$0xf0]  ;;  %v8504_v51 = vld [vmem:[#allocation5 + $0x290] sm:$0xf] }
  0x9e   :  { %3425 = vmatpush.bf16.msrb.mxu3 %v10165_v2  ;;  %3398 = vmatpush.bf16.msrb.mxu1 %v9077_v10  ;;  %v12551_v56 = vld [vmem:[#allocation5 + $0x90c] sm:$0xf]  ;;  %v8821_v61 = vor.u32 %v12423_v53, %v8818_v55  ;;  %v12352_v52 = vld [vmem:[#allocation5 + $0x2cc] sm:$0xf0] }
  0x9f   :  { %v9330_v57 = vld [vmem:[#allocation5 + $0x948] sm:$0xf0]  ;;  %v9016_v53 = vld [vmem:[#allocation5 + $0x690] sm:$0xf] }
  0xa0   :  { %3412 = vmatpush.bf16.msrb.mxu2 %v9589_v11  ;;  %3385 = vmatpush.bf16.msrb.mxu0 %v8501_v23  ;;  %v12679_v58 = vld [vmem:[#allocation5 + $0xd0c] sm:$0xf]  ;;  %v9333_v62 = vor.u32 %v12551_v56, %v9330_v57  ;;  %v8632_v23 = vld [vmem:[#allocation5 + $0x390] sm:$0xf] }
  0xa1   :  { %v9842_v59 = vld [vmem:[#allocation5 + $0xd48] sm:$0xf0]  ;;  %v12480_v55 = vld [vmem:[#allocation5 + $0x6cc] sm:$0xf0] }
  0xa2   :  { %3426 = vmatpush.bf16.msrb.mxu3 %v10101_v15  ;;  %3399 = vmatpush.bf16.msrb.mxu1 %v9013_v24  ;;  %v12279_v63 = vld [vmem:[#allocation5 + $0x8c] sm:$0xf]  ;;  %v9845_v2 = vor.u32 %v12679_v58, %v9842_v59  ;;  %v12384_v24 = vld [vmem:[#allocation5 + $0x3cc] sm:$0xf0] }
  0xa3   :  { %v8242_v0 = vld [vmem:[#allocation5 + $0xc8] sm:$0xf0]  ;;  %v9528_v56 = vld [vmem:[#allocation5 + $0xa90] sm:$0xf] }
  0xa4   :  { %3413 = vmatpush.bf16.msrb.mxu2 %v9525_v25  ;;  %3386 = vmatpush.bf16.msrb.mxu0 %v8437_v36  ;;  %v12407_v1 = vld [vmem:[#allocation5 + $0x48c] sm:$0xf]  ;;  %v8245_v8 = vor.u32 %v12279_v63, %v8242_v0  ;;  %v9144_v25 = vld [vmem:[#allocation5 + $0x790] sm:$0xf]  ;;  %v8633_v36 = vor.u32 %v12384_v24, %v8632_v23 }
  0xa5   :  { %v8754_v3 = vld [vmem:[#allocation5 + $0x4c8] sm:$0xf0]  ;;  %v12608_v57 = vld [vmem:[#allocation5 + $0xacc] sm:$0xf0] }
  0xa6   :  { %3427 = vmatpush.bf16.msrb.mxu3 %v10037_v29  ;;  %3400 = vmatpush.bf16.msrb.mxu1 %v8949_v37  ;;  %v12535_v4 = vld [vmem:[#allocation5 + $0x88c] sm:$0xf]  ;;  %v8757_v12 = vor.u32 %v12407_v1, %v8754_v3  ;;  %v12640_v29 = vld [vmem:[#allocation5 + $0xbcc] sm:$0xf0]  ;;  %v9145_v37 = vor.u32 %v12512_v27, %v9144_v25 }
  0xa7   :  { %v9266_v5 = vld [vmem:[#allocation5 + $0x8c8] sm:$0xf0]  ;;  %v10040_v58 = vld [vmem:[#allocation5 + $0xe90] sm:$0xf] }
  0xa8   :  { %3414 = vmatpush.bf16.msrb.mxu2 %v9461_v38  ;;  %3387 = vmatpush.bf16.msrb.mxu0 %v8373_v48  ;;  %v12663_v6 = vld [vmem:[#allocation5 + $0xc8c] sm:$0xf]  ;;  %v9269_v13 = vor.u32 %v12535_v4, %v9266_v5  ;;  %v9657_v38 = vor.u32 %v12640_v29, %v9656_v28  ;;  %v8569_v48 = vor.u32 %v12368_v40, %v8568_v39  ;;  %v12736_v59 = vld [vmem:[#allocation5 + $0xecc] sm:$0xf0] }
  0xa9   :  { %v9778_v7 = vld [vmem:[#allocation5 + $0xcc8] sm:$0xf0]  ;;  %v8440_v63 = vld [vmem:[#allocation5 + $0x210] sm:$0xf] }
  0xaa   :  { %3428 = vmatpush.bf16.msrb.mxu3 %v9973_v42  ;;  %3401 = vmatpush.bf16.msrb.mxu1 %v8885_v49  ;;  %v12263_v10 = vld [vmem:[#allocation5 + $0xc] sm:$0xf]  ;;  %v9781_v18 = vor.u32 %v12663_v6, %v9778_v7  ;;  %v10169_v42 = vor.u32 %v12768_v34, %v10168_v32  ;;  %v9081_v49 = vor.u32 %v12496_v43, %v9080_v41  ;;  %v12336_v0 = vld [vmem:[#allocation5 + $0x24c] sm:$0xf0] }
  0xab   :  { %v8178_v11 = vld [vmem:[#allocation5 + $0x48] sm:$0xf0]  ;;  %v8952_v1 = vld [vmem:[#allocation5 + $0x610] sm:$0xf] }
  0xac   :  { %3415 = vmatpush.bf16.msrb.mxu2 %v9397_v50  ;;  %3388 = vmatpush.bf16.msrb.mxu0 %v8309_v60  ;;  %v12391_v14 = vld [vmem:[#allocation5 + $0x40c] sm:$0xf]  ;;  %v8181_v26 = vor.u32 %v12263_v10, %v8178_v11  ;;  %v9593_v50 = vor.u32 %v12624_v45, %v9592_v44  ;;  %v8505_v60 = vor.u32 %v12352_v52, %v8504_v51  ;;  %v12464_v3 = vld [vmem:[#allocation5 + $0x64c] sm:$0xf0] }
  0xad   :  { %v8690_v15 = vld [vmem:[#allocation5 + $0x448] sm:$0xf0]  ;;  %v9464_v4 = vld [vmem:[#allocation5 + $0xa10] sm:$0xf]  ;;  %v8953_v10 = vor.u32 %v12464_v3, %v8952_v1  ;;  %v12632_v1 = vld [vmem:[#allocation5 + $0xb94] sm:$0xf] }
  0xae   :  { %3429 = vmatpush.bf16.msrb.mxu3 %v9909_v54  ;;  %3402 = vmatpush.bf16.msrb.mxu1 %v8821_v61  ;;  %v12519_v17 = vld [vmem:[#allocation5 + $0x80c] sm:$0xf]  ;;  %v8693_v30 = vor.u32 %v12391_v14, %v8690_v15  ;;  %v10105_v54 = vor.u32 %v12752_v47, %v10104_v46  ;;  %v9017_v61 = vor.u32 %v12480_v55, %v9016_v53  ;;  %v12592_v5 = vld [vmem:[#allocation5 + $0xa4c] sm:$0xf0] }
  0xaf   :  { %v9202_v19 = vld [vmem:[#allocation5 + $0x848] sm:$0xf0]  ;;  %v9976_v6 = vld [vmem:[#allocation5 + $0xe10] sm:$0xf]  ;;  %v9465_v11 = vor.u32 %v12592_v5, %v9464_v4  ;;  %v12760_v5 = vld [vmem:[#allocation5 + $0xf94] sm:$0xf] }
  0xb0   :  { %3416 = vmatpush.bf16.msrb.mxu2 %v9333_v62  ;;  %v12647_v21 = vld [vmem:[#allocation5 + $0xc0c] sm:$0xf]  ;;  %3389 = vmatpush.bf16.msrb.mxu0 %v8245_v8  ;;  %v9205_v31 = vor.u32 %v12519_v17, %v9202_v19  ;;  %v9529_v62 = vor.u32 %v12608_v57, %v9528_v56  ;;  %v12720_v7 = vld [vmem:[#allocation5 + $0xe4c] sm:$0xf0]  ;;  %v8441_v8 = vor.u32 %v12336_v0, %v8440_v63  ;;  %v9146_v0 = vld [vmem:[#allocation5 + $0x7d0] sm:$0xf0] }
  0xb1   :  { %v9714_v22 = vld [vmem:[#allocation5 + $0xc48] sm:$0xf0]  ;;  %v8888_v14 = vld [vmem:[#allocation5 + $0x590] sm:$0xf]  ;;  %v9977_v15 = vor.u32 %v12720_v7, %v9976_v6  ;;  %v10170_v6 = vld [vmem:[#allocation5 + $0xfd0] sm:$0xf0] }
  0xb2   :  { %3430 = vmatpush.bf16.msrb.mxu3 %v9845_v2  ;;  %3403 = vmatpush.bf16.msrb.mxu1 %v8757_v12  ;;  %v9717_v35 = vor.u32 %v12647_v21, %v9714_v22  ;;  %v10041_v2 = vor.u32 %v12736_v59, %v10040_v58  ;;  %v8376_v12 = vld [vmem:[#allocation5 + $0x190] sm:$0xf] }
  0xb3   :  { %v12448_v17 = vld [vmem:[#allocation5 + $0x5cc] sm:$0xf0] }
  0xb4   :  { %3417 = vmatpush.bf16.msrb.mxu2 %v9269_v13  ;;  %3390 = vmatpush.bf16.msrb.mxu0 %v8181_v26  ;;  %v12320_v13 = vld [vmem:[#allocation5 + $0x1cc] sm:$0xf0]  ;;  %v8889_v24 = vor.u32 %v12448_v17, %v8888_v14  ;;  %v12488_v14 = vld [vmem:[#allocation5 + $0x714] sm:$0xf] }
  0xb5   :  { %v12576_v19 = vld [vmem:[#allocation5 + $0x9cc] sm:$0xf0]  ;;  %v8377_v23 = vor.u32 %v12320_v13, %v8376_v12  ;;  %v12360_v12 = vld [vmem:[#allocation5 + $0x314] sm:$0xf] }
  0xb6   :  { %3431 = vmatpush.bf16.msrb.mxu3 %v9781_v18  ;;  %3404 = vmatpush.bf16.msrb.mxu1 %v8693_v30  ;;  %v9400_v18 = vld [vmem:[#allocation5 + $0x990] sm:$0xf]  ;;  %v8570_v13 = vld [vmem:[#allocation5 + $0x350] sm:$0xf0] }
  0xb7   :  { %3391 = vmatmul.bf16.vlgmr.msrb.gmra.mxu0 %v13517_v16  ;;  %v9912_v21 = vld [vmem:[#allocation5 + $0xd90] sm:$0xf]  ;;  %v9401_v25 = vor.u32 %v12576_v19, %v9400_v18  ;;  %v9082_v17 = vld [vmem:[#allocation5 + $0x750] sm:$0xf0] }
  0xb8   :  { %3418 = vmatpush.bf16.msrb.mxu2 %v9205_v31  ;;  %3439 = vmatpush.bf16.msra.mxu0 %v8633_v36  ;;  %v12704_v22 = vld [vmem:[#allocation5 + $0xdcc] sm:$0xf0]  ;;  %v12616_v18 = vld [vmem:[#allocation5 + $0xb14] sm:$0xf] }
  0xb9   :  { %3405 = vmatmul.bf16.vlgmr.msrb.gmra.mxu1 %v13523_v33  ;;  %v8312_v26 = vld [vmem:[#allocation5 + $0x110] sm:$0xf]  ;;  %v9913_v29 = vor.u32 %v12704_v22, %v9912_v21  ;;  %v9594_v19 = vld [vmem:[#allocation5 + $0xb50] sm:$0xf0] }
  0xba   :  { %3432 = vmatpush.bf16.msrb.mxu3 %v9717_v35  ;;  %3453 = vmatpush.bf16.msra.mxu1 %v9145_v37  ;;  %v12304_v27 = vld [vmem:[#allocation5 + $0x14c] sm:$0xf0]  ;;  %v12744_v21 = vld [vmem:[#allocation5 + $0xf14] sm:$0xf] }
  0xbb   :  { %3419 = vmatmul.bf16.vlgmr.msrb.gmra.mxu2 %v13515_v9  ;;  %v8824_v28 = vld [vmem:[#allocation5 + $0x510] sm:$0xf]  ;;  %v8313_v36 = vor.u32 %v12304_v27, %v8312_v26  ;;  %v10106_v22 = vld [vmem:[#allocation5 + $0xf50] sm:$0xf0] }
  0xbc   :  { %3467 = vmatpush.bf16.msra.mxu2 %v9657_v38  ;;  %3440 = vmatpush.bf16.msra.mxu0 %v8569_v48  ;;  %v12432_v30 = vld [vmem:[#allocation5 + $0x54c] sm:$0xf0]  ;;  %v12344_v26 = vld [vmem:[#allocation5 + $0x294] sm:$0xf] }
  0xbd   :  { %3433 = vmatmul.bf16.vlgmr.msrb.gmra.mxu3 %v13520_v20  ;;  %v9336_v31 = vld [vmem:[#allocation5 + $0x910] sm:$0xf]  ;;  %v8825_v37 = vor.u32 %v12432_v30, %v8824_v28  ;;  %v8506_v27 = vld [vmem:[#allocation5 + $0x2d0] sm:$0xf0] }
  0xbe   :  { %3481 = vmatpush.bf16.msra.mxu3 %v10169_v42  ;;  %3454 = vmatpush.bf16.msra.mxu1 %v9081_v49  ;;  %v12560_v32 = vld [vmem:[#allocation5 + $0x94c] sm:$0xf0]  ;;  %v12472_v28 = vld [vmem:[#allocation5 + $0x694] sm:$0xf] }
  0xbf   :  { %v9848_v34 = vld [vmem:[#allocation5 + $0xd10] sm:$0xf]  ;;  %v9337_v38 = vor.u32 %v12560_v32, %v9336_v31  ;;  %v9018_v30 = vld [vmem:[#allocation5 + $0x6d0] sm:$0xf0] }
  0xc0   :  { %3468 = vmatpush.bf16.msra.mxu2 %v9593_v50  ;;  %3441 = vmatpush.bf16.msra.mxu0 %v8505_v60  ;;  %v12688_v35 = vld [vmem:[#allocation5 + $0xd4c] sm:$0xf0]  ;;  %v12376_v60 = vld [vmem:[#allocation5 + $0x394] sm:$0xf] }
  0xc1   :  { %v8248_v39 = vld [vmem:[#allocation5 + $0x90] sm:$0xf]  ;;  %v9849_v42 = vor.u32 %v12688_v35, %v9848_v34  ;;  %v12600_v31 = vld [vmem:[#allocation5 + $0xa94] sm:$0xf] }
  0xc2   :  { %3482 = vmatpush.bf16.msra.mxu3 %v10105_v54  ;;  %3455 = vmatpush.bf16.msra.mxu1 %v9017_v61  ;;  %v12288_v40 = vld [vmem:[#allocation5 + $0xcc] sm:$0xf0]  ;;  %v8634_v61 = vld [vmem:[#allocation5 + $0x3d0] sm:$0xf0] }
  0xc3   :  { %v8760_v41 = vld [vmem:[#allocation5 + $0x490] sm:$0xf]  ;;  %v8249_v48 = vor.u32 %v12288_v40, %v8248_v39  ;;  %v9530_v32 = vld [vmem:[#allocation5 + $0xad0] sm:$0xf0] }
  0xc4   :  { %3469 = vmatpush.bf16.msra.mxu2 %v9529_v62  ;;  %3442 = vmatpush.bf16.msra.mxu0 %v8441_v8  ;;  %v12416_v43 = vld [vmem:[#allocation5 + $0x4cc] sm:$0xf0]  ;;  %v12504_v62 = vld [vmem:[#allocation5 + $0x794] sm:$0xf]  ;;  %v8637_v8 = vor.u32 %v12376_v60, %v8634_v61 }
  0xc5   :  { %v9272_v44 = vld [vmem:[#allocation5 + $0x890] sm:$0xf]  ;;  %v8761_v51 = vor.u32 %v12416_v43, %v8760_v41  ;;  %v12728_v34 = vld [vmem:[#allocation5 + $0xe94] sm:$0xf] }
  0xc6   :  { %3483 = vmatpush.bf16.msra.mxu3 %v10041_v2  ;;  %3456 = vmatpush.bf16.msra.mxu1 %v8953_v10  ;;  %v12544_v45 = vld [vmem:[#allocation5 + $0x8cc] sm:$0xf0]  ;;  %v9658_v2 = vld [vmem:[#allocation5 + $0xbd0] sm:$0xf0]  ;;  %v9149_v10 = vor.u32 %v12504_v62, %v9146_v0 }
  0xc7   :  { %v9784_v46 = vld [vmem:[#allocation5 + $0xc90] sm:$0xf]  ;;  %v9273_v52 = vor.u32 %v12544_v45, %v9272_v44  ;;  %v10042_v35 = vld [vmem:[#allocation5 + $0xed0] sm:$0xf0] }
  0xc8   :  { %3470 = vmatpush.bf16.msra.mxu2 %v9465_v11  ;;  %3443 = vmatpush.bf16.msra.mxu0 %v8377_v23  ;;  %v12672_v47 = vld [vmem:[#allocation5 + $0xccc] sm:$0xf0]  ;;  %v9661_v11 = vor.u32 %v12632_v1, %v9658_v2  ;;  %v8573_v23 = vor.u32 %v12360_v12, %v8570_v13  ;;  %v12328_v39 = vld [vmem:[#allocation5 + $0x214] sm:$0xf] }
  0xc9   :  { %v8184_v49 = vld [vmem:[#allocation5 + $0x10] sm:$0xf]  ;;  %v9785_v56 = vor.u32 %v12672_v47, %v9784_v46  ;;  %v8442_v40 = vld [vmem:[#allocation5 + $0x250] sm:$0xf0] }
  0xca   :  { %3484 = vmatpush.bf16.msra.mxu3 %v9977_v15  ;;  %3457 = vmatpush.bf16.msra.mxu1 %v8889_v24  ;;  %v12272_v50 = vld [vmem:[#allocation5 + $0x4c] sm:$0xf0]  ;;  %v10173_v15 = vor.u32 %v12760_v5, %v10170_v6  ;;  %v9085_v24 = vor.u32 %v12488_v14, %v9082_v17  ;;  %v12456_v41 = vld [vmem:[#allocation5 + $0x614] sm:$0xf] }
  0xcb   :  { %v8696_v53 = vld [vmem:[#allocation5 + $0x410] sm:$0xf]  ;;  %v8185_v63 = vor.u32 %v12272_v50, %v8184_v49  ;;  %v8954_v43 = vld [vmem:[#allocation5 + $0x650] sm:$0xf0] }
  0xcc   :  { %3471 = vmatpush.bf16.msra.mxu2 %v9401_v25  ;;  %3444 = vmatpush.bf16.msra.mxu0 %v8313_v36  ;;  %v12400_v54 = vld [vmem:[#allocation5 + $0x44c] sm:$0xf0]  ;;  %v9597_v25 = vor.u32 %v12616_v18, %v9594_v19  ;;  %v8509_v36 = vor.u32 %v12344_v26, %v8506_v27  ;;  %v12584_v44 = vld [vmem:[#allocation5 + $0xa14] sm:$0xf]  ;;  %v8957_v50 = vor.u32 %v12456_v41, %v8954_v43 }
  0xcd   :  { %v9208_v55 = vld [vmem:[#allocation5 + $0x810] sm:$0xf]  ;;  %v8697_v3 = vor.u32 %v12400_v54, %v8696_v53  ;;  %v9466_v45 = vld [vmem:[#allocation5 + $0xa50] sm:$0xf0]  ;;  %v13543_v54 = vld [vmem:[#allocation7] sm:$0xff] }
  0xce   :  { %3485 = vmatpush.bf16.msra.mxu3 %v9913_v29  ;;  %3458 = vmatpush.bf16.msra.mxu1 %v8825_v37  ;;  %v12528_v57 = vld [vmem:[#allocation5 + $0x84c] sm:$0xf0]  ;;  %v10109_v29 = vor.u32 %v12744_v21, %v10106_v22  ;;  %v9021_v37 = vor.u32 %v12472_v28, %v9018_v30  ;;  %v12712_v46 = vld [vmem:[#allocation5 + $0xe14] sm:$0xf]  ;;  %v14233_v62 = vperm.slane %v13543_v54, 0 }
  0xcf   :  { %v9720_v58 = vld [vmem:[#allocation5 + $0xc10] sm:$0xf]  ;;  %v9209_v4 = vor.u32 %v12528_v57, %v9208_v55  ;;  %v9978_v47 = vld [vmem:[#allocation5 + $0xe50] sm:$0xf0] }
  0xd0   :  { %3472 = vmatpush.bf16.msra.mxu2 %v9337_v38  ;;  %v12656_v59 = vld [vmem:[#allocation5 + $0xc4c] sm:$0xf0]  ;;  %3445 = vmatpush.bf16.msra.mxu0 %v8249_v48  ;;  %v9533_v38 = vor.u32 %v12600_v31, %v9530_v32  ;;  %v8445_v48 = vor.u32 %v12328_v39, %v8442_v40  ;;  %v12312_v49 = vld [vmem:[#allocation5 + $0x194] sm:$0xf]  ;;  %v9981_v55 = vor.u32 %v12712_v46, %v9978_v47  ;;  %v12385_v46 = vld [vmem:[#allocation5 + $0x3d4] sm:$0xf0] }
  0xd1   :  { %v9721_v7 = vor.u32 %v12656_v59, %v9720_v58  ;;  %v12440_v53 = vld [vmem:[#allocation5 + $0x594] sm:$0xf]  ;;  %v9152_v47 = vld [vmem:[#allocation5 + $0x798] sm:$0xf] }
  0xd2   :  { %3486 = vmatpush.bf16.msra.mxu3 %v9849_v42  ;;  %3459 = vmatpush.bf16.msra.mxu1 %v8761_v51  ;;  %v10045_v42 = vor.u32 %v12728_v34, %v10042_v35  ;;  %v9469_v51 = vor.u32 %v12584_v44, %v9466_v45  ;;  %v12568_v57 = vld [vmem:[#allocation5 + $0x994] sm:$0xf]  ;;  %v8640_v45 = vld [vmem:[#allocation5 + $0x398] sm:$0xf] }
  0xd3   :  { %v9402_v58 = vld [vmem:[#allocation5 + $0x9d0] sm:$0xf0] }
  0xd4   :  { %3473 = vmatpush.bf16.msra.mxu2 %v9273_v52  ;;  %3446 = vmatpush.bf16.msra.mxu0 %v8185_v63  ;;  %v8378_v52 = vld [vmem:[#allocation5 + $0x1d0] sm:$0xf0]  ;;  %v9405_v0 = vor.u32 %v12568_v57, %v9402_v58  ;;  %v12769_v57 = vld [vmem:[#allocation5 + $0xfd4] sm:$0xf0] }
  0xd5   :  { %v12696_v59 = vld [vmem:[#allocation5 + $0xd94] sm:$0xf]  ;;  %v8381_v61 = vor.u32 %v12312_v49, %v8378_v52  ;;  %v12641_v52 = vld [vmem:[#allocation5 + $0xbd4] sm:$0xf0] }
  0xd6   :  { %3487 = vmatpush.bf16.msra.mxu3 %v9785_v56  ;;  %3460 = vmatpush.bf16.msra.mxu1 %v8697_v3  ;;  %v8890_v56 = vld [vmem:[#allocation5 + $0x5d0] sm:$0xf0] }
  0xd7   :  { %3447 = vmatmul.bf16.vlgmr.msra.gmra.mxu0 %v13517_v16  ;;  %v9914_v60 = vld [vmem:[#allocation5 + $0xdd0] sm:$0xf0]  ;;  %v8893_v63 = vor.u32 %v12440_v53, %v8890_v56  ;;  %v10176_v56 = vld [vmem:[#allocation5 + $0xf98] sm:$0xf] }
  0xd8   :  { %3474 = vmatpush.bf16.msra.mxu2 %v9209_v4  ;;  %3495 = vmatpush.bf16.msrb.mxu0 %v8637_v8  ;;  %v12296_v1 = vld [vmem:[#allocation5 + $0x114] sm:$0xf]  ;;  %v9917_v4 = vor.u32 %v12696_v59, %v9914_v60  ;;  %v3238_v21 = vpop.f32.mrf.mxu1  ;;  %v8641_v59 = vor.u32 %v12385_v46, %v8640_v45  ;;  %v8384_v45 = vld [vmem:[#allocation5 + $0x198] sm:$0xf] }
  0xd9   :  { %3461 = vmatmul.bf16.vlgmr.msra.gmra.mxu1 %v13523_v33  ;;  %v8314_v2 = vld [vmem:[#allocation5 + $0x150] sm:$0xf0]  ;;  %v12321_v46 = vld [vmem:[#allocation5 + $0x1d4] sm:$0xf0] }
  0xda   :  { %3488 = vmatpush.bf16.msra.mxu3 %v9721_v7  ;;  %3509 = vmatpush.bf16.msrb.mxu1 %v9149_v10  ;;  %v12424_v3 = vld [vmem:[#allocation5 + $0x514] sm:$0xf]  ;;  %v8317_v12 = vor.u32 %v12296_v1, %v8314_v2  ;;  %v9088_v1 = vld [vmem:[#allocation5 + $0x718] sm:$0xf]  ;;  %v10177_v2 = vor.u32 %v12769_v57, %v10176_v56 }
  0xdb   :  { %3475 = vmatmul.bf16.vlgmr.msra.gmra.mxu2 %v13515_v9  ;;  %v8826_v5 = vld [vmem:[#allocation5 + $0x550] sm:$0xf0]  ;;  %v9920_v56 = vld [vmem:[#allocation5 + $0xd98] sm:$0xf] }
  0xdc   :  { %3523 = vmatpush.bf16.msrb.mxu2 %v9661_v11  ;;  %3496 = vmatpush.bf16.msrb.mxu0 %v8573_v23  ;;  %v12552_v6 = vld [vmem:[#allocation5 + $0x914] sm:$0xf]  ;;  %v3224_v11 = vpop.f32.mrf.mxu0  ;;  %v8829_v14 = vor.u32 %v12424_v3, %v8826_v5  ;;  %v12497_v3 = vld [vmem:[#allocation5 + $0x754] sm:$0xf0] }
  0xdd   :  { %3489 = vmatmul.bf16.vlgmr.msra.gmra.mxu3 %v13520_v20  ;;  %v9338_v7 = vld [vmem:[#allocation5 + $0x950] sm:$0xf0]  ;;  %v3225_v13 = vadd.f32 %v3224_v11, %v14233_v62  ;;  %v12625_v5 = vld [vmem:[#allocation5 + $0xb54] sm:$0xf0]  ;;  %v9089_v11 = vor.u32 %v12497_v3, %v9088_v1  ;;  %v12683_v62 = vld [vmem:[#allocation5 + $0xd2c] sm:$0xf] }
  0xde   :  { %3537 = vmatpush.bf16.msrb.mxu3 %v10173_v15  ;;  %3510 = vmatpush.bf16.msrb.mxu1 %v9085_v24  ;;  %v12680_v8 = vld [vmem:[#allocation5 + $0xd14] sm:$0xf]  ;;  %v9341_v15 = vor.u32 %v12552_v6, %v9338_v7  ;;  %v10112_v6 = vld [vmem:[#allocation5 + $0xf18] sm:$0xf] }
  0xdf   :  { %v9850_v10 = vld [vmem:[#allocation5 + $0xd50] sm:$0xf0]  ;;  %v3239_v26 = vadd.f32 %v3238_v21, %v3225_v13  ;;  %v12753_v7 = vld [vmem:[#allocation5 + $0xf54] sm:$0xf0] }
  0xe0   :  { %3524 = vmatpush.bf16.msrb.mxu2 %v9597_v25  ;;  %3497 = vmatpush.bf16.msrb.mxu0 %v8509_v36  ;;  %v12280_v17 = vld [vmem:[#allocation5 + $0x94] sm:$0xf]  ;;  %v9853_v22 = vor.u32 %v12680_v8, %v9850_v10  ;;  %v3266_v44 = vpop.f32.mrf.mxu3  ;;  %v8512_v13 = vld [vmem:[#allocation5 + $0x298] sm:$0xf] }
  0xe1   :  { %v8250_v18 = vld [vmem:[#allocation5 + $0xd0] sm:$0xf0]  ;;  %v12609_v21 = vld [vmem:[#allocation5 + $0xad4] sm:$0xf0] }
  0xe2   :  { %3538 = vmatpush.bf16.msrb.mxu3 %v10109_v29  ;;  %3511 = vmatpush.bf16.msrb.mxu1 %v9021_v37  ;;  %v12408_v19 = vld [vmem:[#allocation5 + $0x494] sm:$0xf]  ;;  %v3252_v29 = vpop.f32.mrf.mxu2  ;;  %v8253_v30 = vor.u32 %v12280_v17, %v8250_v18  ;;  %v10113_v17 = vor.u32 %v12753_v7, %v10112_v6  ;;  %v12481_v18 = vld [vmem:[#allocation5 + $0x6d4] sm:$0xf0] }
  0xe3   :  { %v8762_v23 = vld [vmem:[#allocation5 + $0x4d0] sm:$0xf0]  ;;  %v3253_v34 = vadd.f32 %v3252_v29, %v3239_v26  ;;  %v8448_v26 = vld [vmem:[#allocation5 + $0x218] sm:$0xf] }
  0xe4   :  { %3525 = vmatpush.bf16.msrb.mxu2 %v9533_v38  ;;  %3498 = vmatpush.bf16.msrb.mxu0 %v8445_v48  ;;  %v12536_v24 = vld [vmem:[#allocation5 + $0x894] sm:$0xf]  ;;  %v8765_v35 = vor.u32 %v12408_v19, %v8762_v23  ;;  %v13550_v10 = vpop.f32.mrf.mxu0  ;;  %v9536_v19 = vld [vmem:[#allocation5 + $0xa98] sm:$0xf] }
  0xe5   :  { %v9274_v25 = vld [vmem:[#allocation5 + $0x8d0] sm:$0xf0]  ;;  %v13548_v48 = vadd.f32 %v3266_v44, %v3253_v34  ;;  %v10048_v23 = vld [vmem:[#allocation5 + $0xe98] sm:$0xf] }
  0xe6   :  { %3539 = vmatpush.bf16.msrb.mxu3 %v10045_v42  ;;  %3512 = vmatpush.bf16.msrb.mxu1 %v8957_v50  ;;  %v12664_v27 = vld [vmem:[#allocation5 + $0xc94] sm:$0xf]  ;;  %v9277_v36 = vor.u32 %v12536_v24, %v9274_v25  ;;  %v12513_v50 = vld [vmem:[#allocation5 + $0x7d4] sm:$0xf0] }
  0xe7   :  { %v9786_v28 = vld [vmem:[#allocation5 + $0xcd0] sm:$0xf0]  ;;  %v9153_v60 = vor.u32 %v12513_v50, %v9152_v47  ;;  %v12737_v24 = vld [vmem:[#allocation5 + $0xed4] sm:$0xf0] }
  0xe8   :  { %3526 = vmatpush.bf16.msrb.mxu2 %v9469_v51  ;;  %3499 = vmatpush.bf16.msrb.mxu0 %v8381_v61  ;;  %v12264_v31 = vld [vmem:[#allocation5 + $0x14] sm:$0xf]  ;;  %v9789_v40 = vor.u32 %v12664_v27, %v9786_v28  ;;  %v9664_v51 = vld [vmem:[#allocation5 + $0xb98] sm:$0xf]  ;;  %v9537_v28 = vor.u32 %v12609_v21, %v9536_v19  ;;  %v10049_v34 = vor.u32 %v12737_v24, %v10048_v23 }
  0xe9   :  { %v8186_v32 = vld [vmem:[#allocation5 + $0x50] sm:$0xf0]  ;;  %v9665_v61 = vor.u32 %v12641_v52, %v9664_v51  ;;  %v12337_v29 = vld [vmem:[#allocation5 + $0x254] sm:$0xf0] }
  0xea   :  { %3540 = vmatpush.bf16.msrb.mxu3 %v9981_v55  ;;  %3513 = vmatpush.bf16.msrb.mxu1 %v8893_v63  ;;  %v12392_v37 = vld [vmem:[#allocation5 + $0x414] sm:$0xf]  ;;  %v8189_v49 = vor.u32 %v12264_v31, %v8186_v32  ;;  %v8576_v63 = vld [vmem:[#allocation5 + $0x318] sm:$0xf]  ;;  %v13558_v31 = vpop.f32.mrf.mxu2  ;;  %v14231_v32 = vperm.slane %v13543_v54, 1 }
  0xeb   :  { %v8698_v38 = vld [vmem:[#allocation5 + $0x450] sm:$0xf0]  ;;  %v8896_v47 = vld [vmem:[#allocation5 + $0x598] sm:$0xf] }
  0xec   :  { %3527 = vmatpush.bf16.msrb.mxu2 %v9405_v0  ;;  %3500 = vmatpush.bf16.msrb.mxu0 %v8317_v12  ;;  %v12520_v39 = vld [vmem:[#allocation5 + $0x814] sm:$0xf]  ;;  %v8701_v53 = vor.u32 %v12392_v37, %v8698_v38  ;;  %v12369_v0 = vld [vmem:[#allocation5 + $0x354] sm:$0xf0] }
  0xed   :  { %v9210_v41 = vld [vmem:[#allocation5 + $0x850] sm:$0xf0]  ;;  %v8577_v8 = vor.u32 %v12369_v0, %v8576_v63  ;;  %v12593_v37 = vld [vmem:[#allocation5 + $0xa54] sm:$0xf0] }
  0xee   :  { %3541 = vmatpush.bf16.msrb.mxu3 %v9917_v4  ;;  %3514 = vmatpush.bf16.msrb.mxu1 %v8829_v14  ;;  %v12648_v42 = vld [vmem:[#allocation5 + $0xc14] sm:$0xf]  ;;  %v9213_v55 = vor.u32 %v12520_v39, %v9210_v41  ;;  %v9600_v4 = vld [vmem:[#allocation5 + $0xb18] sm:$0xf]  ;;  %v8449_v41 = vor.u32 %v12337_v29, %v8448_v26 }
  0xef   :  { %v9722_v43 = vld [vmem:[#allocation5 + $0xc50] sm:$0xf0]  ;;  %v9601_v12 = vor.u32 %v12625_v5, %v9600_v4  ;;  %v12353_v14 = vld [vmem:[#allocation5 + $0x2d4] sm:$0xf0] }
  0xf0   :  { %3528 = vmatpush.bf16.msrb.mxu2 %v9341_v15  ;;  %3501 = vmatpush.bf16.msrb.mxu0 %v8253_v30  ;;  %v9725_v58 = vor.u32 %v12648_v42, %v9722_v43  ;;  %v9024_v15 = vld [vmem:[#allocation5 + $0x698] sm:$0xf]  ;;  %v8513_v25 = vor.u32 %v12353_v14, %v8512_v13 }
  0xf1   :  { %v9025_v27 = vor.u32 %v12481_v18, %v9024_v15  ;;  %v8960_v30 = vld [vmem:[#allocation5 + $0x618] sm:$0xf] }
  0xf2   :  { %3542 = vmatpush.bf16.msrb.mxu3 %v9853_v22  ;;  %3515 = vmatpush.bf16.msrb.mxu1 %v8765_v35  ;;  %v13552_v22 = vpop.f32.mrf.mxu1  ;;  %v12465_v35 = vld [vmem:[#allocation5 + $0x654] sm:$0xf0] }
  0xf3   :  { %v9984_v38 = vld [vmem:[#allocation5 + $0xe18] sm:$0xf]  ;;  %v8961_v43 = vor.u32 %v12465_v35, %v8960_v30 }
  0xf4   :  { %3529 = vmatpush.bf16.msrb.mxu2 %v9277_v36  ;;  %3502 = vmatpush.bf16.msrb.mxu0 %v8189_v49  ;;  %v9472_v36 = vld [vmem:[#allocation5 + $0xa18] sm:$0xf]  ;;  %v3280_v42 = vpop.f32.mrf.mxu0 }
  0xf5   :  { %v12721_v39 = vld [vmem:[#allocation5 + $0xe54] sm:$0xf0]  ;;  %v9473_v44 = vor.u32 %v12593_v37, %v9472_v36  ;;  %v3281_v49 = vadd.f32 %v3280_v42, %v14231_v32  ;;  %v9618_v32 = vld [vmem:[#allocation5 + $0xb68] sm:$0xf0] }
  0xf6   :  { %3543 = vmatpush.bf16.msrb.mxu3 %v9789_v40  ;;  %3516 = vmatpush.bf16.msrb.mxu1 %v8701_v53  ;;  %v13561_v40 = vpop.f32.mrf.mxu3  ;;  %v9985_v50 = vor.u32 %v12721_v39, %v9984_v38  ;;  %v12449_v51 = vld [vmem:[#allocation5 + $0x5d4] sm:$0xf0] }
  0xf7   :  { %3503 = vmatmul.bf16.vlgmr.msrb.gmra.mxu0 %v13517_v16  ;;  %v9408_v52 = vld [vmem:[#allocation5 + $0x998] sm:$0xf] }
  0xf8   :  { %3530 = vmatpush.bf16.msrb.mxu2 %v9213_v55  ;;  %3551 = vmatpush.bf16.msra.mxu0 %v8641_v59  ;;  %v12577_v53 = vld [vmem:[#allocation5 + $0x9d4] sm:$0xf0]  ;;  %v8385_v59 = vor.u32 %v12321_v46, %v8384_v45  ;;  %v12377_v45 = vld [vmem:[#allocation5 + $0x39c] sm:$0xf] }
  0xf9   :  { %3517 = vmatmul.bf16.vlgmr.msrb.gmra.mxu1 %v13523_v33  ;;  %v12705_v57 = vld [vmem:[#allocation5 + $0xdd4] sm:$0xf0]  ;;  %v8642_v46 = vld [vmem:[#allocation5 + $0x3d8] sm:$0xf0] }
  0xfa   :  { %3544 = vmatpush.bf16.msrb.mxu3 %v9725_v58  ;;  %3565 = vmatpush.bf16.msra.mxu1 %v9153_v60  ;;  %v3294_v55 = vpop.f32.mrf.mxu1  ;;  %v8897_v60 = vor.u32 %v12449_v51, %v8896_v47  ;;  %v8320_v63 = vld [vmem:[#allocation5 + $0x118] sm:$0xf]  ;;  %v9921_v3 = vor.u32 %v12705_v57, %v9920_v56  ;;  %v12505_v47 = vld [vmem:[#allocation5 + $0x79c] sm:$0xf] }
  0xfb   :  { %3531 = vmatmul.bf16.vlgmr.msrb.gmra.mxu2 %v13515_v9  ;;  %v3295_v58 = vadd.f32 %v3294_v55, %v3281_v49  ;;  %v12305_v0 = vld [vmem:[#allocation5 + $0x154] sm:$0xf0]  ;;  %v12633_v51 = vld [vmem:[#allocation5 + $0xb9c] sm:$0xf] }
  0xfc   :  { %3579 = vmatpush.bf16.msra.mxu2 %v9665_v61  ;;  %3552 = vmatpush.bf16.msra.mxu0 %v8577_v8  ;;  %v9409_v61 = vor.u32 %v12577_v53, %v9408_v52  ;;  %v8832_v1 = vld [vmem:[#allocation5 + $0x518] sm:$0xf]  ;;  %v8321_v13 = vor.u32 %v12305_v0, %v8320_v63  ;;  %v9666_v52 = vld [vmem:[#allocation5 + $0xbd8] sm:$0xf0] }
  0xfd   :  { %3545 = vmatmul.bf16.vlgmr.msrb.gmra.mxu3 %v13520_v20  ;;  %v12433_v4 = vld [vmem:[#allocation5 + $0x554] sm:$0xf0]  ;;  %v12761_v56 = vld [vmem:[#allocation5 + $0xf9c] sm:$0xf] }
  0xfe   :  { %3593 = vmatpush.bf16.msra.mxu3 %v10177_v2  ;;  %3566 = vmatpush.bf16.msra.mxu1 %v9089_v11  ;;  %v3308_v2 = vpop.f32.mrf.mxu2  ;;  %v9344_v5 = vld [vmem:[#allocation5 + $0x918] sm:$0xf]  ;;  %v8833_v15 = vor.u32 %v12433_v4, %v8832_v1  ;;  %v10178_v57 = vld [vmem:[#allocation5 + $0xfd8] sm:$0xf0] }
  0xff   :  { %v12561_v6 = vld [vmem:[#allocation5 + $0x954] sm:$0xf0]  ;;  %v3309_v7 = vadd.f32 %v3308_v2, %v3295_v58  ;;  %v12361_v63 = vld [vmem:[#allocation5 + $0x31c] sm:$0xf]  ;;  %v10181_v2 = vor.u32 %v12761_v56, %v10178_v57 }
 0x100   :  { %3580 = vmatpush.bf16.msra.mxu2 %v9601_v12  ;;  %3553 = vmatpush.bf16.msra.mxu0 %v8513_v25  ;;  %v9856_v8 = vld [vmem:[#allocation5 + $0xd18] sm:$0xf]  ;;  %v3322_v12 = vpop.f32.mrf.mxu3  ;;  %v8578_v0 = vld [vmem:[#allocation5 + $0x358] sm:$0xf0] }
 0x101   :  { %v12689_v11 = vld [vmem:[#allocation5 + $0xd54] sm:$0xf0]  ;;  %v13565_v14 = vadd.f32 %v3322_v12, %v3309_v7  ;;  %v12489_v1 = vld [vmem:[#allocation5 + $0x71c] sm:$0xf] }
 0x102   :  { %3594 = vmatpush.bf16.msra.mxu3 %v10113_v17  ;;  %3567 = vmatpush.bf16.msra.mxu1 %v9025_v27  ;;  %v9345_v17 = vor.u32 %v12561_v6, %v9344_v5  ;;  %v8256_v18 = vld [vmem:[#allocation5 + $0x98] sm:$0xf]  ;;  %v9857_v23 = vor.u32 %v12689_v11, %v9856_v8  ;;  %v12617_v4 = vld [vmem:[#allocation5 + $0xb1c] sm:$0xf]  ;;  %v8581_v8 = vor.u32 %v12361_v63, %v8578_v0  ;;  %v13567_v11 = vpop.f32.mrf.mxu0 }
 0x103   :  { %v12289_v19 = vld [vmem:[#allocation5 + $0xd4] sm:$0xf0]  ;;  %v9602_v5 = vld [vmem:[#allocation5 + $0xb58] sm:$0xf0] }
 0x104   :  { %3581 = vmatpush.bf16.msra.mxu2 %v9537_v28  ;;  %3554 = vmatpush.bf16.msra.mxu0 %v8449_v41  ;;  %v8768_v21 = vld [vmem:[#allocation5 + $0x498] sm:$0xf]  ;;  %v8257_v29 = vor.u32 %v12289_v19, %v8256_v18  ;;  %v12745_v6 = vld [vmem:[#allocation5 + $0xf1c] sm:$0xf] }
 0x105   :  { %v12417_v24 = vld [vmem:[#allocation5 + $0x4d4] sm:$0xf0]  ;;  %v10114_v7 = vld [vmem:[#allocation5 + $0xf58] sm:$0xf0] }
 0x106   :  { %3595 = vmatpush.bf16.msra.mxu3 %v10049_v34  ;;  %3568 = vmatpush.bf16.msra.mxu1 %v8961_v43  ;;  %v9280_v25 = vld [vmem:[#allocation5 + $0x898] sm:$0xf]  ;;  %v8769_v35 = vor.u32 %v12417_v24, %v8768_v21  ;;  %v12473_v18 = vld [vmem:[#allocation5 + $0x69c] sm:$0xf]  ;;  %v10117_v19 = vor.u32 %v12745_v6, %v10114_v7 }
 0x107   :  { %v12545_v26 = vld [vmem:[#allocation5 + $0x8d4] sm:$0xf0]  ;;  %v9026_v21 = vld [vmem:[#allocation5 + $0x6d8] sm:$0xf0] }
 0x108   :  { %3582 = vmatpush.bf16.msra.mxu2 %v9473_v44  ;;  %3555 = vmatpush.bf16.msra.mxu0 %v8385_v59  ;;  %v9792_v27 = vld [vmem:[#allocation5 + $0xc98] sm:$0xf]  ;;  %v9281_v36 = vor.u32 %v12545_v26, %v9280_v25  ;;  %v8645_v59 = vor.u32 %v12377_v45, %v8642_v46  ;;  %v9538_v24 = vld [vmem:[#allocation5 + $0xad8] sm:$0xf0]  ;;  %v13569_v25 = vpop.f32.mrf.mxu1  ;;  %v13578_v46 = vpop.f32.mrf.mxu3 }
 0x109   :  { %v12673_v28 = vld [vmem:[#allocation5 + $0xcd4] sm:$0xf0]  ;;  %v12729_v26 = vld [vmem:[#allocation5 + $0xe9c] sm:$0xf] }
 0x10a   :  { %3596 = vmatpush.bf16.msra.mxu3 %v9985_v50  ;;  %3569 = vmatpush.bf16.msra.mxu1 %v8897_v60  ;;  %v8192_v30 = vld [vmem:[#allocation5 + $0x18] sm:$0xf]  ;;  %v9793_v41 = vor.u32 %v12673_v28, %v9792_v27  ;;  %v9154_v50 = vld [vmem:[#allocation5 + $0x7d8] sm:$0xf0] }
 0x10b   :  { %v12273_v34 = vld [vmem:[#allocation5 + $0x54] sm:$0xf0]  ;;  %v9157_v60 = vor.u32 %v12505_v47, %v9154_v50  ;;  %v10050_v27 = vld [vmem:[#allocation5 + $0xed8] sm:$0xf0] }
 0x10c   :  { %3583 = vmatpush.bf16.msra.mxu2 %v9409_v61  ;;  %3556 = vmatpush.bf16.msra.mxu0 %v8321_v13  ;;  %v8704_v37 = vld [vmem:[#allocation5 + $0x418] sm:$0xf]  ;;  %v8193_v49 = vor.u32 %v12273_v34, %v8192_v30  ;;  %v9669_v61 = vor.u32 %v12633_v51, %v9666_v52  ;;  %v9605_v13 = vor.u32 %v12617_v4, %v9602_v5  ;;  %v9986_v45 = vld [vmem:[#allocation5 + $0xe58] sm:$0xf0] }
 0x10d   :  { %v12401_v38 = vld [vmem:[#allocation5 + $0x454] sm:$0xf0]  ;;  %v9029_v30 = vor.u32 %v12473_v18, %v9026_v21  ;;  %v12313_v52 = vld [vmem:[#allocation5 + $0x19c] sm:$0xf] }
 0x10e   :  { %3597 = vmatpush.bf16.msra.mxu3 %v9921_v3  ;;  %3570 = vmatpush.bf16.msra.mxu1 %v8833_v15  ;;  %v9216_v39 = vld [vmem:[#allocation5 + $0x818] sm:$0xf]  ;;  %v8705_v53 = vor.u32 %v12401_v38, %v8704_v37  ;;  %v9090_v3 = vld [vmem:[#allocation5 + $0x758] sm:$0xf0]  ;;  %v13575_v37 = vpop.f32.mrf.mxu2  ;;  %v14230_v38 = vperm.slane %v13543_v54, 2 }
 0x10f   :  { %v12529_v42 = vld [vmem:[#allocation5 + $0x854] sm:$0xf0]  ;;  %v9093_v12 = vor.u32 %v12489_v1, %v9090_v3  ;;  %v12345_v15 = vld [vmem:[#allocation5 + $0x29c] sm:$0xf] }
 0x110   :  { %3584 = vmatpush.bf16.msra.mxu2 %v9345_v17  ;;  %v9728_v43 = vld [vmem:[#allocation5 + $0xc18] sm:$0xf]  ;;  %3557 = vmatpush.bf16.msra.mxu0 %v8257_v29  ;;  %v9217_v55 = vor.u32 %v12529_v42, %v9216_v39  ;;  %v8514_v17 = vld [vmem:[#allocation5 + $0x2d8] sm:$0xf0]  ;;  %v10053_v39 = vor.u32 %v12729_v26, %v10050_v27 }
 0x111   :  { %v12657_v44 = vld [vmem:[#allocation5 + $0xc54] sm:$0xf0]  ;;  %v8517_v28 = vor.u32 %v12345_v15, %v8514_v17  ;;  %v12329_v29 = vld [vmem:[#allocation5 + $0x21c] sm:$0xf] }
 0x112   :  { %3598 = vmatpush.bf16.msra.mxu3 %v9857_v23  ;;  %3571 = vmatpush.bf16.msra.mxu1 %v8769_v35  ;;  %v9729_v58 = vor.u32 %v12657_v44, %v9728_v43  ;;  %v12601_v23 = vld [vmem:[#allocation5 + $0xa9c] sm:$0xf] }
 0x113   :  { %v9541_v34 = vor.u32 %v12601_v23, %v9538_v24  ;;  %v8450_v35 = vld [vmem:[#allocation5 + $0x258] sm:$0xf0] }
 0x114   :  { %3585 = vmatpush.bf16.msra.mxu2 %v9281_v36  ;;  %3558 = vmatpush.bf16.msra.mxu0 %v8193_v49  ;;  %v12457_v36 = vld [vmem:[#allocation5 + $0x61c] sm:$0xf]  ;;  %v8453_v47 = vor.u32 %v12329_v29, %v8450_v35  ;;  %v3336_v49 = vpop.f32.mrf.mxu0 }
 0x115   :  { %v12585_v42 = vld [vmem:[#allocation5 + $0xa1c] sm:$0xf]  ;;  %v3337_v56 = vadd.f32 %v3336_v49, %v14230_v38  ;;  %v12491_v38 = vld [vmem:[#allocation5 + $0x72c] sm:$0xf] }
 0x116   :  { %3599 = vmatpush.bf16.msra.mxu3 %v9793_v41  ;;  %3572 = vmatpush.bf16.msra.mxu1 %v8705_v53  ;;  %v8962_v41 = vld [vmem:[#allocation5 + $0x658] sm:$0xf0] }
 0x117   :  { %3559 = vmatmul.bf16.vlgmr.msra.gmra.mxu0 %v13517_v16  ;;  %v9474_v43 = vld [vmem:[#allocation5 + $0xa58] sm:$0xf0]  ;;  %v8965_v50 = vor.u32 %v12457_v36, %v8962_v41 }
 0x118   :  { %3586 = vmatpush.bf16.msra.mxu2 %v9217_v55  ;;  %3607 = vmatpush.bf16.msrb.mxu0 %v8645_v59  ;;  %v12713_v44 = vld [vmem:[#allocation5 + $0xe1c] sm:$0xf]  ;;  %v9477_v51 = vor.u32 %v12585_v42, %v9474_v43 }
 0x119   :  { %3573 = vmatmul.bf16.vlgmr.msra.gmra.mxu1 %v13523_v33  ;;  %v8386_v53 = vld [vmem:[#allocation5 + $0x1d8] sm:$0xf0]  ;;  %v9989_v57 = vor.u32 %v12713_v44, %v9986_v45 }
 0x11a   :  { %3600 = vmatpush.bf16.msra.mxu3 %v9729_v58  ;;  %3621 = vmatpush.bf16.msrb.mxu1 %v9157_v60  ;;  %v12441_v55 = vld [vmem:[#allocation5 + $0x59c] sm:$0xf] }
 0x11b   :  { %3587 = vmatmul.bf16.vlgmr.msra.gmra.mxu2 %v13515_v9  ;;  %v8898_v58 = vld [vmem:[#allocation5 + $0x5d8] sm:$0xf0] }
 0x11c   :  { %3635 = vmatpush.bf16.msrb.mxu2 %v9669_v61  ;;  %3608 = vmatpush.bf16.msrb.mxu0 %v8581_v8  ;;  %v12569_v59 = vld [vmem:[#allocation5 + $0x99c] sm:$0xf]  ;;  %v3350_v61 = vpop.f32.mrf.mxu1  ;;  %v8901_v3 = vor.u32 %v12441_v55, %v8898_v58 }
 0x11d   :  { %3601 = vmatmul.bf16.vlgmr.msra.gmra.mxu3 %v13520_v20  ;;  %v9410_v60 = vld [vmem:[#allocation5 + $0x9d8] sm:$0xf0]  ;;  %v3351_v1 = vadd.f32 %v3350_v61, %v3337_v56  ;;  %v9160_v61 = vld [vmem:[#allocation5 + $0x7a0] sm:$0xf] }
 0x11e   :  { %3649 = vmatpush.bf16.msrb.mxu3 %v10181_v2  ;;  %3622 = vmatpush.bf16.msrb.mxu1 %v9093_v12  ;;  %v12697_v63 = vld [vmem:[#allocation5 + $0xd9c] sm:$0xf]  ;;  %v8389_v2 = vor.u32 %v12313_v52, %v8386_v53  ;;  %v9413_v4 = vor.u32 %v12569_v59, %v9410_v60  ;;  %v3364_v8 = vpop.f32.mrf.mxu2  ;;  %v8648_v59 = vld [vmem:[#allocation5 + $0x3a0] sm:$0xf] }
 0x11f   :  { %v9922_v0 = vld [vmem:[#allocation5 + $0xdd8] sm:$0xf0]  ;;  %v3365_v18 = vadd.f32 %v3364_v8, %v3351_v1  ;;  %v12386_v60 = vld [vmem:[#allocation5 + $0x3dc] sm:$0xf0] }
 0x120   :  { %3636 = vmatpush.bf16.msrb.mxu2 %v9605_v13  ;;  %3609 = vmatpush.bf16.msrb.mxu0 %v8517_v28  ;;  %v12297_v5 = vld [vmem:[#allocation5 + $0x11c] sm:$0xf]  ;;  %v9925_v12 = vor.u32 %v12697_v63, %v9922_v0  ;;  %v3378_v23 = vpop.f32.mrf.mxu3  ;;  %v12514_v0 = vld [vmem:[#allocation5 + $0x7dc] sm:$0xf0]  ;;  %v8649_v8 = vor.u32 %v12386_v60, %v8648_v59  ;;  %v14229_v59 = vperm.slane %v13543_v54, 3 }
 0x121   :  { %v8322_v6 = vld [vmem:[#allocation5 + $0x158] sm:$0xf0]  ;;  %v13582_v26 = vadd.f32 %v3378_v23, %v3365_v18  ;;  %v9672_v1 = vld [vmem:[#allocation5 + $0xba0] sm:$0xf] }
 0x122   :  { %3650 = vmatpush.bf16.msrb.mxu3 %v10117_v19  ;;  %3623 = vmatpush.bf16.msrb.mxu1 %v9029_v30  ;;  %v12425_v7 = vld [vmem:[#allocation5 + $0x51c] sm:$0xf]  ;;  %v8325_v24 = vor.u32 %v12297_v5, %v8322_v6  ;;  %v10184_v5 = vld [vmem:[#allocation5 + $0xfa0] sm:$0xf] }
 0x123   :  { %v8834_v13 = vld [vmem:[#allocation5 + $0x558] sm:$0xf0]  ;;  %v12770_v6 = vld [vmem:[#allocation5 + $0xfdc] sm:$0xf0] }
 0x124   :  { %3637 = vmatpush.bf16.msrb.mxu2 %v9541_v34  ;;  %3610 = vmatpush.bf16.msrb.mxu0 %v8453_v47  ;;  %v12553_v15 = vld [vmem:[#allocation5 + $0x91c] sm:$0xf]  ;;  %v8837_v27 = vor.u32 %v12425_v7, %v8834_v13  ;;  %v9096_v18 = vld [vmem:[#allocation5 + $0x720] sm:$0xf] }
 0x125   :  { %v9346_v17 = vld [vmem:[#allocation5 + $0x958] sm:$0xf0]  ;;  %v9608_v23 = vld [vmem:[#allocation5 + $0xb20] sm:$0xf] }
 0x126   :  { %3651 = vmatpush.bf16.msrb.mxu3 %v10053_v39  ;;  %3624 = vmatpush.bf16.msrb.mxu1 %v8965_v50  ;;  %v12681_v19 = vld [vmem:[#allocation5 + $0xd1c] sm:$0xf]  ;;  %v9349_v28 = vor.u32 %v12553_v15, %v9346_v17  ;;  %v8584_v15 = vld [vmem:[#allocation5 + $0x320] sm:$0xf] }
 0x127   :  { %v9858_v21 = vld [vmem:[#allocation5 + $0xd58] sm:$0xf0]  ;;  %v12370_v17 = vld [vmem:[#allocation5 + $0x35c] sm:$0xf0] }
 0x128   :  { %3638 = vmatpush.bf16.msrb.mxu2 %v9477_v51  ;;  %3611 = vmatpush.bf16.msrb.mxu0 %v8389_v2  ;;  %v12281_v29 = vld [vmem:[#allocation5 + $0x9c] sm:$0xf]  ;;  %v9861_v35 = vor.u32 %v12681_v19, %v9858_v21  ;;  %v12642_v2 = vld [vmem:[#allocation5 + $0xbdc] sm:$0xf0]  ;;  %v10185_v19 = vor.u32 %v12770_v6, %v10184_v5 }
 0x129   :  { %v8258_v30 = vld [vmem:[#allocation5 + $0xd8] sm:$0xf0]  ;;  %v9673_v13 = vor.u32 %v12642_v2, %v9672_v1  ;;  %v12498_v21 = vld [vmem:[#allocation5 + $0x75c] sm:$0xf0] }
 0x12a   :  { %3652 = vmatpush.bf16.msrb.mxu3 %v9989_v57  ;;  %3625 = vmatpush.bf16.msrb.mxu1 %v8901_v3  ;;  %v12409_v34 = vld [vmem:[#allocation5 + $0x49c] sm:$0xf]  ;;  %v8261_v44 = vor.u32 %v12281_v29, %v8258_v30  ;;  %v8585_v29 = vor.u32 %v12370_v17, %v8584_v15  ;;  %v13584_v30 = vpop.f32.mrf.mxu0  ;;  %v9992_v1 = vld [vmem:[#allocation5 + $0xe20] sm:$0xf] }
 0x12b   :  { %v8770_v36 = vld [vmem:[#allocation5 + $0x4d8] sm:$0xf0]  ;;  %v12722_v2 = vld [vmem:[#allocation5 + $0xe5c] sm:$0xf0] }
 0x12c   :  { %3639 = vmatpush.bf16.msrb.mxu2 %v9413_v4  ;;  %v12537_v39 = vld [vmem:[#allocation5 + $0x89c] sm:$0xf]  ;;  %3612 = vmatpush.bf16.msrb.mxu0 %v8325_v24  ;;  %v8773_v49 = vor.u32 %v12409_v34, %v8770_v36  ;;  %v12626_v24 = vld [vmem:[#allocation5 + $0xb5c] sm:$0xf0]  ;;  %v9097_v34 = vor.u32 %v12498_v21, %v9096_v18  ;;  %v9993_v17 = vor.u32 %v12722_v2, %v9992_v1 }
 0x12d   :  { %v9282_v41 = vld [vmem:[#allocation5 + $0x8d8] sm:$0xf0]  ;;  %v8520_v36 = vld [vmem:[#allocation5 + $0x2a0] sm:$0xf] }
 0x12e   :  { %3653 = vmatpush.bf16.msrb.mxu3 %v9925_v12  ;;  %v12665_v42 = vld [vmem:[#allocation5 + $0xc9c] sm:$0xf]  ;;  %3626 = vmatpush.bf16.msrb.mxu1 %v8837_v27  ;;  %v9285_v50 = vor.u32 %v12537_v39, %v9282_v41  ;;  %v9161_v12 = vor.u32 %v12514_v0, %v9160_v61  ;;  %v10120_v27 = vld [vmem:[#allocation5 + $0xf20] sm:$0xf] }
 0x12f   :  { %v9794_v43 = vld [vmem:[#allocation5 + $0xcd8] sm:$0xf0]  ;;  %v12354_v39 = vld [vmem:[#allocation5 + $0x2dc] sm:$0xf0] }
 0x130   :  { %v12265_v45 = vld [vmem:[#allocation5 + $0x1c] sm:$0xf]  ;;  %3640 = vmatpush.bf16.msrb.mxu2 %v9349_v28  ;;  %v9797_v55 = vor.u32 %v12665_v42, %v9794_v43  ;;  %3613 = vmatpush.bf16.msrb.mxu0 %v8261_v44  ;;  %v12754_v28 = vld [vmem:[#allocation5 + $0xf5c] sm:$0xf0] }
 0x131   :  { %v8194_v47 = vld [vmem:[#allocation5 + $0x58] sm:$0xf0]  ;;  %v9032_v41 = vld [vmem:[#allocation5 + $0x6a0] sm:$0xf]  ;;  %v10121_v42 = vor.u32 %v12754_v28, %v10120_v27 }
 0x132   :  { %v12393_v51 = vld [vmem:[#allocation5 + $0x41c] sm:$0xf]  ;;  %3654 = vmatpush.bf16.msrb.mxu3 %v9861_v35  ;;  %v8197_v63 = vor.u32 %v12265_v45, %v8194_v47  ;;  %3627 = vmatpush.bf16.msrb.mxu1 %v8773_v49  ;;  %v9609_v35 = vor.u32 %v12626_v24, %v9608_v23  ;;  %v12482_v43 = vld [vmem:[#allocation5 + $0x6dc] sm:$0xf0]  ;;  %v13586_v47 = vpop.f32.mrf.mxu1 }
 0x133   :  { %v8706_v52 = vld [vmem:[#allocation5 + $0x458] sm:$0xf0]  ;;  %v9544_v44 = vld [vmem:[#allocation5 + $0xaa0] sm:$0xf] }
 0x134   :  { %v12521_v53 = vld [vmem:[#allocation5 + $0x81c] sm:$0xf]  ;;  %3641 = vmatpush.bf16.msrb.mxu2 %v9285_v50  ;;  %v8709_v3 = vor.u32 %v12393_v51, %v8706_v52  ;;  %3614 = vmatpush.bf16.msrb.mxu0 %v8197_v63  ;;  %v12610_v45 = vld [vmem:[#allocation5 + $0xadc] sm:$0xf0]  ;;  %v8521_v51 = vor.u32 %v12354_v39, %v8520_v36  ;;  %v3392_v5 = vpop.f32.mrf.mxu0 }
 0x135   :  { %v9218_v56 = vld [vmem:[#allocation5 + $0x858] sm:$0xf0]  ;;  %v10056_v49 = vld [vmem:[#allocation5 + $0xea0] sm:$0xf]  ;;  %v3393_v15 = vadd.f32 %v3392_v5, %v14229_v59 }
 0x136   :  { %v12649_v57 = vld [vmem:[#allocation5 + $0xc1c] sm:$0xf]  ;;  %v9221_v4 = vor.u32 %v12521_v53, %v9218_v56  ;;  %3655 = vmatpush.bf16.msrb.mxu3 %v9797_v55  ;;  %3628 = vmatpush.bf16.msrb.mxu1 %v8709_v3  ;;  %v12738_v50 = vld [vmem:[#allocation5 + $0xedc] sm:$0xf0]  ;;  %v9033_v53 = vor.u32 %v12482_v43, %v9032_v41  ;;  %v9545_v55 = vor.u32 %v12610_v45, %v9544_v44  ;;  %v13595_v3 = vpop.f32.mrf.mxu3 }
 0x137   :  { %v9730_v58 = vld [vmem:[#allocation5 + $0xc58] sm:$0xf0]  ;;  %3615 = vmatmul.bf16.vlgmr.msrb.gmra.mxu0 %v13517_v16  ;;  %v8456_v52 = vld [vmem:[#allocation5 + $0x220] sm:$0xf]  ;;  %v10057_v60 = vor.u32 %v12738_v50, %v10056_v49 }
 0x138   :  { %v9733_v7 = vor.u32 %v12649_v57, %v9730_v58  ;;  %3642 = vmatpush.bf16.msrb.mxu2 %v9221_v4  ;;  %3663 = vmatpush.bf16.msra.mxu0 %v8649_v8  ;;  %v12338_v56 = vld [vmem:[#allocation5 + $0x25c] sm:$0xf0]  ;;  %v13592_v58 = vpop.f32.mrf.mxu2 }
 0x139   :  { %3629 = vmatmul.bf16.vlgmr.msrb.gmra.mxu1 %v13523_v33  ;;  %v8968_v57 = vld [vmem:[#allocation5 + $0x620] sm:$0xf]  ;;  %v8457_v4 = vor.u32 %v12338_v56, %v8456_v52 }
 0x13a   :  { %3656 = vmatpush.bf16.msrb.mxu3 %v9733_v7  ;;  %3677 = vmatpush.bf16.msra.mxu1 %v9161_v12  ;;  %v12466_v61 = vld [vmem:[#allocation5 + $0x65c] sm:$0xf0]  ;;  %v3406_v23 = vpop.f32.mrf.mxu1 }
 0x13b   :  { %3643 = vmatmul.bf16.vlgmr.msrb.gmra.mxu2 %v13515_v9  ;;  %v9480_v63 = vld [vmem:[#allocation5 + $0xa20] sm:$0xf]  ;;  %v8969_v6 = vor.u32 %v12466_v61, %v8968_v57  ;;  %v3407_v28 = vadd.f32 %v3406_v23, %v3393_v15 }
 0x13c   :  { %3691 = vmatpush.bf16.msra.mxu2 %v9673_v13  ;;  %3664 = vmatpush.bf16.msra.mxu0 %v8585_v29  ;;  %v12594_v0 = vld [vmem:[#allocation5 + $0xa5c] sm:$0xf0] }
 0x13d   :  { %3657 = vmatmul.bf16.vlgmr.msrb.gmra.mxu3 %v13520_v20  ;;  %v9481_v7 = vor.u32 %v12594_v0, %v9480_v63  ;;  %v8392_v8 = vld [vmem:[#allocation5 + $0x1a0] sm:$0xf] }
 0x13e   :  { %3705 = vmatpush.bf16.msra.mxu3 %v10185_v19  ;;  %3678 = vmatpush.bf16.msra.mxu1 %v9097_v34  ;;  %v12322_v12 = vld [vmem:[#allocation5 + $0x1dc] sm:$0xf0] }
 0x13f   :  { %v8904_v13 = vld [vmem:[#allocation5 + $0x5a0] sm:$0xf]  ;;  %v8393_v29 = vor.u32 %v12322_v12, %v8392_v8 }
 0x140   :  { %3692 = vmatpush.bf16.msra.mxu2 %v9609_v35  ;;  %3665 = vmatpush.bf16.msra.mxu0 %v8521_v51  ;;  %v12450_v18 = vld [vmem:[#allocation5 + $0x5dc] sm:$0xf0] }
 0x141   :  { %v9416_v19 = vld [vmem:[#allocation5 + $0x9a0] sm:$0xf]  ;;  %v8905_v34 = vor.u32 %v12450_v18, %v8904_v13 }
 0x142   :  { %3706 = vmatpush.bf16.msra.mxu3 %v10121_v42  ;;  %3679 = vmatpush.bf16.msra.mxu1 %v9033_v53  ;;  %v12578_v21 = vld [vmem:[#allocation5 + $0x9dc] sm:$0xf0]  ;;  %v3420_v42 = vpop.f32.mrf.mxu2  ;;  %v3434_v53 = vpop.f32.mrf.mxu3 }
 0x143   :  { %v9928_v24 = vld [vmem:[#allocation5 + $0xda0] sm:$0xf]  ;;  %v9417_v35 = vor.u32 %v12578_v21, %v9416_v19  ;;  %v3421_v50 = vadd.f32 %v3420_v42, %v3407_v28  ;;  %v9674_v42 = vld [vmem:[#allocation5 + $0xbe0] sm:$0xf0] }
 0x144   :  { %3693 = vmatpush.bf16.msra.mxu2 %v9545_v55  ;;  %v12706_v27 = vld [vmem:[#allocation5 + $0xddc] sm:$0xf0]  ;;  %3666 = vmatpush.bf16.msra.mxu0 %v8457_v4 }
 0x145   :  { %v8328_v36 = vld [vmem:[#allocation5 + $0x120] sm:$0xf]  ;;  %v9929_v43 = vor.u32 %v12706_v27, %v9928_v24  ;;  %v13599_v56 = vadd.f32 %v3434_v53, %v3421_v50 }
 0x146   :  { %3707 = vmatpush.bf16.msra.mxu3 %v10057_v60  ;;  %3680 = vmatpush.bf16.msra.mxu1 %v8969_v6  ;;  %v12306_v39 = vld [vmem:[#allocation5 + $0x15c] sm:$0xf0] }
 0x147   :  { %v8840_v41 = vld [vmem:[#allocation5 + $0x520] sm:$0xf]  ;;  %v8329_v55 = vor.u32 %v12306_v39, %v8328_v36  ;;  %v9162_v39 = vld [vmem:[#allocation5 + $0x7e0] sm:$0xf0] }
 0x148   :  { %3694 = vmatpush.bf16.msra.mxu2 %v9481_v7  ;;  %v12434_v44 = vld [vmem:[#allocation5 + $0x55c] sm:$0xf0]  ;;  %3667 = vmatpush.bf16.msra.mxu0 %v8393_v29  ;;  %v12378_v29 = vld [vmem:[#allocation5 + $0x3a4] sm:$0xf] }
 0x149   :  { %v9352_v45 = vld [vmem:[#allocation5 + $0x920] sm:$0xf]  ;;  %v8841_v57 = vor.u32 %v12434_v44, %v8840_v41  ;;  %v12634_v41 = vld [vmem:[#allocation5 + $0xba4] sm:$0xf] }
 0x14a   :  { %3708 = vmatpush.bf16.msra.mxu3 %v9993_v17  ;;  %v12562_v49 = vld [vmem:[#allocation5 + $0x95c] sm:$0xf0]  ;;  %3681 = vmatpush.bf16.msra.mxu1 %v8905_v34  ;;  %v8650_v34 = vld [vmem:[#allocation5 + $0x3e0] sm:$0xf0]  ;;  %v9677_v53 = vor.u32 %v12634_v41, %v9674_v42  ;;  %v13609_v41 = vpop.f32.mrf.mxu2 }
 0x14b   :  { %v9864_v51 = vld [vmem:[#allocation5 + $0xd20] sm:$0xf]  ;;  %v9353_v60 = vor.u32 %v12562_v49, %v9352_v45  ;;  %v12762_v45 = vld [vmem:[#allocation5 + $0xfa4] sm:$0xf] }
 0x14c   :  { %v12690_v52 = vld [vmem:[#allocation5 + $0xd5c] sm:$0xf0]  ;;  %3695 = vmatpush.bf16.msra.mxu2 %v9417_v35  ;;  %3668 = vmatpush.bf16.msra.mxu0 %v8329_v55  ;;  %v12506_v35 = vld [vmem:[#allocation5 + $0x7a4] sm:$0xf] }
 0x14d   :  { %v8264_v61 = vld [vmem:[#allocation5 + $0xa0] sm:$0xf]  ;;  %v9865_v1 = vor.u32 %v12690_v52, %v9864_v51  ;;  %v10186_v49 = vld [vmem:[#allocation5 + $0xfe0] sm:$0xf0]  ;;  %v8653_v51 = vor.u32 %v12378_v29, %v8650_v34  ;;  %v9165_v52 = vor.u32 %v12506_v35, %v9162_v39 }
 0x14e   :  { %v12290_v63 = vld [vmem:[#allocation5 + $0xdc] sm:$0xf0]  ;;  %3709 = vmatpush.bf16.msra.mxu3 %v9929_v43  ;;  %3682 = vmatpush.bf16.msra.mxu1 %v8841_v57  ;;  %v12362_v55 = vld [vmem:[#allocation5 + $0x324] sm:$0xf] }
 0x14f   :  { %v8776_v0 = vld [vmem:[#allocation5 + $0x4a0] sm:$0xf]  ;;  %v8265_v8 = vor.u32 %v12290_v63, %v8264_v61  ;;  %v8586_v57 = vld [vmem:[#allocation5 + $0x360] sm:$0xf0]  ;;  %v10189_v61 = vor.u32 %v12762_v45, %v10186_v49 }
 0x150   :  { %v12418_v2 = vld [vmem:[#allocation5 + $0x4dc] sm:$0xf0]  ;;  %3696 = vmatpush.bf16.msra.mxu2 %v9353_v60  ;;  %v12490_v60 = vld [vmem:[#allocation5 + $0x724] sm:$0xf] }
 0x151   :  { %v9288_v4 = vld [vmem:[#allocation5 + $0x8a0] sm:$0xf]  ;;  %v8777_v15 = vor.u32 %v12418_v2, %v8776_v0  ;;  %3669 = vmatpush.bf16.msra.mxu0 %v8265_v8  ;;  %v9098_v63 = vld [vmem:[#allocation5 + $0x760] sm:$0xf0] }
 0x152   :  { %v12546_v5 = vld [vmem:[#allocation5 + $0x8dc] sm:$0xf0]  ;;  %3710 = vmatpush.bf16.msra.mxu3 %v9865_v1  ;;  %v12618_v0 = vld [vmem:[#allocation5 + $0xb24] sm:$0xf] }
 0x153   :  { %v9800_v6 = vld [vmem:[#allocation5 + $0xca0] sm:$0xf]  ;;  %v9289_v17 = vor.u32 %v12546_v5, %v9288_v4  ;;  %3683 = vmatpush.bf16.msra.mxu1 %v8777_v15  ;;  %v9610_v1 = vld [vmem:[#allocation5 + $0xb60] sm:$0xf0]  ;;  %v8589_v5 = vor.u32 %v12362_v55, %v8586_v57 }
 0x154   :  { %v12674_v7 = vld [vmem:[#allocation5 + $0xcdc] sm:$0xf0]  ;;  %v12746_v2 = vld [vmem:[#allocation5 + $0xf24] sm:$0xf]  ;;  %v9613_v8 = vor.u32 %v12618_v0, %v9610_v1 }
 0x155   :  { %v8200_v12 = vld [vmem:[#allocation5 + $0x20] sm:$0xf]  ;;  %v9801_v23 = vor.u32 %v12674_v7, %v9800_v6  ;;  %3697 = vmatpush.bf16.msra.mxu2 %v9289_v17  ;;  %v10122_v4 = vld [vmem:[#allocation5 + $0xf60] sm:$0xf0]  ;;  %v13601_v6 = vpop.f32.mrf.mxu0  ;;  %v9101_v7 = vor.u32 %v12490_v60, %v9098_v63 }
 0x156   :  { %v12274_v13 = vld [vmem:[#allocation5 + $0x5c] sm:$0xf0]  ;;  %v12474_v15 = vld [vmem:[#allocation5 + $0x6a4] sm:$0xf]  ;;  %v10125_v17 = vor.u32 %v12746_v2, %v10122_v4 }
 0x157   :  { %v8712_v18 = vld [vmem:[#allocation5 + $0x420] sm:$0xf]  ;;  %v8201_v36 = vor.u32 %v12274_v13, %v8200_v12  ;;  %3711 = vmatpush.bf16.msra.mxu3 %v9801_v23  ;;  %v12346_v12 = vld [vmem:[#allocation5 + $0x2a4] sm:$0xf]  ;;  %v13603_v23 = vpop.f32.mrf.mxu1 }
 0x158   :  { %v12402_v19 = vld [vmem:[#allocation5 + $0x45c] sm:$0xf0]  ;;  %v8522_v13 = vld [vmem:[#allocation5 + $0x2e0] sm:$0xf0] }
 0x159   :  { %v9224_v21 = vld [vmem:[#allocation5 + $0x820] sm:$0xf]  ;;  %v8713_v43 = vor.u32 %v12402_v19, %v8712_v18  ;;  %3670 = vmatpush.bf16.msra.mxu0 %v8201_v36  ;;  %v9034_v18 = vld [vmem:[#allocation5 + $0x6e0] sm:$0xf0] }
 0x15a   :  { %v12530_v24 = vld [vmem:[#allocation5 + $0x85c] sm:$0xf0]  ;;  %v12602_v19 = vld [vmem:[#allocation5 + $0xaa4] sm:$0xf]  ;;  %v9037_v34 = vor.u32 %v12474_v15, %v9034_v18 }
 0x15b   :  { %v9736_v27 = vld [vmem:[#allocation5 + $0xc20] sm:$0xf]  ;;  %v9225_v44 = vor.u32 %v12530_v24, %v9224_v21  ;;  %3684 = vmatpush.bf16.msra.mxu1 %v8713_v43  ;;  %v9546_v21 = vld [vmem:[#allocation5 + $0xae0] sm:$0xf0] }
 0x15c   :  { %v12658_v28 = vld [vmem:[#allocation5 + $0xc5c] sm:$0xf0]  ;;  %v12730_v24 = vld [vmem:[#allocation5 + $0xea4] sm:$0xf]  ;;  %3671 = vmatmul.bf16.vlgmr.msra.gmra.mxu0 %v13517_v16  ;;  %v9549_v35 = vor.u32 %v12602_v19, %v9546_v21 }
 0x15d   :  { %v9737_v50 = vor.u32 %v12658_v28, %v9736_v27  ;;  %3698 = vmatpush.bf16.msra.mxu2 %v9225_v44  ;;  %3719 = vmatpush.bf16.msrb.mxu0 %v8653_v51  ;;  %v10058_v27 = vld [vmem:[#allocation5 + $0xee0] sm:$0xf0]  ;;  %v8525_v28 = vor.u32 %v12346_v12, %v8522_v13  ;;  %v3448_v57 = vpop.f32.mrf.mxu0 }
 0x15e   :  { %v12330_v29 = vld [vmem:[#allocation5 + $0x224] sm:$0xf]  ;;  %3685 = vmatmul.bf16.vlgmr.msra.gmra.mxu1 %v13523_v33  ;;  %v10061_v44 = vor.u32 %v12730_v24, %v10058_v27 }
 0x15f   :  { %3712 = vmatpush.bf16.msra.mxu3 %v9737_v50  ;;  %3733 = vmatpush.bf16.msrb.mxu1 %v9165_v52  ;;  %v8458_v36 = vld [vmem:[#allocation5 + $0x260] sm:$0xf0]  ;;  %v3462_v12 = vpop.f32.mrf.mxu1 }
 0x160   :  { %3699 = vmatmul.bf16.vlgmr.msra.gmra.mxu2 %v13515_v9  ;;  %v12458_v39 = vld [vmem:[#allocation5 + $0x624] sm:$0xf]  ;;  %v8461_v55 = vor.u32 %v12330_v29, %v8458_v36  ;;  %v3476_v29 = vpop.f32.mrf.mxu2 }
 0x161   :  { %3747 = vmatpush.bf16.msrb.mxu2 %v9677_v53  ;;  %3720 = vmatpush.bf16.msrb.mxu0 %v8589_v5  ;;  %v13611_v42 = vld [vmem:[#allocation7] sm:$0xff]  ;;  %v13614_v53 = vpop.f32.mrf.mxu3 }
 0x162   :  { %3713 = vmatmul.bf16.vlgmr.msra.gmra.mxu3 %v13520_v20  ;;  %v14228_v43 = vperm.slane %v13611_v42, 4  ;;  %v8970_v45 = vld [vmem:[#allocation5 + $0x660] sm:$0xf0] }
 0x163   :  { %3761 = vmatpush.bf16.msrb.mxu3 %v10189_v61  ;;  %3734 = vmatpush.bf16.msrb.mxu1 %v9101_v7  ;;  %v12586_v49 = vld [vmem:[#allocation5 + $0xa24] sm:$0xf]  ;;  %v8973_v60 = vor.u32 %v12458_v39, %v8970_v45 }
 0x164   :  { %v9482_v50 = vld [vmem:[#allocation5 + $0xa60] sm:$0xf0]  ;;  %v3449_v2 = vadd.f32 %v3448_v57, %v14228_v43  ;;  %v12691_v43 = vld [vmem:[#allocation5 + $0xd64] sm:$0xf0] }
 0x165   :  { %3748 = vmatpush.bf16.msrb.mxu2 %v9613_v8  ;;  %v12714_v51 = vld [vmem:[#allocation5 + $0xe24] sm:$0xf]  ;;  %3721 = vmatpush.bf16.msrb.mxu0 %v8525_v28  ;;  %v9485_v61 = vor.u32 %v12586_v49, %v9482_v50 }
 0x166   :  { %v9994_v52 = vld [vmem:[#allocation5 + $0xe60] sm:$0xf0] }
 0x167   :  { %3762 = vmatpush.bf16.msrb.mxu3 %v10125_v17  ;;  %3735 = vmatpush.bf16.msrb.mxu1 %v9037_v34  ;;  %v12314_v63 = vld [vmem:[#allocation5 + $0x1a4] sm:$0xf]  ;;  %v9997_v4 = vor.u32 %v12714_v51, %v9994_v52  ;;  %v3463_v17 = vadd.f32 %v3462_v12, %v3449_v2 }
 0x168   :  { %v8394_v0 = vld [vmem:[#allocation5 + $0x1e0] sm:$0xf0] }
 0x169   :  { %3749 = vmatpush.bf16.msrb.mxu2 %v9549_v35  ;;  %v12442_v1 = vld [vmem:[#allocation5 + $0x5a4] sm:$0xf]  ;;  %3722 = vmatpush.bf16.msrb.mxu0 %v8461_v55  ;;  %v8397_v18 = vor.u32 %v12314_v63, %v8394_v0  ;;  %v3490_v50 = vpop.f32.mrf.mxu3 }
 0x16a   :  { %v8906_v5 = vld [vmem:[#allocation5 + $0x5e0] sm:$0xf0] }
 0x16b   :  { %3763 = vmatpush.bf16.msrb.mxu3 %v10061_v44  ;;  %v12570_v7 = vld [vmem:[#allocation5 + $0x9a4] sm:$0xf]  ;;  %3736 = vmatpush.bf16.msrb.mxu1 %v8973_v60  ;;  %v8909_v19 = vor.u32 %v12442_v1, %v8906_v5  ;;  %v3477_v44 = vadd.f32 %v3476_v29, %v3463_v17 }
 0x16c   :  { %v9418_v8 = vld [vmem:[#allocation5 + $0x9e0] sm:$0xf0] }
 0x16d   :  { %v12698_v13 = vld [vmem:[#allocation5 + $0xda4] sm:$0xf]  ;;  %3750 = vmatpush.bf16.msrb.mxu2 %v9485_v61  ;;  %v9421_v21 = vor.u32 %v12570_v7, %v9418_v8  ;;  %3723 = vmatpush.bf16.msrb.mxu0 %v8397_v18  ;;  %v13618_v52 = vadd.f32 %v3490_v50, %v3477_v44  ;;  %v12515_v44 = vld [vmem:[#allocation5 + $0x7e4] sm:$0xf0] }
 0x16e   :  { %v9930_v15 = vld [vmem:[#allocation5 + $0xde0] sm:$0xf0] }
 0x16f   :  { %v12298_v24 = vld [vmem:[#allocation5 + $0x124] sm:$0xf]  ;;  %3764 = vmatpush.bf16.msrb.mxu3 %v9997_v4  ;;  %v9933_v34 = vor.u32 %v12698_v13, %v9930_v15  ;;  %14246 = vst [vmem:[#allocation16_spill] sm:$0xff] %v13618_v52  ;;  %3737 = vmatpush.bf16.msrb.mxu1 %v8909_v19 }
 0x170   :  { %v8330_v27 = vld [vmem:[#allocation5 + $0x160] sm:$0xf0] }
 0x171   :  { %v12426_v28 = vld [vmem:[#allocation5 + $0x524] sm:$0xf]  ;;  %v8333_v51 = vor.u32 %v12298_v24, %v8330_v27  ;;  %3751 = vmatpush.bf16.msrb.mxu2 %v9421_v21 }
 0x172   :  { %v8842_v35 = vld [vmem:[#allocation5 + $0x560] sm:$0xf0] }
 0x173   :  { %v12554_v36 = vld [vmem:[#allocation5 + $0x924] sm:$0xf]  ;;  %v8845_v55 = vor.u32 %v12426_v28, %v8842_v35  ;;  %3765 = vmatpush.bf16.msrb.mxu3 %v9933_v34  ;;  %3724 = vmatpush.bf16.msrb.mxu0 %v8333_v51  ;;  %v8656_v34 = vld [vmem:[#allocation5 + $0x3a8] sm:$0xf] }
 0x174   :  { %v9354_v39 = vld [vmem:[#allocation5 + $0x960] sm:$0xf0]  ;;  %v12387_v35 = vld [vmem:[#allocation5 + $0x3e4] sm:$0xf0] }
 0x175   :  { %v12682_v45 = vld [vmem:[#allocation5 + $0xd24] sm:$0xf]  ;;  %v9357_v57 = vor.u32 %v12554_v36, %v9354_v39  ;;  %3738 = vmatpush.bf16.msrb.mxu1 %v8845_v55  ;;  %v9168_v36 = vld [vmem:[#allocation5 + $0x7a8] sm:$0xf] }
 0x176   :  { %v9866_v49 = vld [vmem:[#allocation5 + $0xd60] sm:$0xf0]  ;;  %v10192_v55 = vld [vmem:[#allocation5 + $0xfa8] sm:$0xf] }
 0x177   :  { %v12282_v60 = vld [vmem:[#allocation5 + $0xa4] sm:$0xf]  ;;  %v9869_v0 = vor.u32 %v12682_v45, %v9866_v49  ;;  %3752 = vmatpush.bf16.msrb.mxu2 %v9357_v57  ;;  %v9680_v45 = vld [vmem:[#allocation5 + $0xba8] sm:$0xf] }
 0x178   :  { %v8266_v61 = vld [vmem:[#allocation5 + $0xe0] sm:$0xf0]  ;;  %v12643_v49 = vld [vmem:[#allocation5 + $0xbe4] sm:$0xf0] }
 0x179   :  { %v12410_v63 = vld [vmem:[#allocation5 + $0x4a4] sm:$0xf]  ;;  %v8269_v8 = vor.u32 %v12282_v60, %v8266_v61  ;;  %3766 = vmatpush.bf16.msrb.mxu3 %v9869_v0  ;;  %v12771_v57 = vld [vmem:[#allocation5 + $0xfe4] sm:$0xf0]  ;;  %v8657_v61 = vor.u32 %v12387_v35, %v8656_v34  ;;  %v9681_v0 = vor.u32 %v12643_v49, %v9680_v45 }
 0x17a   :  { %v8778_v1 = vld [vmem:[#allocation5 + $0x4e0] sm:$0xf0]  ;;  %v12483_v34 = vld [vmem:[#allocation5 + $0x6e4] sm:$0xf0] }
 0x17b   :  { %v12538_v2 = vld [vmem:[#allocation5 + $0x8a4] sm:$0xf]  ;;  %v8781_v15 = vor.u32 %v12410_v63, %v8778_v1  ;;  %3725 = vmatpush.bf16.msrb.mxu0 %v8269_v8  ;;  %v9169_v63 = vor.u32 %v12515_v44, %v9168_v36  ;;  %v8592_v1 = vld [vmem:[#allocation5 + $0x328] sm:$0xf] }
 0x17c   :  { %v9290_v4 = vld [vmem:[#allocation5 + $0x8e0] sm:$0xf0]  ;;  %v9616_v8 = vld [vmem:[#allocation5 + $0xb28] sm:$0xf] }
 0x17d   :  { %v12666_v5 = vld [vmem:[#allocation5 + $0xca4] sm:$0xf]  ;;  %v9293_v17 = vor.u32 %v12538_v2, %v9290_v4  ;;  %3739 = vmatpush.bf16.msrb.mxu1 %v8781_v15  ;;  %v12371_v2 = vld [vmem:[#allocation5 + $0x364] sm:$0xf0] }
 0x17e   :  { %v9802_v7 = vld [vmem:[#allocation5 + $0xce0] sm:$0xf0]  ;;  %v9104_v4 = vld [vmem:[#allocation5 + $0x728] sm:$0xf] }
 0x17f   :  { %v12266_v12 = vld [vmem:[#allocation5 + $0x24] sm:$0xf]  ;;  %v9805_v24 = vor.u32 %v12666_v5, %v9802_v7  ;;  %3753 = vmatpush.bf16.msrb.mxu2 %v9293_v17  ;;  %v10193_v5 = vor.u32 %v12771_v57, %v10192_v55  ;;  %v12499_v7 = vld [vmem:[#allocation5 + $0x764] sm:$0xf0]  ;;  %v8593_v17 = vor.u32 %v12371_v2, %v8592_v1 }
 0x180   :  { %v8202_v13 = vld [vmem:[#allocation5 + $0x60] sm:$0xf0]  ;;  %v12755_v15 = vld [vmem:[#allocation5 + $0xf64] sm:$0xf0] }
 0x181   :  { %v12394_v18 = vld [vmem:[#allocation5 + $0x424] sm:$0xf]  ;;  %v8205_v39 = vor.u32 %v12266_v12, %v8202_v13  ;;  %3767 = vmatpush.bf16.msrb.mxu3 %v9805_v24  ;;  %v12627_v12 = vld [vmem:[#allocation5 + $0xb64] sm:$0xf0] }
 0x182   :  { %v8714_v19 = vld [vmem:[#allocation5 + $0x460] sm:$0xf0]  ;;  %v10128_v13 = vld [vmem:[#allocation5 + $0xf28] sm:$0xf] }
 0x183   :  { %v12522_v21 = vld [vmem:[#allocation5 + $0x824] sm:$0xf]  ;;  %v8717_v50 = vor.u32 %v12394_v18, %v8714_v19  ;;  %3726 = vmatpush.bf16.msrb.mxu0 %v8205_v39  ;;  %v13620_v18 = vpop.f32.mrf.mxu0  ;;  %v9105_v19 = vor.u32 %v12499_v7, %v9104_v4  ;;  %v8528_v24 = vld [vmem:[#allocation5 + $0x2a8] sm:$0xf]  ;;  %v13622_v39 = vpop.f32.mrf.mxu1 }
 0x184   :  { %v9226_v27 = vld [vmem:[#allocation5 + $0x860] sm:$0xf0]  ;;  %v9552_v35 = vld [vmem:[#allocation5 + $0xaa8] sm:$0xf] }
 0x185   :  { %v12650_v28 = vld [vmem:[#allocation5 + $0xc24] sm:$0xf]  ;;  %v9229_v51 = vor.u32 %v12522_v21, %v9226_v27  ;;  %3740 = vmatpush.bf16.msrb.mxu1 %v8717_v50  ;;  %v9617_v21 = vor.u32 %v12627_v12, %v9616_v8  ;;  %v12355_v27 = vld [vmem:[#allocation5 + $0x2e4] sm:$0xf0]  ;;  %v13631_v8 = vpop.f32.mrf.mxu3 }
 0x186   :  { %v9738_v29 = vld [vmem:[#allocation5 + $0xc60] sm:$0xf0]  ;;  %v12611_v36 = vld [vmem:[#allocation5 + $0xae4] sm:$0xf0]  ;;  %3727 = vmatmul.bf16.vlgmr.msrb.gmra.mxu0 %v13517_v16  ;;  %v8529_v49 = vor.u32 %v12355_v27, %v8528_v24  ;;  %14248 = vst [vmem:[#allocation18_spill] sm:$0xff] %v13631_v8 }
 0x187   :  { %v9741_v60 = vor.u32 %v12650_v28, %v9738_v29  ;;  %3754 = vmatpush.bf16.msrb.mxu2 %v9229_v51  ;;  %3775 = vmatpush.bf16.msra.mxu0 %v8657_v61  ;;  %v9040_v28 = vld [vmem:[#allocation5 + $0x6a8] sm:$0xf]  ;;  %v10129_v29 = vor.u32 %v12755_v15, %v10128_v13  ;;  %v9553_v55 = vor.u32 %v12611_v36, %v9552_v35  ;;  %v13628_v61 = vpop.f32.mrf.mxu2 }
 0x188   :  { %v10064_v44 = vld [vmem:[#allocation5 + $0xea8] sm:$0xf]  ;;  %3741 = vmatmul.bf16.vlgmr.msrb.gmra.mxu1 %v13523_v33  ;;  %v9041_v51 = vor.u32 %v12483_v34, %v9040_v28  ;;  %14247 = vst [vmem:[#allocation17_spill] sm:$0xff] %v13628_v61  ;;  %v12629_v61 = vld [vmem:[#allocation5 + $0xb74] sm:$0xf0] }
 0x189   :  { %3768 = vmatpush.bf16.msrb.mxu3 %v9741_v60  ;;  %3789 = vmatpush.bf16.msra.mxu1 %v9169_v63  ;;  %v12739_v45 = vld [vmem:[#allocation5 + $0xee4] sm:$0xf0]  ;;  %v14227_v63 = vperm.slane %v13611_v42, 5 }
 0x18a   :  { %3755 = vmatmul.bf16.vlgmr.msrb.gmra.mxu2 %v13515_v9  ;;  %v8464_v50 = vld [vmem:[#allocation5 + $0x228] sm:$0xf] }
 0x18b   :  { %3803 = vmatpush.bf16.msra.mxu2 %v9681_v0  ;;  %3776 = vmatpush.bf16.msra.mxu0 %v8593_v17  ;;  %v12339_v57 = vld [vmem:[#allocation5 + $0x264] sm:$0xf0]  ;;  %v10065_v0 = vor.u32 %v12739_v45, %v10064_v44  ;;  %v3504_v13 = vpop.f32.mrf.mxu0  ;;  %v3518_v36 = vpop.f32.mrf.mxu1 }
 0x18c   :  { %3769 = vmatmul.bf16.vlgmr.msrb.gmra.mxu3 %v13520_v20  ;;  %v8976_v60 = vld [vmem:[#allocation5 + $0x628] sm:$0xf]  ;;  %v8465_v12 = vor.u32 %v12339_v57, %v8464_v50  ;;  %v3505_v27 = vadd.f32 %v3504_v13, %v14227_v63 }
 0x18d   :  { %3817 = vmatpush.bf16.msra.mxu3 %v10193_v5  ;;  %3790 = vmatpush.bf16.msra.mxu1 %v9105_v19  ;;  %v12467_v1 = vld [vmem:[#allocation5 + $0x664] sm:$0xf0]  ;;  %v3546_v59 = vpop.f32.mrf.mxu3 }
 0x18e   :  { %v9488_v2 = vld [vmem:[#allocation5 + $0xa28] sm:$0xf]  ;;  %v8977_v15 = vor.u32 %v12467_v1, %v8976_v60 }
 0x18f   :  { %3804 = vmatpush.bf16.msra.mxu2 %v9617_v21  ;;  %v12595_v4 = vld [vmem:[#allocation5 + $0xa64] sm:$0xf0]  ;;  %3777 = vmatpush.bf16.msra.mxu0 %v8529_v49  ;;  %v3519_v49 = vadd.f32 %v3518_v36, %v3505_v27 }
 0x190   :  { %v10000_v5 = vld [vmem:[#allocation5 + $0xe28] sm:$0xf]  ;;  %v9489_v17 = vor.u32 %v12595_v4, %v9488_v2  ;;  %v3532_v2 = vpop.f32.mrf.mxu2 }
 0x191   :  { %3818 = vmatpush.bf16.msra.mxu3 %v10129_v29  ;;  %v12723_v7 = vld [vmem:[#allocation5 + $0xe64] sm:$0xf0]  ;;  %3791 = vmatpush.bf16.msra.mxu1 %v9041_v51  ;;  %v3533_v13 = vadd.f32 %v3532_v2, %v3519_v49 }
 0x192   :  { %v8400_v19 = vld [vmem:[#allocation5 + $0x1a8] sm:$0xf]  ;;  %v10001_v28 = vor.u32 %v12723_v7, %v10000_v5 }
 0x193   :  { %3805 = vmatpush.bf16.msra.mxu2 %v9553_v55  ;;  %v12323_v21 = vld [vmem:[#allocation5 + $0x1e4] sm:$0xf0]  ;;  %3778 = vmatpush.bf16.msra.mxu0 %v8465_v12 }
 0x194   :  { %v8912_v24 = vld [vmem:[#allocation5 + $0x5a8] sm:$0xf]  ;;  %v8401_v50 = vor.u32 %v12323_v21, %v8400_v19  ;;  %v13635_v19 = vadd.f32 %v3546_v59, %v3533_v13  ;;  %v9170_v13 = vld [vmem:[#allocation5 + $0x7e8] sm:$0xf0] }
 0x195   :  { %3819 = vmatpush.bf16.msra.mxu3 %v10065_v0  ;;  %v12451_v29 = vld [vmem:[#allocation5 + $0x5e4] sm:$0xf0]  ;;  %3792 = vmatpush.bf16.msra.mxu1 %v8977_v15 }
 0x196   :  { %v9424_v34 = vld [vmem:[#allocation5 + $0x9a8] sm:$0xf]  ;;  %v8913_v51 = vor.u32 %v12451_v29, %v8912_v24  ;;  %14249 = vst [vmem:[#allocation19_spill] sm:$0xff] %v13635_v19  ;;  %v9874_v19 = vld [vmem:[#allocation5 + $0xd68] sm:$0xf0] }
 0x197   :  { %v12579_v35 = vld [vmem:[#allocation5 + $0x9e4] sm:$0xf0]  ;;  %3806 = vmatpush.bf16.msra.mxu2 %v9489_v17  ;;  %3779 = vmatpush.bf16.msra.mxu0 %v8401_v50 }
 0x198   :  { %v9936_v44 = vld [vmem:[#allocation5 + $0xda8] sm:$0xf]  ;;  %v9425_v55 = vor.u32 %v12579_v35, %v9424_v34 }
 0x199   :  { %v12707_v45 = vld [vmem:[#allocation5 + $0xde4] sm:$0xf0]  ;;  %3820 = vmatpush.bf16.msra.mxu3 %v10001_v28  ;;  %3793 = vmatpush.bf16.msra.mxu1 %v8913_v51 }
 0x19a   :  { %v8336_v57 = vld [vmem:[#allocation5 + $0x128] sm:$0xf]  ;;  %v9937_v0 = vor.u32 %v12707_v45, %v9936_v44 }
 0x19b   :  { %v12307_v60 = vld [vmem:[#allocation5 + $0x164] sm:$0xf0]  ;;  %3807 = vmatpush.bf16.msra.mxu2 %v9425_v55 }
 0x19c   :  { %v8848_v1 = vld [vmem:[#allocation5 + $0x528] sm:$0xf]  ;;  %v8337_v12 = vor.u32 %v12307_v60, %v8336_v57 }
 0x19d   :  { %v12435_v4 = vld [vmem:[#allocation5 + $0x564] sm:$0xf0]  ;;  %3821 = vmatpush.bf16.msra.mxu3 %v9937_v0  ;;  %v12379_v0 = vld [vmem:[#allocation5 + $0x3ac] sm:$0xf] }
 0x19e   :  { %v9360_v5 = vld [vmem:[#allocation5 + $0x928] sm:$0xf]  ;;  %v8849_v15 = vor.u32 %v12435_v4, %v8848_v1  ;;  %3780 = vmatpush.bf16.msra.mxu0 %v8337_v12  ;;  %v8658_v4 = vld [vmem:[#allocation5 + $0x3e8] sm:$0xf0] }
 0x19f   :  { %v12563_v7 = vld [vmem:[#allocation5 + $0x964] sm:$0xf0]  ;;  %v12635_v12 = vld [vmem:[#allocation5 + $0xbac] sm:$0xf] }
 0x1a0   :  { %v9872_v63 = vld [vmem:[#allocation5 + $0xd28] sm:$0xf]  ;;  %v9361_v17 = vor.u32 %v12563_v7, %v9360_v5  ;;  %3794 = vmatpush.bf16.msra.mxu1 %v8849_v15  ;;  %v12507_v5 = vld [vmem:[#allocation5 + $0x7ac] sm:$0xf] }
 0x1a1   :  { %v8272_v21 = vld [vmem:[#allocation5 + $0xa8] sm:$0xf]  ;;  %v9873_v28 = vor.u32 %v12691_v43, %v9872_v63 }
 0x1a2   :  { %v12291_v24 = vld [vmem:[#allocation5 + $0xe4] sm:$0xf0]  ;;  %3808 = vmatpush.bf16.msra.mxu2 %v9361_v17 }
 0x1a3   :  { %v8784_v27 = vld [vmem:[#allocation5 + $0x4a8] sm:$0xf]  ;;  %v8273_v45 = vor.u32 %v12291_v24, %v8272_v21  ;;  %3822 = vmatpush.bf16.msra.mxu3 %v9873_v28  ;;  %v9682_v21 = vld [vmem:[#allocation5 + $0xbe8] sm:$0xf0] }
 0x1a4   :  { %v12419_v29 = vld [vmem:[#allocation5 + $0x4e4] sm:$0xf0]  ;;  %v12763_v24 = vld [vmem:[#allocation5 + $0xfac] sm:$0xf] }
 0x1a5   :  { %v9296_v34 = vld [vmem:[#allocation5 + $0x8a8] sm:$0xf]  ;;  %v8785_v59 = vor.u32 %v12419_v29, %v8784_v27  ;;  %3781 = vmatpush.bf16.msra.mxu0 %v8273_v45  ;;  %v10194_v27 = vld [vmem:[#allocation5 + $0xfe8] sm:$0xf0]  ;;  %v8661_v29 = vor.u32 %v12379_v0, %v8658_v4 }
 0x1a6   :  { %v12547_v35 = vld [vmem:[#allocation5 + $0x8e4] sm:$0xf0]  ;;  %v10197_v45 = vor.u32 %v12763_v24, %v10194_v27  ;;  %v9042_v4 = vld [vmem:[#allocation5 + $0x6e8] sm:$0xf0] }
 0x1a7   :  { %v9808_v36 = vld [vmem:[#allocation5 + $0xca8] sm:$0xf]  ;;  %v9297_v51 = vor.u32 %v12547_v35, %v9296_v34  ;;  %3795 = vmatpush.bf16.msra.mxu1 %v8785_v59  ;;  %v9173_v34 = vor.u32 %v12507_v5, %v9170_v13  ;;  %v9685_v35 = vor.u32 %v12635_v12, %v9682_v21  ;;  %v12747_v59 = vld [vmem:[#allocation5 + $0xf2c] sm:$0xf]  ;;  %v13639_v13 = vpop.f32.mrf.mxu1 }
 0x1a8   :  { %v12675_v44 = vld [vmem:[#allocation5 + $0xce4] sm:$0xf0]  ;;  %v12603_v5 = vld [vmem:[#allocation5 + $0xaac] sm:$0xf] }
 0x1a9   :  { %v8208_v49 = vld [vmem:[#allocation5 + $0x28] sm:$0xf]  ;;  %v9809_v1 = vor.u32 %v12675_v44, %v9808_v36  ;;  %3809 = vmatpush.bf16.msra.mxu2 %v9297_v51  ;;  %v12363_v36 = vld [vmem:[#allocation5 + $0x32c] sm:$0xf] }
 0x1aa   :  { %v12275_v50 = vld [vmem:[#allocation5 + $0x64] sm:$0xf0]  ;;  %v8594_v44 = vld [vmem:[#allocation5 + $0x368] sm:$0xf0] }
 0x1ab   :  { %v8720_v55 = vld [vmem:[#allocation5 + $0x428] sm:$0xf]  ;;  %v8209_v7 = vor.u32 %v12275_v50, %v8208_v49  ;;  %3823 = vmatpush.bf16.msra.mxu3 %v9809_v1  ;;  %v9106_v49 = vld [vmem:[#allocation5 + $0x768] sm:$0xf0] }
 0x1ac   :  { %v12403_v57 = vld [vmem:[#allocation5 + $0x464] sm:$0xf0]  ;;  %v12619_v50 = vld [vmem:[#allocation5 + $0xb2c] sm:$0xf] }
 0x1ad   :  { %v9232_v60 = vld [vmem:[#allocation5 + $0x828] sm:$0xf]  ;;  %v8721_v15 = vor.u32 %v12403_v57, %v8720_v55  ;;  %3782 = vmatpush.bf16.msra.mxu0 %v8209_v7  ;;  %v10130_v51 = vld [vmem:[#allocation5 + $0xf68] sm:$0xf0]  ;;  %v8597_v55 = vor.u32 %v12363_v36, %v8594_v44  ;;  %v13637_v57 = vpop.f32.mrf.mxu0  ;;  %v9621_v1 = vor.u32 %v12619_v50, %v9618_v32  ;;  %v13648_v50 = vpop.f32.mrf.mxu3 }
 0x1ae   :  { %v12531_v2 = vld [vmem:[#allocation5 + $0x864] sm:$0xf0]  ;;  %v10133_v0 = vor.u32 %v12747_v59, %v10130_v51  ;;  %v9554_v7 = vld [vmem:[#allocation5 + $0xae8] sm:$0xf0]  ;;  %14251 = vst [vmem:[#allocation21_spill] sm:$0xff] %v13648_v50 }
 0x1af   :  { %v9744_v43 = vld [vmem:[#allocation5 + $0xc28] sm:$0xf]  ;;  %v9233_v17 = vor.u32 %v12531_v2, %v9232_v60  ;;  %3796 = vmatpush.bf16.msra.mxu1 %v8721_v15  ;;  %v9109_v60 = vor.u32 %v12491_v38, %v9106_v49  ;;  %v12347_v2 = vld [vmem:[#allocation5 + $0x2ac] sm:$0xf]  ;;  %v12628_v50 = vld [vmem:[#allocation5 + $0xb6c] sm:$0xf0] }
 0x1b0   :  { %v12659_v63 = vld [vmem:[#allocation5 + $0xc64] sm:$0xf0]  ;;  %v12731_v12 = vld [vmem:[#allocation5 + $0xeac] sm:$0xf]  ;;  %3783 = vmatmul.bf16.vlgmr.msra.gmra.mxu0 %v13517_v16 }
 0x1b1   :  { %v9745_v28 = vor.u32 %v12659_v63, %v9744_v43  ;;  %3810 = vmatpush.bf16.msra.mxu2 %v9233_v17  ;;  %3831 = vmatpush.bf16.msrb.mxu0 %v8661_v29  ;;  %v8530_v43 = vld [vmem:[#allocation5 + $0x2e8] sm:$0xf0]  ;;  %v9557_v17 = vor.u32 %v12603_v5, %v9554_v7  ;;  %v14232_v29 = vperm.slane %v13611_v42, 6 }
 0x1b2   :  { %v12475_v63 = vld [vmem:[#allocation5 + $0x6ac] sm:$0xf]  ;;  %v8533_v32 = vor.u32 %v12347_v2, %v8530_v43  ;;  %3797 = vmatmul.bf16.vlgmr.msra.gmra.mxu1 %v13523_v33 }
 0x1b3   :  { %3824 = vmatpush.bf16.msra.mxu3 %v9745_v28  ;;  %3845 = vmatpush.bf16.msrb.mxu1 %v9173_v34  ;;  %v10066_v21 = vld [vmem:[#allocation5 + $0xee8] sm:$0xf0]  ;;  %v9045_v15 = vor.u32 %v12475_v63, %v9042_v4  ;;  %v13645_v28 = vpop.f32.mrf.mxu2 }
 0x1b4   :  { %3811 = vmatmul.bf16.vlgmr.msra.gmra.mxu2 %v13515_v9  ;;  %v12331_v38 = vld [vmem:[#allocation5 + $0x22c] sm:$0xf]  ;;  %14250 = vst [vmem:[#allocation20_spill] sm:$0xff] %v13645_v28  ;;  %v10069_v34 = vor.u32 %v12731_v12, %v10066_v21  ;;  %v3574_v12 = vpop.f32.mrf.mxu1 }
 0x1b5   :  { %3859 = vmatpush.bf16.msrb.mxu2 %v9685_v35  ;;  %3832 = vmatpush.bf16.msrb.mxu0 %v8597_v55  ;;  %v8466_v24 = vld [vmem:[#allocation5 + $0x268] sm:$0xf0]  ;;  %v3560_v51 = vpop.f32.mrf.mxu0  ;;  %v3602_v52 = vpop.f32.mrf.mxu3 }
 0x1b6   :  { %3825 = vmatmul.bf16.vlgmr.msra.gmra.mxu3 %v13520_v20  ;;  %v12459_v27 = vld [vmem:[#allocation5 + $0x62c] sm:$0xf]  ;;  %v8469_v59 = vor.u32 %v12331_v38, %v8466_v24  ;;  %v3561_v63 = vadd.f32 %v3560_v51, %v14232_v29 }
 0x1b7   :  { %3873 = vmatpush.bf16.msrb.mxu3 %v10197_v45  ;;  %3846 = vmatpush.bf16.msrb.mxu1 %v9109_v60  ;;  %v8978_v35 = vld [vmem:[#allocation5 + $0x668] sm:$0xf0] }
 0x1b8   :  { %v12587_v36 = vld [vmem:[#allocation5 + $0xa2c] sm:$0xf]  ;;  %v8981_v55 = vor.u32 %v12459_v27, %v8978_v35  ;;  %v3575_v38 = vadd.f32 %v3574_v12, %v3561_v63 }
 0x1b9   :  { %3860 = vmatpush.bf16.msrb.mxu2 %v9621_v1  ;;  %v9490_v44 = vld [vmem:[#allocation5 + $0xa68] sm:$0xf0]  ;;  %3833 = vmatpush.bf16.msrb.mxu0 %v8533_v32 }
 0x1ba   :  { %v12715_v45 = vld [vmem:[#allocation5 + $0xe2c] sm:$0xf]  ;;  %v9493_v60 = vor.u32 %v12587_v36, %v9490_v44 }
 0x1bb   :  { %3874 = vmatpush.bf16.msrb.mxu3 %v10133_v0  ;;  %v10002_v49 = vld [vmem:[#allocation5 + $0xe68] sm:$0xf0]  ;;  %3847 = vmatpush.bf16.msrb.mxu1 %v9045_v15  ;;  %v3588_v44 = vpop.f32.mrf.mxu2 }
 0x1bc   :  { %v12315_v1 = vld [vmem:[#allocation5 + $0x1ac] sm:$0xf]  ;;  %v10005_v0 = vor.u32 %v12715_v45, %v10002_v49  ;;  %v3589_v29 = vadd.f32 %v3588_v44, %v3575_v38  ;;  %v8664_v44 = vld [vmem:[#allocation5 + $0x3b0] sm:$0xf] }
 0x1bd   :  { %3861 = vmatpush.bf16.msrb.mxu2 %v9557_v17  ;;  %v8402_v2 = vld [vmem:[#allocation5 + $0x1e8] sm:$0xf0]  ;;  %3834 = vmatpush.bf16.msrb.mxu0 %v8469_v59 }
 0x1be   :  { %v12443_v43 = vld [vmem:[#allocation5 + $0x5ac] sm:$0xf]  ;;  %v8405_v15 = vor.u32 %v12315_v1, %v8402_v2  ;;  %v13652_v1 = vadd.f32 %v3602_v52, %v3589_v29 }
 0x1bf   :  { %3875 = vmatpush.bf16.msrb.mxu3 %v10069_v34  ;;  %v8914_v4 = vld [vmem:[#allocation5 + $0x5e8] sm:$0xf0]  ;;  %3848 = vmatpush.bf16.msrb.mxu1 %v8981_v55 }
 0x1c0   :  { %v12571_v5 = vld [vmem:[#allocation5 + $0x9ac] sm:$0xf]  ;;  %v8917_v17 = vor.u32 %v12443_v43, %v8914_v4  ;;  %14252 = vst [vmem:[#allocation22_spill] sm:$0xff] %v13652_v1  ;;  %v9112_v1 = vld [vmem:[#allocation5 + $0x730] sm:$0xf] }
 0x1c1   :  { %v9426_v7 = vld [vmem:[#allocation5 + $0x9e8] sm:$0xf0]  ;;  %3862 = vmatpush.bf16.msrb.mxu2 %v9493_v60  ;;  %3835 = vmatpush.bf16.msrb.mxu0 %v8405_v15 }
 0x1c2   :  { %v12699_v21 = vld [vmem:[#allocation5 + $0xdac] sm:$0xf]  ;;  %v9429_v24 = vor.u32 %v12571_v5, %v9426_v7 }
 0x1c3   :  { %v9938_v32 = vld [vmem:[#allocation5 + $0xde8] sm:$0xf0]  ;;  %3876 = vmatpush.bf16.msrb.mxu3 %v10005_v0  ;;  %3849 = vmatpush.bf16.msrb.mxu1 %v8917_v17  ;;  %v9877_v0 = vor.u32 %v12683_v62, %v9874_v19 }
 0x1c4   :  { %v12299_v27 = vld [vmem:[#allocation5 + $0x12c] sm:$0xf]  ;;  %v9941_v34 = vor.u32 %v12699_v21, %v9938_v32 }
 0x1c5   :  { %v8338_v35 = vld [vmem:[#allocation5 + $0x168] sm:$0xf0]  ;;  %3863 = vmatpush.bf16.msrb.mxu2 %v9429_v24 }
 0x1c6   :  { %v12427_v36 = vld [vmem:[#allocation5 + $0x52c] sm:$0xf]  ;;  %v8341_v59 = vor.u32 %v12299_v27, %v8338_v35 }
 0x1c7   :  { %v8850_v45 = vld [vmem:[#allocation5 + $0x568] sm:$0xf0]  ;;  %3877 = vmatpush.bf16.msrb.mxu3 %v9941_v34  ;;  %v12388_v34 = vld [vmem:[#allocation5 + $0x3ec] sm:$0xf0] }
 0x1c8   :  { %v12555_v49 = vld [vmem:[#allocation5 + $0x92c] sm:$0xf]  ;;  %v8853_v55 = vor.u32 %v12427_v36, %v8850_v45  ;;  %3836 = vmatpush.bf16.msrb.mxu0 %v8341_v59  ;;  %v9176_v45 = vld [vmem:[#allocation5 + $0x7b0] sm:$0xf] }
 0x1c9   :  { %v9362_v51 = vld [vmem:[#allocation5 + $0x968] sm:$0xf0]  ;;  %v9688_v59 = vld [vmem:[#allocation5 + $0xbb0] sm:$0xf] }
 0x1ca   :  { %v9365_v60 = vor.u32 %v12555_v49, %v9362_v51  ;;  %v12283_v2 = vld [vmem:[#allocation5 + $0xac] sm:$0xf]  ;;  %3850 = vmatpush.bf16.msrb.mxu1 %v8853_v55  ;;  %v12516_v51 = vld [vmem:[#allocation5 + $0x7ec] sm:$0xf0] }
 0x1cb   :  { %v8274_v43 = vld [vmem:[#allocation5 + $0xe8] sm:$0xf0]  ;;  %3878 = vmatpush.bf16.msrb.mxu3 %v9877_v0 }
 0x1cc   :  { %v12411_v63 = vld [vmem:[#allocation5 + $0x4ac] sm:$0xf]  ;;  %v8277_v32 = vor.u32 %v12283_v2, %v8274_v43  ;;  %3864 = vmatpush.bf16.msrb.mxu2 %v9365_v60  ;;  %v12644_v2 = vld [vmem:[#allocation5 + $0xbec] sm:$0xf0] }
 0x1cd   :  { %v8786_v4 = vld [vmem:[#allocation5 + $0x4e8] sm:$0xf0]  ;;  %v10200_v43 = vld [vmem:[#allocation5 + $0xfb0] sm:$0xf] }
 0x1ce   :  { %v12539_v5 = vld [vmem:[#allocation5 + $0x8ac] sm:$0xf]  ;;  %v8789_v52 = vor.u32 %v12411_v63, %v8786_v4  ;;  %3837 = vmatpush.bf16.msrb.mxu0 %v8277_v32  ;;  %v12772_v63 = vld [vmem:[#allocation5 + $0xfec] sm:$0xf0]  ;;  %v8665_v4 = vor.u32 %v12388_v34, %v8664_v44 }
 0x1cf   :  { %v9298_v7 = vld [vmem:[#allocation5 + $0x8e8] sm:$0xf0]  ;;  %v10201_v32 = vor.u32 %v12772_v63, %v10200_v43  ;;  %v12484_v44 = vld [vmem:[#allocation5 + $0x6ec] sm:$0xf0] }
 0x1d0   :  { %v12667_v12 = vld [vmem:[#allocation5 + $0xcac] sm:$0xf]  ;;  %v9301_v29 = vor.u32 %v12539_v5, %v9298_v7  ;;  %3851 = vmatpush.bf16.msrb.mxu1 %v8789_v52  ;;  %v9177_v5 = vor.u32 %v12516_v51, %v9176_v45  ;;  %v9689_v7 = vor.u32 %v12644_v2, %v9688_v59  ;;  %v10136_v52 = vld [vmem:[#allocation5 + $0xf30] sm:$0xf] }
 0x1d1   :  { %v9810_v21 = vld [vmem:[#allocation5 + $0xce8] sm:$0xf0]  ;;  %v9560_v34 = vld [vmem:[#allocation5 + $0xab0] sm:$0xf] }
 0x1d2   :  { %v12267_v38 = vld [vmem:[#allocation5 + $0x2c] sm:$0xf]  ;;  %v9813_v35 = vor.u32 %v12667_v12, %v9810_v21  ;;  %3865 = vmatpush.bf16.msrb.mxu2 %v9301_v29  ;;  %v8600_v12 = vld [vmem:[#allocation5 + $0x330] sm:$0xf] }
 0x1d3   :  { %v8210_v15 = vld [vmem:[#allocation5 + $0x68] sm:$0xf0]  ;;  %v12372_v21 = vld [vmem:[#allocation5 + $0x36c] sm:$0xf0] }
 0x1d4   :  { %v12395_v17 = vld [vmem:[#allocation5 + $0x42c] sm:$0xf]  ;;  %v8213_v49 = vor.u32 %v12267_v38, %v8210_v15  ;;  %3879 = vmatpush.bf16.msrb.mxu3 %v9813_v35  ;;  %v12500_v38 = vld [vmem:[#allocation5 + $0x76c] sm:$0xf0] }
 0x1d5   :  { %v8722_v24 = vld [vmem:[#allocation5 + $0x468] sm:$0xf0]  ;;  %v9624_v15 = vld [vmem:[#allocation5 + $0xb30] sm:$0xf] }
 0x1d6   :  { %v12523_v27 = vld [vmem:[#allocation5 + $0x82c] sm:$0xf]  ;;  %v8725_v55 = vor.u32 %v12395_v17, %v8722_v24  ;;  %3838 = vmatpush.bf16.msrb.mxu0 %v8213_v49  ;;  %v12756_v29 = vld [vmem:[#allocation5 + $0xf6c] sm:$0xf0]  ;;  %v8601_v17 = vor.u32 %v12372_v21, %v8600_v12  ;;  %v9113_v24 = vor.u32 %v12500_v38, %v9112_v1 }
 0x1d7   :  { %v9234_v36 = vld [vmem:[#allocation5 + $0x868] sm:$0xf0]  ;;  %v8536_v35 = vld [vmem:[#allocation5 + $0x2b0] sm:$0xf] }
 0x1d8   :  { %v12651_v62 = vld [vmem:[#allocation5 + $0xc2c] sm:$0xf]  ;;  %v9237_v60 = vor.u32 %v12523_v27, %v9234_v36  ;;  %3852 = vmatpush.bf16.msrb.mxu1 %v8725_v55  ;;  %v9625_v27 = vor.u32 %v12628_v50, %v9624_v15  ;;  %v12356_v36 = vld [vmem:[#allocation5 + $0x2ec] sm:$0xf0] }
 0x1d9   :  { %v9746_v19 = vld [vmem:[#allocation5 + $0xc68] sm:$0xf0]  ;;  %v12612_v45 = vld [vmem:[#allocation5 + $0xaec] sm:$0xf0]  ;;  %3839 = vmatmul.bf16.vlgmr.msrb.gmra.mxu0 %v13517_v16  ;;  %v8537_v59 = vor.u32 %v12356_v36, %v8536_v35 }
 0x1da   :  { %v9749_v0 = vor.u32 %v12651_v62, %v9746_v19  ;;  %3866 = vmatpush.bf16.msrb.mxu2 %v9237_v60  ;;  %3887 = vmatpush.bf16.msra.mxu0 %v8665_v4  ;;  %v9048_v62 = vld [vmem:[#allocation5 + $0x6b0] sm:$0xf]  ;;  %v10137_v19 = vor.u32 %v12756_v29, %v10136_v52  ;;  %v9561_v1 = vor.u32 %v12612_v45, %v9560_v34 }
 0x1db   :  { %v10072_v49 = vld [vmem:[#allocation5 + $0xeb0] sm:$0xf]  ;;  %3853 = vmatmul.bf16.vlgmr.msrb.gmra.mxu1 %v13523_v33  ;;  %v9049_v50 = vor.u32 %v12484_v44, %v9048_v62  ;;  %v13658_v62 = vpop.f32.mrf.mxu0 }
 0x1dc   :  { %3880 = vmatpush.bf16.msrb.mxu3 %v9749_v0  ;;  %3901 = vmatpush.bf16.msra.mxu1 %v9177_v5  ;;  %v12740_v51 = vld [vmem:[#allocation5 + $0xeec] sm:$0xf0] }
 0x1dd   :  { %3867 = vmatmul.bf16.vlgmr.msrb.gmra.mxu2 %v13515_v9  ;;  %v8472_v2 = vld [vmem:[#allocation5 + $0x230] sm:$0xf]  ;;  %v10073_v43 = vor.u32 %v12740_v51, %v10072_v49 }
 0x1de   :  { %3915 = vmatpush.bf16.msra.mxu2 %v9689_v7  ;;  %3888 = vmatpush.bf16.msra.mxu0 %v8601_v17  ;;  %v12340_v55 = vld [vmem:[#allocation5 + $0x26c] sm:$0xf0] }
 0x1df   :  { %3881 = vmatmul.bf16.vlgmr.msrb.gmra.mxu3 %v13520_v20  ;;  %v8984_v60 = vld [vmem:[#allocation5 + $0x630] sm:$0xf]  ;;  %v8473_v12 = vor.u32 %v12340_v55, %v8472_v2 }
 0x1e0   :  { %3929 = vmatpush.bf16.msra.mxu3 %v10201_v32  ;;  %3902 = vmatpush.bf16.msra.mxu1 %v9113_v24  ;;  %v12468_v63 = vld [vmem:[#allocation5 + $0x66c] sm:$0xf0] }
 0x1e1   :  { %v9496_v0 = vld [vmem:[#allocation5 + $0xa30] sm:$0xf]  ;;  %v8985_v21 = vor.u32 %v12468_v63, %v8984_v60 }
 0x1e2   :  { %3916 = vmatpush.bf16.msra.mxu2 %v9625_v27  ;;  %v12596_v4 = vld [vmem:[#allocation5 + $0xa6c] sm:$0xf0]  ;;  %3889 = vmatpush.bf16.msra.mxu0 %v8537_v59  ;;  %v13660_v59 = vpop.f32.mrf.mxu1 }
 0x1e3   :  { %v10008_v5 = vld [vmem:[#allocation5 + $0xe30] sm:$0xf]  ;;  %v9497_v32 = vor.u32 %v12596_v4, %v9496_v0  ;;  %14253 = vst [vmem:[#allocation23_spill] sm:$0xff] %v13660_v59  ;;  %v13662_v0 = vpop.f32.mrf.mxu2  ;;  %v8602_v59 = vld [vmem:[#allocation5 + $0x370] sm:$0xf0] }
 0x1e4   :  { %3930 = vmatpush.bf16.msra.mxu3 %v10137_v19  ;;  %v12724_v7 = vld [vmem:[#allocation5 + $0xe6c] sm:$0xf0]  ;;  %3903 = vmatpush.bf16.msra.mxu1 %v9049_v50  ;;  %14254 = vst [vmem:[#allocation24_spill] sm:$0xff] %v13662_v0 }
 0x1e5   :  { %v8408_v38 = vld [vmem:[#allocation5 + $0x1b0] sm:$0xf]  ;;  %v10009_v29 = vor.u32 %v12724_v7, %v10008_v5 }
 0x1e6   :  { %3917 = vmatpush.bf16.msra.mxu2 %v9561_v1  ;;  %v12324_v15 = vld [vmem:[#allocation5 + $0x1ec] sm:$0xf0]  ;;  %3890 = vmatpush.bf16.msra.mxu0 %v8473_v12 }
 0x1e7   :  { %v8920_v52 = vld [vmem:[#allocation5 + $0x5b0] sm:$0xf]  ;;  %v8409_v19 = vor.u32 %v12324_v15, %v8408_v38 }
 0x1e8   :  { %3931 = vmatpush.bf16.msra.mxu3 %v10073_v43  ;;  %v12452_v17 = vld [vmem:[#allocation5 + $0x5ec] sm:$0xf0]  ;;  %3904 = vmatpush.bf16.msra.mxu1 %v8985_v21 }
 0x1e9   :  { %v9432_v24 = vld [vmem:[#allocation5 + $0x9b0] sm:$0xf]  ;;  %v8921_v44 = vor.u32 %v12452_v17, %v8920_v52 }
 0x1ea   :  { %v12580_v27 = vld [vmem:[#allocation5 + $0x9ec] sm:$0xf0]  ;;  %3918 = vmatpush.bf16.msra.mxu2 %v9497_v32  ;;  %3891 = vmatpush.bf16.msra.mxu0 %v8409_v19  ;;  %v13666_v19 = vpop.f32.mrf.mxu0 }
 0x1eb   :  { %v9944_v35 = vld [vmem:[#allocation5 + $0xdb0] sm:$0xf]  ;;  %v9433_v34 = vor.u32 %v12580_v27, %v9432_v24 }
 0x1ec   :  { %v12708_v36 = vld [vmem:[#allocation5 + $0xdec] sm:$0xf0]  ;;  %3932 = vmatpush.bf16.msra.mxu3 %v10009_v29  ;;  %3905 = vmatpush.bf16.msra.mxu1 %v8921_v44  ;;  %v13664_v29 = vpop.f32.mrf.mxu3 }
 0x1ed   :  { %v8344_v45 = vld [vmem:[#allocation5 + $0x130] sm:$0xf]  ;;  %v9945_v50 = vor.u32 %v12708_v36, %v9944_v35  ;;  %14255 = vst [vmem:[#allocation25_spill] sm:$0xff] %v13664_v29  ;;  %v9178_v29 = vld [vmem:[#allocation5 + $0x7f0] sm:$0xf0] }
 0x1ee   :  { %v12308_v49 = vld [vmem:[#allocation5 + $0x16c] sm:$0xf0]  ;;  %3919 = vmatpush.bf16.msra.mxu2 %v9433_v34 }
 0x1ef   :  { %v8856_v51 = vld [vmem:[#allocation5 + $0x530] sm:$0xf]  ;;  %v8345_v63 = vor.u32 %v12308_v49, %v8344_v45 }
 0x1f0   :  { %v12436_v1 = vld [vmem:[#allocation5 + $0x56c] sm:$0xf0]  ;;  %3933 = vmatpush.bf16.msra.mxu3 %v9945_v50 }
 0x1f1   :  { %v9368_v2 = vld [vmem:[#allocation5 + $0x930] sm:$0xf]  ;;  %v8857_v4 = vor.u32 %v12436_v1, %v8856_v51  ;;  %3892 = vmatpush.bf16.msra.mxu0 %v8345_v63  ;;  %v8666_v63 = vld [vmem:[#allocation5 + $0x3f0] sm:$0xf0] }
 0x1f2   :  { %v12564_v55 = vld [vmem:[#allocation5 + $0x96c] sm:$0xf0] }
 0x1f3   :  { %v9880_v60 = vld [vmem:[#allocation5 + $0xd30] sm:$0xf]  ;;  %v9369_v5 = vor.u32 %v12564_v55, %v9368_v2  ;;  %3906 = vmatpush.bf16.msra.mxu1 %v8857_v4  ;;  %v12636_v4 = vld [vmem:[#allocation5 + $0xbb4] sm:$0xf] }
 0x1f4   :  { %v12692_v43 = vld [vmem:[#allocation5 + $0xd6c] sm:$0xf0] }
 0x1f5   :  { %v8280_v7 = vld [vmem:[#allocation5 + $0xb0] sm:$0xf]  ;;  %v9881_v32 = vor.u32 %v12692_v43, %v9880_v60  ;;  %3920 = vmatpush.bf16.msra.mxu2 %v9369_v5  ;;  %v13668_v60 = vpop.f32.mrf.mxu1  ;;  %v12380_v43 = vld [vmem:[#allocation5 + $0x3b4] sm:$0xf] }
 0x1f6   :  { %v12292_v12 = vld [vmem:[#allocation5 + $0xec] sm:$0xf0]  ;;  %14256 = vst [vmem:[#allocation26_spill] sm:$0xff] %v13668_v60  ;;  %v9690_v5 = vld [vmem:[#allocation5 + $0xbf0] sm:$0xf0] }
 0x1f7   :  { %v8792_v21 = vld [vmem:[#allocation5 + $0x4b0] sm:$0xf]  ;;  %v8281_v27 = vor.u32 %v12292_v12, %v8280_v7  ;;  %3934 = vmatpush.bf16.msra.mxu3 %v9881_v32  ;;  %v12508_v7 = vld [vmem:[#allocation5 + $0x7b4] sm:$0xf]  ;;  %v9693_v8 = vor.u32 %v12636_v4, %v9690_v5 }
 0x1f8   :  { %v12420_v38 = vld [vmem:[#allocation5 + $0x4ec] sm:$0xf0]  ;;  %v10202_v32 = vld [vmem:[#allocation5 + $0xff0] sm:$0xf0]  ;;  %v9181_v0 = vor.u32 %v12508_v7, %v9178_v29  ;;  %v13674_v29 = vpop.f32.mrf.mxu0 }
 0x1f9   :  { %v9304_v15 = vld [vmem:[#allocation5 + $0x8b0] sm:$0xf]  ;;  %v8793_v44 = vor.u32 %v12420_v38, %v8792_v21  ;;  %3893 = vmatpush.bf16.msra.mxu0 %v8281_v27  ;;  %v12364_v60 = vld [vmem:[#allocation5 + $0x334] sm:$0xf] }
 0x1fa   :  { %v12548_v52 = vld [vmem:[#allocation5 + $0x8ec] sm:$0xf0]  ;;  %v12492_v27 = vld [vmem:[#allocation5 + $0x734] sm:$0xf] }
 0x1fb   :  { %v9816_v17 = vld [vmem:[#allocation5 + $0xcb0] sm:$0xf]  ;;  %v9305_v34 = vor.u32 %v12548_v52, %v9304_v15  ;;  %3907 = vmatpush.bf16.msra.mxu1 %v8793_v44  ;;  %v12764_v15 = vld [vmem:[#allocation5 + $0xfb4] sm:$0xf]  ;;  %v13670_v52 = vpop.f32.mrf.mxu2 }
 0x1fc   :  { %v12676_v24 = vld [vmem:[#allocation5 + $0xcec] sm:$0xf0]  ;;  %14257 = vst [vmem:[#allocation27_spill] sm:$0xff] %v13670_v52  ;;  %v9114_v44 = vld [vmem:[#allocation5 + $0x770] sm:$0xf0] }
 0x1fd   :  { %v8216_v35 = vld [vmem:[#allocation5 + $0x30] sm:$0xf]  ;;  %v9817_v50 = vor.u32 %v12676_v24, %v9816_v17  ;;  %3921 = vmatpush.bf16.msra.mxu2 %v9305_v34  ;;  %v8669_v24 = vor.u32 %v12380_v43, %v8666_v63  ;;  %v12620_v34 = vld [vmem:[#allocation5 + $0xb34] sm:$0xf] }
 0x1fe   :  { %v12276_v36 = vld [vmem:[#allocation5 + $0x6c] sm:$0xf0]  ;;  %v8538_v43 = vld [vmem:[#allocation5 + $0x2f0] sm:$0xf0] }
 0x1ff   :  { %v8728_v45 = vld [vmem:[#allocation5 + $0x430] sm:$0xf]  ;;  %v8217_v12 = vor.u32 %v12276_v36, %v8216_v35  ;;  %3935 = vmatpush.bf16.msra.mxu3 %v9817_v50  ;;  %v13672_v35 = vpop.f32.mrf.mxu3  ;;  %v10205_v36 = vor.u32 %v12764_v15, %v10202_v32  ;;  %v8605_v50 = vor.u32 %v12364_v60, %v8602_v59  ;;  %v12476_v63 = vld [vmem:[#allocation5 + $0x6b4] sm:$0xf] }
 0x200   :  { %v12404_v49 = vld [vmem:[#allocation5 + $0x46c] sm:$0xf0]  ;;  %14258 = vst [vmem:[#allocation28_spill] sm:$0xff] %v13672_v35  ;;  %v9050_v7 = vld [vmem:[#allocation5 + $0x6f0] sm:$0xf0] }
 0x201   :  { %v9240_v51 = vld [vmem:[#allocation5 + $0x830] sm:$0xf]  ;;  %v8729_v21 = vor.u32 %v12404_v49, %v8728_v45  ;;  %3894 = vmatpush.bf16.msra.mxu0 %v8217_v12  ;;  %v9626_v45 = vld [vmem:[#allocation5 + $0xb70] sm:$0xf0]  ;;  %v9053_v15 = vor.u32 %v12476_v63, %v9050_v7 }
 0x202   :  { %v12532_v1 = vld [vmem:[#allocation5 + $0x86c] sm:$0xf0]  ;;  %v12748_v49 = vld [vmem:[#allocation5 + $0xf34] sm:$0xf] }
 0x203   :  { %v9752_v2 = vld [vmem:[#allocation5 + $0xc30] sm:$0xf]  ;;  %v9241_v38 = vor.u32 %v12532_v1, %v9240_v51  ;;  %3908 = vmatpush.bf16.msra.mxu1 %v8729_v21  ;;  %v10138_v51 = vld [vmem:[#allocation5 + $0xf70] sm:$0xf0]  ;;  %v13676_v21 = vpop.f32.mrf.mxu1 }
 0x204   :  { %v12660_v55 = vld [vmem:[#allocation5 + $0xc6c] sm:$0xf0]  ;;  %v12348_v1 = vld [vmem:[#allocation5 + $0x2b4] sm:$0xf]  ;;  %v10141_v12 = vor.u32 %v12748_v49, %v10138_v51  ;;  %14259 = vst [vmem:[#allocation29_spill] sm:$0xff] %v13676_v21  ;;  %3895 = vmatmul.bf16.vlgmr.msra.gmra.mxu0 %v13517_v16 }
 0x205   :  { %v9753_v17 = vor.u32 %v12660_v55, %v9752_v2  ;;  %3922 = vmatpush.bf16.msra.mxu2 %v9241_v38  ;;  %3943 = vmatpush.bf16.msrb.mxu0 %v8669_v24  ;;  %v9117_v2 = vor.u32 %v12492_v27, %v9114_v44  ;;  %v9629_v55 = vor.u32 %v12620_v34, %v9626_v45  ;;  %v12604_v4 = vld [vmem:[#allocation5 + $0xab4] sm:$0xf]  ;;  %v13679_v38 = vld [vmem:[#allocation7 + $0x8] sm:$0xff]  ;;  %v13684_v27 = vpop.f32.mrf.mxu2 }
 0x206   :  { %v9562_v5 = vld [vmem:[#allocation5 + $0xaf0] sm:$0xf0]  ;;  %14260 = vst [vmem:[#allocation30_spill] sm:$0xff] %v13679_v38  ;;  %3909 = vmatmul.bf16.vlgmr.msra.gmra.mxu1 %v13523_v33 }
 0x207   :  { %3936 = vmatpush.bf16.msra.mxu3 %v9753_v17  ;;  %3957 = vmatpush.bf16.msrb.mxu1 %v9181_v0  ;;  %v12732_v59 = vld [vmem:[#allocation5 + $0xeb4] sm:$0xf]  ;;  %v9565_v32 = vor.u32 %v12604_v4, %v9562_v5  ;;  %14261 = vst [vmem:[#allocation31_spill] sm:$0xff] %v13684_v27 }
 0x208   :  { %3923 = vmatmul.bf16.vlgmr.msra.gmra.mxu2 %v13515_v9  ;;  %v10074_v60 = vld [vmem:[#allocation5 + $0xef0] sm:$0xf0] }
 0x209   :  { %3971 = vmatpush.bf16.msrb.mxu2 %v9693_v8  ;;  %3944 = vmatpush.bf16.msrb.mxu0 %v8605_v50  ;;  %v8541_v8 = vor.u32 %v12348_v1, %v8538_v43  ;;  %v12332_v0 = vld [vmem:[#allocation5 + $0x234] sm:$0xf]  ;;  %v10077_v44 = vor.u32 %v12732_v59, %v10074_v60  ;;  %v13687_v1 = vpop.f32.mrf.mxu3 }
 0x20a   :  { %3937 = vmatmul.bf16.vlgmr.msra.gmra.mxu3 %v13520_v20  ;;  %v8474_v17 = vld [vmem:[#allocation5 + $0x270] sm:$0xf0]  ;;  %14262 = vst [vmem:[#allocation32_spill] sm:$0xff] %v13687_v1 }
 0x20b   :  { %3985 = vmatpush.bf16.msrb.mxu3 %v10205_v36  ;;  %3958 = vmatpush.bf16.msrb.mxu1 %v9117_v2  ;;  %v12460_v24 = vld [vmem:[#allocation5 + $0x634] sm:$0xf]  ;;  %v14236_v36 = vperm.slane %v13679_v38, 0  ;;  %v8477_v2 = vor.u32 %v12332_v0, %v8474_v17  ;;  %v3686_v52 = vpop.f32.mrf.mxu1 }
 0x20c   :  { %v8986_v34 = vld [vmem:[#allocation5 + $0x670] sm:$0xf0] }
 0x20d   :  { %3972 = vmatpush.bf16.msrb.mxu2 %v9629_v55  ;;  %v12588_v45 = vld [vmem:[#allocation5 + $0xa34] sm:$0xf]  ;;  %3945 = vmatpush.bf16.msrb.mxu0 %v8541_v8  ;;  %v3672_v55 = vpop.f32.mrf.mxu0  ;;  %v8989_v43 = vor.u32 %v12460_v24, %v8986_v34 }
 0x20e   :  { %v9498_v49 = vld [vmem:[#allocation5 + $0xa70] sm:$0xf0] }
 0x20f   :  { %3986 = vmatpush.bf16.msrb.mxu3 %v10141_v12  ;;  %v12716_v51 = vld [vmem:[#allocation5 + $0xe34] sm:$0xf]  ;;  %3959 = vmatpush.bf16.msrb.mxu1 %v9053_v15  ;;  %v9501_v63 = vor.u32 %v12588_v45, %v9498_v49  ;;  %v3673_v12 = vadd.f32 %v3672_v55, %v14236_v36  ;;  %v3700_v49 = vpop.f32.mrf.mxu2 }
 0x210   :  { %v10010_v50 = vld [vmem:[#allocation5 + $0xe70] sm:$0xf0] }
 0x211   :  { %3973 = vmatpush.bf16.msrb.mxu2 %v9565_v32  ;;  %v12316_v7 = vld [vmem:[#allocation5 + $0x1b4] sm:$0xf]  ;;  %v10013_v59 = vor.u32 %v12716_v51, %v10010_v50  ;;  %v3687_v0 = vadd.f32 %v3686_v52, %v3673_v12  ;;  %3946 = vmatpush.bf16.msrb.mxu0 %v8477_v2  ;;  %v3714_v28 = vpop.f32.mrf.mxu3 }
 0x212   :  { %v8410_v4 = vld [vmem:[#allocation5 + $0x1f0] sm:$0xf0] }
 0x213   :  { %v12444_v5 = vld [vmem:[#allocation5 + $0x5b4] sm:$0xf]  ;;  %3987 = vmatpush.bf16.msrb.mxu3 %v10077_v44  ;;  %v8413_v15 = vor.u32 %v12316_v7, %v8410_v4  ;;  %3960 = vmatpush.bf16.msrb.mxu1 %v8989_v43  ;;  %v3701_v36 = vadd.f32 %v3700_v49, %v3687_v0  ;;  %v8672_v49 = vld [vmem:[#allocation5 + $0x3b8] sm:$0xf] }
 0x214   :  { %v8922_v60 = vld [vmem:[#allocation5 + $0x5f0] sm:$0xf0] }
 0x215   :  { %v12572_v35 = vld [vmem:[#allocation5 + $0x9b4] sm:$0xf]  ;;  %3974 = vmatpush.bf16.msrb.mxu2 %v9501_v63  ;;  %v8925_v32 = vor.u32 %v12444_v5, %v8922_v60  ;;  %3947 = vmatpush.bf16.msrb.mxu0 %v8413_v15  ;;  %v13691_v2 = vadd.f32 %v3714_v28, %v3701_v36 }
 0x216   :  { %v9434_v27 = vld [vmem:[#allocation5 + $0x9f0] sm:$0xf0] }
 0x217   :  { %v12700_v1 = vld [vmem:[#allocation5 + $0xdb4] sm:$0xf]  ;;  %v9437_v17 = vor.u32 %v12572_v35, %v9434_v27  ;;  %3988 = vmatpush.bf16.msrb.mxu3 %v10013_v59  ;;  %14263 = vst [vmem:[#allocation33_spill] sm:$0xff] %v13691_v2  ;;  %3961 = vmatpush.bf16.msrb.mxu1 %v8925_v32  ;;  %v9120_v2 = vld [vmem:[#allocation5 + $0x738] sm:$0xf] }
 0x218   :  { %v9946_v8 = vld [vmem:[#allocation5 + $0xdf0] sm:$0xf0] }
 0x219   :  { %v12300_v24 = vld [vmem:[#allocation5 + $0x134] sm:$0xf]  ;;  %v9949_v44 = vor.u32 %v12700_v1, %v9946_v8  ;;  %3975 = vmatpush.bf16.msrb.mxu2 %v9437_v17 }
 0x21a   :  { %v8346_v34 = vld [vmem:[#allocation5 + $0x170] sm:$0xf0] }
 0x21b   :  { %v12428_v45 = vld [vmem:[#allocation5 + $0x534] sm:$0xf]  ;;  %v8349_v52 = vor.u32 %v12300_v24, %v8346_v34  ;;  %3989 = vmatpush.bf16.msrb.mxu3 %v9949_v44  ;;  %v12389_v44 = vld [vmem:[#allocation5 + $0x3f4] sm:$0xf0] }
 0x21c   :  { %v8858_v51 = vld [vmem:[#allocation5 + $0x570] sm:$0xf0] }
 0x21d   :  { %v12556_v50 = vld [vmem:[#allocation5 + $0x934] sm:$0xf]  ;;  %v8861_v35 = vor.u32 %v12428_v45, %v8858_v51  ;;  %3948 = vmatpush.bf16.msrb.mxu0 %v8349_v52  ;;  %v9184_v51 = vld [vmem:[#allocation5 + $0x7b8] sm:$0xf] }
 0x21e   :  { %v9370_v55 = vld [vmem:[#allocation5 + $0x970] sm:$0xf0]  ;;  %v9696_v52 = vld [vmem:[#allocation5 + $0xbb8] sm:$0xf] }
 0x21f   :  { %v12684_v38 = vld [vmem:[#allocation5 + $0xd34] sm:$0xf]  ;;  %v9373_v27 = vor.u32 %v12556_v50, %v9370_v55  ;;  %3962 = vmatpush.bf16.msrb.mxu1 %v8861_v35  ;;  %v12517_v55 = vld [vmem:[#allocation5 + $0x7f4] sm:$0xf0] }
 0x220   :  { %v9882_v21 = vld [vmem:[#allocation5 + $0xd70] sm:$0xf0] }
 0x221   :  { %v12284_v43 = vld [vmem:[#allocation5 + $0xb4] sm:$0xf]  ;;  %v9885_v1 = vor.u32 %v12684_v38, %v9882_v21  ;;  %3976 = vmatpush.bf16.msrb.mxu2 %v9373_v27 }
 0x222   :  { %v8282_v63 = vld [vmem:[#allocation5 + $0xf0] sm:$0xf0] }
 0x223   :  { %v12412_v7 = vld [vmem:[#allocation5 + $0x4b4] sm:$0xf]  ;;  %v8285_v8 = vor.u32 %v12284_v43, %v8282_v63  ;;  %3990 = vmatpush.bf16.msrb.mxu3 %v9885_v1  ;;  %v12645_v43 = vld [vmem:[#allocation5 + $0xbf4] sm:$0xf0] }
 0x224   :  { %v8794_v4 = vld [vmem:[#allocation5 + $0x4f0] sm:$0xf0]  ;;  %v10208_v63 = vld [vmem:[#allocation5 + $0xfb8] sm:$0xf] }
 0x225   :  { %v12540_v5 = vld [vmem:[#allocation5 + $0x8b4] sm:$0xf]  ;;  %v8797_v28 = vor.u32 %v12412_v7, %v8794_v4  ;;  %3949 = vmatpush.bf16.msrb.mxu0 %v8285_v8  ;;  %v12773_v7 = vld [vmem:[#allocation5 + $0xff4] sm:$0xf0]  ;;  %v8673_v4 = vor.u32 %v12389_v44, %v8672_v49 }
 0x226   :  { %v9306_v12 = vld [vmem:[#allocation5 + $0x8f0] sm:$0xf0]  ;;  %v10209_v8 = vor.u32 %v12773_v7, %v10208_v63  ;;  %v12485_v49 = vld [vmem:[#allocation5 + $0x6f4] sm:$0xf0] }
 0x227   :  { %v12668_v59 = vld [vmem:[#allocation5 + $0xcb4] sm:$0xf]  ;;  %v9309_v36 = vor.u32 %v12540_v5, %v9306_v12  ;;  %3963 = vmatpush.bf16.msrb.mxu1 %v8797_v28  ;;  %v9185_v5 = vor.u32 %v12517_v55, %v9184_v51  ;;  %v9697_v12 = vor.u32 %v12645_v43, %v9696_v52  ;;  %v10144_v28 = vld [vmem:[#allocation5 + $0xf38] sm:$0xf] }
 0x228   :  { %v9818_v60 = vld [vmem:[#allocation5 + $0xcf0] sm:$0xf0]  ;;  %v9568_v44 = vld [vmem:[#allocation5 + $0xab8] sm:$0xf] }
 0x229   :  { %v12268_v0 = vld [vmem:[#allocation5 + $0x34] sm:$0xf]  ;;  %v9821_v34 = vor.u32 %v12668_v59, %v9818_v60  ;;  %3977 = vmatpush.bf16.msrb.mxu2 %v9309_v36  ;;  %v8608_v59 = vld [vmem:[#allocation5 + $0x338] sm:$0xf] }
 0x22a   :  { %v8218_v15 = vld [vmem:[#allocation5 + $0x70] sm:$0xf0]  ;;  %v12373_v60 = vld [vmem:[#allocation5 + $0x374] sm:$0xf0] }
 0x22b   :  { %v12396_v32 = vld [vmem:[#allocation5 + $0x434] sm:$0xf]  ;;  %v8221_v50 = vor.u32 %v12268_v0, %v8218_v15  ;;  %3991 = vmatpush.bf16.msrb.mxu3 %v9821_v34  ;;  %v12501_v0 = vld [vmem:[#allocation5 + $0x774] sm:$0xf0] }
 0x22c   :  { %v8730_v17 = vld [vmem:[#allocation5 + $0x470] sm:$0xf0]  ;;  %v9632_v15 = vld [vmem:[#allocation5 + $0xb38] sm:$0xf] }
 0x22d   :  { %v12524_v24 = vld [vmem:[#allocation5 + $0x834] sm:$0xf]  ;;  %v8733_v35 = vor.u32 %v12396_v32, %v8730_v17  ;;  %3950 = vmatpush.bf16.msrb.mxu0 %v8221_v50  ;;  %v12757_v36 = vld [vmem:[#allocation5 + $0xf74] sm:$0xf0]  ;;  %v8609_v32 = vor.u32 %v12373_v60, %v8608_v59  ;;  %v9121_v17 = vor.u32 %v12501_v0, %v9120_v2 }
 0x22e   :  { %v9242_v45 = vld [vmem:[#allocation5 + $0x870] sm:$0xf0]  ;;  %v8544_v34 = vld [vmem:[#allocation5 + $0x2b8] sm:$0xf] }
 0x22f   :  { %v12652_v21 = vld [vmem:[#allocation5 + $0xc34] sm:$0xf]  ;;  %v9245_v27 = vor.u32 %v12524_v24, %v9242_v45  ;;  %3964 = vmatpush.bf16.msrb.mxu1 %v8733_v35  ;;  %v9633_v24 = vor.u32 %v12629_v61, %v9632_v15  ;;  %v12357_v45 = vld [vmem:[#allocation5 + $0x2f4] sm:$0xf0] }
 0x230   :  { %v9754_v38 = vld [vmem:[#allocation5 + $0xc70] sm:$0xf0]  ;;  %v12613_v51 = vld [vmem:[#allocation5 + $0xaf4] sm:$0xf0]  ;;  %3951 = vmatmul.bf16.vlgmr.msrb.gmra.mxu0 %v13517_v16  ;;  %v8545_v52 = vor.u32 %v12357_v45, %v8544_v34 }
 0x231   :  { %v9757_v1 = vor.u32 %v12652_v21, %v9754_v38  ;;  %3978 = vmatpush.bf16.msrb.mxu2 %v9245_v27  ;;  %3999 = vmatpush.bf16.msra.mxu0 %v8673_v4  ;;  %v9056_v21 = vld [vmem:[#allocation5 + $0x6b8] sm:$0xf]  ;;  %v10145_v38 = vor.u32 %v12757_v36, %v10144_v28  ;;  %v9569_v2 = vor.u32 %v12613_v51, %v9568_v44 }
 0x232   :  { %v10080_v50 = vld [vmem:[#allocation5 + $0xeb8] sm:$0xf]  ;;  %3965 = vmatmul.bf16.vlgmr.msrb.gmra.mxu1 %v13523_v33  ;;  %v9057_v61 = vor.u32 %v12485_v49, %v9056_v21 }
 0x233   :  { %3992 = vmatpush.bf16.msrb.mxu3 %v9757_v1  ;;  %4013 = vmatpush.bf16.msra.mxu1 %v9185_v5  ;;  %v12741_v55 = vld [vmem:[#allocation5 + $0xef4] sm:$0xf0] }
 0x234   :  { %3979 = vmatmul.bf16.vlgmr.msrb.gmra.mxu2 %v13515_v9  ;;  %v8480_v43 = vld [vmem:[#allocation5 + $0x238] sm:$0xf]  ;;  %v10081_v63 = vor.u32 %v12741_v55, %v10080_v50 }
 0x235   :  { %4027 = vmatpush.bf16.msra.mxu2 %v9697_v12  ;;  %4000 = vmatpush.bf16.msra.mxu0 %v8609_v32  ;;  %v12341_v35 = vld [vmem:[#allocation5 + $0x274] sm:$0xf0] }
 0x236   :  { %3993 = vmatmul.bf16.vlgmr.msrb.gmra.mxu3 %v13520_v20  ;;  %v8992_v27 = vld [vmem:[#allocation5 + $0x638] sm:$0xf]  ;;  %v8481_v59 = vor.u32 %v12341_v35, %v8480_v43 }
 0x237   :  { %4041 = vmatpush.bf16.msra.mxu3 %v10209_v8  ;;  %4014 = vmatpush.bf16.msra.mxu1 %v9121_v17  ;;  %v12469_v7 = vld [vmem:[#allocation5 + $0x674] sm:$0xf0] }
 0x238   :  { %v9504_v1 = vld [vmem:[#allocation5 + $0xa38] sm:$0xf]  ;;  %v8993_v60 = vor.u32 %v12469_v7, %v8992_v27 }
 0x239   :  { %4028 = vmatpush.bf16.msra.mxu2 %v9633_v24  ;;  %v12597_v4 = vld [vmem:[#allocation5 + $0xa74] sm:$0xf0]  ;;  %4001 = vmatpush.bf16.msra.mxu0 %v8545_v52 }
 0x23a   :  { %v10016_v5 = vld [vmem:[#allocation5 + $0xe38] sm:$0xf]  ;;  %v9505_v8 = vor.u32 %v12597_v4, %v9504_v1 }
 0x23b   :  { %4042 = vmatpush.bf16.msra.mxu3 %v10145_v38  ;;  %v12725_v12 = vld [vmem:[#allocation5 + $0xe74] sm:$0xf0]  ;;  %4015 = vmatpush.bf16.msra.mxu1 %v9057_v61 }
 0x23c   :  { %v8416_v0 = vld [vmem:[#allocation5 + $0x1b8] sm:$0xf]  ;;  %v10017_v36 = vor.u32 %v12725_v12, %v10016_v5 }
 0x23d   :  { %4029 = vmatpush.bf16.msra.mxu2 %v9569_v2  ;;  %v12325_v15 = vld [vmem:[#allocation5 + $0x1f4] sm:$0xf0]  ;;  %4002 = vmatpush.bf16.msra.mxu0 %v8481_v59 }
 0x23e   :  { %v8928_v28 = vld [vmem:[#allocation5 + $0x5b8] sm:$0xf]  ;;  %v8417_v21 = vor.u32 %v12325_v15, %v8416_v0 }
 0x23f   :  { %4043 = vmatpush.bf16.msra.mxu3 %v10081_v63  ;;  %v12453_v32 = vld [vmem:[#allocation5 + $0x5f4] sm:$0xf0]  ;;  %4016 = vmatpush.bf16.msra.mxu1 %v8993_v60 }
 0x240   :  { %v9440_v17 = vld [vmem:[#allocation5 + $0x9b8] sm:$0xf]  ;;  %v8929_v38 = vor.u32 %v12453_v32, %v8928_v28 }
 0x241   :  { %v12581_v24 = vld [vmem:[#allocation5 + $0x9f4] sm:$0xf0]  ;;  %4030 = vmatpush.bf16.msra.mxu2 %v9505_v8  ;;  %4003 = vmatpush.bf16.msra.mxu0 %v8417_v21 }
 0x242   :  { %v9952_v34 = vld [vmem:[#allocation5 + $0xdb8] sm:$0xf]  ;;  %v9441_v49 = vor.u32 %v12581_v24, %v9440_v17 }
 0x243   :  { %v12709_v45 = vld [vmem:[#allocation5 + $0xdf4] sm:$0xf0]  ;;  %4044 = vmatpush.bf16.msra.mxu3 %v10017_v36  ;;  %4017 = vmatpush.bf16.msra.mxu1 %v8929_v38 }
 0x244   :  { %v8352_v44 = vld [vmem:[#allocation5 + $0x138] sm:$0xf]  ;;  %v9953_v55 = vor.u32 %v12709_v45, %v9952_v34 }
 0x245   :  { %v12309_v51 = vld [vmem:[#allocation5 + $0x174] sm:$0xf0]  ;;  %4031 = vmatpush.bf16.msra.mxu2 %v9441_v49 }
 0x246   :  { %v8864_v50 = vld [vmem:[#allocation5 + $0x538] sm:$0xf]  ;;  %v8353_v27 = vor.u32 %v12309_v51, %v8352_v44 }
 0x247   :  { %v12437_v52 = vld [vmem:[#allocation5 + $0x574] sm:$0xf0]  ;;  %4045 = vmatpush.bf16.msra.mxu3 %v9953_v55  ;;  %v8674_v55 = vld [vmem:[#allocation5 + $0x3f8] sm:$0xf0] }
 0x248   :  { %v9376_v61 = vld [vmem:[#allocation5 + $0x938] sm:$0xf]  ;;  %v8865_v63 = vor.u32 %v12437_v52, %v8864_v50  ;;  %4004 = vmatpush.bf16.msra.mxu0 %v8353_v27  ;;  %v12381_v50 = vld [vmem:[#allocation5 + $0x3bc] sm:$0xf] }
 0x249   :  { %v12565_v2 = vld [vmem:[#allocation5 + $0x974] sm:$0xf0]  ;;  %v12509_v52 = vld [vmem:[#allocation5 + $0x7bc] sm:$0xf] }
 0x24a   :  { %v9888_v43 = vld [vmem:[#allocation5 + $0xd38] sm:$0xf]  ;;  %v9377_v7 = vor.u32 %v12565_v2, %v9376_v61  ;;  %4018 = vmatpush.bf16.msra.mxu1 %v8865_v63  ;;  %v9186_v2 = vld [vmem:[#allocation5 + $0x7f8] sm:$0xf0] }
 0x24b   :  { %v12693_v35 = vld [vmem:[#allocation5 + $0xd74] sm:$0xf0] }
 0x24c   :  { %v8288_v1 = vld [vmem:[#allocation5 + $0xb8] sm:$0xf]  ;;  %v9889_v12 = vor.u32 %v12693_v35, %v9888_v43  ;;  %4032 = vmatpush.bf16.msra.mxu2 %v9377_v7  ;;  %v12637_v43 = vld [vmem:[#allocation5 + $0xbbc] sm:$0xf] }
 0x24d   :  { %v12293_v4 = vld [vmem:[#allocation5 + $0xf4] sm:$0xf0]  ;;  %v9698_v35 = vld [vmem:[#allocation5 + $0xbf8] sm:$0xf0] }
 0x24e   :  { %v8800_v5 = vld [vmem:[#allocation5 + $0x4b8] sm:$0xf]  ;;  %v8289_v28 = vor.u32 %v12293_v4, %v8288_v1  ;;  %4046 = vmatpush.bf16.msra.mxu3 %v9889_v12  ;;  %v12765_v7 = vld [vmem:[#allocation5 + $0xfbc] sm:$0xf]  ;;  %v9189_v12 = vor.u32 %v12509_v52, %v9186_v2 }
 0x24f   :  { %v12421_v59 = vld [vmem:[#allocation5 + $0x4f4] sm:$0xf0]  ;;  %v10210_v1 = vld [vmem:[#allocation5 + $0xff8] sm:$0xf0] }
 0x250   :  { %v9312_v60 = vld [vmem:[#allocation5 + $0x8b8] sm:$0xf]  ;;  %v8801_v17 = vor.u32 %v12421_v59, %v8800_v5  ;;  %4005 = vmatpush.bf16.msra.mxu0 %v8289_v28  ;;  %v8677_v5 = vor.u32 %v12381_v50, %v8674_v55  ;;  %v9701_v59 = vor.u32 %v12637_v43, %v9698_v35  ;;  %v9122_v28 = vld [vmem:[#allocation5 + $0x778] sm:$0xf0] }
 0x251   :  { %v12549_v8 = vld [vmem:[#allocation5 + $0x8f4] sm:$0xf0]  ;;  %v9058_v50 = vld [vmem:[#allocation5 + $0x6f8] sm:$0xf0] }
 0x252   :  { %v9824_v0 = vld [vmem:[#allocation5 + $0xcb8] sm:$0xf]  ;;  %v9313_v24 = vor.u32 %v12549_v8, %v9312_v60  ;;  %4019 = vmatpush.bf16.msra.mxu1 %v8801_v17  ;;  %v12365_v60 = vld [vmem:[#allocation5 + $0x33c] sm:$0xf] }
 0x253   :  { %v12677_v15 = vld [vmem:[#allocation5 + $0xcf4] sm:$0xf0]  ;;  %v8610_v8 = vld [vmem:[#allocation5 + $0x378] sm:$0xf0] }
 0x254   :  { %v8224_v36 = vld [vmem:[#allocation5 + $0x38] sm:$0xf]  ;;  %v9825_v38 = vor.u32 %v12677_v15, %v9824_v0  ;;  %4033 = vmatpush.bf16.msra.mxu2 %v9313_v24  ;;  %v12493_v0 = vld [vmem:[#allocation5 + $0x73c] sm:$0xf]  ;;  %v10213_v15 = vor.u32 %v12765_v7, %v10210_v1 }
 0x255   :  { %v12277_v32 = vld [vmem:[#allocation5 + $0x74] sm:$0xf0]  ;;  %v12749_v17 = vld [vmem:[#allocation5 + $0xf3c] sm:$0xf] }
 0x256   :  { %v8736_v34 = vld [vmem:[#allocation5 + $0x438] sm:$0xf]  ;;  %v8225_v61 = vor.u32 %v12277_v32, %v8224_v36  ;;  %4047 = vmatpush.bf16.msra.mxu3 %v9825_v38  ;;  %v12621_v36 = vld [vmem:[#allocation5 + $0xb3c] sm:$0xf] }
 0x257   :  { %v12405_v45 = vld [vmem:[#allocation5 + $0x474] sm:$0xf0]  ;;  %v9634_v32 = vld [vmem:[#allocation5 + $0xb78] sm:$0xf0] }
 0x258   :  { %v9248_v21 = vld [vmem:[#allocation5 + $0x838] sm:$0xf]  ;;  %v8737_v27 = vor.u32 %v12405_v45, %v8736_v34  ;;  %4006 = vmatpush.bf16.msra.mxu0 %v8225_v61  ;;  %v10146_v24 = vld [vmem:[#allocation5 + $0xf78] sm:$0xf0]  ;;  %v8613_v34 = vor.u32 %v12365_v60, %v8610_v8  ;;  %v9125_v45 = vor.u32 %v12493_v0, %v9122_v28 }
 0x259   :  { %v12533_v49 = vld [vmem:[#allocation5 + $0x874] sm:$0xf0]  ;;  %v12349_v38 = vld [vmem:[#allocation5 + $0x2bc] sm:$0xf] }
 0x25a   :  { %v9760_v44 = vld [vmem:[#allocation5 + $0xc38] sm:$0xf]  ;;  %v9249_v63 = vor.u32 %v12533_v49, %v9248_v21  ;;  %4020 = vmatpush.bf16.msra.mxu1 %v8737_v27  ;;  %v9637_v21 = vor.u32 %v12621_v36, %v9634_v32  ;;  %v8546_v49 = vld [vmem:[#allocation5 + $0x2f8] sm:$0xf0] }
 0x25b   :  { %v12661_v51 = vld [vmem:[#allocation5 + $0xc74] sm:$0xf0]  ;;  %v12605_v55 = vld [vmem:[#allocation5 + $0xabc] sm:$0xf]  ;;  %4007 = vmatmul.bf16.vlgmr.msra.gmra.mxu0 %v13517_v16  ;;  %v8549_v43 = vor.u32 %v12349_v38, %v8546_v49 }
 0x25c   :  { %v9761_v4 = vor.u32 %v12661_v51, %v9760_v44  ;;  %4034 = vmatpush.bf16.msra.mxu2 %v9249_v63  ;;  %4055 = vmatpush.bf16.msrb.mxu0 %v8677_v5  ;;  %v12477_v44 = vld [vmem:[#allocation5 + $0x6bc] sm:$0xf]  ;;  %v10149_v51 = vor.u32 %v12749_v17, %v10146_v24 }
 0x25d   :  { %v9570_v52 = vld [vmem:[#allocation5 + $0xaf8] sm:$0xf0]  ;;  %4021 = vmatmul.bf16.vlgmr.msra.gmra.mxu1 %v13523_v33  ;;  %v9061_v35 = vor.u32 %v12477_v44, %v9058_v50 }
 0x25e   :  { %4048 = vmatpush.bf16.msra.mxu3 %v9761_v4  ;;  %4069 = vmatpush.bf16.msrb.mxu1 %v9189_v12  ;;  %v12733_v61 = vld [vmem:[#allocation5 + $0xebc] sm:$0xf]  ;;  %v9573_v27 = vor.u32 %v12605_v55, %v9570_v52 }
 0x25f   :  { %4035 = vmatmul.bf16.vlgmr.msra.gmra.mxu2 %v13515_v9  ;;  %v10082_v2 = vld [vmem:[#allocation5 + $0xef8] sm:$0xf0] }
 0x260   :  { %4083 = vmatpush.bf16.msrb.mxu2 %v9701_v59  ;;  %4056 = vmatpush.bf16.msrb.mxu0 %v8613_v34  ;;  %v12333_v63 = vld [vmem:[#allocation5 + $0x23c] sm:$0xf]  ;;  %v10085_v4 = vor.u32 %v12733_v61, %v10082_v2 }
 0x261   :  { %4049 = vmatmul.bf16.vlgmr.msra.gmra.mxu3 %v13520_v20  ;;  %v8482_v7 = vld [vmem:[#allocation5 + $0x278] sm:$0xf0] }
 0x262   :  { %4097 = vmatpush.bf16.msrb.mxu3 %v10213_v15  ;;  %4070 = vmatpush.bf16.msrb.mxu1 %v9125_v45  ;;  %v12461_v1 = vld [vmem:[#allocation5 + $0x63c] sm:$0xf]  ;;  %v8485_v0 = vor.u32 %v12333_v63, %v8482_v7 }
 0x263   :  { %v8994_v5 = vld [vmem:[#allocation5 + $0x678] sm:$0xf0] }
 0x264   :  { %4084 = vmatpush.bf16.msrb.mxu2 %v9637_v21  ;;  %v12589_v12 = vld [vmem:[#allocation5 + $0xa3c] sm:$0xf]  ;;  %4057 = vmatpush.bf16.msrb.mxu0 %v8549_v43  ;;  %v8997_v15 = vor.u32 %v12461_v1, %v8994_v5 }
 0x265   :  { %v9506_v59 = vld [vmem:[#allocation5 + $0xa78] sm:$0xf0] }
 0x266   :  { %4098 = vmatpush.bf16.msrb.mxu3 %v10149_v51  ;;  %v12717_v60 = vld [vmem:[#allocation5 + $0xe3c] sm:$0xf]  ;;  %4071 = vmatpush.bf16.msrb.mxu1 %v9061_v35  ;;  %v9509_v28 = vor.u32 %v12589_v12, %v9506_v59 }
 0x267   :  { %v10018_v8 = vld [vmem:[#allocation5 + $0xe78] sm:$0xf0] }
 0x268   :  { %4085 = vmatpush.bf16.msrb.mxu2 %v9573_v27  ;;  %v12317_v36 = vld [vmem:[#allocation5 + $0x1bc] sm:$0xf]  ;;  %v10021_v24 = vor.u32 %v12717_v60, %v10018_v8  ;;  %4058 = vmatpush.bf16.msrb.mxu0 %v8485_v0 }
 0x269   :  { %v8418_v32 = vld [vmem:[#allocation5 + $0x1f8] sm:$0xf0] }
 0x26a   :  { %v12445_v17 = vld [vmem:[#allocation5 + $0x5bc] sm:$0xf]  ;;  %4099 = vmatpush.bf16.msrb.mxu3 %v10085_v4  ;;  %v8421_v44 = vor.u32 %v12317_v36, %v8418_v32  ;;  %4072 = vmatpush.bf16.msrb.mxu1 %v8997_v15 }
 0x26b   :  { %v8930_v34 = vld [vmem:[#allocation5 + $0x5f8] sm:$0xf0] }
 0x26c   :  { %v12573_v45 = vld [vmem:[#allocation5 + $0x9bc] sm:$0xf]  ;;  %4086 = vmatpush.bf16.msrb.mxu2 %v9509_v28  ;;  %v8933_v51 = vor.u32 %v12445_v17, %v8930_v34  ;;  %4059 = vmatpush.bf16.msrb.mxu0 %v8421_v44 }
 0x26d   :  { %v9442_v21 = vld [vmem:[#allocation5 + $0x9f8] sm:$0xf0] }
 0x26e   :  { %v12701_v38 = vld [vmem:[#allocation5 + $0xdbc] sm:$0xf]  ;;  %v9445_v50 = vor.u32 %v12573_v45, %v9442_v21  ;;  %4100 = vmatpush.bf16.msrb.mxu3 %v10021_v24  ;;  %4073 = vmatpush.bf16.msrb.mxu1 %v8933_v51 }
 0x26f   :  { %v9954_v49 = vld [vmem:[#allocation5 + $0xdf8] sm:$0xf0] }
 0x270   :  { %v12301_v55 = vld [vmem:[#allocation5 + $0x13c] sm:$0xf]  ;;  %v9957_v2 = vor.u32 %v12701_v38, %v9954_v49  ;;  %4087 = vmatpush.bf16.msrb.mxu2 %v9445_v50 }
 0x271   :  { %v8354_v52 = vld [vmem:[#allocation5 + $0x178] sm:$0xf0] }
 0x272   :  { %v12429_v61 = vld [vmem:[#allocation5 + $0x53c] sm:$0xf]  ;;  %v8357_v1 = vor.u32 %v12301_v55, %v8354_v52  ;;  %4101 = vmatpush.bf16.msrb.mxu3 %v9957_v2  ;;  %v12804_v2 = vld [vmem:[#allocation8 + $0xec] sm:$0xf0] }
 0x273   :  { %v8866_v43 = vld [vmem:[#allocation5 + $0x578] sm:$0xf0] }
 0x274   :  { %v12557_v35 = vld [vmem:[#allocation5 + $0x93c] sm:$0xf]  ;;  %v8869_v4 = vor.u32 %v12429_v61, %v8866_v43  ;;  %4060 = vmatpush.bf16.msrb.mxu0 %v8357_v1  ;;  %v10328_v61 = vld [vmem:[#allocation8 + $0xe0] sm:$0xf] }
 0x275   :  { %v9378_v27 = vld [vmem:[#allocation5 + $0x978] sm:$0xf0]  ;;  %v10456_v43 = vld [vmem:[#allocation8 + $0x1e0] sm:$0xf] }
 0x276   :  { %v12685_v63 = vld [vmem:[#allocation5 + $0xd3c] sm:$0xf]  ;;  %v9381_v5 = vor.u32 %v12557_v35, %v9378_v27  ;;  %4074 = vmatpush.bf16.msrb.mxu1 %v8869_v4  ;;  %v12836_v27 = vld [vmem:[#allocation8 + $0x1ec] sm:$0xf0] }
 0x277   :  { %v9890_v7 = vld [vmem:[#allocation5 + $0xd78] sm:$0xf0] }
 0x278   :  { %v12285_v12 = vld [vmem:[#allocation5 + $0xbc] sm:$0xf]  ;;  %v9893_v8 = vor.u32 %v12685_v63, %v9890_v7  ;;  %4088 = vmatpush.bf16.msrb.mxu2 %v9381_v5  ;;  %v10584_v63 = vld [vmem:[#allocation8 + $0x2e0] sm:$0xf]  ;;  %v12868_v7 = vld [vmem:[#allocation8 + $0x2ec] sm:$0xf0] }
 0x279   :  { %v8290_v59 = vld [vmem:[#allocation5 + $0xf8] sm:$0xf0]  ;;  %v10712_v5 = vld [vmem:[#allocation8 + $0x3e0] sm:$0xf] }
 0x27a   :  { %v12413_v60 = vld [vmem:[#allocation5 + $0x4bc] sm:$0xf]  ;;  %v8293_v17 = vor.u32 %v12285_v12, %v8290_v59  ;;  %4102 = vmatpush.bf16.msrb.mxu3 %v9893_v8  ;;  %v12900_v12 = vld [vmem:[#allocation8 + $0x3ec] sm:$0xf0]  ;;  %v10457_v8 = vor.u32 %v12836_v27, %v10456_v43 }
 0x27b   :  { %v8802_v0 = vld [vmem:[#allocation5 + $0x4f8] sm:$0xf0]  ;;  %v12828_v43 = vld [vmem:[#allocation8 + $0x1ac] sm:$0xf0] }
 0x27c   :  { %v12541_v15 = vld [vmem:[#allocation5 + $0x8bc] sm:$0xf]  ;;  %v8805_v45 = vor.u32 %v12413_v60, %v8802_v0  ;;  %4061 = vmatpush.bf16.msrb.mxu0 %v8293_v17  ;;  %v10329_v60 = vor.u32 %v12804_v2, %v10328_v61  ;;  %v10585_v0 = vor.u32 %v12868_v7, %v10584_v63  ;;  %v10713_v17 = vor.u32 %v12900_v12, %v10712_v5  ;;  %v10424_v61 = vld [vmem:[#allocation8 + $0x1a0] sm:$0xf]  ;;  %v12860_v27 = vld [vmem:[#allocation8 + $0x2ac] sm:$0xf0] }
 0x27d   :  { %v9314_v28 = vld [vmem:[#allocation5 + $0x8f8] sm:$0xf0]  ;;  %v14264_v63 = vperm.slane %v13543_v54, 0  ;;  %v12892_v5 = vld [vmem:[#allocation8 + $0x3ac] sm:$0xf0]  ;;  %v14265_v12 = vperm.slane %v13543_v54, 1 }
 0x27e   :  { %v12669_v36 = vld [vmem:[#allocation5 + $0xcbc] sm:$0xf]  ;;  %v9317_v21 = vor.u32 %v12541_v15, %v9314_v28  ;;  %4075 = vmatpush.bf16.msrb.mxu1 %v8805_v45  ;;  %v10312_v15 = vld [vmem:[#allocation8 + $0xc0] sm:$0xf]  ;;  %v12800_v28 = vld [vmem:[#allocation8 + $0xcc] sm:$0xf0] }
 0x27f   :  { %v9826_v32 = vld [vmem:[#allocation5 + $0xcf8] sm:$0xf0]  ;;  %v12864_v45 = vld [vmem:[#allocation8 + $0x2cc] sm:$0xf0]  ;;  %v3227_v7 = vadd.f32 %v13550_v10, %v14264_v63  ;;  %v10425_v10 = vor.u32 %v12828_v43, %v10424_v61 }
 0x280   :  { %v12269_v24 = vld [vmem:[#allocation5 + $0x3c] sm:$0xf]  ;;  %v9829_v51 = vor.u32 %v12669_v36, %v9826_v32  ;;  %4089 = vmatpush.bf16.msrb.mxu2 %v9317_v21  ;;  %v10440_v36 = vld [vmem:[#allocation8 + $0x1c0] sm:$0xf]  ;;  %v13701_v32 = vpop.f32.mrf.mxu0  ;;  %v13703_v21 = vpop.f32.mrf.mxu1  ;;  %v12788_v61 = vld [vmem:[#allocation8 + $0x6c] sm:$0xf0] }
 0x281   :  { %v8226_v34 = vld [vmem:[#allocation5 + $0x78] sm:$0xf0]  ;;  %v12852_v63 = vld [vmem:[#allocation8 + $0x26c] sm:$0xf0] }
 0x282   :  { %v12397_v38 = vld [vmem:[#allocation5 + $0x43c] sm:$0xf]  ;;  %v8229_v35 = vor.u32 %v12269_v24, %v8226_v34  ;;  %4103 = vmatpush.bf16.msrb.mxu3 %v9829_v51  ;;  %v12832_v24 = vld [vmem:[#allocation8 + $0x1cc] sm:$0xf0]  ;;  %v10568_v34 = vld [vmem:[#allocation8 + $0x2c0] sm:$0xf] }
 0x283   :  { %v8738_v49 = vld [vmem:[#allocation5 + $0x478] sm:$0xf0]  ;;  %v10441_v51 = vor.u32 %v12832_v24, %v10440_v36  ;;  %v12824_v36 = vld [vmem:[#allocation8 + $0x18c] sm:$0xf0]  ;;  %v3241_v24 = vadd.f32 %v13552_v22, %v3227_v7  ;;  %v14267_v22 = vperm.slane %v13543_v54, 3 }
 0x284   :  { %v12525_v44 = vld [vmem:[#allocation5 + $0x83c] sm:$0xf]  ;;  %v8741_v1 = vor.u32 %v12397_v38, %v8738_v49  ;;  %4062 = vmatpush.bf16.msrb.mxu0 %v8229_v35  ;;  %v10696_v38 = vld [vmem:[#allocation8 + $0x3c0] sm:$0xf]  ;;  %v12896_v49 = vld [vmem:[#allocation8 + $0x3cc] sm:$0xf0] }
 0x285   :  { %v9250_v50 = vld [vmem:[#allocation5 + $0x878] sm:$0xf0]  ;;  %v10697_v2 = vor.u32 %v12896_v49, %v10696_v38  ;;  %v10552_v35 = vld [vmem:[#allocation8 + $0x2a0] sm:$0xf]  ;;  %v3395_v43 = vadd.f32 %v13601_v6, %v14267_v22  ;;  %v3255_v7 = vadd.f32 %v13558_v31, %v3241_v24  ;;  %v12880_v24 = vld [vmem:[#allocation8 + $0x34c] sm:$0xf0] }
 0x286   :  { %v12653_v55 = vld [vmem:[#allocation5 + $0xc3c] sm:$0xf]  ;;  %v9253_v4 = vor.u32 %v12525_v44, %v9250_v50  ;;  %4076 = vmatpush.bf16.msrb.mxu1 %v8741_v1  ;;  %v10313_v44 = vor.u32 %v12800_v28, %v10312_v15  ;;  %v10569_v50 = vor.u32 %v12864_v45, %v10568_v34  ;;  %v13709_v1 = vpop.f32.mrf.mxu2  ;;  %v10408_v15 = vld [vmem:[#allocation8 + $0x180] sm:$0xf]  ;;  %v12888_v45 = vld [vmem:[#allocation8 + $0x38c] sm:$0xf0] }
 0x287   :  { %v9762_v52 = vld [vmem:[#allocation5 + $0xc78] sm:$0xf0]  ;;  %4063 = vmatmul.bf16.vlgmr.msrb.gmra.mxu0 %v13517_v16  ;;  %v3283_v16 = vadd.f32 %v13567_v11, %v14265_v12  ;;  %v12856_v11 = vld [vmem:[#allocation8 + $0x28c] sm:$0xf0]  ;;  %v3409_v31 = vadd.f32 %v13603_v23, %v3395_v43  ;;  %v4111_v22 = vmax.f32 %v13548_v48, 0.0 }
 0x288   :  { %v9765_v59 = vor.u32 %v12653_v55, %v9762_v52  ;;  %4090 = vmatpush.bf16.msrb.mxu2 %v9253_v4  ;;  %7241 = vmatpush.bf16.msra.mxu0 %v10329_v60  ;;  %v10296_v55 = vld [vmem:[#allocation8 + $0xa0] sm:$0xf]  ;;  %v12796_v52 = vld [vmem:[#allocation8 + $0xac] sm:$0xf0]  ;;  %v13722_v34 = vpop.f32.mrf.mxu1 }
 0x289   :  { %4077 = vmatmul.bf16.vlgmr.msrb.gmra.mxu1 %v13523_v33  ;;  %v10680_v4 = vld [vmem:[#allocation8 + $0x3a0] sm:$0xf]  ;;  %v10297_v60 = vor.u32 %v12796_v52, %v10296_v55  ;;  %v12792_v33 = vld [vmem:[#allocation8 + $0x8c] sm:$0xf0]  ;;  %v3297_v38 = vadd.f32 %v13569_v25, %v3283_v16 }
 0x28a   :  { %4104 = vmatpush.bf16.msrb.mxu3 %v9765_v59  ;;  %7255 = vmatpush.bf16.msra.mxu1 %v10457_v8  ;;  %v13716_v59 = vpop.f32.mrf.mxu3  ;;  %v10553_v8 = vor.u32 %v12860_v27, %v10552_v35  ;;  %v10681_v28 = vor.u32 %v12892_v5, %v10680_v4  ;;  %v10264_v52 = vld [vmem:[#allocation8 + $0x60] sm:$0xf]  ;;  %v12820_v25 = vld [vmem:[#allocation8 + $0x16c] sm:$0xf0] }
 0x28b   :  { %4091 = vmatmul.bf16.vlgmr.msrb.gmra.mxu2 %v13515_v9  ;;  %v13719_v9 = vpop.f32.mrf.mxu0  ;;  %v10520_v27 = vld [vmem:[#allocation8 + $0x260] sm:$0xf]  ;;  %v12884_v5 = vld [vmem:[#allocation8 + $0x36c] sm:$0xf0]  ;;  %v3311_v12 = vadd.f32 %v13575_v37, %v3297_v38 }
 0x28c   :  { %7269 = vmatpush.bf16.msra.mxu2 %v10585_v0  ;;  %7242 = vmatpush.bf16.msra.mxu0 %v10313_v44  ;;  %v10280_v0 = vld [vmem:[#allocation8 + $0x80] sm:$0xf]  ;;  %v14266_v44 = vperm.slane %v13543_v54, 2  ;;  %v12848_v37 = vld [vmem:[#allocation8 + $0x24c] sm:$0xf0] }
 0x28d   :  { %4105 = vmatmul.bf16.vlgmr.msrb.gmra.mxu3 %v13520_v20  ;;  %v10664_v20 = vld [vmem:[#allocation8 + $0x380] sm:$0xf]  ;;  %v10281_v49 = vor.u32 %v12792_v33, %v10280_v0  ;;  %v12784_v0 = vld [vmem:[#allocation8 + $0x4c] sm:$0xf0] }
 0x28e   :  { %7283 = vmatpush.bf16.msra.mxu3 %v10713_v17  ;;  %7256 = vmatpush.bf16.msra.mxu1 %v10441_v51  ;;  %v10536_v17 = vld [vmem:[#allocation8 + $0x280] sm:$0xf]  ;;  %v3339_v51 = vadd.f32 %v13584_v30, %v14266_v44  ;;  %v10665_v35 = vor.u32 %v12888_v45, %v10664_v20  ;;  %v13732_v4 = vpop.f32.mrf.mxu2 }
 0x28f   :  { %v10537_v55 = vor.u32 %v12856_v11, %v10536_v17  ;;  %v10648_v30 = vld [vmem:[#allocation8 + $0x360] sm:$0xf]  ;;  %v13740_v17 = vadd.f32 %v13561_v40, %v3255_v7  ;;  %v12780_v40 = vld [vmem:[#allocation8 + $0x2c] sm:$0xf0] }
 0x290   :  { %7270 = vmatpush.bf16.msra.mxu2 %v10569_v50  ;;  %7243 = vmatpush.bf16.msra.mxu0 %v10297_v60  ;;  %v10409_v50 = vor.u32 %v12824_v36, %v10408_v15  ;;  %v10265_v60 = vor.u32 %v12788_v61, %v10264_v52  ;;  %v3353_v54 = vadd.f32 %v13586_v47, %v3339_v51  ;;  %v10376_v33 = vld [vmem:[#allocation8 + $0x140] sm:$0xf]  ;;  %v13748_v23 = vpop.f32.mrf.mxu1  ;;  %v12812_v52 = vld [vmem:[#allocation8 + $0x12c] sm:$0xf0] }
 0x291   :  { %v10649_v15 = vor.u32 %v12884_v5, %v10648_v30  ;;  %v10504_v36 = vld [vmem:[#allocation8 + $0x240] sm:$0xf]  ;;  %v13743_v47 = vadd.f32 %v13578_v46, %v3311_v12  ;;  %v12776_v30 = vld [vmem:[#allocation8 + $0xc] sm:$0xf0] }
 0x292   :  { %7284 = vmatpush.bf16.msra.mxu3 %v10697_v2  ;;  %7257 = vmatpush.bf16.msra.mxu1 %v10425_v10  ;;  %v10392_v2 = vld [vmem:[#allocation8 + $0x160] sm:$0xf]  ;;  %v13735_v16 = vpop.f32.mrf.mxu3  ;;  %v10521_v10 = vor.u32 %v12852_v63, %v10520_v27  ;;  %v3367_v38 = vadd.f32 %v13592_v58, %v3353_v54  ;;  %v10505_v44 = vor.u32 %v12848_v37, %v10504_v36  ;;  %v4127_v58 = vmax.f32 %v13740_v17, 0.0 }
 0x293   :  { %v10393_v6 = vor.u32 %v12820_v25, %v10392_v2  ;;  %v10632_v11 = vld [vmem:[#allocation8 + $0x340] sm:$0xf]  ;;  %v13745_v20 = vpop.f32.mrf.mxu0  ;;  %v12844_v2 = vld [vmem:[#allocation8 + $0x22c] sm:$0xf0]  ;;  %v4112_v25 = vmax.f32 %v13565_v14, 0.0  ;;  %v4128_v27 = vmax.f32 %v13743_v47, 0.0 }
 0x294   :  { %7271 = vmatpush.bf16.msra.mxu2 %v10553_v8  ;;  %7244 = vmatpush.bf16.msra.mxu0 %v10281_v49  ;;  %v10248_v8 = vld [vmem:[#allocation8 + $0x40] sm:$0xf]  ;;  %v10633_v46 = vor.u32 %v12880_v24, %v10632_v11  ;;  %v12964_v24 = vld [vmem:[#allocation8 + $0x5ec] sm:$0xf0] }
 0x295   :  { %v10249_v45 = vor.u32 %v12784_v0, %v10248_v8  ;;  %v10232_v51 = vld [vmem:[#allocation8 + $0x20] sm:$0xf] }
 0x296   :  { %7285 = vmatpush.bf16.msra.mxu3 %v10681_v28  ;;  %7258 = vmatpush.bf16.msra.mxu1 %v10409_v50  ;;  %v12816_v28 = vld [vmem:[#allocation8 + $0x14c] sm:$0xf0]  ;;  %v10360_v50 = vld [vmem:[#allocation8 + $0x120] sm:$0xf]  ;;  %v10233_v63 = vor.u32 %v12780_v40, %v10232_v51  ;;  %v13756_v5 = vpop.f32.mrf.mxu2 }
 0x297   :  { %v10377_v49 = vor.u32 %v12816_v28, %v10376_v33  ;;  %v10488_v61 = vld [vmem:[#allocation8 + $0x220] sm:$0xf]  ;;  %v10361_v12 = vor.u32 %v12812_v52, %v10360_v50  ;;  %v12840_v33 = vld [vmem:[#allocation8 + $0x20c] sm:$0xf0] }
 0x298   :  { %7272 = vmatpush.bf16.msra.mxu2 %v10537_v55  ;;  %7245 = vmatpush.bf16.msra.mxu0 %v10265_v60  ;;  %v3423_v55 = vadd.f32 %v13609_v41, %v3409_v31  ;;  %v10616_v43 = vld [vmem:[#allocation8 + $0x320] sm:$0xf]  ;;  %v3381_v41 = vadd.f32 %v13595_v3, %v3367_v38  ;;  %v10489_v60 = vor.u32 %v12844_v2, %v10488_v61  ;;  %v12932_v3 = vld [vmem:[#allocation8 + $0x4ec] sm:$0xf0]  ;;  %v4113_v38 = vmax.f32 %v13582_v26, 0.0 }
 0x299   :  { %v10216_v7 = vld [vmem:[#allocation8] sm:$0xf]  ;;  %v13028_v50 = vld [vmem:[#allocation8 + $0x7ec] sm:$0xf0] }
 0x29a   :  { %7286 = vmatpush.bf16.msra.mxu3 %v10665_v35  ;;  %7259 = vmatpush.bf16.msra.mxu1 %v10393_v6  ;;  %v12876_v35 = vld [vmem:[#allocation8 + $0x32c] sm:$0xf0]  ;;  %v10344_v54 = vld [vmem:[#allocation8 + $0x100] sm:$0xf]  ;;  %v3437_v8 = vadd.f32 %v13614_v53, %v3423_v55  ;;  %v13759_v14 = vpop.f32.mrf.mxu3  ;;  %v10217_v11 = vor.u32 %v12776_v30, %v10216_v7  ;;  %v4129_v53 = vmax.f32 %v3381_v41, 0.0  ;;  %v4114_v55 = vmax.f32 %v13599_v56, 0.0 }
 0x29b   :  { %v12808_v6 = vld [vmem:[#allocation8 + $0x10c] sm:$0xf0]  ;;  %v10617_v0 = vor.u32 %v12876_v35, %v10616_v43  ;;  %v10600_v31 = vld [vmem:[#allocation8 + $0x300] sm:$0xf]  ;;  %v13761_v37 = vpop.f32.mrf.mxu0 }
 0x29c   :  { %7273 = vmatpush.bf16.msra.mxu2 %v10521_v10  ;;  %7246 = vmatpush.bf16.msra.mxu0 %v10249_v45  ;;  %v10472_v10 = vld [vmem:[#allocation8 + $0x200] sm:$0xf]  ;;  %v12996_v45 = vld [vmem:[#allocation8 + $0x6ec] sm:$0xf0] }
 0x29d   :  { %v10840_v28 = vld [vmem:[#allocation8 + $0x4e0] sm:$0xf]  ;;  %v10473_v51 = vor.u32 %v12840_v33, %v10472_v10  ;;  %v12960_v30 = vld [vmem:[#allocation8 + $0x5cc] sm:$0xf0]  ;;  %v13775_v10 = vpack.c.bf16 %v4128_v27, %v4112_v25  ;;  %v13779_v33 = vpack.c.bf16 %v4129_v53, %v4113_v38  ;;  %v14272_v27 = vperm.slane %v13611_v42, 4 }
 0x29e   :  { %7287 = vmatpush.bf16.msra.mxu3 %v10649_v15  ;;  %7260 = vmatpush.bf16.msra.mxu1 %v10377_v49  ;;  %v12872_v15 = vld [vmem:[#allocation8 + $0x30c] sm:$0xf0]  ;;  %v10968_v36 = vld [vmem:[#allocation8 + $0x5e0] sm:$0xf]  ;;  %v13764_v49 = vpop.f32.mrf.mxu1  ;;  %v10841_v61 = vor.u32 %v12932_v3, %v10840_v28 }
 0x29f   :  { %v11096_v47 = vld [vmem:[#allocation8 + $0x6e0] sm:$0xf]  ;;  %v10601_v52 = vor.u32 %v12872_v15, %v10600_v31  ;;  %v10969_v2 = vor.u32 %v12964_v24, %v10968_v36  ;;  %v13024_v56 = vld [vmem:[#allocation8 + $0x7cc] sm:$0xf0]  ;;  %14269 = vst [vmem:[#allocation35_spill] sm:$0xff] %v13775_v10 }
 0x2a0   :  { %7274 = vmatpush.bf16.msra.mxu2 %v10505_v44  ;;  %7247 = vmatpush.bf16.msra.mxu0 %v10233_v63  ;;  %v10345_v44 = vor.u32 %v12808_v6, %v10344_v54  ;;  %v11224_v40 = vld [vmem:[#allocation8 + $0x7e0] sm:$0xf]  ;;  %v11097_v43 = vor.u32 %v12996_v45, %v11096_v47  ;;  %v12928_v63 = vld [vmem:[#allocation8 + $0x4cc] sm:$0xf0]  ;;  %v13773_v6 = vpack.c.bf16 %v4127_v58, %v4111_v22  ;;  %v14273_v45 = vperm.slane %v13611_v42, 5 }
 0x2a1   :  { %v10824_v35 = vld [vmem:[#allocation8 + $0x4c0] sm:$0xf]  ;;  %v11225_v7 = vor.u32 %v13028_v50, %v11224_v40  ;;  %14270 = vst [vmem:[#allocation36_spill] sm:$0xff] %v13779_v33  ;;  %v12924_v3 = vld [vmem:[#allocation8 + $0x4ac] sm:$0xf0] }
 0x2a2   :  { %7288 = vmatpush.bf16.msra.mxu3 %v10633_v46  ;;  %7261 = vmatpush.bf16.msra.mxu1 %v10361_v12  ;;  %v4130_v46 = vmax.f32 %v3437_v8, 0.0  ;;  %v10952_v26 = vld [vmem:[#allocation8 + $0x5c0] sm:$0xf]  ;;  %v12992_v12 = vld [vmem:[#allocation8 + $0x6cc] sm:$0xf0]  ;;  %14268 = vst [vmem:[#allocation34_spill] sm:$0xff] %v13773_v6  ;;  %v13777_v8 = vpop.f32.mrf.mxu3  ;;  %v3507_v38 = vadd.f32 %v13637_v57, %v14273_v45 }
 0x2a3   :  { %v11080_v41 = vld [vmem:[#allocation8 + $0x6c0] sm:$0xf]  ;;  %v10953_v31 = vor.u32 %v12960_v30, %v10952_v26  ;;  %v12956_v22 = vld [vmem:[#allocation8 + $0x5ac] sm:$0xf0] }
 0x2a4   :  { %7275 = vmatpush.bf16.msra.mxu2 %v10489_v60  ;;  %7248 = vmatpush.bf16.msra.mxu0 %v10217_v11  ;;  %v13767_v60 = vpop.f32.mrf.mxu2  ;;  %v11208_v54 = vld [vmem:[#allocation8 + $0x7c0] sm:$0xf]  ;;  %v11081_v15 = vor.u32 %v12992_v12, %v11080_v41  ;;  %v13781_v36 = vpack.c.bf16 %v4130_v46, %v4114_v55  ;;  %v12988_v25 = vld [vmem:[#allocation8 + $0x6ac] sm:$0xf0]  ;;  %v3451_v11 = vadd.f32 %v13620_v18, %v14272_v27  ;;  %v14274_v12 = vperm.slane %v13611_v42, 6 }
 0x2a5   :  { %v10808_v28 = vld [vmem:[#allocation8 + $0x4a0] sm:$0xf]  ;;  %v11209_v17 = vor.u32 %v13024_v56, %v11208_v54  ;;  %v13020_v47 = vld [vmem:[#allocation8 + $0x7ac] sm:$0xf0]  ;;  %v3521_v30 = vadd.f32 %v13639_v13, %v3507_v38 }
 0x2a6   :  { %7289 = vmatpush.bf16.msra.mxu3 %v10617_v0  ;;  %7262 = vmatpush.bf16.msra.mxu1 %v10345_v44  ;;  %v10825_v0 = vor.u32 %v12928_v63, %v10824_v35  ;;  %v10936_v48 = vld [vmem:[#allocation8 + $0x5a0] sm:$0xf]  ;;  %14271 = vst [vmem:[#allocation37_spill] sm:$0xff] %v13781_v36  ;;  %v13299_v53 = vld [vmem:[#allocation7] sm:$0xff]  ;;  %v10809_v40 = vor.u32 %v12924_v3, %v10808_v28  ;;  %v13795_v50 = vpop.f32.mrf.mxu1 }
 0x2a7   :  { %7249 = vmatmul.bf16.vlgmr.msra.gmra.mxu0 %v13773_v6  ;;  %v11064_v58 = vld [vmem:[#allocation8 + $0x6a0] sm:$0xf]  ;;  %v630_v44 = vperm.slane %v13299_v53, 7  ;;  %v10937_v18 = vor.u32 %v12956_v22, %v10936_v48  ;;  %v12952_v57 = vld [vmem:[#allocation8 + $0x58c] sm:$0xf0]  ;;  %v3465_v63 = vadd.f32 %v13622_v39, %v3451_v11  ;;  %v3563_v54 = vadd.f32 %v13658_v62, %v14274_v12 }
 0x2a8   :  { %7276 = vmatpush.bf16.msra.mxu2 %v10473_v51  ;;  %7297 = vmatpush.bf16.msrb.mxu0 %v10841_v61  ;;  %v11192_v24 = vld [vmem:[#allocation8 + $0x7a0] sm:$0xf]  ;;  %v13792_v51 = vpop.f32.mrf.mxu0  ;;  %v11065_v55 = vor.u32 %v12988_v25, %v11064_v58  ;;  %v12984_v35 = vld [vmem:[#allocation8 + $0x68c] sm:$0xf0] }
 0x2a9   :  { %7263 = vmatmul.bf16.vlgmr.msra.gmra.mxu1 %v13775_v10  ;;  %v10792_v46 = vld [vmem:[#allocation8 + $0x480] sm:$0xf]  ;;  %v12916_v28 = vld [vmem:[#allocation8 + $0x46c] sm:$0xf0]  ;;  %v3617_v39 = vadd.f32 %v13666_v19, %v630_v44  ;;  %v3619_v48 = vadd.f32 %v13674_v29, %v630_v44 }
 0x2aa   :  { %7290 = vmatpush.bf16.msra.mxu3 %v10601_v52  ;;  %7311 = vmatpush.bf16.msrb.mxu1 %v10969_v2  ;;  %v12920_v52 = vld [vmem:[#allocation8 + $0x48c] sm:$0xf0]  ;;  %v10920_v61 = vld [vmem:[#allocation8 + $0x580] sm:$0xf]  ;;  %v11193_v2 = vor.u32 %v13020_v47, %v11192_v24  ;;  %v13806_v13 = vpop.f32.mrf.mxu3  ;;  %v14276_v24 = vld [vmem:[#allocation20_spill] sm:$0xff] }
 0x2ab   :  { %7277 = vmatmul.bf16.vlgmr.msra.gmra.mxu2 %v13779_v33  ;;  %v11176_v26 = vld [vmem:[#allocation8 + $0x780] sm:$0xf]  ;;  %v10793_v41 = vor.u32 %v12920_v52, %v10792_v46  ;;  %v12948_v42 = vld [vmem:[#allocation8 + $0x56c] sm:$0xf0]  ;;  %v3535_v47 = vadd.f32 %v14276_v24, %v3521_v30  ;;  %v14278_v52 = vld [vmem:[#allocation26_spill] sm:$0xff] }
 0x2ac   :  { %7325 = vmatpush.bf16.msrb.mxu2 %v11097_v43  ;;  %7298 = vmatpush.bf16.msrb.mxu0 %v10825_v0  ;;  %v11048_v43 = vld [vmem:[#allocation8 + $0x680] sm:$0xf]  ;;  %v13802_v56 = vpop.f32.mrf.mxu2  ;;  %v10921_v0 = vor.u32 %v12952_v57, %v10920_v61  ;;  %v12980_v62 = vld [vmem:[#allocation8 + $0x66c] sm:$0xf0]  ;;  %v3631_v61 = vadd.f32 %v14278_v52, %v3617_v39 }
 0x2ad   :  { %7291 = vmatmul.bf16.vlgmr.msra.gmra.mxu3 %v13781_v36  ;;  %v10904_v3 = vld [vmem:[#allocation8 + $0x560] sm:$0xf]  ;;  %v14275_v58 = vld [vmem:[#allocation17_spill] sm:$0xff] }
 0x2ae   :  { %7339 = vmatpush.bf16.msrb.mxu3 %v11225_v7  ;;  %7312 = vmatpush.bf16.msrb.mxu1 %v10953_v31  ;;  %v13016_v7 = vld [vmem:[#allocation8 + $0x78c] sm:$0xf0]  ;;  %v11049_v31 = vor.u32 %v12984_v35, %v11048_v43  ;;  %v11032_v22 = vld [vmem:[#allocation8 + $0x660] sm:$0xf]  ;;  %v3479_v25 = vadd.f32 %v14275_v58, %v3465_v63  ;;  %v13813_v29 = vpop.f32.mrf.mxu1  ;;  %v10905_v44 = vor.u32 %v12948_v42, %v10904_v3 }
 0x2af   :  { %v11160_v27 = vld [vmem:[#allocation8 + $0x760] sm:$0xf]  ;;  %v13012_v11 = vld [vmem:[#allocation8 + $0x76c] sm:$0xf0] }
 0x2b0   :  { %7326 = vmatpush.bf16.msrb.mxu2 %v11081_v15  ;;  %7299 = vmatpush.bf16.msrb.mxu0 %v10809_v40  ;;  %v10776_v15 = vld [vmem:[#allocation8 + $0x460] sm:$0xf]  ;;  %v13810_v45 = vpop.f32.mrf.mxu0  ;;  %v11033_v40 = vor.u32 %v12980_v62, %v11032_v22  ;;  %v11161_v43 = vor.u32 %v13012_v11, %v11160_v27  ;;  %v12944_v35 = vld [vmem:[#allocation8 + $0x54c] sm:$0xf0] }
 0x2b1   :  { %v10777_v38 = vor.u32 %v12916_v28, %v10776_v15  ;;  %v14277_v19 = vld [vmem:[#allocation23_spill] sm:$0xff]  ;;  %v13008_v12 = vld [vmem:[#allocation8 + $0x74c] sm:$0xf0]  ;;  %v14282_v15 = vld [vmem:[#allocation24_spill] sm:$0xff] }
 0x2b2   :  { %7340 = vmatpush.bf16.msrb.mxu3 %v11209_v17  ;;  %7313 = vmatpush.bf16.msrb.mxu1 %v10937_v18  ;;  %v11177_v17 = vor.u32 %v13016_v7, %v11176_v26  ;;  %v3577_v53 = vadd.f32 %v14277_v19, %v3563_v54  ;;  %v10760_v18 = vld [vmem:[#allocation8 + $0x440] sm:$0xf]  ;;  %v12976_v26 = vld [vmem:[#allocation8 + $0x64c] sm:$0xf0]  ;;  %v14280_v7 = vld [vmem:[#allocation18_spill] sm:$0xff]  ;;  %v13828_v11 = vpop.f32.mrf.mxu3 }
 0x2b3   :  { %v10888_v46 = vld [vmem:[#allocation8 + $0x540] sm:$0xf]  ;;  %v13818_v30 = vadd.f32 %v14280_v7, %v3479_v25  ;;  %v14281_v54 = vld [vmem:[#allocation21_spill] sm:$0xff] }
 0x2b4   :  { %7327 = vmatpush.bf16.msrb.mxu2 %v11065_v55  ;;  %7300 = vmatpush.bf16.msrb.mxu0 %v10793_v41  ;;  %v12912_v55 = vld [vmem:[#allocation8 + $0x44c] sm:$0xf0]  ;;  %v11016_v63 = vld [vmem:[#allocation8 + $0x640] sm:$0xf]  ;;  %v3591_v28 = vadd.f32 %v14282_v15, %v3577_v53  ;;  %v13824_v3 = vpop.f32.mrf.mxu2  ;;  %v10889_v39 = vor.u32 %v12944_v35, %v10888_v46  ;;  %v14285_v53 = vld [vmem:[#allocation16_spill] sm:$0xff] }
 0x2b5   :  { %v11144_v41 = vld [vmem:[#allocation8 + $0x740] sm:$0xf]  ;;  %v12908_v42 = vld [vmem:[#allocation8 + $0x42c] sm:$0xf0]  ;;  %v14288_v15 = vld [vmem:[#allocation28_spill] sm:$0xff] }
 0x2b6   :  { %7341 = vmatpush.bf16.msrb.mxu3 %v11193_v2  ;;  %7314 = vmatpush.bf16.msrb.mxu1 %v10921_v0  ;;  %v14279_v2 = vld [vmem:[#allocation29_spill] sm:$0xff]  ;;  %v13821_v0 = vadd.f32 %v14281_v54, %v3535_v47  ;;  %v10872_v22 = vld [vmem:[#allocation8 + $0x520] sm:$0xf]  ;;  %v11145_v24 = vor.u32 %v13008_v12, %v11144_v41 }
 0x2b7   :  { %v3633_v57 = vadd.f32 %v14279_v2, %v3619_v48  ;;  %v11017_v48 = vor.u32 %v12976_v26, %v11016_v63  ;;  %v14283_v62 = vld [vmem:[#allocation27_spill] sm:$0xff]  ;;  %v12940_v47 = vld [vmem:[#allocation8 + $0x52c] sm:$0xf0] }
 0x2b8   :  { %7328 = vmatpush.bf16.msrb.mxu2 %v11049_v31  ;;  %7301 = vmatpush.bf16.msrb.mxu0 %v10777_v38  ;;  %v10761_v31 = vor.u32 %v12912_v55, %v10760_v18  ;;  %v3645_v58 = vadd.f32 %v14283_v62, %v3631_v61  ;;  %v14284_v25 = vld [vmem:[#allocation31_spill] sm:$0xff]  ;;  %v12972_v19 = vld [vmem:[#allocation8 + $0x62c] sm:$0xf0]  ;;  %v4132_v2 = vmax.f32 %v13821_v0, 0.0  ;;  %v10873_v26 = vor.u32 %v12940_v47, %v10872_v22  ;;  %v13843_v0 = vpop.f32.mrf.mxu0 }
 0x2b9   :  { %v3647_v27 = vadd.f32 %v14284_v25, %v3633_v57  ;;  %v11000_v38 = vld [vmem:[#allocation8 + $0x620] sm:$0xf]  ;;  %v13004_v55 = vld [vmem:[#allocation8 + $0x72c] sm:$0xf0]  ;;  %v14289_v25 = vld [vmem:[#allocation32_spill] sm:$0xff] }
 0x2ba   :  { %7342 = vmatpush.bf16.msrb.mxu3 %v11177_v17  ;;  %7315 = vmatpush.bf16.msrb.mxu1 %v10905_v44  ;;  %v10744_v17 = vld [vmem:[#allocation8 + $0x420] sm:$0xf]  ;;  %v12904_v35 = vld [vmem:[#allocation8 + $0x40c] sm:$0xf0]  ;;  %v11001_v7 = vor.u32 %v12972_v19, %v11000_v38  ;;  %v13838_v62 = vadd.f32 %v14288_v15, %v3645_v58  ;;  %v14290_v15 = vld [vmem:[#allocation22_spill] sm:$0xff] }
 0x2bb   :  { %v14286_v46 = vld [vmem:[#allocation19_spill] sm:$0xff]  ;;  %v10745_v61 = vor.u32 %v12908_v42, %v10744_v17  ;;  %v14287_v63 = vld [vmem:[#allocation25_spill] sm:$0xff]  ;;  %v13841_v52 = vadd.f32 %v14289_v25, %v3647_v27  ;;  %v4117_v27 = vmax.f32 %v14290_v15, 0.0 }
 0x2bc   :  { %7329 = vmatpush.bf16.msrb.mxu2 %v11033_v40  ;;  %v11128_v40 = vld [vmem:[#allocation8 + $0x720] sm:$0xf]  ;;  %7302 = vmatpush.bf16.msrb.mxu0 %v10761_v31  ;;  %v12936_v12 = vld [vmem:[#allocation8 + $0x50c] sm:$0xf0]  ;;  %v4118_v18 = vmax.f32 %v13838_v62, 0.0  ;;  %v13855_v62 = vld [vmem:[#allocation7 + $0x8] sm:$0xff] }
 0x2bd   :  { %v10728_v57 = vld [vmem:[#allocation8 + $0x400] sm:$0xf]  ;;  %v11129_v31 = vor.u32 %v13004_v55, %v11128_v40  ;;  %v12968_v17 = vld [vmem:[#allocation8 + $0x60c] sm:$0xf0]  ;;  %v4134_v36 = vmax.f32 %v13841_v52, 0.0  ;;  %v632_v52 = vperm.slane %v13855_v62, 1 }
 0x2be   :  { %7343 = vmatpush.bf16.msrb.mxu3 %v11161_v43  ;;  %v13835_v43 = vadd.f32 %v14287_v63, %v3591_v28  ;;  %7316 = vmatpush.bf16.msrb.mxu1 %v10889_v39  ;;  %v10856_v41 = vld [vmem:[#allocation8 + $0x500] sm:$0xf]  ;;  %v13000_v42 = vld [vmem:[#allocation8 + $0x70c] sm:$0xf0]  ;;  %v13845_v39 = vpop.f32.mrf.mxu1  ;;  %v10729_v38 = vor.u32 %v12904_v35, %v10728_v57  ;;  %v13851_v35 = vpop.f32.mrf.mxu2 }
 0x2bf   :  { %v10984_v54 = vld [vmem:[#allocation8 + $0x600] sm:$0xf]  ;;  %v13060_v22 = vld [vmem:[#allocation8 + $0x8ec] sm:$0xf0] }
 0x2c0   :  { %7330 = vmatpush.bf16.msrb.mxu2 %v11017_v48  ;;  %v11112_v28 = vld [vmem:[#allocation8 + $0x700] sm:$0xf]  ;;  %7303 = vmatpush.bf16.msrb.mxu0 %v10745_v61  ;;  %v13092_v19 = vld [vmem:[#allocation8 + $0x9ec] sm:$0xf0]  ;;  %v4133_v25 = vmax.f32 %v13835_v43, 0.0  ;;  %v10985_v40 = vor.u32 %v12968_v17, %v10984_v54 }
 0x2c1   :  { %v11352_v48 = vld [vmem:[#allocation8 + $0x8e0] sm:$0xf]  ;;  %v13124_v63 = vld [vmem:[#allocation8 + $0xaec] sm:$0xf0]  ;;  %v11113_v61 = vor.u32 %v13000_v42, %v11112_v28  ;;  %v14291_v28 = vmax.f32 %v14285_v53, 0.0  ;;  %v14292_v42 = vmax.f32 %v13818_v30, 0.0 }
 0x2c2   :  { %7344 = vmatpush.bf16.msrb.mxu3 %v11145_v24  ;;  %v11480_v47 = vld [vmem:[#allocation8 + $0x9e0] sm:$0xf]  ;;  %7317 = vmatpush.bf16.msrb.mxu1 %v10873_v26  ;;  %v10857_v24 = vor.u32 %v12936_v12, %v10856_v41  ;;  %v13156_v44 = vld [vmem:[#allocation8 + $0xbec] sm:$0xf0]  ;;  %v11353_v57 = vor.u32 %v13060_v22, %v11352_v48  ;;  %v13853_v26 = vpop.f32.mrf.mxu3  ;;  %v14293_v22 = vmax.f32 %v14286_v46, 0.0 }
 0x2c3   :  { %v11608_v58 = vld [vmem:[#allocation8 + $0xae0] sm:$0xf]  ;;  %v11481_v33 = vor.u32 %v13092_v19, %v11480_v47  ;;  %v13056_v6 = vld [vmem:[#allocation8 + $0x8cc] sm:$0xf0]  ;;  %v13862_v48 = vpack.c.bf16 %v14292_v42, %v14291_v28  ;;  %v13868_v47 = vpop.f32.mrf.mxu0  ;;  %v13870_v19 = vpack.c.bf16 %v4133_v25, %v4117_v27  ;;  %v14294_v27 = vld [vmem:[#allocation30_spill] sm:$0xff] }
 0x2c4   :  { %7331 = vmatpush.bf16.msrb.mxu2 %v11001_v7  ;;  %v11736_v55 = vld [vmem:[#allocation8 + $0xbe0] sm:$0xf]  ;;  %v11609_v10 = vor.u32 %v13124_v63, %v11608_v58  ;;  %7304 = vmatpush.bf16.msrb.mxu0 %v10729_v38  ;;  %v13088_v41 = vld [vmem:[#allocation8 + $0x9cc] sm:$0xf0]  ;;  %v14295_v25 = vperm.slane %v14294_v27, 0 }
 0x2c5   :  { %v11336_v15 = vld [vmem:[#allocation8 + $0x8c0] sm:$0xf]  ;;  %v11737_v7 = vor.u32 %v13156_v44, %v11736_v55  ;;  %v13120_v54 = vld [vmem:[#allocation8 + $0xacc] sm:$0xf0]  ;;  %v13866_v44 = vpack.c.bf16 %v4132_v2, %v14293_v22  ;;  %v13874_v55 = vpack.c.bf16 %v4134_v36, %v4118_v18  ;;  %v3731_v18 = vadd.f32 %v13745_v20, %v632_v52 }
 0x2c6   :  { %7345 = vmatpush.bf16.msrb.mxu3 %v11129_v31  ;;  %v11464_v43 = vld [vmem:[#allocation8 + $0x9c0] sm:$0xf]  ;;  %7318 = vmatpush.bf16.msrb.mxu1 %v10857_v24  ;;  %v13152_v17 = vld [vmem:[#allocation8 + $0xbcc] sm:$0xf0]  ;;  %v11337_v38 = vor.u32 %v13056_v6, %v11336_v15  ;;  %v13872_v53 = vpop.f32.mrf.mxu1  ;;  %v633_v15 = vperm.slane %v13855_v62, 2 }
 0x2c7   :  { %v11592_v12 = vld [vmem:[#allocation8 + $0xac0] sm:$0xf]  ;;  %v11465_v58 = vor.u32 %v13088_v41, %v11464_v43  ;;  %v13052_v24 = vld [vmem:[#allocation8 + $0x8ac] sm:$0xf0]  ;;  %7305 = vmatmul.bf16.vlgmr.msrb.gmra.mxu0 %v13862_v48  ;;  %v634_v43 = vperm.slane %v13855_v62, 3 }
 0x2c8   :  { %7332 = vmatpush.bf16.msrb.mxu2 %v10985_v40  ;;  %v11720_v31 = vld [vmem:[#allocation8 + $0xbc0] sm:$0xf]  ;;  %7353 = vmatpush.bf16.msra.mxu0 %v11353_v57  ;;  %v11593_v63 = vor.u32 %v13120_v54, %v11592_v12  ;;  %v13084_v2 = vld [vmem:[#allocation8 + $0x9ac] sm:$0xf0] }
 0x2c9   :  { %v11320_v30 = vld [vmem:[#allocation8 + $0x8a0] sm:$0xf]  ;;  %v11721_v46 = vor.u32 %v13152_v17, %v11720_v31  ;;  %v13116_v6 = vld [vmem:[#allocation8 + $0xaac] sm:$0xf0]  ;;  %7319 = vmatmul.bf16.vlgmr.msrb.gmra.mxu1 %v13866_v44 }
 0x2ca   :  { %7346 = vmatpush.bf16.msrb.mxu3 %v11113_v61  ;;  %7367 = vmatpush.bf16.msra.mxu1 %v11481_v33  ;;  %v11448_v40 = vld [vmem:[#allocation8 + $0x9a0] sm:$0xf]  ;;  %v3729_v33 = vadd.f32 %v13719_v9, %v632_v52  ;;  %v13148_v36 = vld [vmem:[#allocation8 + $0xbac] sm:$0xf0]  ;;  %v13889_v20 = vpop.f32.mrf.mxu3 }
 0x2cb   :  { %v11576_v61 = vld [vmem:[#allocation8 + $0xaa0] sm:$0xf]  ;;  %7333 = vmatmul.bf16.vlgmr.msrb.gmra.mxu2 %v13870_v19  ;;  %v11449_v9 = vor.u32 %v13084_v2, %v11448_v40  ;;  %v13048_v54 = vld [vmem:[#allocation8 + $0x88c] sm:$0xf0] }
 0x2cc   :  { %7381 = vmatpush.bf16.msra.mxu2 %v11609_v10  ;;  %v3675_v10 = vadd.f32 %v13701_v32, %v14295_v25  ;;  %v11704_v57 = vld [vmem:[#allocation8 + $0xba0] sm:$0xf]  ;;  %7354 = vmatpush.bf16.msra.mxu0 %v11337_v38  ;;  %v13887_v32 = vpop.f32.mrf.mxu2  ;;  %v11577_v41 = vor.u32 %v13116_v6, %v11576_v61  ;;  %v13080_v52 = vld [vmem:[#allocation8 + $0x98c] sm:$0xf0] }
 0x2cd   :  { %7347 = vmatmul.bf16.vlgmr.msrb.gmra.mxu3 %v13874_v55  ;;  %v11304_v12 = vld [vmem:[#allocation8 + $0x880] sm:$0xf]  ;;  %v11705_v17 = vor.u32 %v13148_v36, %v11704_v57  ;;  %v13112_v42 = vld [vmem:[#allocation8 + $0xa8c] sm:$0xf0] }
 0x2ce   :  { %7395 = vmatpush.bf16.msra.mxu3 %v11737_v7  ;;  %v11321_v7 = vor.u32 %v13052_v24, %v11320_v30  ;;  %7368 = vmatpush.bf16.msra.mxu1 %v11465_v58  ;;  %v11432_v31 = vld [vmem:[#allocation8 + $0x980] sm:$0xf]  ;;  %v3689_v22 = vadd.f32 %v13703_v21, %v3675_v10  ;;  %v13144_v30 = vld [vmem:[#allocation8 + $0xb8c] sm:$0xf0]  ;;  %v3743_v58 = vadd.f32 %v13722_v34, %v3729_v33  ;;  %v13898_v34 = vpop.f32.mrf.mxu0  ;;  %v13901_v36 = vpop.f32.mrf.mxu1 }
 0x2cf   :  { %v11560_v28 = vld [vmem:[#allocation8 + $0xa80] sm:$0xf]  ;;  %v3785_v24 = vadd.f32 %v13761_v37, %v633_v15  ;;  %v11305_v40 = vor.u32 %v13048_v54, %v11304_v12  ;;  %v11433_v2 = vor.u32 %v13080_v52, %v11432_v31  ;;  %v13044_v27 = vld [vmem:[#allocation8 + $0x86c] sm:$0xf0]  ;;  %v3841_v21 = vadd.f32 %v13810_v45, %v634_v43 }
 0x2d0   :  { %7382 = vmatpush.bf16.msra.mxu2 %v11593_v63  ;;  %v11688_v38 = vld [vmem:[#allocation8 + $0xb80] sm:$0xf]  ;;  %v3745_v63 = vadd.f32 %v13748_v23, %v3731_v18  ;;  %7355 = vmatpush.bf16.msra.mxu0 %v11321_v7  ;;  %v11561_v61 = vor.u32 %v13112_v42, %v11560_v28  ;;  %v3843_v10 = vadd.f32 %v13843_v0, %v634_v43  ;;  %v13076_v37 = vld [vmem:[#allocation8 + $0x96c] sm:$0xf0] }
 0x2d1   :  { %v11288_v6 = vld [vmem:[#allocation8 + $0x860] sm:$0xf]  ;;  %v11689_v23 = vor.u32 %v13144_v30, %v11688_v38  ;;  %v13108_v57 = vld [vmem:[#allocation8 + $0xa6c] sm:$0xf0]  ;;  %v3757_v7 = vadd.f32 %v13732_v4, %v3743_v58  ;;  %v3799_v45 = vadd.f32 %v13764_v49, %v3785_v24 }
 0x2d2   :  { %7396 = vmatpush.bf16.msra.mxu3 %v11721_v46  ;;  %v3787_v46 = vadd.f32 %v13792_v51, %v633_v15  ;;  %7369 = vmatpush.bf16.msra.mxu1 %v11449_v9  ;;  %v11416_v25 = vld [vmem:[#allocation8 + $0x960] sm:$0xf]  ;;  %v3703_v51 = vadd.f32 %v13709_v1, %v3689_v22  ;;  %v13140_v15 = vld [vmem:[#allocation8 + $0xb6c] sm:$0xf0]  ;;  %v3759_v9 = vadd.f32 %v13756_v5, %v3745_v63 }
 0x2d3   :  { %v11544_v33 = vld [vmem:[#allocation8 + $0xa60] sm:$0xf]  ;;  %v11289_v0 = vor.u32 %v13044_v27, %v11288_v6  ;;  %v13040_v1 = vld [vmem:[#allocation8 + $0x84c] sm:$0xf0]  ;;  %v3857_v52 = vadd.f32 %v13845_v39, %v3843_v10  ;;  %v13915_v30 = vadd.f32 %v13735_v16, %v3757_v7  ;;  %v13921_v39 = vpop.f32.mrf.mxu3 }
 0x2d4   :  { %7383 = vmatpush.bf16.msra.mxu2 %v11577_v41  ;;  %v11672_v18 = vld [vmem:[#allocation8 + $0xb60] sm:$0xf]  ;;  %7356 = vmatpush.bf16.msra.mxu0 %v11305_v40  ;;  %v3801_v43 = vadd.f32 %v13795_v50, %v3787_v46  ;;  %v11417_v41 = vor.u32 %v13076_v37, %v11416_v25  ;;  %v11545_v12 = vor.u32 %v13108_v57, %v11544_v33  ;;  %v13072_v5 = vld [vmem:[#allocation8 + $0x94c] sm:$0xf0]  ;;  %v13912_v50 = vpop.f32.mrf.mxu2 }
 0x2d5   :  { %v11272_v54 = vld [vmem:[#allocation8 + $0x840] sm:$0xf]  ;;  %v11673_v4 = vor.u32 %v13140_v15, %v11672_v18  ;;  %v13104_v49 = vld [vmem:[#allocation8 + $0xa4c] sm:$0xf0]  ;;  %v13910_v42 = vadd.f32 %v13716_v59, %v3703_v51  ;;  %v13918_v58 = vadd.f32 %v13759_v14, %v3759_v9  ;;  %v3871_v14 = vadd.f32 %v13851_v35, %v3857_v52 }
 0x2d6   :  { %7397 = vmatpush.bf16.msra.mxu3 %v11705_v17  ;;  %7370 = vmatpush.bf16.msra.mxu1 %v11433_v2  ;;  %v11400_v31 = vld [vmem:[#allocation8 + $0x940] sm:$0xf]  ;;  %v3855_v17 = vadd.f32 %v13813_v29, %v3841_v21  ;;  %v13136_v38 = vld [vmem:[#allocation8 + $0xb4c] sm:$0xf0]  ;;  %v3813_v29 = vadd.f32 %v13767_v60, %v3799_v45  ;;  %v11273_v63 = vor.u32 %v13040_v1, %v11272_v54  ;;  %v13926_v21 = vpop.f32.mrf.mxu0  ;;  %v13930_v57 = vpop.f32.mrf.mxu1  ;;  %v4120_v51 = vmax.f32 %v13915_v30, 0.0 }
 0x2d7   :  { %v11528_v28 = vld [vmem:[#allocation8 + $0xa40] sm:$0xf]  ;;  %v3815_v24 = vadd.f32 %v13802_v56, %v3801_v43  ;;  %v11401_v59 = vor.u32 %v13072_v5, %v11400_v31  ;;  %v13036_v2 = vld [vmem:[#allocation8 + $0x82c] sm:$0xf0]  ;;  %v3885_v1 = vadd.f32 %v13853_v26, %v3871_v14 }
 0x2d8   :  { %7384 = vmatpush.bf16.msra.mxu2 %v11561_v61  ;;  %v11656_v22 = vld [vmem:[#allocation8 + $0xb40] sm:$0xf]  ;;  %7357 = vmatpush.bf16.msra.mxu0 %v11289_v0  ;;  %v11529_v40 = vor.u32 %v13104_v49, %v11528_v28  ;;  %v3869_v16 = vadd.f32 %v13824_v3, %v3855_v17  ;;  %v13068_v60 = vld [vmem:[#allocation8 + $0x92c] sm:$0xf0]  ;;  %v4136_v3 = vmax.f32 %v13918_v58, 0.0  ;;  %v3827_v35 = vadd.f32 %v13777_v8, %v3813_v29 }
 0x2d9   :  { %v11256_v46 = vld [vmem:[#allocation8 + $0x820] sm:$0xf]  ;;  %v11657_v6 = vor.u32 %v13136_v38, %v11656_v22  ;;  %v13100_v25 = vld [vmem:[#allocation8 + $0xa2c] sm:$0xf0]  ;;  %v3829_v9 = vadd.f32 %v13806_v13, %v3815_v24  ;;  %v4138_v24 = vmax.f32 %v3885_v1, 0.0 }
 0x2da   :  { %7398 = vmatpush.bf16.msra.mxu3 %v11689_v23  ;;  %7371 = vmatpush.bf16.msra.mxu1 %v11417_v41  ;;  %v11384_v61 = vld [vmem:[#allocation8 + $0x920] sm:$0xf]  ;;  %v14296_v10 = vld [vmem:[#allocation33_spill] sm:$0xff]  ;;  %v4135_v23 = vmax.f32 %v13910_v42, 0.0  ;;  %v11257_v18 = vor.u32 %v13036_v2, %v11256_v46  ;;  %v3883_v54 = vadd.f32 %v13828_v11, %v3869_v16  ;;  %v4121_v11 = vmax.f32 %v3827_v35, 0.0 }
 0x2db   :  { %v11512_v27 = vld [vmem:[#allocation8 + $0xa20] sm:$0xf]  ;;  %v4119_v56 = vmax.f32 %v14296_v10, 0.0  ;;  %v13132_v33 = vld [vmem:[#allocation8 + $0xb2c] sm:$0xf0]  ;;  %v11385_v45 = vor.u32 %v13068_v60, %v11384_v61  ;;  %v13940_v30 = vpop.f32.mrf.mxu3  ;;  %v4137_v58 = vmax.f32 %v3829_v9, 0.0  ;;  %v13946_v35 = vpack.c.bf16 %v4136_v3, %v4120_v51 }
 0x2dc   :  { %7385 = vmatpush.bf16.msra.mxu2 %v11545_v12  ;;  %v11640_v37 = vld [vmem:[#allocation8 + $0xb20] sm:$0xf]  ;;  %7358 = vmatpush.bf16.msra.mxu0 %v11273_v63  ;;  %v13032_v7 = vld [vmem:[#allocation8 + $0x80c] sm:$0xf0]  ;;  %v11513_v0 = vor.u32 %v13100_v25, %v11512_v27  ;;  %v13938_v13 = vpop.f32.mrf.mxu2  ;;  %v4122_v63 = vmax.f32 %v3883_v54, 0.0 }
 0x2dd   :  { %v11240_v15 = vld [vmem:[#allocation8 + $0x800] sm:$0xf]  ;;  %v13064_v41 = vld [vmem:[#allocation8 + $0x90c] sm:$0xf0]  ;;  %v11641_v31 = vor.u32 %v13132_v33, %v11640_v37  ;;  %v13944_v33 = vpack.c.bf16 %v4135_v23, %v4119_v56 }
 0x2de   :  { %7399 = vmatpush.bf16.msra.mxu3 %v11673_v4  ;;  %7372 = vmatpush.bf16.msra.mxu1 %v11401_v59  ;;  %v11368_v43 = vld [vmem:[#allocation8 + $0x900] sm:$0xf]  ;;  %v13096_v8 = vld [vmem:[#allocation8 + $0xa0c] sm:$0xf0]  ;;  %v11241_v49 = vor.u32 %v13032_v7, %v11240_v15  ;;  %v13942_v37 = vpop.f32.mrf.mxu0  ;;  %v13949_v15 = vpop.f32.mrf.mxu1  ;;  %v13951_v7 = vpack.c.bf16 %v4137_v58, %v4121_v11  ;;  %v637_v11 = vperm.slane %v13855_v62, 6 }
 0x2df   :  { %v11496_v12 = vld [vmem:[#allocation8 + $0xa00] sm:$0xf]  ;;  %v13128_v52 = vld [vmem:[#allocation8 + $0xb0c] sm:$0xf0]  ;;  %v11369_v26 = vor.u32 %v13064_v41, %v11368_v43  ;;  %v13953_v41 = vpack.c.bf16 %v4138_v24, %v4122_v63 }
 0x2e0   :  { %7386 = vmatpush.bf16.msra.mxu2 %v11529_v40  ;;  %v11624_v17 = vld [vmem:[#allocation8 + $0xb00] sm:$0xf]  ;;  %v13188_v5 = vld [vmem:[#allocation8 + $0xcec] sm:$0xf0]  ;;  %7359 = vmatpush.bf16.msra.mxu0 %v11257_v18  ;;  %v11497_v29 = vor.u32 %v13096_v8, %v11496_v12  ;;  %v635_v18 = vperm.slane %v13855_v62, 4 }
 0x2e1   :  { %v11864_v4 = vld [vmem:[#allocation8 + $0xce0] sm:$0xf]  ;;  %v13220_v42 = vld [vmem:[#allocation8 + $0xdec] sm:$0xf0]  ;;  %v11625_v59 = vor.u32 %v13128_v52, %v11624_v17  ;;  %v636_v52 = vperm.slane %v13855_v62, 5 }
 0x2e2   :  { %7400 = vmatpush.bf16.msra.mxu3 %v11657_v6  ;;  %v11992_v28 = vld [vmem:[#allocation8 + $0xde0] sm:$0xf]  ;;  %v13252_v38 = vld [vmem:[#allocation8 + $0xeec] sm:$0xf0]  ;;  %7373 = vmatpush.bf16.msra.mxu1 %v11385_v45  ;;  %v11865_v40 = vor.u32 %v13188_v5, %v11864_v4  ;;  %v3897_v8 = vadd.f32 %v13868_v47, %v635_v18  ;;  %v3899_v17 = vadd.f32 %v13898_v34, %v635_v18 }
 0x2e3   :  { %v12120_v22 = vld [vmem:[#allocation8 + $0xee0] sm:$0xf]  ;;  %v13184_v2 = vld [vmem:[#allocation8 + $0xccc] sm:$0xf0]  ;;  %v11993_v61 = vor.u32 %v13220_v42, %v11992_v28 }
 0x2e4   :  { %7387 = vmatpush.bf16.msra.mxu2 %v11513_v0  ;;  %v11848_v46 = vld [vmem:[#allocation8 + $0xcc0] sm:$0xf]  ;;  %v12121_v16 = vor.u32 %v13252_v38, %v12120_v22  ;;  %v13284_v60 = vld [vmem:[#allocation8 + $0xfec] sm:$0xf0]  ;;  %7360 = vmatpush.bf16.msra.mxu0 %v11241_v49  ;;  %v13962_v4 = vpop.f32.mrf.mxu2  ;;  %v13964_v49 = vpop.f32.mrf.mxu3 }
 0x2e5   :  { %v11976_v14 = vld [vmem:[#allocation8 + $0xdc0] sm:$0xf]  ;;  %v13216_v27 = vld [vmem:[#allocation8 + $0xdcc] sm:$0xf0]  ;;  %v11849_v9 = vor.u32 %v13184_v2, %v11848_v46  ;;  %v3953_v46 = vadd.f32 %v13926_v21, %v636_v52  ;;  %v3955_v21 = vadd.f32 %v13942_v37, %v636_v52 }
 0x2e6   :  { %7401 = vmatpush.bf16.msra.mxu3 %v11641_v31  ;;  %v12248_v6 = vld [vmem:[#allocation8 + $0xfe0] sm:$0xf]  ;;  %v13248_v10 = vld [vmem:[#allocation8 + $0xecc] sm:$0xf0]  ;;  %7374 = vmatpush.bf16.msra.mxu1 %v11369_v26  ;;  %v11977_v56 = vor.u32 %v13216_v27, %v11976_v14 }
 0x2e7   :  { %v12104_v25 = vld [vmem:[#allocation8 + $0xec0] sm:$0xf]  ;;  %v12249_v45 = vor.u32 %v13284_v60, %v12248_v6  ;;  %v13180_v43 = vld [vmem:[#allocation8 + $0xcac] sm:$0xf0]  ;;  %7361 = vmatmul.bf16.vlgmr.msra.gmra.mxu0 %v13944_v33 }
 0x2e8   :  { %7388 = vmatpush.bf16.msra.mxu2 %v11497_v29  ;;  %7409 = vmatpush.bf16.msrb.mxu0 %v11865_v40  ;;  %v11832_v0 = vld [vmem:[#allocation8 + $0xca0] sm:$0xf]  ;;  %v12105_v23 = vor.u32 %v13248_v10, %v12104_v25  ;;  %v13280_v12 = vld [vmem:[#allocation8 + $0xfcc] sm:$0xf0]  ;;  %v3913_v40 = vadd.f32 %v13901_v36, %v3899_v17  ;;  %v4022_v10 = vpop.f32.mrf.mxu1 }
 0x2e9   :  { %v11960_v51 = vld [vmem:[#allocation8 + $0xda0] sm:$0xf]  ;;  %7375 = vmatmul.bf16.vlgmr.msra.gmra.mxu1 %v13946_v35  ;;  %v13212_v54 = vld [vmem:[#allocation8 + $0xdac] sm:$0xf0]  ;;  %v11833_v5 = vor.u32 %v13180_v43, %v11832_v0 }
 0x2ea   :  { %7402 = vmatpush.bf16.msra.mxu3 %v11625_v59  ;;  %7423 = vmatpush.bf16.msrb.mxu1 %v11993_v61  ;;  %v12232_v3 = vld [vmem:[#allocation8 + $0xfc0] sm:$0xf]  ;;  %v13244_v31 = vld [vmem:[#allocation8 + $0xeac] sm:$0xf0]  ;;  %v11961_v47 = vor.u32 %v13212_v54, %v11960_v51  ;;  %v3911_v59 = vadd.f32 %v13872_v53, %v3897_v8  ;;  %v4008_v61 = vpop.f32.mrf.mxu0 }
 0x2eb   :  { %v12088_v1 = vld [vmem:[#allocation8 + $0xea0] sm:$0xf]  ;;  %7389 = vmatmul.bf16.vlgmr.msra.gmra.mxu2 %v13951_v7  ;;  %v12233_v28 = vor.u32 %v13280_v12, %v12232_v3  ;;  %v13176_v22 = vld [vmem:[#allocation8 + $0xc8c] sm:$0xf0]  ;;  %v4009_v25 = vadd.f32 %v4008_v61, %v637_v11 }
 0x2ec   :  { %7437 = vmatpush.bf16.msrb.mxu2 %v12121_v16  ;;  %7410 = vmatpush.bf16.msrb.mxu0 %v11849_v9  ;;  %v11816_v42 = vld [vmem:[#allocation8 + $0xc80] sm:$0xf]  ;;  %v12089_v34 = vor.u32 %v13244_v31, %v12088_v1  ;;  %v13276_v26 = vld [vmem:[#allocation8 + $0xfac] sm:$0xf0]  ;;  %v3925_v43 = vadd.f32 %v13887_v32, %v3911_v59  ;;  %v4036_v17 = vpop.f32.mrf.mxu2 }
 0x2ed   :  { %7403 = vmatmul.bf16.vlgmr.msra.gmra.mxu3 %v13953_v41  ;;  %v11944_v38 = vld [vmem:[#allocation8 + $0xd80] sm:$0xf]  ;;  %v13208_v29 = vld [vmem:[#allocation8 + $0xd8c] sm:$0xf0]  ;;  %v11817_v2 = vor.u32 %v13176_v22, %v11816_v42  ;;  %v4023_v31 = vadd.f32 %v4022_v10, %v4009_v25 }
 0x2ee   :  { %7451 = vmatpush.bf16.msrb.mxu3 %v12249_v45  ;;  %7424 = vmatpush.bf16.msrb.mxu1 %v11977_v56  ;;  %v12216_v58 = vld [vmem:[#allocation8 + $0xfa0] sm:$0xf]  ;;  %v13240_v24 = vld [vmem:[#allocation8 + $0xe8c] sm:$0xf0]  ;;  %v11945_v60 = vor.u32 %v13208_v29, %v11944_v38  ;;  %v3927_v56 = vadd.f32 %v13912_v50, %v3913_v40  ;;  %v3969_v50 = vadd.f32 %v13949_v15, %v3955_v21 }
 0x2ef   :  { %v12072_v63 = vld [vmem:[#allocation8 + $0xe80] sm:$0xf]  ;;  %v12217_v16 = vor.u32 %v13276_v26, %v12216_v58  ;;  %v13172_v6 = vld [vmem:[#allocation8 + $0xc6c] sm:$0xf0]  ;;  %v13978_v22 = vadd.f32 %v13889_v20, %v3925_v43  ;;  %v4037_v15 = vadd.f32 %v4036_v17, %v4023_v31  ;;  %v12834_v31 = vld [vmem:[#allocation8 + $0x1e4] sm:$0xf] }
 0x2f0   :  { %7438 = vmatpush.bf16.msrb.mxu2 %v12105_v23  ;;  %7411 = vmatpush.bf16.msrb.mxu0 %v11833_v5  ;;  %v11800_v14 = vld [vmem:[#allocation8 + $0xc60] sm:$0xf]  ;;  %v12073_v27 = vor.u32 %v13240_v24, %v12072_v63  ;;  %v13272_v36 = vld [vmem:[#allocation8 + $0xf8c] sm:$0xf0]  ;;  %v3967_v23 = vadd.f32 %v13930_v57, %v3953_v46  ;;  %v13981_v38 = vadd.f32 %v13921_v39, %v3927_v56  ;;  %v4024_v40 = vpop.f32.mrf.mxu1 }
 0x2f1   :  { %v11928_v53 = vld [vmem:[#allocation8 + $0xd60] sm:$0xf]  ;;  %v13204_v9 = vld [vmem:[#allocation8 + $0xd6c] sm:$0xf0]  ;;  %v11801_v51 = vor.u32 %v13172_v6, %v11800_v14  ;;  %v4123_v6 = vmax.f32 %v13978_v22, 0.0 }
 0x2f2   :  { %7452 = vmatpush.bf16.msrb.mxu3 %v12233_v28  ;;  %7425 = vmatpush.bf16.msrb.mxu1 %v11961_v47  ;;  %v12200_v18 = vld [vmem:[#allocation8 + $0xf80] sm:$0xf]  ;;  %v13236_v0 = vld [vmem:[#allocation8 + $0xe6c] sm:$0xf0]  ;;  %v11929_v37 = vor.u32 %v13204_v9, %v11928_v53  ;;  %v4050_v28 = vpop.f32.mrf.mxu3  ;;  %v3981_v47 = vadd.f32 %v13938_v13, %v3967_v23  ;;  %v4010_v26 = vpop.f32.mrf.mxu0  ;;  %v3983_v13 = vadd.f32 %v13962_v4, %v3969_v50 }
 0x2f3   :  { %v12056_v45 = vld [vmem:[#allocation8 + $0xe60] sm:$0xf]  ;;  %v12201_v3 = vor.u32 %v13272_v36, %v12200_v18  ;;  %v13168_v54 = vld [vmem:[#allocation8 + $0xc4c] sm:$0xf0]  ;;  %v4011_v20 = vadd.f32 %v4010_v26, %v637_v11  ;;  %v4051_v21 = vadd.f32 %v4050_v28, %v4037_v15  ;;  %v10314_v15 = vld [vmem:[#allocation8 + $0xd0] sm:$0xf0] }
 0x2f4   :  { %7439 = vmatpush.bf16.msrb.mxu2 %v12089_v34  ;;  %7412 = vmatpush.bf16.msrb.mxu0 %v11817_v2  ;;  %v11784_v12 = vld [vmem:[#allocation8 + $0xc40] sm:$0xf]  ;;  %v12057_v8 = vor.u32 %v13236_v0, %v12056_v45  ;;  %v13200_v52 = vld [vmem:[#allocation8 + $0xd4c] sm:$0xf0]  ;;  %v13990_v25 = vadd.f32 %v13940_v30, %v3981_v47  ;;  %v4038_v45 = vpop.f32.mrf.mxu2  ;;  %v3997_v23 = vadd.f32 %v13964_v49, %v3983_v13 }
 0x2f5   :  { %v11912_v1 = vld [vmem:[#allocation8 + $0xd40] sm:$0xf]  ;;  %v13268_v32 = vld [vmem:[#allocation8 + $0xf6c] sm:$0xf0]  ;;  %v11785_v34 = vor.u32 %v13168_v54, %v11784_v12  ;;  %v12802_v54 = vld [vmem:[#allocation8 + $0xe4] sm:$0xf] }
 0x2f6   :  { %7453 = vmatpush.bf16.msrb.mxu3 %v12217_v16  ;;  %7426 = vmatpush.bf16.msrb.mxu1 %v11945_v60  ;;  %v12184_v5 = vld [vmem:[#allocation8 + $0xf60] sm:$0xf]  ;;  %v13232_v42 = vld [vmem:[#allocation8 + $0xe4c] sm:$0xf0]  ;;  %v11913_v58 = vor.u32 %v13200_v52, %v11912_v1  ;;  %v4139_v60 = vmax.f32 %v13981_v38, 0.0  ;;  %v4124_v28 = vmax.f32 %v13990_v25, 0.0 }
 0x2f7   :  { %v12040_v57 = vld [vmem:[#allocation8 + $0xe40] sm:$0xf]  ;;  %v12185_v29 = vor.u32 %v13268_v32, %v12184_v5  ;;  %v13164_v24 = vld [vmem:[#allocation8 + $0xc2c] sm:$0xf0]  ;;  %v10330_v1 = vld [vmem:[#allocation8 + $0xf0] sm:$0xf0] }
 0x2f8   :  { %7440 = vmatpush.bf16.msrb.mxu2 %v12073_v27  ;;  %7413 = vmatpush.bf16.msrb.mxu0 %v11801_v51  ;;  %v11768_v63 = vld [vmem:[#allocation8 + $0xc20] sm:$0xf]  ;;  %v12041_v59 = vor.u32 %v13232_v42, %v12040_v57  ;;  %v13264_v2 = vld [vmem:[#allocation8 + $0xf4c] sm:$0xf0]  ;;  %v4025_v27 = vadd.f32 %v4024_v40, %v4011_v20  ;;  %v12866_v5 = vld [vmem:[#allocation8 + $0x2e4] sm:$0xf] }
 0x2f9   :  { %v11896_v39 = vld [vmem:[#allocation8 + $0xd20] sm:$0xf]  ;;  %v13196_v61 = vld [vmem:[#allocation8 + $0xd2c] sm:$0xf0]  ;;  %v11769_v11 = vor.u32 %v13164_v24, %v11768_v63  ;;  %v10586_v32 = vld [vmem:[#allocation8 + $0x2f0] sm:$0xf0] }
 0x2fa   :  { %7454 = vmatpush.bf16.msrb.mxu3 %v12201_v3  ;;  %7427 = vmatpush.bf16.msrb.mxu1 %v11929_v37  ;;  %v12168_v46 = vld [vmem:[#allocation8 + $0xf40] sm:$0xf]  ;;  %v13228_v14 = vld [vmem:[#allocation8 + $0xe2c] sm:$0xf0]  ;;  %v11897_v4 = vor.u32 %v13196_v61, %v11896_v39  ;;  %v4039_v30 = vadd.f32 %v4038_v45, %v4025_v27  ;;  %v4052_v51 = vpop.f32.mrf.mxu3  ;;  %v10458_v37 = vld [vmem:[#allocation8 + $0x1f0] sm:$0xf0]  ;;  %v10589_v24 = vor.u32 %v12866_v5, %v10586_v32 }
 0x2fb   :  { %v12024_v16 = vld [vmem:[#allocation8 + $0xe20] sm:$0xf]  ;;  %v12169_v10 = vor.u32 %v13264_v2, %v12168_v46  ;;  %v13160_v18 = vld [vmem:[#allocation8 + $0xc0c] sm:$0xf0]  ;;  %v4125_v57 = vmax.f32 %v4051_v21, 0.0  ;;  %v4140_v47 = vmax.f32 %v3997_v23, 0.0  ;;  %v10461_v26 = vor.u32 %v12834_v31, %v10458_v37 }
 0x2fc   :  { %7441 = vmatpush.bf16.msrb.mxu2 %v12057_v8  ;;  %7414 = vmatpush.bf16.msrb.mxu0 %v11785_v34  ;;  %v11752_v53 = vld [vmem:[#allocation8 + $0xc00] sm:$0xf]  ;;  %v12025_v9 = vor.u32 %v13228_v14, %v12024_v16  ;;  %v13192_v0 = vld [vmem:[#allocation8 + $0xd0c] sm:$0xf0]  ;;  %v4053_v8 = vadd.f32 %v4052_v51, %v4039_v30  ;;  %v12798_v38 = vld [vmem:[#allocation8 + $0xc4] sm:$0xf]  ;;  %v13994_v2 = vpack.c.bf16 %v4139_v60, %v4123_v6 }
 0x2fd   :  { %v11880_v36 = vld [vmem:[#allocation8 + $0xd00] sm:$0xf]  ;;  %v13260_v56 = vld [vmem:[#allocation8 + $0xf2c] sm:$0xf0]  ;;  %v11753_v17 = vor.u32 %v13160_v18, %v11752_v53  ;;  %v10714_v63 = vld [vmem:[#allocation8 + $0x3f0] sm:$0xf0]  ;;  %v13998_v16 = vpack.c.bf16 %v4140_v47, %v4124_v28  ;;  %v10317_v14 = vor.u32 %v12798_v38, %v10314_v15 }
 0x2fe   :  { %7455 = vmatpush.bf16.msrb.mxu3 %v12185_v29  ;;  %7428 = vmatpush.bf16.msrb.mxu1 %v11913_v58  ;;  %v12152_v43 = vld [vmem:[#allocation8 + $0xf20] sm:$0xf]  ;;  %v13224_v12 = vld [vmem:[#allocation8 + $0xe0c] sm:$0xf0]  ;;  %v11881_v49 = vor.u32 %v13192_v0, %v11880_v36  ;;  %v4141_v34 = vmax.f32 %v4053_v8, 0.0  ;;  %v10333_v58 = vor.u32 %v12802_v54, %v10330_v1  ;;  %v638_v1 = vperm.slane %v13855_v62, 7 }
 0x2ff   :  { %v12008_v3 = vld [vmem:[#allocation8 + $0xe00] sm:$0xf]  ;;  %v12153_v52 = vor.u32 %v13260_v56, %v12152_v43  ;;  %v13256_v22 = vld [vmem:[#allocation8 + $0xf0c] sm:$0xf0]  ;;  %v12898_v29 = vld [vmem:[#allocation8 + $0x3e4] sm:$0xf] }
 0x300   :  { %7442 = vmatpush.bf16.msrb.mxu2 %v12041_v59  ;;  %7415 = vmatpush.bf16.msrb.mxu0 %v11769_v11  ;;  %v12136_v50 = vld [vmem:[#allocation8 + $0xf00] sm:$0xf]  ;;  %v12009_v42 = vor.u32 %v13224_v12, %v12008_v3  ;;  %v12830_v59 = vld [vmem:[#allocation8 + $0x1c4] sm:$0xf]  ;;  %v10442_v20 = vld [vmem:[#allocation8 + $0x1d0] sm:$0xf0]  ;;  %v13996_v13 = vpack.c.bf16 %v4141_v34, %v4125_v57  ;;  %v10717_v61 = vor.u32 %v12898_v29, %v10714_v63 }
 0x301   :  { %v12137_v40 = vor.u32 %v13256_v22, %v12136_v50  ;;  %v12862_v39 = vld [vmem:[#allocation8 + $0x2c4] sm:$0xf]  ;;  %v10570_v46 = vld [vmem:[#allocation8 + $0x2d0] sm:$0xf0]  ;;  %v10445_v27 = vor.u32 %v12830_v59, %v10442_v20 }
 0x302   :  { %7456 = vmatpush.bf16.msrb.mxu3 %v12169_v10  ;;  %7429 = vmatpush.bf16.msrb.mxu1 %v11897_v4  ;;  %v12794_v25 = vld [vmem:[#allocation8 + $0xa4] sm:$0xf]  ;;  %v10698_v10 = vld [vmem:[#allocation8 + $0x3d0] sm:$0xf0]  ;;  %v10573_v53 = vor.u32 %v12862_v39, %v10570_v46 }
 0x303   :  { %v12894_v11 = vld [vmem:[#allocation8 + $0x3c4] sm:$0xf]  ;;  %v10298_v6 = vld [vmem:[#allocation8 + $0xb0] sm:$0xf0] }
 0x304   :  { %7443 = vmatpush.bf16.msrb.mxu2 %v12025_v9  ;;  %7416 = vmatpush.bf16.msrb.mxu0 %v11753_v17  ;;  %v12826_v60 = vld [vmem:[#allocation8 + $0x1a4] sm:$0xf]  ;;  %v10426_v18 = vld [vmem:[#allocation8 + $0x1b0] sm:$0xf0]  ;;  %v10701_v4 = vor.u32 %v12894_v11, %v10698_v10  ;;  %v10301_v9 = vor.u32 %v12794_v25, %v10298_v6  ;;  %v4064_v31 = vpop.f32.mrf.mxu0 }
 0x305   :  { %v12858_v36 = vld [vmem:[#allocation8 + $0x2a4] sm:$0xf]  ;;  %v10554_v21 = vld [vmem:[#allocation8 + $0x2b0] sm:$0xf0]  ;;  %v10429_v45 = vor.u32 %v12826_v60, %v10426_v18  ;;  %v4065_v47 = vadd.f32 %v4064_v31, %v638_v1 }
 0x306   :  { %7457 = vmatpush.bf16.msrb.mxu3 %v12153_v52  ;;  %7430 = vmatpush.bf16.msrb.mxu1 %v11881_v49  ;;  %v12790_v0 = vld [vmem:[#allocation8 + $0x84] sm:$0xf]  ;;  %v10682_v56 = vld [vmem:[#allocation8 + $0x3b0] sm:$0xf0]  ;;  %v10557_v23 = vor.u32 %v12858_v36, %v10554_v21 }
 0x307   :  { %7417 = vmatmul.bf16.vlgmr.msrb.gmra.mxu0 %v13994_v2  ;;  %v12890_v43 = vld [vmem:[#allocation8 + $0x3a4] sm:$0xf]  ;;  %v10282_v30 = vld [vmem:[#allocation8 + $0x90] sm:$0xf0] }
 0x308   :  { %7444 = vmatpush.bf16.msrb.mxu2 %v12009_v42  ;;  %7465 = vmatpush.bf16.msra.mxu0 %v10333_v58  ;;  %v12822_v51 = vld [vmem:[#allocation8 + $0x184] sm:$0xf]  ;;  %v10410_v3 = vld [vmem:[#allocation8 + $0x190] sm:$0xf0]  ;;  %v10685_v37 = vor.u32 %v12890_v43, %v10682_v56  ;;  %v10285_v8 = vor.u32 %v12790_v0, %v10282_v30  ;;  %v4078_v42 = vpop.f32.mrf.mxu1 }
 0x309   :  { %7431 = vmatmul.bf16.vlgmr.msrb.gmra.mxu1 %v13998_v16  ;;  %v12854_v12 = vld [vmem:[#allocation8 + $0x284] sm:$0xf]  ;;  %v10538_v54 = vld [vmem:[#allocation8 + $0x290] sm:$0xf0]  ;;  %v10413_v17 = vor.u32 %v12822_v51, %v10410_v3 }
 0x30a   :  { %7479 = vmatpush.bf16.msra.mxu1 %v10461_v26  ;;  %7458 = vmatpush.bf16.msrb.mxu3 %v12137_v40  ;;  %v12786_v52 = vld [vmem:[#allocation8 + $0x64] sm:$0xf]  ;;  %v10666_v32 = vld [vmem:[#allocation8 + $0x390] sm:$0xf0]  ;;  %v10541_v50 = vor.u32 %v12854_v12, %v10538_v54 }
 0x30b   :  { %7445 = vmatmul.bf16.vlgmr.msrb.gmra.mxu2 %v13996_v13  ;;  %v12886_v5 = vld [vmem:[#allocation8 + $0x384] sm:$0xf]  ;;  %v10266_v28 = vld [vmem:[#allocation8 + $0x70] sm:$0xf0] }
 0x30c   :  { %7493 = vmatpush.bf16.msra.mxu2 %v10589_v24  ;;  %7466 = vmatpush.bf16.msra.mxu0 %v10317_v14  ;;  %v12818_v57 = vld [vmem:[#allocation8 + $0x164] sm:$0xf]  ;;  %v10394_v49 = vld [vmem:[#allocation8 + $0x170] sm:$0xf0]  ;;  %v10669_v62 = vor.u32 %v12886_v5, %v10666_v32  ;;  %v10269_v34 = vor.u32 %v12786_v52, %v10266_v28 }
 0x30d   :  { %v12850_v22 = vld [vmem:[#allocation8 + $0x264] sm:$0xf]  ;;  %v10522_v38 = vld [vmem:[#allocation8 + $0x270] sm:$0xf0]  ;;  %v10397_v58 = vor.u32 %v12818_v57, %v10394_v49 }
 0x30e   :  { %7507 = vmatpush.bf16.msra.mxu3 %v10717_v61  ;;  %7480 = vmatpush.bf16.msra.mxu1 %v10445_v27  ;;  %v12782_v26 = vld [vmem:[#allocation8 + $0x44] sm:$0xf]  ;;  %v10650_v63 = vld [vmem:[#allocation8 + $0x370] sm:$0xf0]  ;;  %v10525_v24 = vor.u32 %v12850_v22, %v10522_v38  ;;  %v4092_v40 = vpop.f32.mrf.mxu2  ;;  %v4079_v61 = vadd.f32 %v4078_v42, %v4065_v47  ;;  %v4066_v27 = vpop.f32.mrf.mxu0 }
 0x30f   :  { %v12882_v29 = vld [vmem:[#allocation8 + $0x364] sm:$0xf]  ;;  %v10250_v15 = vld [vmem:[#allocation8 + $0x50] sm:$0xf0]  ;;  %v4067_v18 = vadd.f32 %v4066_v27, %v638_v1 }
 0x310   :  { %7494 = vmatpush.bf16.msra.mxu2 %v10573_v53  ;;  %7467 = vmatpush.bf16.msra.mxu0 %v10301_v9  ;;  %v12814_v59 = vld [vmem:[#allocation8 + $0x144] sm:$0xf]  ;;  %v10378_v20 = vld [vmem:[#allocation8 + $0x150] sm:$0xf0]  ;;  %v4106_v14 = vpop.f32.mrf.mxu3  ;;  %v10653_v25 = vor.u32 %v12882_v29, %v10650_v63  ;;  %v10253_v11 = vor.u32 %v12782_v26, %v10250_v15  ;;  %v4093_v43 = vadd.f32 %v4092_v40, %v4079_v61  ;;  %v4080_v51 = vpop.f32.mrf.mxu1 }
 0x311   :  { %v12846_v39 = vld [vmem:[#allocation8 + $0x244] sm:$0xf]  ;;  %v10506_v46 = vld [vmem:[#allocation8 + $0x250] sm:$0xf0]  ;;  %v10381_v10 = vor.u32 %v12814_v59, %v10378_v20  ;;  %v4081_v1 = vadd.f32 %v4080_v51, %v4067_v18 }
 0x312   :  { %7508 = vmatpush.bf16.msra.mxu3 %v10701_v4  ;;  %7481 = vmatpush.bf16.msra.mxu1 %v10429_v45  ;;  %v12778_v53 = vld [vmem:[#allocation8 + $0x24] sm:$0xf]  ;;  %v10634_v60 = vld [vmem:[#allocation8 + $0x350] sm:$0xf0]  ;;  %v10509_v36 = vor.u32 %v12846_v39, %v10506_v46  ;;  %v4107_v49 = vadd.f32 %v4106_v14, %v4093_v43 }
 0x313   :  { %v12878_v6 = vld [vmem:[#allocation8 + $0x344] sm:$0xf]  ;;  %v10234_v21 = vld [vmem:[#allocation8 + $0x30] sm:$0xf0] }
 0x314   :  { %7495 = vmatpush.bf16.msra.mxu2 %v10557_v23  ;;  %7468 = vmatpush.bf16.msra.mxu0 %v10285_v8  ;;  %v12810_v4 = vld [vmem:[#allocation8 + $0x124] sm:$0xf]  ;;  %v10362_v9 = vld [vmem:[#allocation8 + $0x130] sm:$0xf0]  ;;  %v10637_v56 = vor.u32 %v12878_v6, %v10634_v60  ;;  %v10237_v3 = vor.u32 %v12778_v53, %v10234_v21  ;;  %v4126_v27 = vmax.f32 %v4107_v49, 0.0 }
 0x315   :  { %v12842_v45 = vld [vmem:[#allocation8 + $0x224] sm:$0xf]  ;;  %v10490_v0 = vld [vmem:[#allocation8 + $0x230] sm:$0xf0]  ;;  %v10365_v12 = vor.u32 %v12810_v4, %v10362_v9 }
 0x316   :  { %7509 = vmatpush.bf16.msra.mxu3 %v10685_v37  ;;  %7482 = vmatpush.bf16.msra.mxu1 %v10413_v17  ;;  %v12774_v23 = vld [vmem:[#allocation8 + $0x4] sm:$0xf]  ;;  %v10218_v30 = vld [vmem:[#allocation8 + $0x10] sm:$0xf0]  ;;  %v10493_v8 = vor.u32 %v12842_v45, %v10490_v0  ;;  %v4094_v32 = vpop.f32.mrf.mxu2 }
 0x317   :  { %v12806_v54 = vld [vmem:[#allocation8 + $0x104] sm:$0xf]  ;;  %v10618_v37 = vld [vmem:[#allocation8 + $0x330] sm:$0xf0]  ;;  %v4095_v42 = vadd.f32 %v4094_v32, %v4081_v1 }
 0x318   :  { %7496 = vmatpush.bf16.msra.mxu2 %v10541_v50  ;;  %7469 = vmatpush.bf16.msra.mxu0 %v10269_v34  ;;  %v12874_v31 = vld [vmem:[#allocation8 + $0x324] sm:$0xf]  ;;  %v10346_v17 = vld [vmem:[#allocation8 + $0x110] sm:$0xf0]  ;;  %v4108_v34 = vpop.f32.mrf.mxu3 }
 0x319   :  { %v12838_v52 = vld [vmem:[#allocation8 + $0x204] sm:$0xf]  ;;  %v10474_v5 = vld [vmem:[#allocation8 + $0x210] sm:$0xf0]  ;;  %v10621_v22 = vor.u32 %v12874_v31, %v10618_v37  ;;  %v10349_v26 = vor.u32 %v12806_v54, %v10346_v17  ;;  %v4109_v29 = vadd.f32 %v4108_v34, %v4095_v42 }
 0x31a   :  { %7510 = vmatpush.bf16.msra.mxu3 %v10669_v62  ;;  %7483 = vmatpush.bf16.msra.mxu1 %v10397_v58  ;;  %v12930_v50 = vld [vmem:[#allocation8 + $0x4e4] sm:$0xf]  ;;  %v10842_v28 = vld [vmem:[#allocation8 + $0x4f0] sm:$0xf0]  ;;  %v10221_v58 = vor.u32 %v12774_v23, %v10218_v30  ;;  %v10477_v63 = vor.u32 %v12838_v52, %v10474_v5 }
 0x31b   :  { %v12962_v57 = vld [vmem:[#allocation8 + $0x5e4] sm:$0xf]  ;;  %v10970_v38 = vld [vmem:[#allocation8 + $0x5f0] sm:$0xf0] }
 0x31c   :  { %7497 = vmatpush.bf16.msra.mxu2 %v10525_v24  ;;  %7470 = vmatpush.bf16.msra.mxu0 %v10253_v11  ;;  %v12994_v47 = vld [vmem:[#allocation8 + $0x6e4] sm:$0xf]  ;;  %v11098_v62 = vld [vmem:[#allocation8 + $0x6f0] sm:$0xf0]  ;;  %v10845_v24 = vor.u32 %v12930_v50, %v10842_v28  ;;  %v10973_v40 = vor.u32 %v12962_v57, %v10970_v38 }
 0x31d   :  { %v12870_v15 = vld [vmem:[#allocation8 + $0x304] sm:$0xf]  ;;  %v10602_v59 = vld [vmem:[#allocation8 + $0x310] sm:$0xf0]  ;;  %v11101_v39 = vor.u32 %v12994_v47, %v11098_v62 }
 0x31e   :  { %7511 = vmatpush.bf16.msra.mxu3 %v10653_v25  ;;  %7484 = vmatpush.bf16.msra.mxu1 %v10381_v10  ;;  %v12926_v20 = vld [vmem:[#allocation8 + $0x4c4] sm:$0xf]  ;;  %v10826_v46 = vld [vmem:[#allocation8 + $0x4d0] sm:$0xf0]  ;;  %v4142_v25 = vmax.f32 %v4109_v29, 0.0  ;;  %v10605_v53 = vor.u32 %v12870_v15, %v10602_v59 }
 0x31f   :  { %v12958_v61 = vld [vmem:[#allocation8 + $0x5c4] sm:$0xf]  ;;  %v10954_v14 = vld [vmem:[#allocation8 + $0x5d0] sm:$0xf0] }
 0x320   :  { %7498 = vmatpush.bf16.msra.mxu2 %v10509_v36  ;;  %7471 = vmatpush.bf16.msra.mxu0 %v10237_v3  ;;  %v12990_v11 = vld [vmem:[#allocation8 + $0x6c4] sm:$0xf]  ;;  %v11082_v10 = vld [vmem:[#allocation8 + $0x6d0] sm:$0xf0]  ;;  %v14004_v18 = vpack.c.bf16 %v4142_v25, %v4126_v27  ;;  %v10829_v36 = vor.u32 %v12926_v20, %v10826_v46  ;;  %v10957_v21 = vor.u32 %v12958_v61, %v10954_v14 }
 0x321   :  { %v13026_v6 = vld [vmem:[#allocation8 + $0x7e4] sm:$0xf]  ;;  %v11226_v60 = vld [vmem:[#allocation8 + $0x7f0] sm:$0xf0]  ;;  %v11085_v4 = vor.u32 %v12990_v11, %v11082_v10 }
 0x322   :  { %7512 = vmatpush.bf16.msra.mxu3 %v10637_v56  ;;  %7485 = vmatpush.bf16.msra.mxu1 %v10365_v12  ;;  %v12922_v9 = vld [vmem:[#allocation8 + $0x4a4] sm:$0xf]  ;;  %v10810_v45 = vld [vmem:[#allocation8 + $0x4b0] sm:$0xf0]  ;;  %v14298_v56 = vld [vmem:[#allocation35_spill] sm:$0xff]  ;;  %v11229_v23 = vor.u32 %v13026_v6, %v11226_v60 }
 0x323   :  { %v12954_v0 = vld [vmem:[#allocation8 + $0x5a4] sm:$0xf]  ;;  %v14297_v43 = vld [vmem:[#allocation34_spill] sm:$0xff]  ;;  %7459 = vmatmul.bf16.vlgmr.msrb.gmra.mxu3 %v14004_v18  ;;  %v10813_v37 = vor.u32 %v12922_v9, %v10810_v45 }
 0x324   :  { %7499 = vmatpush.bf16.msra.mxu2 %v10493_v8  ;;  %7472 = vmatpush.bf16.msra.mxu0 %v10221_v58  ;;  %v10938_v30 = vld [vmem:[#allocation8 + $0x5b0] sm:$0xf0]  ;;  %v12986_v51 = vld [vmem:[#allocation8 + $0x6a4] sm:$0xf] }
 0x325   :  { %v11066_v3 = vld [vmem:[#allocation8 + $0x6b0] sm:$0xf0]  ;;  %v14299_v12 = vld [vmem:[#allocation36_spill] sm:$0xff]  ;;  %v10941_v1 = vor.u32 %v12954_v0, %v10938_v30 }
 0x326   :  { %7513 = vmatpush.bf16.msra.mxu3 %v10621_v22  ;;  %7486 = vmatpush.bf16.msra.mxu1 %v10349_v26  ;;  %v13022_v54 = vld [vmem:[#allocation8 + $0x7c4] sm:$0xf]  ;;  %v11210_v31 = vld [vmem:[#allocation8 + $0x7d0] sm:$0xf0]  ;;  %v11069_v8 = vor.u32 %v12986_v51, %v11066_v3 }
 0x327   :  { %7473 = vmatmul.bf16.vlgmr.msra.gmra.mxu0 %v14297_v43  ;;  %v12918_v17 = vld [vmem:[#allocation8 + $0x484] sm:$0xf]  ;;  %v10794_v52 = vld [vmem:[#allocation8 + $0x490] sm:$0xf0]  ;;  %v11213_v32 = vor.u32 %v13022_v54, %v11210_v31  ;;  %v14300_v31 = vld [vmem:[#allocation37_spill] sm:$0xff] }
 0x328   :  { %7500 = vmatpush.bf16.msra.mxu2 %v10477_v63  ;;  %7521 = vmatpush.bf16.msrb.mxu0 %v10845_v24  ;;  %v12950_v5 = vld [vmem:[#allocation8 + $0x584] sm:$0xf]  ;;  %v10922_v50 = vld [vmem:[#allocation8 + $0x590] sm:$0xf0]  ;;  %v10797_v22 = vor.u32 %v12918_v17, %v10794_v52 }
 0x329   :  { %7487 = vmatmul.bf16.vlgmr.msra.gmra.mxu1 %v14298_v56  ;;  %v12982_v28 = vld [vmem:[#allocation8 + $0x684] sm:$0xf]  ;;  %v11050_v57 = vld [vmem:[#allocation8 + $0x690] sm:$0xf0]  ;;  %v10925_v38 = vor.u32 %v12950_v5, %v10922_v50 }
 0x32a   :  { %7535 = vmatpush.bf16.msrb.mxu1 %v10973_v40  ;;  %7514 = vmatpush.bf16.msra.mxu3 %v10605_v53  ;;  %v13018_v49 = vld [vmem:[#allocation8 + $0x7a4] sm:$0xf]  ;;  %v11194_v42 = vld [vmem:[#allocation8 + $0x7b0] sm:$0xf0]  ;;  %v11053_v47 = vor.u32 %v12982_v28, %v11050_v57 }
 0x32b   :  { %7501 = vmatmul.bf16.vlgmr.msra.gmra.mxu2 %v14299_v12  ;;  %v12914_v62 = vld [vmem:[#allocation8 + $0x464] sm:$0xf]  ;;  %v10778_v34 = vld [vmem:[#allocation8 + $0x470] sm:$0xf0]  ;;  %v11197_v26 = vor.u32 %v13018_v49, %v11194_v42 }
 0x32c   :  { %7549 = vmatpush.bf16.msrb.mxu2 %v11101_v39  ;;  %7522 = vmatpush.bf16.msrb.mxu0 %v10829_v36  ;;  %v12946_v58 = vld [vmem:[#allocation8 + $0x564] sm:$0xf]  ;;  %v10906_v29 = vld [vmem:[#allocation8 + $0x570] sm:$0xf0]  ;;  %v10781_v20 = vor.u32 %v12914_v62, %v10778_v34 }
 0x32d   :  { %v12978_v63 = vld [vmem:[#allocation8 + $0x664] sm:$0xf]  ;;  %v11034_v24 = vld [vmem:[#allocation8 + $0x670] sm:$0xf0]  ;;  %v10909_v40 = vor.u32 %v12946_v58, %v10906_v29 }
 0x32e   :  { %7536 = vmatpush.bf16.msrb.mxu1 %v10957_v21  ;;  %7563 = vmatpush.bf16.msrb.mxu3 %v11229_v23  ;;  %v13014_v15 = vld [vmem:[#allocation8 + $0x784] sm:$0xf]  ;;  %v11178_v59 = vld [vmem:[#allocation8 + $0x790] sm:$0xf0]  ;;  %v11037_v39 = vor.u32 %v12978_v63, %v11034_v24 }
 0x32f   :  { %v12910_v46 = vld [vmem:[#allocation8 + $0x444] sm:$0xf]  ;;  %v10762_v61 = vld [vmem:[#allocation8 + $0x450] sm:$0xf0]  ;;  %v11181_v27 = vor.u32 %v13014_v15, %v11178_v59 }
 0x330   :  { %7550 = vmatpush.bf16.msrb.mxu2 %v11085_v4  ;;  %7523 = vmatpush.bf16.msrb.mxu0 %v10813_v37  ;;  %v12942_v14 = vld [vmem:[#allocation8 + $0x544] sm:$0xf]  ;;  %v10890_v25 = vld [vmem:[#allocation8 + $0x550] sm:$0xf0]  ;;  %v10765_v60 = vor.u32 %v12910_v46, %v10762_v61 }
 0x331   :  { %v12974_v11 = vld [vmem:[#allocation8 + $0x644] sm:$0xf]  ;;  %v11018_v10 = vld [vmem:[#allocation8 + $0x650] sm:$0xf0]  ;;  %v10893_v36 = vor.u32 %v12942_v14, %v10890_v25 }
 0x332   :  { %7537 = vmatpush.bf16.msrb.mxu1 %v10941_v1  ;;  %7564 = vmatpush.bf16.msrb.mxu3 %v11213_v32  ;;  %v13010_v53 = vld [vmem:[#allocation8 + $0x764] sm:$0xf]  ;;  %v11162_v6 = vld [vmem:[#allocation8 + $0x770] sm:$0xf0]  ;;  %v11021_v21 = vor.u32 %v12974_v11, %v11018_v10 }
 0x333   :  { %v12906_v4 = vld [vmem:[#allocation8 + $0x424] sm:$0xf]  ;;  %v10746_v9 = vld [vmem:[#allocation8 + $0x430] sm:$0xf0]  ;;  %v11165_v0 = vor.u32 %v13010_v53, %v11162_v6  ;;  %7515 = vmatmul.bf16.vlgmr.msra.gmra.mxu3 %v14300_v31 }
 0x334   :  { %7551 = vmatpush.bf16.msrb.mxu2 %v11069_v8  ;;  %7524 = vmatpush.bf16.msrb.mxu0 %v10797_v22  ;;  %v12938_v45 = vld [vmem:[#allocation8 + $0x524] sm:$0xf]  ;;  %v10874_v23 = vld [vmem:[#allocation8 + $0x530] sm:$0xf0]  ;;  %v10749_v37 = vor.u32 %v12906_v4, %v10746_v9 }
 0x335   :  { %v12970_v30 = vld [vmem:[#allocation8 + $0x624] sm:$0xf]  ;;  %v11002_v51 = vld [vmem:[#allocation8 + $0x630] sm:$0xf0]  ;;  %v10877_v17 = vor.u32 %v12938_v45, %v10874_v23 }
 0x336   :  { %7538 = vmatpush.bf16.msrb.mxu1 %v10925_v38  ;;  %7565 = vmatpush.bf16.msrb.mxu3 %v11197_v26  ;;  %v13006_v3 = vld [vmem:[#allocation8 + $0x744] sm:$0xf]  ;;  %v11146_v54 = vld [vmem:[#allocation8 + $0x750] sm:$0xf0]  ;;  %v11005_v52 = vor.u32 %v12970_v30, %v11002_v51 }
 0x337   :  { %v12902_v1 = vld [vmem:[#allocation8 + $0x404] sm:$0xf]  ;;  %v10730_v8 = vld [vmem:[#allocation8 + $0x410] sm:$0xf0]  ;;  %v11149_v28 = vor.u32 %v13006_v3, %v11146_v54 }
 0x338   :  { %7552 = vmatpush.bf16.msrb.mxu2 %v11053_v47  ;;  %7525 = vmatpush.bf16.msrb.mxu0 %v10781_v20  ;;  %v12934_v5 = vld [vmem:[#allocation8 + $0x504] sm:$0xf]  ;;  %v10858_v32 = vld [vmem:[#allocation8 + $0x510] sm:$0xf0]  ;;  %v10733_v62 = vor.u32 %v12902_v1, %v10730_v8 }
 0x339   :  { %v12966_v50 = vld [vmem:[#allocation8 + $0x604] sm:$0xf]  ;;  %v10986_v57 = vld [vmem:[#allocation8 + $0x610] sm:$0xf0]  ;;  %v10861_v29 = vor.u32 %v12934_v5, %v10858_v32 }
 0x33a   :  { %7539 = vmatpush.bf16.msrb.mxu1 %v10909_v40  ;;  %7566 = vmatpush.bf16.msrb.mxu3 %v11181_v27  ;;  %v13002_v49 = vld [vmem:[#allocation8 + $0x724] sm:$0xf]  ;;  %v11130_v42 = vld [vmem:[#allocation8 + $0x730] sm:$0xf0]  ;;  %v10989_v63 = vor.u32 %v12966_v50, %v10986_v57 }
 0x33b   :  { %v13058_v22 = vld [vmem:[#allocation8 + $0x8e4] sm:$0xf]  ;;  %v11354_v38 = vld [vmem:[#allocation8 + $0x8f0] sm:$0xf0]  ;;  %v11133_v24 = vor.u32 %v13002_v49, %v11130_v42 }
 0x33c   :  { %7553 = vmatpush.bf16.msrb.mxu2 %v11037_v39  ;;  %7526 = vmatpush.bf16.msrb.mxu0 %v10765_v60  ;;  %v13090_v47 = vld [vmem:[#allocation8 + $0x9e4] sm:$0xf]  ;;  %v11482_v34 = vld [vmem:[#allocation8 + $0x9f0] sm:$0xf0]  ;;  %v11357_v15 = vor.u32 %v13058_v22, %v11354_v38 }
 0x33d   :  { %v13122_v58 = vld [vmem:[#allocation8 + $0xae4] sm:$0xf]  ;;  %v11610_v26 = vld [vmem:[#allocation8 + $0xaf0] sm:$0xf0]  ;;  %v11485_v40 = vor.u32 %v13090_v47, %v11482_v34 }
 0x33e   :  { %7540 = vmatpush.bf16.msrb.mxu1 %v10893_v36  ;;  %7567 = vmatpush.bf16.msrb.mxu3 %v11165_v0  ;;  %v12998_v59 = vld [vmem:[#allocation8 + $0x704] sm:$0xf]  ;;  %v11114_v20 = vld [vmem:[#allocation8 + $0x710] sm:$0xf0]  ;;  %v11613_v39 = vor.u32 %v13122_v58, %v11610_v26 }
 0x33f   :  { %v13054_v46 = vld [vmem:[#allocation8 + $0x8c4] sm:$0xf]  ;;  %v11338_v61 = vld [vmem:[#allocation8 + $0x8d0] sm:$0xf0]  ;;  %v11117_v6 = vor.u32 %v12998_v59, %v11114_v20 }
 0x340   :  { %7554 = vmatpush.bf16.msrb.mxu2 %v11021_v21  ;;  %7527 = vmatpush.bf16.msrb.mxu0 %v10749_v37  ;;  %v13086_v14 = vld [vmem:[#allocation8 + $0x9c4] sm:$0xf]  ;;  %v11466_v27 = vld [vmem:[#allocation8 + $0x9d0] sm:$0xf0]  ;;  %v11341_v60 = vor.u32 %v13054_v46, %v11338_v61 }
 0x341   :  { %v13118_v25 = vld [vmem:[#allocation8 + $0xac4] sm:$0xf]  ;;  %v11594_v11 = vld [vmem:[#allocation8 + $0xad0] sm:$0xf0]  ;;  %v11469_v36 = vor.u32 %v13086_v14, %v11466_v27 }
 0x342   :  { %7541 = vmatpush.bf16.msrb.mxu1 %v10877_v17  ;;  %7568 = vmatpush.bf16.msrb.mxu3 %v11149_v28  ;;  %v13154_v10 = vld [vmem:[#allocation8 + $0xbe4] sm:$0xf]  ;;  %v11738_v53 = vld [vmem:[#allocation8 + $0xbf0] sm:$0xf0]  ;;  %v11597_v21 = vor.u32 %v13118_v25, %v11594_v11 }
 0x343   :  { %v13050_v4 = vld [vmem:[#allocation8 + $0x8a4] sm:$0xf]  ;;  %v11322_v9 = vld [vmem:[#allocation8 + $0x8b0] sm:$0xf0]  ;;  %v11741_v0 = vor.u32 %v13154_v10, %v11738_v53 }
 0x344   :  { %7555 = vmatpush.bf16.msrb.mxu2 %v11005_v52  ;;  %7528 = vmatpush.bf16.msrb.mxu0 %v10733_v62  ;;  %v13082_v45 = vld [vmem:[#allocation8 + $0x9a4] sm:$0xf]  ;;  %v11450_v23 = vld [vmem:[#allocation8 + $0x9b0] sm:$0xf0]  ;;  %v11325_v37 = vor.u32 %v13050_v4, %v11322_v9 }
 0x345   :  { %v13114_v30 = vld [vmem:[#allocation8 + $0xaa4] sm:$0xf]  ;;  %v11578_v51 = vld [vmem:[#allocation8 + $0xab0] sm:$0xf0]  ;;  %v11453_v1 = vor.u32 %v13082_v45, %v11450_v23 }
 0x346   :  { %7542 = vmatpush.bf16.msrb.mxu1 %v10861_v29  ;;  %7569 = vmatpush.bf16.msrb.mxu3 %v11133_v24  ;;  %v13150_v3 = vld [vmem:[#allocation8 + $0xbc4] sm:$0xf]  ;;  %v11722_v54 = vld [vmem:[#allocation8 + $0xbd0] sm:$0xf0]  ;;  %v11581_v8 = vor.u32 %v13114_v30, %v11578_v51 }
 0x347   :  { %7529 = vmatmul.bf16.vlgmr.msrb.gmra.mxu0 %v13862_v48  ;;  %v13046_v17 = vld [vmem:[#allocation8 + $0x884] sm:$0xf]  ;;  %v11306_v52 = vld [vmem:[#allocation8 + $0x890] sm:$0xf0]  ;;  %v11725_v32 = vor.u32 %v13150_v3, %v11722_v54 }
 0x348   :  { %7556 = vmatpush.bf16.msrb.mxu2 %v10989_v63  ;;  %7577 = vmatpush.bf16.msra.mxu0 %v11357_v15  ;;  %v13078_v5 = vld [vmem:[#allocation8 + $0x984] sm:$0xf]  ;;  %v11434_v50 = vld [vmem:[#allocation8 + $0x990] sm:$0xf0]  ;;  %v11309_v22 = vor.u32 %v13046_v17, %v11306_v52 }
 0x349   :  { %7543 = vmatmul.bf16.vlgmr.msrb.gmra.mxu1 %v13866_v44  ;;  %v13110_v28 = vld [vmem:[#allocation8 + $0xa84] sm:$0xf]  ;;  %v11562_v57 = vld [vmem:[#allocation8 + $0xa90] sm:$0xf0]  ;;  %v11437_v38 = vor.u32 %v13078_v5, %v11434_v50 }
 0x34a   :  { %7591 = vmatpush.bf16.msra.mxu1 %v11485_v40  ;;  %7570 = vmatpush.bf16.msrb.mxu3 %v11117_v6  ;;  %v13146_v49 = vld [vmem:[#allocation8 + $0xba4] sm:$0xf]  ;;  %v11706_v42 = vld [vmem:[#allocation8 + $0xbb0] sm:$0xf0]  ;;  %v11565_v47 = vor.u32 %v13110_v28, %v11562_v57 }
 0x34b   :  { %7557 = vmatmul.bf16.vlgmr.msrb.gmra.mxu2 %v13870_v19  ;;  %v13042_v62 = vld [vmem:[#allocation8 + $0x864] sm:$0xf]  ;;  %v11290_v34 = vld [vmem:[#allocation8 + $0x870] sm:$0xf0]  ;;  %v11709_v26 = vor.u32 %v13146_v49, %v11706_v42 }
 0x34c   :  { %7605 = vmatpush.bf16.msra.mxu2 %v11613_v39  ;;  %7578 = vmatpush.bf16.msra.mxu0 %v11341_v60  ;;  %v13074_v58 = vld [vmem:[#allocation8 + $0x964] sm:$0xf]  ;;  %v11418_v29 = vld [vmem:[#allocation8 + $0x970] sm:$0xf0]  ;;  %v11293_v20 = vor.u32 %v13042_v62, %v11290_v34 }
 0x34d   :  { %7571 = vmatmul.bf16.vlgmr.msrb.gmra.mxu3 %v13874_v55  ;;  %v13106_v63 = vld [vmem:[#allocation8 + $0xa64] sm:$0xf]  ;;  %v11546_v24 = vld [vmem:[#allocation8 + $0xa70] sm:$0xf0]  ;;  %v11421_v40 = vor.u32 %v13074_v58, %v11418_v29 }
 0x34e   :  { %7592 = vmatpush.bf16.msra.mxu1 %v11469_v36  ;;  %7619 = vmatpush.bf16.msra.mxu3 %v11741_v0  ;;  %v13142_v15 = vld [vmem:[#allocation8 + $0xb84] sm:$0xf]  ;;  %v11690_v59 = vld [vmem:[#allocation8 + $0xb90] sm:$0xf0]  ;;  %v11549_v39 = vor.u32 %v13106_v63, %v11546_v24 }
 0x34f   :  { %v13038_v46 = vld [vmem:[#allocation8 + $0x844] sm:$0xf]  ;;  %v11274_v61 = vld [vmem:[#allocation8 + $0x850] sm:$0xf0]  ;;  %v11693_v27 = vor.u32 %v13142_v15, %v11690_v59 }
 0x350   :  { %7606 = vmatpush.bf16.msra.mxu2 %v11597_v21  ;;  %7579 = vmatpush.bf16.msra.mxu0 %v11325_v37  ;;  %v13070_v14 = vld [vmem:[#allocation8 + $0x944] sm:$0xf]  ;;  %v11402_v25 = vld [vmem:[#allocation8 + $0x950] sm:$0xf0]  ;;  %v11277_v60 = vor.u32 %v13038_v46, %v11274_v61 }
 0x351   :  { %v13102_v11 = vld [vmem:[#allocation8 + $0xa44] sm:$0xf]  ;;  %v11530_v10 = vld [vmem:[#allocation8 + $0xa50] sm:$0xf0]  ;;  %v11405_v36 = vor.u32 %v13070_v14, %v11402_v25 }
 0x352   :  { %7593 = vmatpush.bf16.msra.mxu1 %v11453_v1  ;;  %7620 = vmatpush.bf16.msra.mxu3 %v11725_v32  ;;  %v13138_v53 = vld [vmem:[#allocation8 + $0xb64] sm:$0xf]  ;;  %v11674_v6 = vld [vmem:[#allocation8 + $0xb70] sm:$0xf0]  ;;  %v11533_v21 = vor.u32 %v13102_v11, %v11530_v10 }
 0x353   :  { %v13034_v4 = vld [vmem:[#allocation8 + $0x824] sm:$0xf]  ;;  %v11258_v9 = vld [vmem:[#allocation8 + $0x830] sm:$0xf0]  ;;  %v11677_v0 = vor.u32 %v13138_v53, %v11674_v6 }
 0x354   :  { %7607 = vmatpush.bf16.msra.mxu2 %v11581_v8  ;;  %7580 = vmatpush.bf16.msra.mxu0 %v11309_v22  ;;  %v13066_v45 = vld [vmem:[#allocation8 + $0x924] sm:$0xf]  ;;  %v11386_v23 = vld [vmem:[#allocation8 + $0x930] sm:$0xf0]  ;;  %v11261_v37 = vor.u32 %v13034_v4, %v11258_v9 }
 0x355   :  { %v13098_v30 = vld [vmem:[#allocation8 + $0xa24] sm:$0xf]  ;;  %v11514_v51 = vld [vmem:[#allocation8 + $0xa30] sm:$0xf0]  ;;  %v11389_v17 = vor.u32 %v13066_v45, %v11386_v23 }
 0x356   :  { %7594 = vmatpush.bf16.msra.mxu1 %v11437_v38  ;;  %7621 = vmatpush.bf16.msra.mxu3 %v11709_v26  ;;  %v13134_v3 = vld [vmem:[#allocation8 + $0xb44] sm:$0xf]  ;;  %v11658_v54 = vld [vmem:[#allocation8 + $0xb50] sm:$0xf0]  ;;  %v11517_v52 = vor.u32 %v13098_v30, %v11514_v51 }
 0x357   :  { %v13030_v1 = vld [vmem:[#allocation8 + $0x804] sm:$0xf]  ;;  %v11242_v8 = vld [vmem:[#allocation8 + $0x810] sm:$0xf0]  ;;  %v11661_v28 = vor.u32 %v13134_v3, %v11658_v54 }
 0x358   :  { %7608 = vmatpush.bf16.msra.mxu2 %v11565_v47  ;;  %7581 = vmatpush.bf16.msra.mxu0 %v11293_v20  ;;  %v13062_v5 = vld [vmem:[#allocation8 + $0x904] sm:$0xf]  ;;  %v11370_v32 = vld [vmem:[#allocation8 + $0x910] sm:$0xf0]  ;;  %v11245_v62 = vor.u32 %v13030_v1, %v11242_v8 }
 0x359   :  { %v13094_v50 = vld [vmem:[#allocation8 + $0xa04] sm:$0xf]  ;;  %v11498_v57 = vld [vmem:[#allocation8 + $0xa10] sm:$0xf0]  ;;  %v11373_v29 = vor.u32 %v13062_v5, %v11370_v32 }
 0x35a   :  { %7595 = vmatpush.bf16.msra.mxu1 %v11421_v40  ;;  %7622 = vmatpush.bf16.msra.mxu3 %v11693_v27  ;;  %v13130_v49 = vld [vmem:[#allocation8 + $0xb24] sm:$0xf]  ;;  %v11642_v42 = vld [vmem:[#allocation8 + $0xb30] sm:$0xf0]  ;;  %v11501_v63 = vor.u32 %v13094_v50, %v11498_v57 }
 0x35b   :  { %v13186_v22 = vld [vmem:[#allocation8 + $0xce4] sm:$0xf]  ;;  %v11866_v38 = vld [vmem:[#allocation8 + $0xcf0] sm:$0xf0]  ;;  %v11645_v24 = vor.u32 %v13130_v49, %v11642_v42 }
 0x35c   :  { %7609 = vmatpush.bf16.msra.mxu2 %v11549_v39  ;;  %7582 = vmatpush.bf16.msra.mxu0 %v11277_v60  ;;  %v13218_v47 = vld [vmem:[#allocation8 + $0xde4] sm:$0xf]  ;;  %v11994_v34 = vld [vmem:[#allocation8 + $0xdf0] sm:$0xf0]  ;;  %v11869_v15 = vor.u32 %v13186_v22, %v11866_v38  ;;  %v14019_v38 = vpop.f32.mrf.mxu0 }
 0x35d   :  { %v13250_v58 = vld [vmem:[#allocation8 + $0xee4] sm:$0xf]  ;;  %v12122_v26 = vld [vmem:[#allocation8 + $0xef0] sm:$0xf0]  ;;  %v11997_v40 = vor.u32 %v13218_v47, %v11994_v34 }
 0x35e   :  { %7596 = vmatpush.bf16.msra.mxu1 %v11405_v36  ;;  %7623 = vmatpush.bf16.msra.mxu3 %v11677_v0  ;;  %v13126_v59 = vld [vmem:[#allocation8 + $0xb04] sm:$0xf]  ;;  %v11626_v20 = vld [vmem:[#allocation8 + $0xb10] sm:$0xf0]  ;;  %v12125_v39 = vor.u32 %v13250_v58, %v12122_v26 }
 0x35f   :  { %v13182_v46 = vld [vmem:[#allocation8 + $0xcc4] sm:$0xf]  ;;  %v11850_v61 = vld [vmem:[#allocation8 + $0xcd0] sm:$0xf0]  ;;  %v11629_v6 = vor.u32 %v13126_v59, %v11626_v20 }
 0x360   :  { %7610 = vmatpush.bf16.msra.mxu2 %v11533_v21  ;;  %7583 = vmatpush.bf16.msra.mxu0 %v11261_v37  ;;  %v13214_v14 = vld [vmem:[#allocation8 + $0xdc4] sm:$0xf]  ;;  %v11978_v27 = vld [vmem:[#allocation8 + $0xdd0] sm:$0xf0]  ;;  %v11853_v60 = vor.u32 %v13182_v46, %v11850_v61 }
 0x361   :  { %v13246_v25 = vld [vmem:[#allocation8 + $0xec4] sm:$0xf]  ;;  %v12106_v11 = vld [vmem:[#allocation8 + $0xed0] sm:$0xf0]  ;;  %v11981_v36 = vor.u32 %v13214_v14, %v11978_v27 }
 0x362   :  { %7597 = vmatpush.bf16.msra.mxu1 %v11389_v17  ;;  %7624 = vmatpush.bf16.msra.mxu3 %v11661_v28  ;;  %v13282_v10 = vld [vmem:[#allocation8 + $0xfe4] sm:$0xf]  ;;  %v12250_v53 = vld [vmem:[#allocation8 + $0xff0] sm:$0xf0]  ;;  %v12109_v21 = vor.u32 %v13246_v25, %v12106_v11 }
 0x363   :  { %v13178_v4 = vld [vmem:[#allocation8 + $0xca4] sm:$0xf]  ;;  %v11834_v9 = vld [vmem:[#allocation8 + $0xcb0] sm:$0xf0]  ;;  %v12253_v0 = vor.u32 %v13282_v10, %v12250_v53 }
 0x364   :  { %7611 = vmatpush.bf16.msra.mxu2 %v11517_v52  ;;  %7584 = vmatpush.bf16.msra.mxu0 %v11245_v62  ;;  %v13210_v45 = vld [vmem:[#allocation8 + $0xda4] sm:$0xf]  ;;  %v11962_v23 = vld [vmem:[#allocation8 + $0xdb0] sm:$0xf0]  ;;  %v11837_v37 = vor.u32 %v13178_v4, %v11834_v9 }
 0x365   :  { %v13242_v30 = vld [vmem:[#allocation8 + $0xea4] sm:$0xf]  ;;  %v12090_v51 = vld [vmem:[#allocation8 + $0xeb0] sm:$0xf0]  ;;  %v11965_v1 = vor.u32 %v13210_v45, %v11962_v23 }
 0x366   :  { %7598 = vmatpush.bf16.msra.mxu1 %v11373_v29  ;;  %7625 = vmatpush.bf16.msra.mxu3 %v11645_v24  ;;  %v13278_v3 = vld [vmem:[#allocation8 + $0xfc4] sm:$0xf]  ;;  %v12234_v54 = vld [vmem:[#allocation8 + $0xfd0] sm:$0xf0]  ;;  %v12093_v8 = vor.u32 %v13242_v30, %v12090_v51 }
 0x367   :  { %7585 = vmatmul.bf16.vlgmr.msra.gmra.mxu0 %v13944_v33  ;;  %v13174_v17 = vld [vmem:[#allocation8 + $0xc84] sm:$0xf]  ;;  %v11818_v52 = vld [vmem:[#allocation8 + $0xc90] sm:$0xf0]  ;;  %v12237_v32 = vor.u32 %v13278_v3, %v12234_v54 }
 0x368   :  { %7612 = vmatpush.bf16.msra.mxu2 %v11501_v63  ;;  %7633 = vmatpush.bf16.msrb.mxu0 %v11869_v15  ;;  %v13206_v5 = vld [vmem:[#allocation8 + $0xd84] sm:$0xf]  ;;  %v11946_v50 = vld [vmem:[#allocation8 + $0xd90] sm:$0xf0]  ;;  %v11821_v22 = vor.u32 %v13174_v17, %v11818_v52 }
 0x369   :  { %7599 = vmatmul.bf16.vlgmr.msra.gmra.mxu1 %v13946_v35  ;;  %v13238_v28 = vld [vmem:[#allocation8 + $0xe84] sm:$0xf]  ;;  %v12074_v57 = vld [vmem:[#allocation8 + $0xe90] sm:$0xf0]  ;;  %v11949_v47 = vor.u32 %v13206_v5, %v11946_v50 }
 0x36a   :  { %7647 = vmatpush.bf16.msrb.mxu1 %v11997_v40  ;;  %7626 = vmatpush.bf16.msra.mxu3 %v11629_v6  ;;  %v13274_v49 = vld [vmem:[#allocation8 + $0xfa4] sm:$0xf]  ;;  %v12218_v42 = vld [vmem:[#allocation8 + $0xfb0] sm:$0xf0]  ;;  %v12077_v62 = vor.u32 %v13238_v28, %v12074_v57 }
 0x36b   :  { %7613 = vmatmul.bf16.vlgmr.msra.gmra.mxu2 %v13951_v7  ;;  %v13170_v34 = vld [vmem:[#allocation8 + $0xc64] sm:$0xf]  ;;  %v11802_v58 = vld [vmem:[#allocation8 + $0xc70] sm:$0xf0]  ;;  %v12221_v29 = vor.u32 %v13274_v49, %v12218_v42 }
 0x36c   :  { %7661 = vmatpush.bf16.msrb.mxu2 %v12125_v39  ;;  %7634 = vmatpush.bf16.msrb.mxu0 %v11853_v60  ;;  %v13202_v26 = vld [vmem:[#allocation8 + $0xd64] sm:$0xf]  ;;  %v11930_v63 = vld [vmem:[#allocation8 + $0xd70] sm:$0xf0]  ;;  %v11805_v40 = vor.u32 %v13170_v34, %v11802_v58 }
 0x36d   :  { %7627 = vmatmul.bf16.vlgmr.msra.gmra.mxu3 %v13953_v41  ;;  %v13234_v24 = vld [vmem:[#allocation8 + $0xe64] sm:$0xf]  ;;  %v12058_v15 = vld [vmem:[#allocation8 + $0xe70] sm:$0xf0]  ;;  %v11933_v39 = vor.u32 %v13202_v26, %v11930_v63  ;;  %v10336_v26 = vld [vmem:[#allocation8 + $0xe8] sm:$0xf] }
 0x36e   :  { %7648 = vmatpush.bf16.msrb.mxu1 %v11981_v36  ;;  %7675 = vmatpush.bf16.msrb.mxu3 %v12253_v0  ;;  %v13270_v59 = vld [vmem:[#allocation8 + $0xf84] sm:$0xf]  ;;  %v12202_v20 = vld [vmem:[#allocation8 + $0xf90] sm:$0xf0]  ;;  %v12061_v46 = vor.u32 %v13234_v24, %v12058_v15  ;;  %v14021_v36 = vpop.f32.mrf.mxu1  ;;  %v10464_v63 = vld [vmem:[#allocation8 + $0x1e8] sm:$0xf] }
 0x36f   :  { %v13166_v61 = vld [vmem:[#allocation8 + $0xc44] sm:$0xf]  ;;  %v11786_v14 = vld [vmem:[#allocation8 + $0xc50] sm:$0xf0]  ;;  %v12205_v25 = vor.u32 %v13270_v59, %v12202_v20  ;;  %v12837_v15 = vld [vmem:[#allocation8 + $0x1f4] sm:$0xf0] }
 0x370   :  { %7662 = vmatpush.bf16.msrb.mxu2 %v12109_v21  ;;  %7635 = vmatpush.bf16.msrb.mxu0 %v11837_v37  ;;  %v13198_v27 = vld [vmem:[#allocation8 + $0xd44] sm:$0xf]  ;;  %v11914_v11 = vld [vmem:[#allocation8 + $0xd50] sm:$0xf0]  ;;  %v14023_v21 = vpop.f32.mrf.mxu2  ;;  %v11789_v4 = vor.u32 %v13166_v61, %v11786_v14  ;;  %v10592_v59 = vld [vmem:[#allocation8 + $0x2e8] sm:$0xf] }
 0x371   :  { %v13230_v10 = vld [vmem:[#allocation8 + $0xe44] sm:$0xf]  ;;  %v12042_v53 = vld [vmem:[#allocation8 + $0xe50] sm:$0xf0]  ;;  %v11917_v9 = vor.u32 %v13198_v27, %v11914_v11  ;;  %v12869_v20 = vld [vmem:[#allocation8 + $0x2f4] sm:$0xf0] }
 0x372   :  { %7649 = vmatpush.bf16.msrb.mxu1 %v11965_v1  ;;  %7676 = vmatpush.bf16.msrb.mxu3 %v12237_v32  ;;  %v13266_v6 = vld [vmem:[#allocation8 + $0xf64] sm:$0xf]  ;;  %v12186_v60 = vld [vmem:[#allocation8 + $0xf70] sm:$0xf0]  ;;  %v12045_v45 = vor.u32 %v13230_v10, %v12042_v53  ;;  %v14025_v1 = vpop.f32.mrf.mxu0 }
 0x373   :  { %v13162_v0 = vld [vmem:[#allocation8 + $0xc24] sm:$0xf]  ;;  %v11770_v23 = vld [vmem:[#allocation8 + $0xc30] sm:$0xf0]  ;;  %v12189_v51 = vor.u32 %v13266_v6, %v12186_v60  ;;  %v10465_v6 = vor.u32 %v12837_v15, %v10464_v63  ;;  %v10593_v60 = vor.u32 %v12869_v20, %v10592_v59  ;;  %v10288_v59 = vld [vmem:[#allocation8 + $0x88] sm:$0xf] }
 0x374   :  { %7663 = vmatpush.bf16.msrb.mxu2 %v12093_v8  ;;  %7636 = vmatpush.bf16.msrb.mxu0 %v11821_v22  ;;  %v13194_v30 = vld [vmem:[#allocation8 + $0xd24] sm:$0xf]  ;;  %v11898_v3 = vld [vmem:[#allocation8 + $0xd30] sm:$0xf0]  ;;  %v11773_v52 = vor.u32 %v13162_v0, %v11770_v23  ;;  %v14027_v22 = vpop.f32.mrf.mxu3  ;;  %v12833_v0 = vld [vmem:[#allocation8 + $0x1d4] sm:$0xf0] }
 0x375   :  { %v13226_v54 = vld [vmem:[#allocation8 + $0xe24] sm:$0xf]  ;;  %v12026_v37 = vld [vmem:[#allocation8 + $0xe30] sm:$0xf0]  ;;  %v11901_v50 = vor.u32 %v13194_v30, %v11898_v3  ;;  %v10576_v23 = vld [vmem:[#allocation8 + $0x2c8] sm:$0xf] }
 0x376   :  { %7650 = vmatpush.bf16.msrb.mxu1 %v11949_v47  ;;  %7677 = vmatpush.bf16.msrb.mxu3 %v12221_v29  ;;  %v13262_v8 = vld [vmem:[#allocation8 + $0xf44] sm:$0xf]  ;;  %v12170_v17 = vld [vmem:[#allocation8 + $0xf50] sm:$0xf0]  ;;  %v12029_v28 = vor.u32 %v13226_v54, %v12026_v37  ;;  %v12805_v29 = vld [vmem:[#allocation8 + $0xf4] sm:$0xf0]  ;;  %v14031_v61 = vpop.f32.mrf.mxu1 }
 0x377   :  { %v13158_v5 = vld [vmem:[#allocation8 + $0xc04] sm:$0xf]  ;;  %v11754_v32 = vld [vmem:[#allocation8 + $0xc10] sm:$0xf0]  ;;  %v12173_v47 = vor.u32 %v13262_v8, %v12170_v17  ;;  %v12865_v30 = vld [vmem:[#allocation8 + $0x2d4] sm:$0xf0] }
 0x378   :  { %7664 = vmatpush.bf16.msrb.mxu2 %v12077_v62  ;;  %7637 = vmatpush.bf16.msrb.mxu0 %v11805_v40  ;;  %v13190_v57 = vld [vmem:[#allocation8 + $0xd04] sm:$0xf]  ;;  %v11882_v49 = vld [vmem:[#allocation8 + $0xd10] sm:$0xf0]  ;;  %v11757_v24 = vor.u32 %v13158_v5, %v11754_v32  ;;  %v14033_v14 = vpop.f32.mrf.mxu2  ;;  %v10720_v3 = vld [vmem:[#allocation8 + $0x3e8] sm:$0xf] }
 0x379   :  { %v13222_v42 = vld [vmem:[#allocation8 + $0xe04] sm:$0xf]  ;;  %v12010_v62 = vld [vmem:[#allocation8 + $0xe10] sm:$0xf0]  ;;  %v11885_v40 = vor.u32 %v13190_v57, %v11882_v49  ;;  %v12901_v54 = vld [vmem:[#allocation8 + $0x3f4] sm:$0xf0] }
 0x37a   :  { %7651 = vmatpush.bf16.msrb.mxu1 %v11933_v39  ;;  %7678 = vmatpush.bf16.msrb.mxu3 %v12205_v25  ;;  %v13258_v34 = vld [vmem:[#allocation8 + $0xf24] sm:$0xf]  ;;  %v12154_v58 = vld [vmem:[#allocation8 + $0xf30] sm:$0xf0]  ;;  %v12013_v39 = vor.u32 %v13222_v42, %v12010_v62  ;;  %v10337_v25 = vor.u32 %v12805_v29, %v10336_v26  ;;  %v14035_v53 = vpop.f32.mrf.mxu0  ;;  %v10304_v5 = vld [vmem:[#allocation8 + $0xa8] sm:$0xf]  ;;  %v10721_v57 = vor.u32 %v12901_v54, %v10720_v3 }
 0x37b   :  { %v12157_v27 = vor.u32 %v13258_v34, %v12154_v58  ;;  %v13254_v11 = vld [vmem:[#allocation8 + $0xf04] sm:$0xf]  ;;  %v12138_v10 = vld [vmem:[#allocation8 + $0xf10] sm:$0xf0]  ;;  %v12797_v32 = vld [vmem:[#allocation8 + $0xb4] sm:$0xf0] }
 0x37c   :  { %7665 = vmatpush.bf16.msrb.mxu2 %v12061_v46  ;;  %7638 = vmatpush.bf16.msrb.mxu0 %v11789_v4  ;;  %v14029_v46 = vld [vmem:[#allocation10] sm:$0xf]  ;;  %v10320_v4 = vld [vmem:[#allocation8 + $0xc8] sm:$0xf]  ;;  %v12141_v37 = vor.u32 %v13254_v11, %v12138_v10  ;;  %v12829_v49 = vld [vmem:[#allocation8 + $0x1b4] sm:$0xf0]  ;;  %v10305_v63 = vor.u32 %v12797_v32, %v10304_v5 }
 0x37d   :  { %v10560_v42 = vld [vmem:[#allocation8 + $0x2a8] sm:$0xf]  ;;  %v12897_v58 = vld [vmem:[#allocation8 + $0x3d4] sm:$0xf0] }
 0x37e   :  { %7652 = vmatpush.bf16.msrb.mxu1 %v11917_v9  ;;  %7679 = vmatpush.bf16.msrb.mxu3 %v12189_v51  ;;  %v12801_v9 = vld [vmem:[#allocation8 + $0xd4] sm:$0xf0]  ;;  %v4673_v51 = vperm.slane %v14029_v46, 0  ;;  %v10704_v34 = vld [vmem:[#allocation8 + $0x3c8] sm:$0xf]  ;;  %v14044_v26 = vpop.f32.mrf.mxu1 }
 0x37f   :  { %v10321_v8 = vor.u32 %v12801_v9, %v10320_v4  ;;  %v12793_v20 = vld [vmem:[#allocation8 + $0x94] sm:$0xf0]  ;;  %v10544_v46 = vld [vmem:[#allocation8 + $0x288] sm:$0xf] }
 0x380   :  { %7666 = vmatpush.bf16.msrb.mxu2 %v12045_v45  ;;  %7639 = vmatpush.bf16.msrb.mxu0 %v11773_v52  ;;  %v10448_v45 = vld [vmem:[#allocation8 + $0x1c8] sm:$0xf]  ;;  %v10577_v52 = vor.u32 %v12865_v30, %v10576_v23  ;;  %v7251_v62 = vadd.f32 %v14019_v38, %v4673_v51  ;;  %v14046_v29 = vpop.f32.mrf.mxu2  ;;  %v10705_v38 = vor.u32 %v12897_v58, %v10704_v34  ;;  %v12789_v23 = vld [vmem:[#allocation8 + $0x74] sm:$0xf0] }
 0x381   :  { %v10449_v17 = vor.u32 %v12833_v0, %v10448_v45  ;;  %v10688_v10 = vld [vmem:[#allocation8 + $0x3a8] sm:$0xf]  ;;  %v7253_v3 = vadd.f32 %v14025_v1, %v4673_v51  ;;  %v12889_v5 = vld [vmem:[#allocation8 + $0x394] sm:$0xf0] }
 0x382   :  { %7653 = vmatpush.bf16.msrb.mxu1 %v11901_v50  ;;  %7680 = vmatpush.bf16.msrb.mxu3 %v12173_v47  ;;  %v10432_v50 = vld [vmem:[#allocation8 + $0x1a8] sm:$0xf]  ;;  %v12861_v47 = vld [vmem:[#allocation8 + $0x2b4] sm:$0xf0]  ;;  %v14049_v11 = vpop.f32.mrf.mxu0 }
 0x383   :  { %v10561_v15 = vor.u32 %v12861_v47, %v10560_v42  ;;  %v10272_v0 = vld [vmem:[#allocation8 + $0x68] sm:$0xf]  ;;  %v12785_v42 = vld [vmem:[#allocation8 + $0x54] sm:$0xf0]  ;;  %v7267_v51 = vadd.f32 %v14031_v61, %v7253_v3 }
 0x384   :  { %7667 = vmatpush.bf16.msrb.mxu2 %v12029_v28  ;;  %7640 = vmatpush.bf16.msrb.mxu0 %v11757_v24  ;;  %v14038_v28 = vpop.f32.mrf.mxu3  ;;  %v10433_v24 = vor.u32 %v12829_v49, %v10432_v50  ;;  %v10400_v30 = vld [vmem:[#allocation8 + $0x168] sm:$0xf]  ;;  %v12817_v58 = vld [vmem:[#allocation8 + $0x154] sm:$0xf0] }
 0x385   :  { %v10256_v49 = vld [vmem:[#allocation8 + $0x48] sm:$0xf]  ;;  %v12777_v3 = vld [vmem:[#allocation8 + $0x14] sm:$0xf0] }
 0x386   :  { %7654 = vmatpush.bf16.msrb.mxu1 %v11885_v40  ;;  %7681 = vmatpush.bf16.msrb.mxu3 %v12157_v27  ;;  %v10416_v40 = vld [vmem:[#allocation8 + $0x188] sm:$0xf]  ;;  %v12857_v27 = vld [vmem:[#allocation8 + $0x294] sm:$0xf0]  ;;  %v14058_v47 = vpop.f32.mrf.mxu1 }
 0x387   :  { %7641 = vmatmul.bf16.vlgmr.msrb.gmra.mxu0 %v13994_v2  ;;  %v10545_v45 = vor.u32 %v12857_v27, %v10544_v46  ;;  %v10384_v1 = vld [vmem:[#allocation8 + $0x148] sm:$0xf]  ;;  %v12781_v27 = vld [vmem:[#allocation8 + $0x34] sm:$0xf0] }
 0x388   :  { %7668 = vmatpush.bf16.msrb.mxu2 %v12013_v39  ;;  %7689 = vmatpush.bf16.msra.mxu0 %v10337_v25  ;;  %v12825_v39 = vld [vmem:[#allocation8 + $0x194] sm:$0xf0]  ;;  %v7265_v25 = vadd.f32 %v14021_v36, %v7251_v62  ;;  %v14060_v62 = vpop.f32.mrf.mxu2  ;;  %v10385_v61 = vor.u32 %v12817_v58, %v10384_v1  ;;  %v10240_v46 = vld [vmem:[#allocation8 + $0x28] sm:$0xf] }
 0x389   :  { %7655 = vmatmul.bf16.vlgmr.msrb.gmra.mxu1 %v13998_v16  ;;  %v10417_v9 = vor.u32 %v12825_v39, %v10416_v40  ;;  %v7281_v40 = vadd.f32 %v14033_v14, %v7267_v51  ;;  %v12933_v1 = vld [vmem:[#allocation8 + $0x4f4] sm:$0xf0]  ;;  %v11104_v58 = vld [vmem:[#allocation8 + $0x6e8] sm:$0xf] }
 0x38a   :  { %7703 = vmatpush.bf16.msra.mxu1 %v10465_v6  ;;  %7682 = vmatpush.bf16.msrb.mxu3 %v12141_v37  ;;  %v12893_v6 = vld [vmem:[#allocation8 + $0x3b4] sm:$0xf0]  ;;  %v7279_v4 = vadd.f32 %v14023_v21, %v7265_v25  ;;  %v10273_v21 = vor.u32 %v12789_v23, %v10272_v0  ;;  %v10368_v25 = vld [vmem:[#allocation8 + $0x128] sm:$0xf]  ;;  %v10241_v23 = vor.u32 %v12781_v27, %v10240_v46 }
 0x38b   :  { %7669 = vmatmul.bf16.vlgmr.msrb.gmra.mxu2 %v13996_v13  ;;  %v10689_v54 = vor.u32 %v12893_v6, %v10688_v10  ;;  %v12821_v37 = vld [vmem:[#allocation8 + $0x174] sm:$0xf0]  ;;  %v7295_v14 = vadd.f32 %v14038_v28, %v7281_v40 }
 0x38c   :  { %7717 = vmatpush.bf16.msra.mxu2 %v10593_v60  ;;  %7690 = vmatpush.bf16.msra.mxu0 %v10321_v8  ;;  %v10289_v60 = vor.u32 %v12793_v20, %v10288_v59  ;;  %v14054_v36 = vpop.f32.mrf.mxu3  ;;  %v10528_v8 = vld [vmem:[#allocation8 + $0x268] sm:$0xf]  ;;  %v7293_v32 = vadd.f32 %v14027_v22, %v7279_v4  ;;  %v10401_v50 = vor.u32 %v12821_v37, %v10400_v30  ;;  %v12885_v20 = vld [vmem:[#allocation8 + $0x374] sm:$0xf0] }
 0x38d   :  { %7683 = vmatmul.bf16.vlgmr.msrb.gmra.mxu3 %v14004_v18  ;;  %v10656_v59 = vld [vmem:[#allocation8 + $0x368] sm:$0xf]  ;;  %v12813_v6 = vld [vmem:[#allocation8 + $0x134] sm:$0xf0] }
 0x38e   :  { %7704 = vmatpush.bf16.msra.mxu1 %v10449_v17  ;;  %7731 = vmatpush.bf16.msra.mxu3 %v10721_v57  ;;  %v12853_v17 = vld [vmem:[#allocation8 + $0x274] sm:$0xf0]  ;;  %v7307_v22 = vadd.f32 %v14035_v53, %v7293_v32  ;;  %v10657_v10 = vor.u32 %v12885_v20, %v10656_v59  ;;  %v10224_v30 = vld [vmem:[#allocation8 + $0x8] sm:$0xf]  ;;  %v10369_v37 = vor.u32 %v12813_v6, %v10368_v25 }
 0x38f   :  { %v10529_v57 = vor.u32 %v12853_v17, %v10528_v8  ;;  %v12845_v53 = vld [vmem:[#allocation8 + $0x234] sm:$0xf0]  ;;  %v10352_v17 = vld [vmem:[#allocation8 + $0x108] sm:$0xf]  ;;  %v10225_v51 = vor.u32 %v12777_v3, %v10224_v30 }
 0x390   :  { %7718 = vmatpush.bf16.msra.mxu2 %v10577_v52  ;;  %7691 = vmatpush.bf16.msra.mxu0 %v10305_v63  ;;  %v10672_v52 = vld [vmem:[#allocation8 + $0x388] sm:$0xf]  ;;  %v7321_v4 = vadd.f32 %v14044_v26, %v7307_v22  ;;  %v7309_v26 = vadd.f32 %v14049_v11, %v7295_v14  ;;  %v14072_v32 = vpop.f32.mrf.mxu2  ;;  %v12929_v6 = vld [vmem:[#allocation8 + $0x4d4] sm:$0xf0] }
 0x391   :  { %v10673_v34 = vor.u32 %v12889_v5, %v10672_v52  ;;  %v10512_v63 = vld [vmem:[#allocation8 + $0x248] sm:$0xf]  ;;  %v12809_v52 = vld [vmem:[#allocation8 + $0x114] sm:$0xf0] }
 0x392   :  { %7705 = vmatpush.bf16.msra.mxu1 %v10433_v24  ;;  %7732 = vmatpush.bf16.msra.mxu3 %v10705_v38  ;;  %v12849_v24 = vld [vmem:[#allocation8 + $0x254] sm:$0xf0]  ;;  %v10257_v38 = vor.u32 %v12785_v42, %v10256_v49  ;;  %v10480_v5 = vld [vmem:[#allocation8 + $0x208] sm:$0xf]  ;;  %v10353_v11 = vor.u32 %v12809_v52, %v10352_v17  ;;  %v7323_v20 = vadd.f32 %v14058_v47, %v7309_v26 }
 0x393   :  { %v10513_v39 = vor.u32 %v12849_v24, %v10512_v63  ;;  %v12877_v49 = vld [vmem:[#allocation8 + $0x334] sm:$0xf0]  ;;  %v10848_v42 = vld [vmem:[#allocation8 + $0x4e8] sm:$0xf] }
 0x394   :  { %7719 = vmatpush.bf16.msra.mxu2 %v10561_v15  ;;  %7692 = vmatpush.bf16.msra.mxu0 %v10289_v60  ;;  %v14063_v15 = vpop.f32.mrf.mxu0  ;;  %v10496_v60 = vld [vmem:[#allocation8 + $0x228] sm:$0xf]  ;;  %v14068_v0 = vpop.f32.mrf.mxu3  ;;  %v12997_v63 = vld [vmem:[#allocation8 + $0x6f4] sm:$0xf0] }
 0x395   :  { %v10497_v8 = vor.u32 %v12845_v53, %v10496_v60  ;;  %v11105_v25 = vor.u32 %v12997_v63, %v11104_v58  ;;  %v10960_v60 = vld [vmem:[#allocation8 + $0x5c8] sm:$0xf]  ;;  %v13029_v14 = vld [vmem:[#allocation8 + $0x7f4] sm:$0xf0] }
 0x396   :  { %7706 = vmatpush.bf16.msra.mxu1 %v10417_v9  ;;  %7733 = vmatpush.bf16.msra.mxu3 %v10689_v54  ;;  %v10640_v9 = vld [vmem:[#allocation8 + $0x348] sm:$0xf]  ;;  %v7335_v54 = vadd.f32 %v14046_v29, %v7321_v4  ;;  %v12961_v4 = vld [vmem:[#allocation8 + $0x5d4] sm:$0xf0] }
 0x397   :  { %v10976_v29 = vld [vmem:[#allocation8 + $0x5e8] sm:$0xf]  ;;  %v10961_v3 = vor.u32 %v12961_v4, %v10960_v60  ;;  %v12921_v63 = vld [vmem:[#allocation8 + $0x494] sm:$0xf0] }
 0x398   :  { %7720 = vmatpush.bf16.msra.mxu2 %v10545_v45  ;;  %7693 = vmatpush.bf16.msra.mxu0 %v10273_v21  ;;  %v12881_v45 = vld [vmem:[#allocation8 + $0x354] sm:$0xf0]  ;;  %v7376_v21 = vpop.f32.mrf.mxu1  ;;  %v7349_v24 = vadd.f32 %v14054_v36, %v7335_v54  ;;  %v7337_v36 = vadd.f32 %v14060_v62, %v7323_v20  ;;  %v11232_v47 = vld [vmem:[#allocation8 + $0x7e8] sm:$0xf] }
 0x399   :  { %v10641_v28 = vor.u32 %v12881_v45, %v10640_v9  ;;  %v11088_v9 = vld [vmem:[#allocation8 + $0x6c8] sm:$0xf]  ;;  %v12993_v45 = vld [vmem:[#allocation8 + $0x6d4] sm:$0xf0]  ;;  %v11233_v26 = vor.u32 %v13029_v14, %v11232_v47 }
 0x39a   :  { %7707 = vmatpush.bf16.msra.mxu1 %v10401_v50  ;;  %7734 = vmatpush.bf16.msra.mxu3 %v10673_v34  ;;  %v12841_v50 = vld [vmem:[#allocation8 + $0x214] sm:$0xf0]  ;;  %v7363_v46 = vadd.f32 %v14063_v15, %v7349_v24  ;;  %v11089_v54 = vor.u32 %v12993_v45, %v11088_v9  ;;  %v7351_v17 = vadd.f32 %v14068_v0, %v7337_v36  ;;  %v10800_v58 = vld [vmem:[#allocation8 + $0x488] sm:$0xf] }
 0x39b   :  { %v12965_v34 = vld [vmem:[#allocation8 + $0x5f4] sm:$0xf0]  ;;  %v10481_v59 = vor.u32 %v12841_v50, %v10480_v5  ;;  %v7392_v5 = vpop.f32.mrf.mxu2  ;;  %v11072_v50 = vld [vmem:[#allocation8 + $0x6a8] sm:$0xf] }
 0x39c   :  { %7721 = vmatpush.bf16.msra.mxu2 %v10529_v57  ;;  %7694 = vmatpush.bf16.msra.mxu0 %v10257_v38  ;;  %v10624_v57 = vld [vmem:[#allocation8 + $0x328] sm:$0xf]  ;;  %v7364_v22 = vpop.f32.mrf.mxu0  ;;  %v10849_v38 = vor.u32 %v12933_v1, %v10848_v42  ;;  %v10977_v27 = vor.u32 %v12965_v34, %v10976_v29  ;;  %v7404_v53 = vpop.f32.mrf.mxu3  ;;  %v7377_v30 = vadd.f32 %v7376_v21, %v7363_v46  ;;  %v12925_v62 = vld [vmem:[#allocation8 + $0x4b4] sm:$0xf0] }
 0x39d   :  { %v10625_v40 = vor.u32 %v12877_v49, %v10624_v57  ;;  %v12989_v57 = vld [vmem:[#allocation8 + $0x6b4] sm:$0xf0]  ;;  %v11216_v42 = vld [vmem:[#allocation8 + $0x7c8] sm:$0xf]  ;;  %v7365_v29 = vadd.f32 %v7364_v22, %v7351_v17  ;;  %v10801_v46 = vor.u32 %v12921_v63, %v10800_v58 }
 0x39e   :  { %7708 = vmatpush.bf16.msra.mxu1 %v10385_v61  ;;  %7735 = vmatpush.bf16.msra.mxu3 %v10657_v10  ;;  %v10608_v61 = vld [vmem:[#allocation8 + $0x308] sm:$0xf]  ;;  %v7391_v21 = vadd.f32 %v14072_v32, %v7377_v30  ;;  %v13025_v1 = vld [vmem:[#allocation8 + $0x7d4] sm:$0xf0]  ;;  %v11073_v34 = vor.u32 %v12989_v57, %v11072_v50 }
 0x39f   :  { %v10832_v10 = vld [vmem:[#allocation8 + $0x4c8] sm:$0xf]  ;;  %v12985_v20 = vld [vmem:[#allocation8 + $0x694] sm:$0xf0] }
 0x3a0   :  { %7722 = vmatpush.bf16.msra.mxu2 %v10513_v39  ;;  %7695 = vmatpush.bf16.msra.mxu0 %v10241_v23  ;;  %v12873_v39 = vld [vmem:[#allocation8 + $0x314] sm:$0xf0]  ;;  %v10833_v15 = vor.u32 %v12929_v6, %v10832_v10  ;;  %v7378_v52 = vpop.f32.mrf.mxu1  ;;  %v10928_v24 = vld [vmem:[#allocation8 + $0x588] sm:$0xf] }
 0x3a1   :  { %v10609_v23 = vor.u32 %v12873_v39, %v10608_v61  ;;  %v11056_v32 = vld [vmem:[#allocation8 + $0x688] sm:$0xf]  ;;  %v13021_v22 = vld [vmem:[#allocation8 + $0x7b4] sm:$0xf0]  ;;  %v7379_v61 = vadd.f32 %v7378_v52, %v7365_v29 }
 0x3a2   :  { %7709 = vmatpush.bf16.msra.mxu1 %v10369_v37  ;;  %7736 = vmatpush.bf16.msra.mxu3 %v10641_v28  ;;  %v10816_v37 = vld [vmem:[#allocation8 + $0x4a8] sm:$0xf]  ;;  %v12957_v28 = vld [vmem:[#allocation8 + $0x5b4] sm:$0xf0]  ;;  %v11057_v10 = vor.u32 %v12985_v20, %v11056_v32 }
 0x3a3   :  { %v10817_v0 = vor.u32 %v12925_v62, %v10816_v37  ;;  %v10784_v6 = vld [vmem:[#allocation8 + $0x468] sm:$0xf]  ;;  %v12917_v60 = vld [vmem:[#allocation8 + $0x474] sm:$0xf0]  ;;  %v7393_v4 = vadd.f32 %v7392_v5, %v7379_v61  ;;  %v7446_v45 = vpop.f32.mrf.mxu2 }
 0x3a4   :  { %7723 = vmatpush.bf16.msra.mxu2 %v10497_v8  ;;  %7696 = vmatpush.bf16.msra.mxu0 %v10225_v51  ;;  %v10944_v8 = vld [vmem:[#allocation8 + $0x5a8] sm:$0xf]  ;;  %v7418_v49 = vpop.f32.mrf.mxu0  ;;  %v7406_v39 = vpop.f32.mrf.mxu3  ;;  %v12949_v47 = vld [vmem:[#allocation8 + $0x574] sm:$0xf0] }
 0x3a5   :  { %v10945_v51 = vor.u32 %v12957_v28, %v10944_v8  ;;  %v10912_v36 = vld [vmem:[#allocation8 + $0x568] sm:$0xf]  ;;  %v13017_v30 = vld [vmem:[#allocation8 + $0x794] sm:$0xf0] }
 0x3a6   :  { %7710 = vmatpush.bf16.msra.mxu1 %v10353_v11  ;;  %7737 = vmatpush.bf16.msra.mxu3 %v10625_v40  ;;  %v11217_v11 = vor.u32 %v13025_v1, %v11216_v42  ;;  %v7405_v40 = vadd.f32 %v7404_v53, %v7391_v21  ;;  %v11040_v14 = vld [vmem:[#allocation8 + $0x668] sm:$0xf]  ;;  %v10913_v62 = vor.u32 %v12949_v47, %v10912_v36  ;;  %v12913_v52 = vld [vmem:[#allocation8 + $0x454] sm:$0xf0] }
 0x3a7   :  { %7697 = vmatmul.bf16.vlgmr.msra.gmra.mxu0 %v14297_v43  ;;  %v10768_v17 = vld [vmem:[#allocation8 + $0x448] sm:$0xf]  ;;  %v12945_v50 = vld [vmem:[#allocation8 + $0x554] sm:$0xf0] }
 0x3a8   :  { %7724 = vmatpush.bf16.msra.mxu2 %v10481_v59  ;;  %7745 = vmatpush.bf16.msrb.mxu0 %v10849_v38  ;;  %v12953_v59 = vld [vmem:[#allocation8 + $0x594] sm:$0xf0]  ;;  %v11200_v38 = vld [vmem:[#allocation8 + $0x7a8] sm:$0xf]  ;;  %v7432_v9 = vpop.f32.mrf.mxu1 }
 0x3a9   :  { %7711 = vmatmul.bf16.vlgmr.msra.gmra.mxu1 %v14298_v56  ;;  %v11201_v53 = vor.u32 %v13021_v22, %v11200_v38  ;;  %v10896_v5 = vld [vmem:[#allocation8 + $0x548] sm:$0xf]  ;;  %v12977_v21 = vld [vmem:[#allocation8 + $0x654] sm:$0xf0] }
 0x3aa   :  { %7759 = vmatpush.bf16.msrb.mxu1 %v10977_v27  ;;  %7738 = vmatpush.bf16.msra.mxu3 %v10609_v23  ;;  %v7419_v27 = vadd.f32 %v7418_v49, %v7405_v40  ;;  %v12981_v23 = vld [vmem:[#allocation8 + $0x674] sm:$0xf0]  ;;  %v11024_v57 = vld [vmem:[#allocation8 + $0x648] sm:$0xf]  ;;  %v10897_v58 = vor.u32 %v12945_v50, %v10896_v5 }
 0x3ab   :  { %7725 = vmatmul.bf16.vlgmr.msra.gmra.mxu2 %v14299_v12  ;;  %v11041_v8 = vor.u32 %v12981_v23, %v11040_v14  ;;  %v11168_v42 = vld [vmem:[#allocation8 + $0x768] sm:$0xf]  ;;  %v13013_v1 = vld [vmem:[#allocation8 + $0x774] sm:$0xf0]  ;;  %v11025_v63 = vor.u32 %v12977_v21, %v11024_v57 }
 0x3ac   :  { %7773 = vmatpush.bf16.msrb.mxu2 %v11105_v25  ;;  %7746 = vmatpush.bf16.msrb.mxu0 %v10833_v15  ;;  %v10929_v25 = vor.u32 %v12953_v59, %v10928_v24  ;;  %v11184_v15 = vld [vmem:[#allocation8 + $0x788] sm:$0xf]  ;;  %v7420_v37 = vpop.f32.mrf.mxu0  ;;  %v11169_v32 = vor.u32 %v13013_v1, %v11168_v42  ;;  %v12941_v20 = vld [vmem:[#allocation8 + $0x534] sm:$0xf0] }
 0x3ad   :  { %7739 = vmatmul.bf16.vlgmr.msra.gmra.mxu3 %v14300_v31  ;;  %v11185_v28 = vor.u32 %v13017_v30, %v11184_v15  ;;  %v10752_v24 = vld [vmem:[#allocation8 + $0x428] sm:$0xf]  ;;  %v12973_v38 = vld [vmem:[#allocation8 + $0x634] sm:$0xf0] }
 0x3ae   :  { %7760 = vmatpush.bf16.msrb.mxu1 %v10961_v3  ;;  %7787 = vmatpush.bf16.msrb.mxu3 %v11233_v26  ;;  %v10785_v3 = vor.u32 %v12917_v60, %v10784_v6  ;;  %v7407_v26 = vadd.f32 %v7406_v39, %v7393_v4  ;;  %v10880_v59 = vld [vmem:[#allocation8 + $0x528] sm:$0xf]  ;;  %v13009_v61 = vld [vmem:[#allocation8 + $0x754] sm:$0xf0] }
 0x3af   :  { %v11008_v40 = vld [vmem:[#allocation8 + $0x628] sm:$0xf]  ;;  %v10881_v60 = vor.u32 %v12941_v20, %v10880_v59  ;;  %v12969_v47 = vld [vmem:[#allocation8 + $0x614] sm:$0xf0] }
 0x3b0   :  { %7774 = vmatpush.bf16.msrb.mxu2 %v11089_v54  ;;  %7747 = vmatpush.bf16.msrb.mxu0 %v10817_v0  ;;  %v7433_v54 = vadd.f32 %v7432_v9, %v7419_v27  ;;  %v7421_v29 = vadd.f32 %v7420_v37, %v7407_v26  ;;  %v7460_v0 = vpop.f32.mrf.mxu3  ;;  %v11152_v22 = vld [vmem:[#allocation8 + $0x748] sm:$0xf]  ;;  %v7434_v39 = vpop.f32.mrf.mxu1  ;;  %v11009_v36 = vor.u32 %v12973_v38, %v11008_v40  ;;  %v12937_v9 = vld [vmem:[#allocation8 + $0x514] sm:$0xf0] }
 0x3b1   :  { %v10864_v4 = vld [vmem:[#allocation8 + $0x508] sm:$0xf]  ;;  %v13005_v23 = vld [vmem:[#allocation8 + $0x734] sm:$0xf0] }
 0x3b2   :  { %7761 = vmatpush.bf16.msrb.mxu1 %v10945_v51  ;;  %7788 = vmatpush.bf16.msrb.mxu3 %v11217_v11  ;;  %v7447_v49 = vadd.f32 %v7446_v45, %v7433_v54  ;;  %v10769_v51 = vor.u32 %v12913_v52, %v10768_v17  ;;  %v12909_v11 = vld [vmem:[#allocation8 + $0x434] sm:$0xf0]  ;;  %v7435_v6 = vadd.f32 %v7434_v39, %v7421_v29  ;;  %v10992_v45 = vld [vmem:[#allocation8 + $0x608] sm:$0xf] }
 0x3b3   :  { %v10753_v27 = vor.u32 %v12909_v11, %v10752_v24  ;;  %v11136_v14 = vld [vmem:[#allocation8 + $0x728] sm:$0xf]  ;;  %v13125_v52 = vld [vmem:[#allocation8 + $0xaf4] sm:$0xf0]  ;;  %v10865_v26 = vor.u32 %v12937_v9, %v10864_v4 }
 0x3b4   :  { %7775 = vmatpush.bf16.msrb.mxu2 %v11073_v34  ;;  %7748 = vmatpush.bf16.msrb.mxu0 %v10801_v46  ;;  %v7461_v34 = vadd.f32 %v7460_v0, %v7447_v49  ;;  %v7448_v46 = vpop.f32.mrf.mxu2  ;;  %v11360_v30 = vld [vmem:[#allocation8 + $0x8e8] sm:$0xf]  ;;  %v11137_v50 = vor.u32 %v13005_v23, %v11136_v14  ;;  %v13001_v49 = vld [vmem:[#allocation8 + $0x714] sm:$0xf0] }
 0x3b5   :  { %v7449_v15 = vadd.f32 %v7448_v46, %v7435_v6  ;;  %v11488_v54 = vld [vmem:[#allocation8 + $0x9e8] sm:$0xf]  ;;  %v13057_v0 = vld [vmem:[#allocation8 + $0x8d4] sm:$0xf0] }
 0x3b6   :  { %7762 = vmatpush.bf16.msrb.mxu1 %v10929_v25  ;;  %7789 = vmatpush.bf16.msrb.mxu3 %v11201_v53  ;;  %8137 = vst [vmem:[#allocation11] sm:$0xff] %v7461_v34  ;;  %v10736_v25 = vld [vmem:[#allocation8 + $0x408] sm:$0xf]  ;;  %v11153_v53 = vor.u32 %v13009_v61, %v11152_v22  ;;  %v13089_v34 = vld [vmem:[#allocation8 + $0x9d4] sm:$0xf0] }
 0x3b7   :  { %v11616_v17 = vld [vmem:[#allocation8 + $0xae8] sm:$0xf]  ;;  %v13157_v11 = vld [vmem:[#allocation8 + $0xbf4] sm:$0xf0] }
 0x3b8   :  { %7776 = vmatpush.bf16.msrb.mxu2 %v11057_v10  ;;  %7749 = vmatpush.bf16.msrb.mxu0 %v10785_v3  ;;  %v12905_v10 = vld [vmem:[#allocation8 + $0x414] sm:$0xf0]  ;;  %v7462_v37 = vpop.f32.mrf.mxu3  ;;  %v11120_v21 = vld [vmem:[#allocation8 + $0x708] sm:$0xf]  ;;  %v11617_v29 = vor.u32 %v13125_v52, %v11616_v17 }
 0x3b9   :  { %v13061_v3 = vld [vmem:[#allocation8 + $0x8f4] sm:$0xf0]  ;;  %v7463_v5 = vadd.f32 %v7462_v37, %v7449_v15  ;;  %v11344_v42 = vld [vmem:[#allocation8 + $0x8c8] sm:$0xf]  ;;  %v11121_v59 = vor.u32 %v13001_v49, %v11120_v21 }
 0x3ba   :  { %7763 = vmatpush.bf16.msrb.mxu1 %v10913_v62  ;;  %7790 = vmatpush.bf16.msrb.mxu3 %v11185_v28  ;;  %v10737_v62 = vor.u32 %v12905_v10, %v10736_v25  ;;  %v10993_v28 = vor.u32 %v12969_v47, %v10992_v45  ;;  %v11361_v57 = vor.u32 %v13061_v3, %v11360_v30  ;;  %v11744_v24 = vld [vmem:[#allocation8 + $0xbe8] sm:$0xf]  ;;  %v13053_v22 = vld [vmem:[#allocation8 + $0x8b4] sm:$0xf0] }
 0x3bb   :  { %8141 = vst [vmem:[#allocation11 + $0x20] sm:$0xff] %v7463_v5  ;;  %v11328_v38 = vld [vmem:[#allocation8 + $0x8a8] sm:$0xf]  ;;  %v11745_v39 = vor.u32 %v13157_v11, %v11744_v24  ;;  %v13085_v46 = vld [vmem:[#allocation8 + $0x9b4] sm:$0xf0] }
 0x3bc   :  { %7777 = vmatpush.bf16.msrb.mxu2 %v11041_v8  ;;  %7750 = vmatpush.bf16.msrb.mxu0 %v10769_v51  ;;  %v13093_v8 = vld [vmem:[#allocation8 + $0x9f4] sm:$0xf0]  ;;  %v11472_v51 = vld [vmem:[#allocation8 + $0x9c8] sm:$0xf] }
 0x3bd   :  { %v11489_v1 = vor.u32 %v13093_v8, %v11488_v54  ;;  %v11473_v20 = vor.u32 %v13089_v34, %v11472_v51  ;;  %v11456_v61 = vld [vmem:[#allocation8 + $0x9a8] sm:$0xf]  ;;  %v13117_v25 = vld [vmem:[#allocation8 + $0xab4] sm:$0xf0] }
 0x3be   :  { %7764 = vmatpush.bf16.msrb.mxu1 %v10897_v58  ;;  %7791 = vmatpush.bf16.msrb.mxu3 %v11169_v32  ;;  %v11600_v58 = vld [vmem:[#allocation8 + $0xac8] sm:$0xf]  ;;  %v11345_v32 = vor.u32 %v13057_v0, %v11344_v42  ;;  %v13153_v6 = vld [vmem:[#allocation8 + $0xbd4] sm:$0xf0]  ;;  %v14088_v42 = vpop.f32.mrf.mxu0 }
 0x3bf   :  { %v11728_v10 = vld [vmem:[#allocation8 + $0xbc8] sm:$0xf]  ;;  %v13049_v45 = vld [vmem:[#allocation8 + $0x894] sm:$0xf0] }
 0x3c0   :  { %7778 = vmatpush.bf16.msrb.mxu2 %v11025_v63  ;;  %7751 = vmatpush.bf16.msrb.mxu0 %v10753_v27  ;;  %v13121_v63 = vld [vmem:[#allocation8 + $0xad4] sm:$0xf0]  ;;  %v11584_v27 = vld [vmem:[#allocation8 + $0xaa8] sm:$0xf]  ;;  %v11729_v47 = vor.u32 %v13153_v6, %v11728_v10 }
 0x3c1   :  { %v11601_v40 = vor.u32 %v13121_v63, %v11600_v58  ;;  %v11585_v4 = vor.u32 %v13117_v25, %v11584_v27  ;;  %v11312_v9 = vld [vmem:[#allocation8 + $0x888] sm:$0xf]  ;;  %v13081_v14 = vld [vmem:[#allocation8 + $0x994] sm:$0xf0] }
 0x3c2   :  { %7765 = vmatpush.bf16.msrb.mxu1 %v10881_v60  ;;  %7792 = vmatpush.bf16.msrb.mxu3 %v11153_v53  ;;  %v11329_v60 = vor.u32 %v13053_v22, %v11328_v38  ;;  %v11440_v53 = vld [vmem:[#allocation8 + $0x988] sm:$0xf]  ;;  %v13113_v15 = vld [vmem:[#allocation8 + $0xa94] sm:$0xf0]  ;;  %v11313_v54 = vor.u32 %v13049_v45, %v11312_v9 }
 0x3c3   :  { %v11568_v23 = vld [vmem:[#allocation8 + $0xa88] sm:$0xf]  ;;  %v13149_v3 = vld [vmem:[#allocation8 + $0xbb4] sm:$0xf0]  ;;  %v11441_v37 = vor.u32 %v13081_v14, %v11440_v53 }
 0x3c4   :  { %7779 = vmatpush.bf16.msrb.mxu2 %v11009_v36  ;;  %7752 = vmatpush.bf16.msrb.mxu0 %v10737_v62  ;;  %v11457_v36 = vor.u32 %v13085_v46, %v11456_v61  ;;  %v11712_v30 = vld [vmem:[#allocation8 + $0xba8] sm:$0xf]  ;;  %v11569_v62 = vor.u32 %v13113_v15, %v11568_v23  ;;  %v13045_v17 = vld [vmem:[#allocation8 + $0x874] sm:$0xf0]  ;;  %v14090_v46 = vpop.f32.mrf.mxu1 }
 0x3c5   :  { %v11296_v8 = vld [vmem:[#allocation8 + $0x868] sm:$0xf]  ;;  %v11713_v5 = vor.u32 %v13149_v3, %v11712_v30  ;;  %v13145_v21 = vld [vmem:[#allocation8 + $0xb94] sm:$0xf0]  ;;  %v14094_v3 = vpop.f32.mrf.mxu3 }
 0x3c6   :  { %7766 = vmatpush.bf16.msrb.mxu1 %v10865_v26  ;;  %7793 = vmatpush.bf16.msrb.mxu3 %v11137_v50  ;;  %v11424_v52 = vld [vmem:[#allocation8 + $0x968] sm:$0xf]  ;;  %v13077_v26 = vld [vmem:[#allocation8 + $0x974] sm:$0xf0]  ;;  %v11297_v49 = vor.u32 %v13045_v17, %v11296_v8  ;;  %v14096_v17 = vpop.f32.mrf.mxu0 }
 0x3c7   :  { %7753 = vmatmul.bf16.vlgmr.msrb.gmra.mxu0 %v13862_v48  ;;  %v13109_v50 = vld [vmem:[#allocation8 + $0xa74] sm:$0xf0]  ;;  %v11280_v0 = vld [vmem:[#allocation8 + $0x848] sm:$0xf] }
 0x3c8   :  { %7780 = vmatpush.bf16.msrb.mxu2 %v10993_v28  ;;  %7801 = vmatpush.bf16.msra.mxu0 %v11361_v57  ;;  %v11552_v28 = vld [vmem:[#allocation8 + $0xa68] sm:$0xf]  ;;  %v13041_v51 = vld [vmem:[#allocation8 + $0x854] sm:$0xf0] }
 0x3c9   :  { %7767 = vmatmul.bf16.vlgmr.msrb.gmra.mxu1 %v13866_v44  ;;  %v11696_v57 = vld [vmem:[#allocation8 + $0xb88] sm:$0xf]  ;;  %v13073_v63 = vld [vmem:[#allocation8 + $0x954] sm:$0xf0] }
 0x3ca   :  { %7815 = vmatpush.bf16.msra.mxu1 %v11489_v1  ;;  %7794 = vmatpush.bf16.msrb.mxu3 %v11121_v59  ;;  %v11425_v1 = vor.u32 %v13077_v26, %v11424_v52  ;;  %v11408_v34 = vld [vmem:[#allocation8 + $0x948] sm:$0xf]  ;;  %v11697_v58 = vor.u32 %v13145_v21, %v11696_v57  ;;  %v13105_v11 = vld [vmem:[#allocation8 + $0xa54] sm:$0xf0] }
 0x3cb   :  { %7781 = vmatmul.bf16.vlgmr.msrb.gmra.mxu2 %v13870_v19  ;;  %v11536_v24 = vld [vmem:[#allocation8 + $0xa48] sm:$0xf]  ;;  %v13037_v61 = vld [vmem:[#allocation8 + $0x834] sm:$0xf0] }
 0x3cc   :  { %7829 = vmatpush.bf16.msra.mxu2 %v11617_v29  ;;  %7802 = vmatpush.bf16.msra.mxu0 %v11345_v32  ;;  %v11553_v29 = vor.u32 %v13109_v50, %v11552_v28  ;;  %v11680_v59 = vld [vmem:[#allocation8 + $0xb68] sm:$0xf]  ;;  %v13141_v32 = vld [vmem:[#allocation8 + $0xb74] sm:$0xf0]  ;;  %v11537_v38 = vor.u32 %v13105_v11, %v11536_v24 }
 0x3cd   :  { %7795 = vmatmul.bf16.vlgmr.msrb.gmra.mxu3 %v13874_v55  ;;  %v11264_v22 = vld [vmem:[#allocation8 + $0x828] sm:$0xf]  ;;  %v11681_v27 = vor.u32 %v13141_v32, %v11680_v59  ;;  %v13069_v25 = vld [vmem:[#allocation8 + $0x934] sm:$0xf0]  ;;  %v14098_v32 = vpop.f32.mrf.mxu1 }
 0x3ce   :  { %7816 = vmatpush.bf16.msra.mxu1 %v11473_v20  ;;  %7843 = vmatpush.bf16.msra.mxu3 %v11745_v39  ;;  %v11281_v20 = vor.u32 %v13041_v51, %v11280_v0  ;;  %v11392_v39 = vld [vmem:[#allocation8 + $0x928] sm:$0xf]  ;;  %v13101_v6 = vld [vmem:[#allocation8 + $0xa34] sm:$0xf0]  ;;  %v11265_v9 = vor.u32 %v13037_v61, %v11264_v22 }
 0x3cf   :  { %v11520_v10 = vld [vmem:[#allocation8 + $0xa28] sm:$0xf]  ;;  %v13033_v53 = vld [vmem:[#allocation8 + $0x814] sm:$0xf0] }
 0x3d0   :  { %7830 = vmatpush.bf16.msra.mxu2 %v11601_v40  ;;  %7803 = vmatpush.bf16.msra.mxu0 %v11329_v60  ;;  %v11409_v40 = vor.u32 %v13073_v63, %v11408_v34  ;;  %v11664_v60 = vld [vmem:[#allocation8 + $0xb48] sm:$0xf]  ;;  %v11521_v14 = vor.u32 %v13101_v6, %v11520_v10  ;;  %v13065_v15 = vld [vmem:[#allocation8 + $0x914] sm:$0xf0]  ;;  %v14102_v10 = vpop.f32.mrf.mxu0 }
 0x3d1   :  { %v11248_v45 = vld [vmem:[#allocation8 + $0x808] sm:$0xf]  ;;  %v13133_v8 = vld [vmem:[#allocation8 + $0xb34] sm:$0xf0] }
 0x3d2   :  { %7817 = vmatpush.bf16.msra.mxu1 %v11457_v36  ;;  %7844 = vmatpush.bf16.msra.mxu3 %v11729_v47  ;;  %v13137_v36 = vld [vmem:[#allocation8 + $0xb54] sm:$0xf0]  ;;  %v11393_v47 = vor.u32 %v13069_v25, %v11392_v39  ;;  %v11376_v23 = vld [vmem:[#allocation8 + $0x908] sm:$0xf]  ;;  %v11249_v28 = vor.u32 %v13033_v53, %v11248_v45  ;;  %v14104_v53 = vpop.f32.mrf.mxu3 }
 0x3d3   :  { %v11504_v30 = vld [vmem:[#allocation8 + $0xa08] sm:$0xf]  ;;  %v13221_v50 = vld [vmem:[#allocation8 + $0xdf4] sm:$0xf0] }
 0x3d4   :  { %7831 = vmatpush.bf16.msra.mxu2 %v11585_v4  ;;  %7804 = vmatpush.bf16.msra.mxu0 %v11313_v54  ;;  %v14092_v4 = vpop.f32.mrf.mxu2  ;;  %v11665_v54 = vor.u32 %v13137_v36, %v11664_v60  ;;  %v11872_v52 = vld [vmem:[#allocation8 + $0xce8] sm:$0xf]  ;;  %v13253_v21 = vld [vmem:[#allocation8 + $0xef4] sm:$0xf0] }
 0x3d5   :  { %v12000_v26 = vld [vmem:[#allocation8 + $0xde8] sm:$0xf]  ;;  %v13129_v34 = vld [vmem:[#allocation8 + $0xb14] sm:$0xf0] }
 0x3d6   :  { %7818 = vmatpush.bf16.msra.mxu1 %v11441_v37  ;;  %7845 = vmatpush.bf16.msra.mxu3 %v11713_v5  ;;  %v13097_v37 = vld [vmem:[#allocation8 + $0xa14] sm:$0xf0]  ;;  %v12128_v57 = vld [vmem:[#allocation8 + $0xee8] sm:$0xf] }
 0x3d7   :  { %v13189_v5 = vld [vmem:[#allocation8 + $0xcf4] sm:$0xf0]  ;;  %v11632_v51 = vld [vmem:[#allocation8 + $0xb08] sm:$0xf]  ;;  %v12129_v63 = vor.u32 %v13253_v21, %v12128_v57 }
 0x3d8   :  { %7832 = vmatpush.bf16.msra.mxu2 %v11569_v62  ;;  %7805 = vmatpush.bf16.msra.mxu0 %v11297_v49  ;;  %v11648_v62 = vld [vmem:[#allocation8 + $0xb28] sm:$0xf]  ;;  %v11377_v49 = vor.u32 %v13065_v15, %v11376_v23  ;;  %v11873_v0 = vor.u32 %v13189_v5, %v11872_v52  ;;  %v13185_v11 = vld [vmem:[#allocation8 + $0xcd4] sm:$0xf0] }
 0x3d9   :  { %v11856_v24 = vld [vmem:[#allocation8 + $0xcc8] sm:$0xf]  ;;  %v13285_v61 = vld [vmem:[#allocation8 + $0xff4] sm:$0xf0] }
 0x3da   :  { %7819 = vmatpush.bf16.msra.mxu1 %v11425_v1  ;;  %7846 = vmatpush.bf16.msra.mxu3 %v11697_v58  ;;  %v11505_v1 = vor.u32 %v13097_v37, %v11504_v30  ;;  %v12001_v58 = vor.u32 %v13221_v50, %v12000_v26  ;;  %v11984_v59 = vld [vmem:[#allocation8 + $0xdc8] sm:$0xf]  ;;  %v11857_v25 = vor.u32 %v13185_v11, %v11856_v24  ;;  %v13245_v15 = vld [vmem:[#allocation8 + $0xeb4] sm:$0xf0] }
 0x3db   :  { %v12256_v22 = vld [vmem:[#allocation8 + $0xfe8] sm:$0xf]  ;;  %v13177_v5 = vld [vmem:[#allocation8 + $0xc94] sm:$0xf0] }
 0x3dc   :  { %7833 = vmatpush.bf16.msra.mxu2 %v11553_v29  ;;  %7806 = vmatpush.bf16.msra.mxu0 %v11281_v20  ;;  %v11649_v29 = vor.u32 %v13133_v8, %v11648_v62  ;;  %v13217_v20 = vld [vmem:[#allocation8 + $0xdd4] sm:$0xf0]  ;;  %v14100_v39 = vpop.f32.mrf.mxu2  ;;  %v11840_v36 = vld [vmem:[#allocation8 + $0xca8] sm:$0xf] }
 0x3dd   :  { %v11985_v6 = vor.u32 %v13217_v20, %v11984_v59  ;;  %v11968_v45 = vld [vmem:[#allocation8 + $0xda8] sm:$0xf]  ;;  %v13209_v57 = vld [vmem:[#allocation8 + $0xd94] sm:$0xf0] }
 0x3de   :  { %7820 = vmatpush.bf16.msra.mxu1 %v11409_v40  ;;  %7847 = vmatpush.bf16.msra.mxu3 %v11681_v27  ;;  %v12112_v40 = vld [vmem:[#allocation8 + $0xec8] sm:$0xf]  ;;  %v11633_v27 = vor.u32 %v13129_v34, %v11632_v51  ;;  %v13277_v51 = vld [vmem:[#allocation8 + $0xfb4] sm:$0xf0] }
 0x3df   :  { %v12096_v23 = vld [vmem:[#allocation8 + $0xea8] sm:$0xf]  ;;  %v13173_v59 = vld [vmem:[#allocation8 + $0xc74] sm:$0xf0] }
 0x3e0   :  { %7834 = vmatpush.bf16.msra.mxu2 %v11537_v38  ;;  %7807 = vmatpush.bf16.msra.mxu0 %v11265_v9  ;;  %v13249_v38 = vld [vmem:[#allocation8 + $0xed4] sm:$0xf0]  ;;  %v12240_v30 = vld [vmem:[#allocation8 + $0xfc8] sm:$0xf]  ;;  %v12097_v8 = vor.u32 %v13245_v15, %v12096_v23 }
 0x3e1   :  { %v12113_v60 = vor.u32 %v13249_v38, %v12112_v40  ;;  %v13181_v9 = vld [vmem:[#allocation8 + $0xcb4] sm:$0xf0]  ;;  %v11824_v52 = vld [vmem:[#allocation8 + $0xc88] sm:$0xf] }
 0x3e2   :  { %7821 = vmatpush.bf16.msra.mxu1 %v11393_v47  ;;  %7848 = vmatpush.bf16.msra.mxu3 %v11665_v54  ;;  %v12257_v47 = vor.u32 %v13285_v61, %v12256_v22  ;;  %v13281_v54 = vld [vmem:[#allocation8 + $0xfd4] sm:$0xf0]  ;;  %v11841_v37 = vor.u32 %v13181_v9, %v11840_v36  ;;  %v11952_v26 = vld [vmem:[#allocation8 + $0xd88] sm:$0xf]  ;;  %v14117_v36 = vpop.f32.mrf.mxu3 }
 0x3e3   :  { %v12241_v50 = vor.u32 %v13281_v54, %v12240_v30  ;;  %v12080_v21 = vld [vmem:[#allocation8 + $0xe88] sm:$0xf]  ;;  %v13205_v38 = vld [vmem:[#allocation8 + $0xd74] sm:$0xf0] }
 0x3e4   :  { %7835 = vmatpush.bf16.msra.mxu2 %v11521_v14  ;;  %7808 = vmatpush.bf16.msra.mxu0 %v11249_v28  ;;  %v13213_v14 = vld [vmem:[#allocation8 + $0xdb4] sm:$0xf0]  ;;  %v14109_v28 = vpop.f32.mrf.mxu1  ;;  %v14112_v34 = vpop.f32.mrf.mxu2  ;;  %v11808_v11 = vld [vmem:[#allocation8 + $0xc68] sm:$0xf] }
 0x3e5   :  { %v11969_v62 = vor.u32 %v13213_v14, %v11968_v45  ;;  %v11936_v20 = vld [vmem:[#allocation8 + $0xd68] sm:$0xf]  ;;  %v13237_v61 = vld [vmem:[#allocation8 + $0xe74] sm:$0xf0]  ;;  %v11809_v9 = vor.u32 %v13173_v59, %v11808_v11 }
 0x3e6   :  { %7822 = vmatpush.bf16.msra.mxu1 %v11377_v49  ;;  %7849 = vmatpush.bf16.msra.mxu3 %v11649_v29  ;;  %v13241_v49 = vld [vmem:[#allocation8 + $0xe94] sm:$0xf0]  ;;  %v12064_v22 = vld [vmem:[#allocation8 + $0xe68] sm:$0xf]  ;;  %v11937_v45 = vor.u32 %v13205_v38, %v11936_v20 }
 0x3e7   :  { %7809 = vmatmul.bf16.vlgmr.msra.gmra.mxu0 %v13944_v33  ;;  %v12081_v24 = vor.u32 %v13241_v49, %v12080_v21  ;;  %v11792_v14 = vld [vmem:[#allocation8 + $0xc48] sm:$0xf]  ;;  %v13169_v23 = vld [vmem:[#allocation8 + $0xc54] sm:$0xf0] }
 0x3e8   :  { %7836 = vmatpush.bf16.msra.mxu2 %v11505_v1  ;;  %7857 = vmatpush.bf16.msrb.mxu0 %v11873_v0  ;;  %v13301_v1 = vld [vmem:[#allocation10] sm:$0xf]  ;;  %v12224_v0 = vld [vmem:[#allocation8 + $0xfa8] sm:$0xf]  ;;  %v13201_v54 = vld [vmem:[#allocation8 + $0xd54] sm:$0xf0] }
 0x3e9   :  { %7823 = vmatmul.bf16.vlgmr.msra.gmra.mxu1 %v13946_v35  ;;  %v4674_v29 = vperm.slane %v13301_v1, 1  ;;  %v12225_v40 = vor.u32 %v13277_v51, %v12224_v0  ;;  %v11920_v15 = vld [vmem:[#allocation8 + $0xd48] sm:$0xf]  ;;  %v13165_v1 = vld [vmem:[#allocation8 + $0xc34] sm:$0xf0] }
 0x3ea   :  { %7871 = vmatpush.bf16.msrb.mxu1 %v12001_v58  ;;  %7850 = vmatpush.bf16.msra.mxu3 %v11633_v27  ;;  %v11825_v58 = vor.u32 %v13177_v5, %v11824_v52  ;;  %v13269_v52 = vld [vmem:[#allocation8 + $0xf74] sm:$0xf0]  ;;  %v11776_v49 = vld [vmem:[#allocation8 + $0xc28] sm:$0xf] }
 0x3eb   :  { %7837 = vmatmul.bf16.vlgmr.msra.gmra.mxu2 %v13951_v7  ;;  %v7475_v27 = vadd.f32 %v14088_v42, %v4674_v29  ;;  %v13233_v42 = vld [vmem:[#allocation8 + $0xe54] sm:$0xf0]  ;;  %v11904_v0 = vld [vmem:[#allocation8 + $0xd28] sm:$0xf]  ;;  %v7477_v51 = vadd.f32 %v14096_v17, %v4674_v29  ;;  %v11777_v38 = vor.u32 %v13165_v1, %v11776_v49 }
 0x3ec   :  { %7885 = vmatpush.bf16.msrb.mxu2 %v12129_v63  ;;  %7858 = vmatpush.bf16.msrb.mxu0 %v11857_v25  ;;  %v11953_v63 = vor.u32 %v13209_v57, %v11952_v26  ;;  %v14115_v25 = vpop.f32.mrf.mxu0  ;;  %v14120_v5 = vpop.f32.mrf.mxu1  ;;  %v11793_v26 = vor.u32 %v13169_v23, %v11792_v14  ;;  %v11921_v57 = vor.u32 %v13201_v54, %v11920_v15  ;;  %v13229_v11 = vld [vmem:[#allocation8 + $0xe34] sm:$0xf0]  ;;  %v12160_v23 = vld [vmem:[#allocation8 + $0xf28] sm:$0xf]  ;;  %v10338_v54 = vld [vmem:[#allocation8 + $0xf8] sm:$0xf0] }
 0x3ed   :  { %7851 = vmatmul.bf16.vlgmr.msra.gmra.mxu3 %v13953_v41  ;;  %v13225_v14 = vld [vmem:[#allocation8 + $0xe14] sm:$0xf0] }
 0x3ee   :  { %7872 = vmatpush.bf16.msrb.mxu1 %v11985_v6  ;;  %7899 = vmatpush.bf16.msrb.mxu3 %v12257_v47  ;;  %v12208_v6 = vld [vmem:[#allocation8 + $0xf88] sm:$0xf]  ;;  %v12065_v47 = vor.u32 %v13237_v61, %v12064_v22  ;;  %v13161_v61 = vld [vmem:[#allocation8 + $0xc14] sm:$0xf0] }
 0x3ef   :  { %v11760_v22 = vld [vmem:[#allocation8 + $0xc08] sm:$0xf]  ;;  %v13261_v15 = vld [vmem:[#allocation8 + $0xf34] sm:$0xf0] }
 0x3f0   :  { %7886 = vmatpush.bf16.msrb.mxu2 %v12113_v60  ;;  %7859 = vmatpush.bf16.msrb.mxu0 %v11841_v37  ;;  %v13273_v60 = vld [vmem:[#allocation8 + $0xf94] sm:$0xf0]  ;;  %v12048_v37 = vld [vmem:[#allocation8 + $0xe48] sm:$0xf]  ;;  %v12161_v1 = vor.u32 %v13261_v15, %v12160_v23  ;;  %v10434_v15 = vld [vmem:[#allocation8 + $0x1b8] sm:$0xf0] }
 0x3f1   :  { %v12209_v30 = vor.u32 %v13273_v60, %v12208_v6  ;;  %v12049_v21 = vor.u32 %v13233_v42, %v12048_v37  ;;  %v11888_v6 = vld [vmem:[#allocation8 + $0xd08] sm:$0xf]  ;;  %v13193_v60 = vld [vmem:[#allocation8 + $0xd14] sm:$0xf0]  ;;  %v12835_v37 = vld [vmem:[#allocation8 + $0x1ec] sm:$0xf] }
 0x3f2   :  { %7873 = vmatpush.bf16.msrb.mxu1 %v11969_v62  ;;  %7900 = vmatpush.bf16.msrb.mxu3 %v12241_v50  ;;  %v7489_v62 = vadd.f32 %v14090_v46, %v7475_v27 }
 0x3f4   :  { %7887 = vmatpush.bf16.msrb.mxu2 %v12097_v8  ;;  %7860 = vmatpush.bf16.msrb.mxu0 %v11825_v58  ;;  %v12192_v8 = vld [vmem:[#allocation8 + $0xf68] sm:$0xf]  ;;  %v7503_v50 = vadd.f32 %v14092_v4, %v7489_v62  ;;  %v14124_v58 = vpop.f32.mrf.mxu2  ;;  %v14127_v20 = vpop.f32.mrf.mxu0  ;;  %v11761_v62 = vor.u32 %v13161_v61, %v11760_v22 }
 0x3f5   :  { %v12193_v46 = vor.u32 %v13269_v52, %v12192_v8  ;;  %v12176_v4 = vld [vmem:[#allocation8 + $0xf48] sm:$0xf]  ;;  %v14134_v42 = vpop.f32.mrf.mxu1  ;;  %v10466_v8 = vld [vmem:[#allocation8 + $0x1f8] sm:$0xf0]  ;;  %v12867_v52 = vld [vmem:[#allocation8 + $0x2ec] sm:$0xf] }
 0x3f6   :  { %7874 = vmatpush.bf16.msrb.mxu1 %v11953_v63  ;;  %7901 = vmatpush.bf16.msrb.mxu3 %v12225_v40  ;;  %v13197_v63 = vld [vmem:[#allocation8 + $0xd34] sm:$0xf0]  ;;  %v7517_v59 = vadd.f32 %v14094_v3, %v7503_v50  ;;  %v14131_v3 = vpop.f32.mrf.mxu3  ;;  %v11889_v50 = vor.u32 %v13193_v60, %v11888_v6 }
 0x3f7   :  { %v13265_v40 = vld [vmem:[#allocation8 + $0xf54] sm:$0xf0]  ;;  %v11905_v17 = vor.u32 %v13197_v63, %v11904_v0  ;;  %v12144_v0 = vld [vmem:[#allocation8 + $0xf08] sm:$0xf]  ;;  %v10469_v63 = vor.u32 %v12835_v37, %v10466_v8  ;;  %v10706_v37 = vld [vmem:[#allocation8 + $0x3d8] sm:$0xf0] }
 0x3f8   :  { %7888 = vmatpush.bf16.msrb.mxu2 %v12081_v24  ;;  %7861 = vmatpush.bf16.msrb.mxu0 %v11809_v9  ;;  %v12032_v24 = vld [vmem:[#allocation8 + $0xe28] sm:$0xf]  ;;  %v7531_v27 = vadd.f32 %v14102_v10, %v7517_v59  ;;  %v10322_v59 = vld [vmem:[#allocation8 + $0xd8] sm:$0xf0] }
 0x3f9   :  { %v12033_v29 = vor.u32 %v13229_v11, %v12032_v24  ;;  %v12016_v9 = vld [vmem:[#allocation8 + $0xe08] sm:$0xf]  ;;  %v12799_v11 = vld [vmem:[#allocation8 + $0xcc] sm:$0xf] }
 0x3fa   :  { %7875 = vmatpush.bf16.msrb.mxu1 %v11937_v45  ;;  %7902 = vmatpush.bf16.msrb.mxu3 %v12209_v30  ;;  %v7491_v45 = vadd.f32 %v14098_v32, %v7477_v51  ;;  %v12803_v30 = vld [vmem:[#allocation8 + $0xec] sm:$0xf]  ;;  %v7545_v32 = vadd.f32 %v14109_v28, %v7531_v27  ;;  %v13257_v51 = vld [vmem:[#allocation8 + $0xf14] sm:$0xf0]  ;;  %v10325_v6 = vor.u32 %v12799_v11, %v10322_v59 }
 0x3fb   :  { %v12831_v28 = vld [vmem:[#allocation8 + $0x1cc] sm:$0xf] }
 0x3fc   :  { %7889 = vmatpush.bf16.msrb.mxu2 %v12065_v47  ;;  %7862 = vmatpush.bf16.msrb.mxu0 %v11793_v26  ;;  %v12177_v47 = vor.u32 %v13265_v40, %v12176_v4  ;;  %v7505_v10 = vadd.f32 %v14100_v39, %v7491_v45  ;;  %v10594_v26 = vld [vmem:[#allocation8 + $0x2f8] sm:$0xf0]  ;;  %v14138_v49 = vpop.f32.mrf.mxu2  ;;  %v10341_v39 = vor.u32 %v12803_v30, %v10338_v54  ;;  %v7588_v61 = vpop.f32.mrf.mxu0  ;;  %v12899_v27 = vld [vmem:[#allocation8 + $0x3ec] sm:$0xf] }
 0x3fd   :  { %v10597_v24 = vor.u32 %v12867_v52, %v10594_v26  ;;  %v10450_v40 = vld [vmem:[#allocation8 + $0x1d8] sm:$0xf0]  ;;  %v12795_v45 = vld [vmem:[#allocation8 + $0xac] sm:$0xf] }
 0x3fe   :  { %7876 = vmatpush.bf16.msrb.mxu1 %v11921_v57  ;;  %7903 = vmatpush.bf16.msrb.mxu3 %v12193_v46  ;;  %v12017_v57 = vor.u32 %v13225_v14, %v12016_v9  ;;  %v7559_v46 = vadd.f32 %v14112_v34, %v7545_v32  ;;  %v12145_v34 = vor.u32 %v13257_v51, %v12144_v0  ;;  %v12827_v14 = vld [vmem:[#allocation8 + $0x1ac] sm:$0xf]  ;;  %v10562_v54 = vld [vmem:[#allocation8 + $0x2b8] sm:$0xf0] }
 0x3ff   :  { %v12859_v30 = vld [vmem:[#allocation8 + $0x2ac] sm:$0xf]  ;;  %v10437_v26 = vor.u32 %v12827_v14, %v10434_v15  ;;  %v10546_v51 = vld [vmem:[#allocation8 + $0x298] sm:$0xf0] }
 0x400   :  { %7890 = vmatpush.bf16.msrb.mxu2 %v12049_v21  ;;  %7863 = vmatpush.bf16.msrb.mxu0 %v11777_v38  ;;  %v7519_v21 = vadd.f32 %v14104_v53, %v7505_v10  ;;  %v12863_v38 = vld [vmem:[#allocation8 + $0x2cc] sm:$0xf]  ;;  %v10578_v53 = vld [vmem:[#allocation8 + $0x2d8] sm:$0xf0]  ;;  %v7573_v22 = vadd.f32 %v14117_v36, %v7559_v46  ;;  %v10565_v32 = vor.u32 %v12859_v30, %v10562_v54 }
 0x401   :  { %v10581_v9 = vor.u32 %v12863_v38, %v10578_v53  ;;  %v12791_v52 = vld [vmem:[#allocation8 + $0x8c] sm:$0xf]  ;;  %v10274_v53 = vld [vmem:[#allocation8 + $0x78] sm:$0xf0] }
 0x402   :  { %7877 = vmatpush.bf16.msrb.mxu1 %v11905_v17  ;;  %7904 = vmatpush.bf16.msrb.mxu3 %v12177_v47  ;;  %v7533_v4 = vadd.f32 %v14115_v25, %v7519_v21  ;;  %v10722_v17 = vld [vmem:[#allocation8 + $0x3f8] sm:$0xf0]  ;;  %v7587_v60 = vadd.f32 %v14127_v20, %v7573_v22  ;;  %v10453_v25 = vor.u32 %v12831_v28, %v10450_v40  ;;  %v12895_v20 = vld [vmem:[#allocation8 + $0x3cc] sm:$0xf] }
 0x403   :  { %v10306_v47 = vld [vmem:[#allocation8 + $0xb8] sm:$0xf0]  ;;  %v10725_v23 = vor.u32 %v12899_v27, %v10722_v17  ;;  %v12855_v0 = vld [vmem:[#allocation8 + $0x28c] sm:$0xf] }
 0x404   :  { %7891 = vmatpush.bf16.msrb.mxu2 %v12033_v29  ;;  %7864 = vmatpush.bf16.msrb.mxu0 %v11761_v62  ;;  %v7628_v29 = vpop.f32.mrf.mxu3  ;;  %v7547_v36 = vadd.f32 %v14120_v5, %v7533_v4  ;;  %v7602_v62 = vpop.f32.mrf.mxu1  ;;  %v10309_v8 = vor.u32 %v12795_v45, %v10306_v47  ;;  %v7601_v5 = vadd.f32 %v14134_v42, %v7587_v60  ;;  %v10418_v21 = vld [vmem:[#allocation8 + $0x198] sm:$0xf0]  ;;  %v12891_v42 = vld [vmem:[#allocation8 + $0x3ac] sm:$0xf] }
 0x405   :  { %v10549_v40 = vor.u32 %v12855_v0, %v10546_v51  ;;  %v12787_v38 = vld [vmem:[#allocation8 + $0x6c] sm:$0xf]  ;;  %v10386_v15 = vld [vmem:[#allocation8 + $0x158] sm:$0xf0] }
 0x406   :  { %7878 = vmatpush.bf16.msrb.mxu1 %v11889_v50  ;;  %7905 = vmatpush.bf16.msrb.mxu3 %v12161_v1  ;;  %v7561_v10 = vadd.f32 %v14124_v58, %v7547_v36  ;;  %v10290_v50 = vld [vmem:[#allocation8 + $0x98] sm:$0xf0]  ;;  %v7616_v1 = vpop.f32.mrf.mxu2  ;;  %v7615_v46 = vadd.f32 %v14138_v49, %v7601_v5  ;;  %v12819_v22 = vld [vmem:[#allocation8 + $0x16c] sm:$0xf]  ;;  %v10277_v45 = vor.u32 %v12787_v38, %v10274_v53 }
 0x407   :  { %7865 = vmatmul.bf16.vlgmr.msrb.gmra.mxu0 %v13994_v2  ;;  %v10293_v11 = vor.u32 %v12791_v52, %v10290_v50  ;;  %v10402_v49 = vld [vmem:[#allocation8 + $0x178] sm:$0xf0]  ;;  %v12851_v17 = vld [vmem:[#allocation8 + $0x26c] sm:$0xf] }
 0x408   :  { %7892 = vmatpush.bf16.msrb.mxu2 %v12017_v57  ;;  %7913 = vmatpush.bf16.msra.mxu0 %v10341_v39  ;;  %v12823_v57 = vld [vmem:[#allocation8 + $0x18c] sm:$0xf]  ;;  %v10709_v39 = vor.u32 %v12895_v20, %v10706_v37  ;;  %v7575_v58 = vadd.f32 %v14131_v3, %v7561_v10  ;;  %v7629_v4 = vadd.f32 %v7628_v29, %v7615_v46  ;;  %v10258_v36 = vld [vmem:[#allocation8 + $0x58] sm:$0xf0] }
 0x409   :  { %7879 = vmatmul.bf16.vlgmr.msrb.gmra.mxu1 %v13998_v16  ;;  %v10421_v59 = vor.u32 %v12823_v57, %v10418_v21  ;;  %v12887_v60 = vld [vmem:[#allocation8 + $0x38c] sm:$0xf]  ;;  %v10405_v47 = vor.u32 %v12819_v22, %v10402_v49  ;;  %v10514_v37 = vld [vmem:[#allocation8 + $0x258] sm:$0xf0] }
 0x40a   :  { %7927 = vmatpush.bf16.msra.mxu1 %v10469_v63  ;;  %7906 = vmatpush.bf16.msrb.mxu3 %v12145_v34  ;;  %v7642_v63 = vpop.f32.mrf.mxu0  ;;  %v7589_v28 = vadd.f32 %v7588_v61, %v7575_v58  ;;  %v10530_v34 = vld [vmem:[#allocation8 + $0x278] sm:$0xf0]  ;;  %v12783_v61 = vld [vmem:[#allocation8 + $0x4c] sm:$0xf] }
 0x40b   :  { %7893 = vmatmul.bf16.vlgmr.msrb.gmra.mxu2 %v13996_v13  ;;  %v10533_v14 = vor.u32 %v12851_v17, %v10530_v34  ;;  %v12847_v20 = vld [vmem:[#allocation8 + $0x24c] sm:$0xf]  ;;  %v10658_v5 = vld [vmem:[#allocation8 + $0x378] sm:$0xf0] }
 0x40c   :  { %7941 = vmatpush.bf16.msra.mxu2 %v10597_v24  ;;  %7914 = vmatpush.bf16.msra.mxu0 %v10325_v6  ;;  %v10690_v24 = vld [vmem:[#allocation8 + $0x3b8] sm:$0xf0]  ;;  %v7630_v27 = vpop.f32.mrf.mxu3  ;;  %v7643_v6 = vadd.f32 %v7642_v63, %v7629_v4  ;;  %v7603_v29 = vadd.f32 %v7602_v62, %v7589_v28  ;;  %v12883_v52 = vld [vmem:[#allocation8 + $0x36c] sm:$0xf]  ;;  %v10517_v21 = vor.u32 %v12847_v20, %v10514_v37 }
 0x40d   :  { %7907 = vmatmul.bf16.vlgmr.msrb.gmra.mxu3 %v14004_v18  ;;  %v10693_v3 = vor.u32 %v12891_v42, %v10690_v24  ;;  %v10242_v0 = vld [vmem:[#allocation8 + $0x38] sm:$0xf0]  ;;  %v12811_v51 = vld [vmem:[#allocation8 + $0x12c] sm:$0xf]  ;;  %v10661_v58 = vor.u32 %v12883_v52, %v10658_v5 }
 0x40e   :  { %7928 = vmatpush.bf16.msra.mxu1 %v10453_v25  ;;  %7955 = vmatpush.bf16.msra.mxu3 %v10725_v23  ;;  %v10674_v25 = vld [vmem:[#allocation8 + $0x398] sm:$0xf0]  ;;  %v12815_v23 = vld [vmem:[#allocation8 + $0x14c] sm:$0xf]  ;;  %v7670_v30 = vpop.f32.mrf.mxu2  ;;  %v7617_v10 = vadd.f32 %v7616_v1, %v7603_v29 }
 0x40f   :  { %v10677_v54 = vor.u32 %v12887_v60, %v10674_v25  ;;  %v10389_v62 = vor.u32 %v12815_v23, %v10386_v15  ;;  %v10370_v63 = vld [vmem:[#allocation8 + $0x138] sm:$0xf0]  ;;  %v12843_v1 = vld [vmem:[#allocation8 + $0x22c] sm:$0xf] }
 0x410   :  { %7942 = vmatpush.bf16.msra.mxu2 %v10581_v9  ;;  %7915 = vmatpush.bf16.msra.mxu0 %v10309_v8  ;;  %v7656_v9 = vpop.f32.mrf.mxu1  ;;  %v7631_v50 = vadd.f32 %v7630_v27, %v7617_v10  ;;  %v10498_v42 = vld [vmem:[#allocation8 + $0x238] sm:$0xf0]  ;;  %v12807_v53 = vld [vmem:[#allocation8 + $0x10c] sm:$0xf]  ;;  %v10373_v22 = vor.u32 %v12811_v51, %v10370_v63 }
 0x411   :  { %v7657_v8 = vadd.f32 %v7656_v9, %v7643_v6  ;;  %v10642_v28 = vld [vmem:[#allocation8 + $0x358] sm:$0xf0]  ;;  %v10501_v27 = vor.u32 %v12843_v1, %v10498_v42  ;;  %v12839_v49 = vld [vmem:[#allocation8 + $0x20c] sm:$0xf] }
 0x412   :  { %7929 = vmatpush.bf16.msra.mxu1 %v10437_v26  ;;  %7956 = vmatpush.bf16.msra.mxu3 %v10709_v39  ;;  %v7644_v26 = vpop.f32.mrf.mxu0  ;;  %v12779_v39 = vld [vmem:[#allocation8 + $0x2c] sm:$0xf]  ;;  %v10226_v38 = vld [vmem:[#allocation8 + $0x18] sm:$0xf0] }
 0x413   :  { %v7671_v57 = vadd.f32 %v7670_v30, %v7657_v8  ;;  %v7645_v24 = vadd.f32 %v7644_v26, %v7631_v50  ;;  %v10245_v4 = vor.u32 %v12779_v39, %v10242_v0  ;;  %v10482_v60 = vld [vmem:[#allocation8 + $0x218] sm:$0xf0]  ;;  %v12875_v25 = vld [vmem:[#allocation8 + $0x32c] sm:$0xf] }
 0x414   :  { %7943 = vmatpush.bf16.msra.mxu2 %v10565_v32  ;;  %7916 = vmatpush.bf16.msra.mxu0 %v10293_v11  ;;  %v10261_v32 = vor.u32 %v12783_v61, %v10258_v36  ;;  %v7684_v46 = vpop.f32.mrf.mxu3  ;;  %v10626_v9 = vld [vmem:[#allocation8 + $0x338] sm:$0xf0]  ;;  %v12931_v61 = vld [vmem:[#allocation8 + $0x4ec] sm:$0xf]  ;;  %v10485_v20 = vor.u32 %v12839_v49, %v10482_v60 }
 0x415   :  { %v7685_v11 = vadd.f32 %v7684_v46, %v7671_v57  ;;  %v10850_v29 = vld [vmem:[#allocation8 + $0x4f8] sm:$0xf0]  ;;  %v12995_v23 = vld [vmem:[#allocation8 + $0x6ec] sm:$0xf]  ;;  %v10629_v37 = vor.u32 %v12875_v25, %v10626_v9 }
 0x416   :  { %7930 = vmatpush.bf16.msra.mxu1 %v10421_v59  ;;  %7957 = vmatpush.bf16.msra.mxu3 %v10693_v3  ;;  %v12879_v59 = vld [vmem:[#allocation8 + $0x34c] sm:$0xf]  ;;  %v10354_v3 = vld [vmem:[#allocation8 + $0x118] sm:$0xf0]  ;;  %v7672_v34 = vpop.f32.mrf.mxu2  ;;  %v10853_v10 = vor.u32 %v12931_v61, %v10850_v29 }
 0x417   :  { %8138 = vst [vmem:[#allocation11 + $0x8] sm:$0xff] %v7685_v11  ;;  %v10645_v6 = vor.u32 %v12879_v59, %v10642_v28  ;;  %v10978_v36 = vld [vmem:[#allocation8 + $0x5f8] sm:$0xf0]  ;;  %v12871_v52 = vld [vmem:[#allocation8 + $0x30c] sm:$0xf] }
 0x418   :  { %7944 = vmatpush.bf16.msra.mxu2 %v10549_v40  ;;  %7917 = vmatpush.bf16.msra.mxu0 %v10277_v45  ;;  %v12775_v40 = vld [vmem:[#allocation8 + $0xc] sm:$0xf]  ;;  %v7658_v17 = vpop.f32.mrf.mxu1  ;;  %v11106_v15 = vld [vmem:[#allocation8 + $0x6f8] sm:$0xf0] }
 0x419   :  { %v7659_v45 = vadd.f32 %v7658_v17, %v7645_v24  ;;  %v10610_v5 = vld [vmem:[#allocation8 + $0x318] sm:$0xf0]  ;;  %v12927_v50 = vld [vmem:[#allocation8 + $0x4cc] sm:$0xf] }
 0x41a   :  { %7931 = vmatpush.bf16.msra.mxu1 %v10405_v47  ;;  %7958 = vmatpush.bf16.msra.mxu3 %v10677_v54  ;;  %v12963_v47 = vld [vmem:[#allocation8 + $0x5ec] sm:$0xf]  ;;  %v10357_v54 = vor.u32 %v12807_v53, %v10354_v3  ;;  %v10834_v57 = vld [vmem:[#allocation8 + $0x4d8] sm:$0xf0]  ;;  %v10613_v63 = vor.u32 %v12871_v52, %v10610_v5 }
 0x41b   :  { %v7673_v30 = vadd.f32 %v7672_v34, %v7659_v45  ;;  %v10981_v26 = vor.u32 %v12963_v47, %v10978_v36  ;;  %v10962_v39 = vld [vmem:[#allocation8 + $0x5d8] sm:$0xf0]  ;;  %v12991_v0 = vld [vmem:[#allocation8 + $0x6cc] sm:$0xf]  ;;  %v10837_v1 = vor.u32 %v12927_v50, %v10834_v57 }
 0x41c   :  { %7945 = vmatpush.bf16.msra.mxu2 %v10533_v14  ;;  %7918 = vmatpush.bf16.msra.mxu0 %v10261_v32  ;;  %v10229_v14 = vor.u32 %v12775_v40, %v10226_v38  ;;  %v7686_v8 = vpop.f32.mrf.mxu3  ;;  %v11109_v32 = vor.u32 %v12995_v23, %v11106_v15  ;;  %v11090_v51 = vld [vmem:[#allocation8 + $0x6d8] sm:$0xf0]  ;;  %v12923_v11 = vld [vmem:[#allocation8 + $0x4ac] sm:$0xf] }
 0x41d   :  { %v11234_v46 = vld [vmem:[#allocation8 + $0x7f8] sm:$0xf0]  ;;  %v11093_v24 = vor.u32 %v12991_v0, %v11090_v51  ;;  %v12955_v28 = vld [vmem:[#allocation8 + $0x5ac] sm:$0xf] }
 0x41e   :  { %7932 = vmatpush.bf16.msra.mxu1 %v10389_v62  ;;  %7959 = vmatpush.bf16.msra.mxu3 %v10661_v58  ;;  %v7687_v62 = vadd.f32 %v7686_v8, %v7673_v30  ;;  %v13027_v58 = vld [vmem:[#allocation8 + $0x7ec] sm:$0xf]  ;;  %v10818_v59 = vld [vmem:[#allocation8 + $0x4b8] sm:$0xf0] }
 0x41f   :  { %v10946_v40 = vld [vmem:[#allocation8 + $0x5b8] sm:$0xf0]  ;;  %v12987_v38 = vld [vmem:[#allocation8 + $0x6ac] sm:$0xf]  ;;  %v10821_v3 = vor.u32 %v12923_v11, %v10818_v59 }
 0x420   :  { %7946 = vmatpush.bf16.msra.mxu2 %v10517_v21  ;;  %7919 = vmatpush.bf16.msra.mxu0 %v10245_v4  ;;  %v12959_v21 = vld [vmem:[#allocation8 + $0x5cc] sm:$0xf]  ;;  %8142 = vst [vmem:[#allocation11 + $0x28] sm:$0xff] %v7687_v62  ;;  %v11237_v4 = vor.u32 %v13027_v58, %v11234_v46  ;;  %v11074_v53 = vld [vmem:[#allocation8 + $0x6b8] sm:$0xf0]  ;;  %v10949_v49 = vor.u32 %v12955_v28, %v10946_v40 }
 0x421   :  { %v10965_v42 = vor.u32 %v12959_v21, %v10962_v39  ;;  %v11077_v17 = vor.u32 %v12987_v38, %v11074_v53  ;;  %v12919_v34 = vld [vmem:[#allocation8 + $0x48c] sm:$0xf]  ;;  %v10930_v60 = vld [vmem:[#allocation8 + $0x598] sm:$0xf0] }
 0x422   :  { %7933 = vmatpush.bf16.msra.mxu1 %v10373_v22  ;;  %7960 = vmatpush.bf16.msra.mxu3 %v10645_v6  ;;  %v13023_v22 = vld [vmem:[#allocation8 + $0x7cc] sm:$0xf]  ;;  %v10802_v6 = vld [vmem:[#allocation8 + $0x498] sm:$0xf0] }
 0x423   :  { %v12983_v25 = vld [vmem:[#allocation8 + $0x68c] sm:$0xf]  ;;  %v11058_v9 = vld [vmem:[#allocation8 + $0x698] sm:$0xf0]  ;;  %v10805_v61 = vor.u32 %v12919_v34, %v10802_v6 }
 0x424   :  { %7947 = vmatpush.bf16.msra.mxu2 %v10501_v27  ;;  %7920 = vmatpush.bf16.msra.mxu0 %v10229_v14  ;;  %v11218_v27 = vld [vmem:[#allocation8 + $0x7d8] sm:$0xf0]  ;;  %v11061_v47 = vor.u32 %v12983_v25, %v11058_v9  ;;  %v12915_v14 = vld [vmem:[#allocation8 + $0x46c] sm:$0xf] }
 0x425   :  { %v11202_v45 = vld [vmem:[#allocation8 + $0x7b8] sm:$0xf0]  ;;  %v12947_v23 = vld [vmem:[#allocation8 + $0x56c] sm:$0xf] }
 0x426   :  { %7934 = vmatpush.bf16.msra.mxu1 %v10357_v54  ;;  %7961 = vmatpush.bf16.msra.mxu3 %v10629_v37  ;;  %v10786_v36 = vld [vmem:[#allocation8 + $0x478] sm:$0xf0]  ;;  %v12979_v54 = vld [vmem:[#allocation8 + $0x66c] sm:$0xf] }
 0x427   :  { %7921 = vmatmul.bf16.vlgmr.msra.gmra.mxu0 %v14297_v43  ;;  %v12951_v43 = vld [vmem:[#allocation8 + $0x58c] sm:$0xf]  ;;  %v10914_v30 = vld [vmem:[#allocation8 + $0x578] sm:$0xf0] }
 0x428   :  { %7948 = vmatpush.bf16.msra.mxu2 %v10485_v20  ;;  %7969 = vmatpush.bf16.msrb.mxu0 %v10853_v10  ;;  %v10933_v29 = vor.u32 %v12951_v43, %v10930_v60  ;;  %v11042_v20 = vld [vmem:[#allocation8 + $0x678] sm:$0xf0]  ;;  %v13015_v37 = vld [vmem:[#allocation8 + $0x78c] sm:$0xf]  ;;  %v10917_v8 = vor.u32 %v12947_v23, %v10914_v30 }
 0x429   :  { %7935 = vmatmul.bf16.vlgmr.msra.gmra.mxu1 %v14298_v56  ;;  %v11221_v56 = vor.u32 %v13023_v22, %v11218_v27  ;;  %v11186_v10 = vld [vmem:[#allocation8 + $0x798] sm:$0xf0]  ;;  %v11045_v52 = vor.u32 %v12979_v54, %v11042_v20  ;;  %v12911_v5 = vld [vmem:[#allocation8 + $0x44c] sm:$0xf] }
 0x42a   :  { %7983 = vmatpush.bf16.msrb.mxu1 %v10981_v26  ;;  %7962 = vmatpush.bf16.msra.mxu3 %v10613_v63  ;;  %v10770_v26 = vld [vmem:[#allocation8 + $0x458] sm:$0xf0]  ;;  %v11189_v62 = vor.u32 %v13015_v37, %v11186_v10  ;;  %v12975_v57 = vld [vmem:[#allocation8 + $0x64c] sm:$0xf] }
 0x42b   :  { %7949 = vmatmul.bf16.vlgmr.msra.gmra.mxu2 %v14299_v12  ;;  %v13019_v12 = vld [vmem:[#allocation8 + $0x7ac] sm:$0xf]  ;;  %v10898_v50 = vld [vmem:[#allocation8 + $0x558] sm:$0xf0]  ;;  %v10773_v51 = vor.u32 %v12911_v5, %v10770_v26 }
 0x42c   :  { %7997 = vmatpush.bf16.msrb.mxu2 %v11109_v32  ;;  %7970 = vmatpush.bf16.msrb.mxu0 %v10837_v1  ;;  %v11205_v15 = vor.u32 %v13019_v12, %v11202_v45  ;;  %v12943_v32 = vld [vmem:[#allocation8 + $0x54c] sm:$0xf]  ;;  %v11026_v21 = vld [vmem:[#allocation8 + $0x658] sm:$0xf0] }
 0x42d   :  { %7963 = vmatmul.bf16.vlgmr.msra.gmra.mxu3 %v14300_v31  ;;  %v10789_v31 = vor.u32 %v12915_v14, %v10786_v36  ;;  %v13011_v39 = vld [vmem:[#allocation8 + $0x76c] sm:$0xf]  ;;  %v11170_v0 = vld [vmem:[#allocation8 + $0x778] sm:$0xf0]  ;;  %v10901_v58 = vor.u32 %v12943_v32, %v10898_v50  ;;  %v11029_v46 = vor.u32 %v12975_v57, %v11026_v21 }
 0x42e   :  { %7984 = vmatpush.bf16.msrb.mxu1 %v10965_v42  ;;  %8011 = vmatpush.bf16.msrb.mxu3 %v11237_v4  ;;  %v12907_v63 = vld [vmem:[#allocation8 + $0x42c] sm:$0xf]  ;;  %v10754_v1 = vld [vmem:[#allocation8 + $0x438] sm:$0xf0] }
 0x42f   :  { %v12939_v42 = vld [vmem:[#allocation8 + $0x52c] sm:$0xf]  ;;  %v10882_v11 = vld [vmem:[#allocation8 + $0x538] sm:$0xf0]  ;;  %v10757_v38 = vor.u32 %v12907_v63, %v10754_v1 }
 0x430   :  { %7998 = vmatpush.bf16.msrb.mxu2 %v11093_v24  ;;  %7971 = vmatpush.bf16.msrb.mxu0 %v10821_v3  ;;  %v11173_v24 = vor.u32 %v13011_v39, %v11170_v0  ;;  %v12971_v59 = vld [vmem:[#allocation8 + $0x62c] sm:$0xf]  ;;  %v11010_v28 = vld [vmem:[#allocation8 + $0x638] sm:$0xf0]  ;;  %v10885_v27 = vor.u32 %v12939_v42, %v10882_v11 }
 0x431   :  { %v13007_v4 = vld [vmem:[#allocation8 + $0x74c] sm:$0xf]  ;;  %v11154_v40 = vld [vmem:[#allocation8 + $0x758] sm:$0xf0]  ;;  %v11013_v3 = vor.u32 %v12971_v59, %v11010_v28 }
 0x432   :  { %7985 = vmatpush.bf16.msrb.mxu1 %v10949_v49  ;;  %8012 = vmatpush.bf16.msrb.mxu3 %v11221_v56  ;;  %v12903_v53 = vld [vmem:[#allocation8 + $0x40c] sm:$0xf]  ;;  %v10738_v22 = vld [vmem:[#allocation8 + $0x418] sm:$0xf0]  ;;  %v11157_v6 = vor.u32 %v13007_v4, %v11154_v40 }
 0x433   :  { %v12935_v49 = vld [vmem:[#allocation8 + $0x50c] sm:$0xf]  ;;  %v10994_v43 = vld [vmem:[#allocation8 + $0x618] sm:$0xf0]  ;;  %v10741_v45 = vor.u32 %v12903_v53, %v10738_v22 }
 0x434   :  { %7999 = vmatpush.bf16.msrb.mxu2 %v11077_v17  ;;  %7972 = vmatpush.bf16.msrb.mxu0 %v10805_v61  ;;  %v10866_v17 = vld [vmem:[#allocation8 + $0x518] sm:$0xf0]  ;;  %v12967_v34 = vld [vmem:[#allocation8 + $0x60c] sm:$0xf] }
 0x435   :  { %v13003_v56 = vld [vmem:[#allocation8 + $0x72c] sm:$0xf]  ;;  %v11138_v60 = vld [vmem:[#allocation8 + $0x738] sm:$0xf0]  ;;  %v10869_v14 = vor.u32 %v12935_v49, %v10866_v17  ;;  %v10997_v36 = vor.u32 %v12967_v34, %v10994_v43 }
 0x436   :  { %7986 = vmatpush.bf16.msrb.mxu1 %v10933_v29  ;;  %8013 = vmatpush.bf16.msrb.mxu3 %v11205_v15  ;;  %v13059_v25 = vld [vmem:[#allocation8 + $0x8ec] sm:$0xf]  ;;  %v11362_v9 = vld [vmem:[#allocation8 + $0x8f8] sm:$0xf0]  ;;  %v11141_v23 = vor.u32 %v13003_v56, %v11138_v60 }
 0x437   :  { %v13091_v12 = vld [vmem:[#allocation8 + $0x9ec] sm:$0xf]  ;;  %v11490_v61 = vld [vmem:[#allocation8 + $0x9f8] sm:$0xf0]  ;;  %v11365_v15 = vor.u32 %v13059_v25, %v11362_v9 }
 0x438   :  { %8000 = vmatpush.bf16.msrb.mxu2 %v11061_v47  ;;  %7973 = vmatpush.bf16.msrb.mxu0 %v10789_v31  ;;  %v13123_v29 = vld [vmem:[#allocation8 + $0xaec] sm:$0xf]  ;;  %v11618_v47 = vld [vmem:[#allocation8 + $0xaf8] sm:$0xf0]  ;;  %v11493_v20 = vor.u32 %v13091_v12, %v11490_v61 }
 0x439   :  { %v12999_v30 = vld [vmem:[#allocation8 + $0x70c] sm:$0xf]  ;;  %v11122_v54 = vld [vmem:[#allocation8 + $0x718] sm:$0xf0]  ;;  %v11621_v37 = vor.u32 %v13123_v29, %v11618_v47  ;;  %v14161_v29 = vpop.f32.mrf.mxu0 }
 0x43a   :  { %7987 = vmatpush.bf16.msrb.mxu1 %v10917_v8  ;;  %8014 = vmatpush.bf16.msrb.mxu3 %v11189_v62  ;;  %v13055_v10 = vld [vmem:[#allocation8 + $0x8cc] sm:$0xf]  ;;  %v11346_v31 = vld [vmem:[#allocation8 + $0x8d8] sm:$0xf0]  ;;  %v11125_v50 = vor.u32 %v12999_v30, %v11122_v54 }
 0x43b   :  { %v13087_v8 = vld [vmem:[#allocation8 + $0x9cc] sm:$0xf]  ;;  %v11602_v26 = vld [vmem:[#allocation8 + $0xad8] sm:$0xf0]  ;;  %v11349_v57 = vor.u32 %v13055_v10, %v11346_v31 }
 0x43c   :  { %8001 = vmatpush.bf16.msrb.mxu2 %v11045_v52  ;;  %7974 = vmatpush.bf16.msrb.mxu0 %v10773_v51  ;;  %v11474_v52 = vld [vmem:[#allocation8 + $0x9d8] sm:$0xf0]  ;;  %v13119_v5 = vld [vmem:[#allocation8 + $0xacc] sm:$0xf] }
 0x43d   :  { %v13155_v32 = vld [vmem:[#allocation8 + $0xbec] sm:$0xf]  ;;  %v11746_v62 = vld [vmem:[#allocation8 + $0xbf8] sm:$0xf0]  ;;  %v11477_v21 = vor.u32 %v13087_v8, %v11474_v52  ;;  %v11605_v39 = vor.u32 %v13119_v5, %v11602_v26 }
 0x43e   :  { %7988 = vmatpush.bf16.msrb.mxu1 %v10901_v58  ;;  %8015 = vmatpush.bf16.msrb.mxu3 %v11173_v24  ;;  %v13051_v0 = vld [vmem:[#allocation8 + $0x8ac] sm:$0xf]  ;;  %v11330_v51 = vld [vmem:[#allocation8 + $0x8b8] sm:$0xf0] }
 0x43f   :  { %v13083_v58 = vld [vmem:[#allocation8 + $0x9ac] sm:$0xf]  ;;  %v11458_v63 = vld [vmem:[#allocation8 + $0x9b8] sm:$0xf0]  ;;  %v11333_v59 = vor.u32 %v13051_v0, %v11330_v51 }
 0x440   :  { %8002 = vmatpush.bf16.msrb.mxu2 %v11029_v46  ;;  %7975 = vmatpush.bf16.msrb.mxu0 %v10757_v38  ;;  %v11749_v46 = vor.u32 %v13155_v32, %v11746_v62  ;;  %v13115_v1 = vld [vmem:[#allocation8 + $0xaac] sm:$0xf]  ;;  %v11586_v42 = vld [vmem:[#allocation8 + $0xab8] sm:$0xf0]  ;;  %v11461_v28 = vor.u32 %v13083_v58, %v11458_v63 }
 0x441   :  { %v13151_v24 = vld [vmem:[#allocation8 + $0xbcc] sm:$0xf]  ;;  %v11730_v11 = vld [vmem:[#allocation8 + $0xbd8] sm:$0xf0]  ;;  %v11589_v4 = vor.u32 %v13115_v1, %v11586_v42 }
 0x442   :  { %7989 = vmatpush.bf16.msrb.mxu1 %v10885_v27  ;;  %8016 = vmatpush.bf16.msrb.mxu3 %v11157_v6  ;;  %v13047_v40 = vld [vmem:[#allocation8 + $0x88c] sm:$0xf]  ;;  %v11314_v38 = vld [vmem:[#allocation8 + $0x898] sm:$0xf0] }
 0x443   :  { %v11442_v53 = vld [vmem:[#allocation8 + $0x998] sm:$0xf0]  ;;  %v13111_v22 = vld [vmem:[#allocation8 + $0xa8c] sm:$0xf]  ;;  %v11317_v49 = vor.u32 %v13047_v40, %v11314_v38 }
 0x444   :  { %8003 = vmatpush.bf16.msrb.mxu2 %v11013_v3  ;;  %7976 = vmatpush.bf16.msrb.mxu0 %v10741_v45  ;;  %v11570_v27 = vld [vmem:[#allocation8 + $0xa98] sm:$0xf0]  ;;  %v13043_v6 = vld [vmem:[#allocation8 + $0x86c] sm:$0xf] }
 0x445   :  { %v11714_v3 = vld [vmem:[#allocation8 + $0xbb8] sm:$0xf0]  ;;  %v11573_v34 = vor.u32 %v13111_v22, %v11570_v27  ;;  %v13075_v56 = vld [vmem:[#allocation8 + $0x96c] sm:$0xf] }
 0x446   :  { %7990 = vmatpush.bf16.msrb.mxu1 %v10869_v14  ;;  %8017 = vmatpush.bf16.msrb.mxu3 %v11141_v23  ;;  %v11298_v43 = vld [vmem:[#allocation8 + $0x878] sm:$0xf0]  ;;  %v13107_v9 = vld [vmem:[#allocation8 + $0xa6c] sm:$0xf] }
 0x447   :  { %7977 = vmatmul.bf16.vlgmr.msrb.gmra.mxu0 %v13862_v48  ;;  %v13079_v48 = vld [vmem:[#allocation8 + $0x98c] sm:$0xf]  ;;  %v11426_v25 = vld [vmem:[#allocation8 + $0x978] sm:$0xf0] }
 0x448   :  { %8004 = vmatpush.bf16.msrb.mxu2 %v10997_v36  ;;  %8025 = vmatpush.bf16.msra.mxu0 %v11365_v15  ;;  %v11445_v17 = vor.u32 %v13079_v48, %v11442_v53  ;;  %v11554_v12 = vld [vmem:[#allocation8 + $0xa78] sm:$0xf0]  ;;  %v13143_v45 = vld [vmem:[#allocation8 + $0xb8c] sm:$0xf]  ;;  %v11429_v47 = vor.u32 %v13075_v56, %v11426_v25  ;;  %v14167_v53 = vpop.f32.mrf.mxu0 }
 0x449   :  { %7991 = vmatmul.bf16.vlgmr.msrb.gmra.mxu1 %v13866_v44  ;;  %v11733_v44 = vor.u32 %v13151_v24, %v11730_v11  ;;  %v11698_v61 = vld [vmem:[#allocation8 + $0xb98] sm:$0xf0]  ;;  %v11557_v14 = vor.u32 %v13107_v9, %v11554_v12  ;;  %v13039_v36 = vld [vmem:[#allocation8 + $0x84c] sm:$0xf] }
 0x44a   :  { %8039 = vmatpush.bf16.msra.mxu1 %v11493_v20  ;;  %8018 = vmatpush.bf16.msrb.mxu3 %v11125_v50  ;;  %v11282_v23 = vld [vmem:[#allocation8 + $0x858] sm:$0xf0]  ;;  %v13071_v15 = vld [vmem:[#allocation8 + $0x94c] sm:$0xf]  ;;  %v11701_v30 = vor.u32 %v13143_v45, %v11698_v61  ;;  %v14163_v50 = vpop.f32.mrf.mxu1 }
 0x44b   :  { %8005 = vmatmul.bf16.vlgmr.msrb.gmra.mxu2 %v13870_v19  ;;  %v13147_v19 = vld [vmem:[#allocation8 + $0xbac] sm:$0xf]  ;;  %v11410_v54 = vld [vmem:[#allocation8 + $0x958] sm:$0xf0]  ;;  %v11285_v8 = vor.u32 %v13039_v36, %v11282_v23 }
 0x44c   :  { %8053 = vmatpush.bf16.msra.mxu2 %v11621_v37  ;;  %8026 = vmatpush.bf16.msra.mxu0 %v11349_v57  ;;  %v11717_v60 = vor.u32 %v13147_v19, %v11714_v3  ;;  %v13103_v20 = vld [vmem:[#allocation8 + $0xa4c] sm:$0xf]  ;;  %v11538_v37 = vld [vmem:[#allocation8 + $0xa58] sm:$0xf0]  ;;  %v11413_v52 = vor.u32 %v13071_v15, %v11410_v54  ;;  %v14169_v3 = vpop.f32.mrf.mxu3 }
 0x44d   :  { %8019 = vmatmul.bf16.vlgmr.msrb.gmra.mxu3 %v13874_v55  ;;  %v11301_v55 = vor.u32 %v13043_v6, %v11298_v43  ;;  %v13139_v10 = vld [vmem:[#allocation8 + $0xb6c] sm:$0xf]  ;;  %v11682_v31 = vld [vmem:[#allocation8 + $0xb78] sm:$0xf0]  ;;  %v11541_v5 = vor.u32 %v13103_v20, %v11538_v37 }
 0x44e   :  { %8040 = vmatpush.bf16.msra.mxu1 %v11477_v21  ;;  %8067 = vmatpush.bf16.msra.mxu3 %v11749_v46  ;;  %v13035_v26 = vld [vmem:[#allocation8 + $0x82c] sm:$0xf]  ;;  %v11266_v32 = vld [vmem:[#allocation8 + $0x838] sm:$0xf0]  ;;  %v11685_v57 = vor.u32 %v13139_v10, %v11682_v31  ;;  %v14165_v46 = vpop.f32.mrf.mxu2 }
 0x44f   :  { %v13067_v62 = vld [vmem:[#allocation8 + $0x92c] sm:$0xf]  ;;  %v11394_v21 = vld [vmem:[#allocation8 + $0x938] sm:$0xf0]  ;;  %v11269_v63 = vor.u32 %v13035_v26, %v11266_v32 }
 0x450   :  { %8054 = vmatpush.bf16.msra.mxu2 %v11605_v39  ;;  %8027 = vmatpush.bf16.msra.mxu0 %v11333_v59  ;;  %v13099_v39 = vld [vmem:[#allocation8 + $0xa2c] sm:$0xf]  ;;  %v11522_v0 = vld [vmem:[#allocation8 + $0xa38] sm:$0xf0]  ;;  %v11397_v24 = vor.u32 %v13067_v62, %v11394_v21 }
 0x451   :  { %v13135_v51 = vld [vmem:[#allocation8 + $0xb4c] sm:$0xf]  ;;  %v11666_v58 = vld [vmem:[#allocation8 + $0xb58] sm:$0xf0]  ;;  %v11525_v11 = vor.u32 %v13099_v39, %v11522_v0 }
 0x452   :  { %8041 = vmatpush.bf16.msra.mxu1 %v11461_v28  ;;  %8068 = vmatpush.bf16.msra.mxu3 %v11733_v44  ;;  %v13031_v1 = vld [vmem:[#allocation8 + $0x80c] sm:$0xf]  ;;  %v11250_v42 = vld [vmem:[#allocation8 + $0x818] sm:$0xf0]  ;;  %v11669_v40 = vor.u32 %v13135_v51, %v11666_v58  ;;  %v14171_v36 = vpop.f32.mrf.mxu1 }
 0x453   :  { %v13063_v59 = vld [vmem:[#allocation8 + $0x90c] sm:$0xf]  ;;  %v11378_v28 = vld [vmem:[#allocation8 + $0x918] sm:$0xf0] }
 0x454   :  { %8055 = vmatpush.bf16.msra.mxu2 %v11589_v4  ;;  %8028 = vmatpush.bf16.msra.mxu0 %v11317_v49  ;;  %v13095_v4 = vld [vmem:[#allocation8 + $0xa0c] sm:$0xf]  ;;  %v11506_v38 = vld [vmem:[#allocation8 + $0xa18] sm:$0xf0]  ;;  %v11253_v49 = vor.u32 %v13031_v1, %v11250_v42  ;;  %v11381_v43 = vor.u32 %v13063_v59, %v11378_v28 }
 0x455   :  { %v13131_v48 = vld [vmem:[#allocation8 + $0xb2c] sm:$0xf]  ;;  %v11650_v44 = vld [vmem:[#allocation8 + $0xb38] sm:$0xf0]  ;;  %v11509_v56 = vor.u32 %v13095_v4, %v11506_v38  ;;  %v14184_v38 = vld [vmem:[#allocation10] sm:$0xf] }
 0x456   :  { %8042 = vmatpush.bf16.msra.mxu1 %v11445_v17  ;;  %8069 = vmatpush.bf16.msra.mxu3 %v11717_v60  ;;  %v13187_v22 = vld [vmem:[#allocation8 + $0xcec] sm:$0xf]  ;;  %v11874_v27 = vld [vmem:[#allocation8 + $0xcf8] sm:$0xf0]  ;;  %v11653_v60 = vor.u32 %v13131_v48, %v11650_v44  ;;  %v14173_v37 = vpop.f32.mrf.mxu2  ;;  %v4675_v48 = vperm.slane %v14184_v38, 2 }
 0x457   :  { %v13219_v19 = vld [vmem:[#allocation8 + $0xdec] sm:$0xf]  ;;  %v12002_v17 = vld [vmem:[#allocation8 + $0xdf8] sm:$0xf0]  ;;  %v11877_v25 = vor.u32 %v13187_v22, %v11874_v27 }
 0x458   :  { %8056 = vmatpush.bf16.msra.mxu2 %v11573_v34  ;;  %8029 = vmatpush.bf16.msra.mxu0 %v11301_v55  ;;  %v13251_v34 = vld [vmem:[#allocation8 + $0xeec] sm:$0xf]  ;;  %v12130_v6 = vld [vmem:[#allocation8 + $0xef8] sm:$0xf0]  ;;  %v12005_v45 = vor.u32 %v13219_v19, %v12002_v17 }
 0x459   :  { %v13127_v9 = vld [vmem:[#allocation8 + $0xb0c] sm:$0xf]  ;;  %v11634_v12 = vld [vmem:[#allocation8 + $0xb18] sm:$0xf0]  ;;  %v12133_v61 = vor.u32 %v13251_v34, %v12130_v6 }
 0x45a   :  { %8043 = vmatpush.bf16.msra.mxu1 %v11429_v47  ;;  %8070 = vmatpush.bf16.msra.mxu3 %v11701_v30  ;;  %v13183_v55 = vld [vmem:[#allocation8 + $0xccc] sm:$0xf]  ;;  %v11858_v47 = vld [vmem:[#allocation8 + $0xcd8] sm:$0xf0]  ;;  %v11637_v10 = vor.u32 %v13127_v9, %v11634_v12  ;;  %v14182_v59 = vpop.f32.mrf.mxu1 }
 0x45b   :  { %v11986_v23 = vld [vmem:[#allocation8 + $0xdd8] sm:$0xf0]  ;;  %v13247_v15 = vld [vmem:[#allocation8 + $0xecc] sm:$0xf]  ;;  %v11861_v31 = vor.u32 %v13183_v55, %v11858_v47 }
 0x45c   :  { %8057 = vmatpush.bf16.msra.mxu2 %v11557_v14  ;;  %8030 = vmatpush.bf16.msra.mxu0 %v11285_v8  ;;  %v13215_v14 = vld [vmem:[#allocation8 + $0xdcc] sm:$0xf]  ;;  %v12114_v30 = vld [vmem:[#allocation8 + $0xed8] sm:$0xf0]  ;;  %v14175_v8 = vpop.f32.mrf.mxu0 }
 0x45d   :  { %v13283_v54 = vld [vmem:[#allocation8 + $0xfec] sm:$0xf]  ;;  %v12258_v20 = vld [vmem:[#allocation8 + $0xff8] sm:$0xf0] }
 0x45e   :  { %8044 = vmatpush.bf16.msra.mxu1 %v11413_v52  ;;  %8071 = vmatpush.bf16.msra.mxu3 %v11685_v57  ;;  %v11989_v52 = vor.u32 %v13215_v14, %v11986_v23  ;;  %v13179_v26 = vld [vmem:[#allocation8 + $0xcac] sm:$0xf]  ;;  %v11842_v32 = vld [vmem:[#allocation8 + $0xcb8] sm:$0xf0]  ;;  %v12261_v57 = vor.u32 %v13283_v54, %v12258_v20  ;;  %v14188_v27 = vpop.f32.mrf.mxu2 }
 0x45f   :  { %v13211_v62 = vld [vmem:[#allocation8 + $0xdac] sm:$0xf]  ;;  %v11970_v21 = vld [vmem:[#allocation8 + $0xdb8] sm:$0xf0]  ;;  %v11845_v1 = vor.u32 %v13179_v26, %v11842_v32 }
 0x460   :  { %8058 = vmatpush.bf16.msra.mxu2 %v11541_v5  ;;  %8031 = vmatpush.bf16.msra.mxu0 %v11269_v63  ;;  %v12117_v5 = vor.u32 %v13247_v15, %v12114_v30  ;;  %v13243_v39 = vld [vmem:[#allocation8 + $0xeac] sm:$0xf]  ;;  %v12098_v0 = vld [vmem:[#allocation8 + $0xeb8] sm:$0xf0]  ;;  %v14180_v63 = vpop.f32.mrf.mxu3  ;;  %v11973_v42 = vor.u32 %v13211_v62, %v11970_v21 }
 0x461   :  { %v13279_v51 = vld [vmem:[#allocation8 + $0xfcc] sm:$0xf]  ;;  %v12242_v58 = vld [vmem:[#allocation8 + $0xfd8] sm:$0xf0] }
 0x462   :  { %8045 = vmatpush.bf16.msra.mxu1 %v11397_v24  ;;  %8072 = vmatpush.bf16.msra.mxu3 %v11669_v40  ;;  %v12101_v24 = vor.u32 %v13243_v39, %v12098_v0  ;;  %v12245_v28 = vor.u32 %v13279_v51, %v12242_v58  ;;  %v11954_v4 = vld [vmem:[#allocation8 + $0xd98] sm:$0xf0]  ;;  %v13275_v44 = vld [vmem:[#allocation8 + $0xfac] sm:$0xf]  ;;  %v14196_v32 = vpop.f32.mrf.mxu1 }
 0x463   :  { %v12082_v40 = vld [vmem:[#allocation8 + $0xe98] sm:$0xf0]  ;;  %v13171_v34 = vld [vmem:[#allocation8 + $0xc6c] sm:$0xf] }
 0x464   :  { %8059 = vmatpush.bf16.msra.mxu2 %v11525_v11  ;;  %8032 = vmatpush.bf16.msra.mxu0 %v11253_v49  ;;  %v11826_v11 = vld [vmem:[#allocation8 + $0xc98] sm:$0xf0]  ;;  %v14191_v12 = vpop.f32.mrf.mxu0  ;;  %v13167_v15 = vld [vmem:[#allocation8 + $0xc4c] sm:$0xf] }
 0x465   :  { %v12226_v22 = vld [vmem:[#allocation8 + $0xfb8] sm:$0xf0]  ;;  %v13199_v54 = vld [vmem:[#allocation8 + $0xd4c] sm:$0xf] }
 0x466   :  { %8046 = vmatpush.bf16.msra.mxu1 %v11381_v43  ;;  %8073 = vmatpush.bf16.msra.mxu3 %v11653_v60  ;;  %v11810_v6 = vld [vmem:[#allocation8 + $0xc78] sm:$0xf0]  ;;  %v13203_v43 = vld [vmem:[#allocation8 + $0xd6c] sm:$0xf] }
 0x467   :  { %8033 = vmatmul.bf16.vlgmr.msra.gmra.mxu0 %v13944_v33  ;;  %v13175_v33 = vld [vmem:[#allocation8 + $0xc8c] sm:$0xf]  ;;  %v11938_v60 = vld [vmem:[#allocation8 + $0xd78] sm:$0xf0]  ;;  %v11813_v47 = vor.u32 %v13171_v34, %v11810_v6 }
 0x468   :  { %8060 = vmatpush.bf16.msra.mxu2 %v11509_v56  ;;  %8081 = vmatpush.bf16.msrb.mxu0 %v11877_v25  ;;  %v11829_v19 = vor.u32 %v13175_v33, %v11826_v11  ;;  %v12229_v56 = vor.u32 %v13275_v44, %v12226_v22  ;;  %v13235_v25 = vld [vmem:[#allocation8 + $0xe6c] sm:$0xf]  ;;  %v12066_v9 = vld [vmem:[#allocation8 + $0xe78] sm:$0xf0]  ;;  %v14193_v55 = vpop.f32.mrf.mxu3  ;;  %v11941_v14 = vor.u32 %v13203_v43, %v11938_v60 }
 0x469   :  { %8047 = vmatmul.bf16.vlgmr.msra.gmra.mxu1 %v13946_v35  ;;  %v13207_v35 = vld [vmem:[#allocation8 + $0xd8c] sm:$0xf]  ;;  %v12069_v23 = vor.u32 %v13235_v25, %v12066_v9  ;;  %v11794_v30 = vld [vmem:[#allocation8 + $0xc58] sm:$0xf0] }
 0x46a   :  { %8095 = vmatpush.bf16.msrb.mxu1 %v12005_v45  ;;  %8074 = vmatpush.bf16.msra.mxu3 %v11637_v10  ;;  %v11957_v49 = vor.u32 %v13207_v35, %v11954_v4  ;;  %v13271_v45 = vld [vmem:[#allocation8 + $0xf8c] sm:$0xf]  ;;  %v11922_v10 = vld [vmem:[#allocation8 + $0xd58] sm:$0xf0]  ;;  %v11797_v62 = vor.u32 %v13167_v15, %v11794_v30 }
 0x46b   :  { %8061 = vmatmul.bf16.vlgmr.msra.gmra.mxu2 %v13951_v7  ;;  %v13239_v7 = vld [vmem:[#allocation8 + $0xe8c] sm:$0xf]  ;;  %v12194_v26 = vld [vmem:[#allocation8 + $0xf78] sm:$0xf0]  ;;  %v11925_v21 = vor.u32 %v13199_v54, %v11922_v10 }
 0x46c   :  { %8109 = vmatpush.bf16.msrb.mxu2 %v12133_v61  ;;  %8082 = vmatpush.bf16.msrb.mxu0 %v11861_v31  ;;  %v12085_v17 = vor.u32 %v13239_v7, %v12082_v40  ;;  %v12210_v61 = vld [vmem:[#allocation8 + $0xf98] sm:$0xf0]  ;;  %v13231_v31 = vld [vmem:[#allocation8 + $0xe4c] sm:$0xf] }
 0x46d   :  { %8075 = vmatmul.bf16.vlgmr.msra.gmra.mxu3 %v13953_v41  ;;  %v7699_v41 = vadd.f32 %v14161_v29, %v4675_v48  ;;  %v12213_v20 = vor.u32 %v13271_v45, %v12210_v61  ;;  %v12050_v29 = vld [vmem:[#allocation8 + $0xe58] sm:$0xf0]  ;;  %v13163_v0 = vld [vmem:[#allocation8 + $0xc2c] sm:$0xf] }
 0x46e   :  { %8096 = vmatpush.bf16.msrb.mxu1 %v11989_v52  ;;  %8123 = vmatpush.bf16.msrb.mxu3 %v12261_v57  ;;  %v12053_v39 = vor.u32 %v13231_v31, %v12050_v29  ;;  %v11778_v51 = vld [vmem:[#allocation8 + $0xc38] sm:$0xf0]  ;;  %v13195_v58 = vld [vmem:[#allocation8 + $0xd2c] sm:$0xf] }
 0x46f   :  { %v7713_v52 = vadd.f32 %v14163_v50, %v7699_v41  ;;  %v13227_v33 = vld [vmem:[#allocation8 + $0xe2c] sm:$0xf]  ;;  %v12034_v11 = vld [vmem:[#allocation8 + $0xe38] sm:$0xf0]  ;;  %v11781_v7 = vor.u32 %v13163_v0, %v11778_v51 }
 0x470   :  { %8110 = vmatpush.bf16.msrb.mxu2 %v12117_v5  ;;  %8083 = vmatpush.bf16.msrb.mxu0 %v11845_v1  ;;  %v13267_v5 = vld [vmem:[#allocation8 + $0xf6c] sm:$0xf]  ;;  %v7701_v1 = vadd.f32 %v14167_v53, %v4675_v48  ;;  %v12037_v22 = vor.u32 %v13227_v33, %v12034_v11  ;;  %v11762_v48 = vld [vmem:[#allocation8 + $0xc18] sm:$0xf0] }
 0x471   :  { %v7727_v57 = vadd.f32 %v14165_v46, %v7713_v52  ;;  %v12197_v50 = vor.u32 %v13267_v5, %v12194_v26  ;;  %v13263_v4 = vld [vmem:[#allocation8 + $0xf4c] sm:$0xf]  ;;  %v12178_v46 = vld [vmem:[#allocation8 + $0xf58] sm:$0xf0] }
 0x472   :  { %8097 = vmatpush.bf16.msrb.mxu1 %v11973_v42  ;;  %8124 = vmatpush.bf16.msrb.mxu3 %v12245_v28  ;;  %v7784_v42 = vpop.f32.mrf.mxu2  ;;  %v7810_v28 = vpop.f32.mrf.mxu0  ;;  %v13159_v53 = vld [vmem:[#allocation8 + $0xc0c] sm:$0xf]  ;;  %v12181_v34 = vor.u32 %v13263_v4, %v12178_v46  ;;  %v12018_v43 = vld [vmem:[#allocation8 + $0xe18] sm:$0xf0] }
 0x473   :  { %v7741_v35 = vadd.f32 %v14169_v3, %v7727_v57  ;;  %v11890_v3 = vld [vmem:[#allocation8 + $0xd18] sm:$0xf0]  ;;  %v13223_v6 = vld [vmem:[#allocation8 + $0xe0c] sm:$0xf]  ;;  %v11765_v9 = vor.u32 %v13159_v53, %v11762_v48 }
 0x474   :  { %8111 = vmatpush.bf16.msrb.mxu2 %v12101_v24  ;;  %8084 = vmatpush.bf16.msrb.mxu0 %v11829_v19  ;;  %v11906_v24 = vld [vmem:[#allocation8 + $0xd38] sm:$0xf0]  ;;  %v13191_v19 = vld [vmem:[#allocation8 + $0xd0c] sm:$0xf]  ;;  %v12021_v61 = vor.u32 %v13223_v6, %v12018_v43 }
 0x475   :  { %v7755_v40 = vadd.f32 %v14175_v8, %v7741_v35  ;;  %v11909_v44 = vor.u32 %v13195_v58, %v11906_v24  ;;  %v12162_v60 = vld [vmem:[#allocation8 + $0xf38] sm:$0xf0]  ;;  %v7824_v8 = vpop.f32.mrf.mxu1  ;;  %v11893_v45 = vor.u32 %v13191_v19, %v11890_v3  ;;  %v13255_v15 = vld [vmem:[#allocation8 + $0xf0c] sm:$0xf] }
 0x476   :  { %8098 = vmatpush.bf16.msrb.mxu1 %v11957_v49  ;;  %8125 = vmatpush.bf16.msrb.mxu3 %v12229_v56  ;;  %v7715_v49 = vadd.f32 %v14171_v36, %v7701_v1  ;;  %v13259_v56 = vld [vmem:[#allocation8 + $0xf2c] sm:$0xf]  ;;  %v12146_v30 = vld [vmem:[#allocation8 + $0xf18] sm:$0xf0] }
 0x477   :  { %v7769_v41 = vadd.f32 %v14182_v59, %v7755_v40  ;;  %v12149_v10 = vor.u32 %v13255_v15, %v12146_v30 }
 0x478   :  { %8112 = vmatpush.bf16.msrb.mxu2 %v12085_v17  ;;  %8085 = vmatpush.bf16.msrb.mxu0 %v11813_v47  ;;  %v7798_v17 = vpop.f32.mrf.mxu3  ;;  %v7729_v25 = vadd.f32 %v14173_v37, %v7715_v49  ;;  %v12165_v47 = vor.u32 %v13259_v56, %v12162_v60 }
 0x47a   :  { %8099 = vmatpush.bf16.msrb.mxu1 %v11941_v14  ;;  %8126 = vmatpush.bf16.msrb.mxu3 %v12213_v20  ;;  %v7838_v36 = vpop.f32.mrf.mxu2  ;;  %v7743_v14 = vadd.f32 %v14180_v63, %v7729_v25  ;;  %v7812_v20 = vpop.f32.mrf.mxu0 }
 0x47c   :  { %8113 = vmatpush.bf16.msrb.mxu2 %v12069_v23  ;;  %8086 = vmatpush.bf16.msrb.mxu0 %v11797_v62  ;;  %v7783_v23 = vadd.f32 %v14188_v27, %v7769_v41  ;;  %v7757_v37 = vadd.f32 %v14191_v12, %v7743_v14 }
 0x47d   :  { %v7826_v27 = vpop.f32.mrf.mxu1 }
 0x47e   :  { %8100 = vmatpush.bf16.msrb.mxu1 %v11925_v21  ;;  %8127 = vmatpush.bf16.msrb.mxu3 %v12197_v50  ;;  %v7797_v54 = vadd.f32 %v14193_v55, %v7783_v23  ;;  %v7771_v63 = vadd.f32 %v14196_v32, %v7757_v37 }
 0x480   :  { %8114 = vmatpush.bf16.msrb.mxu2 %v12053_v39  ;;  %8087 = vmatpush.bf16.msrb.mxu0 %v11781_v7  ;;  %v7852_v59 = vpop.f32.mrf.mxu3  ;;  %v7811_v31 = vadd.f32 %v7810_v28, %v7797_v54  ;;  %v7785_v12 = vadd.f32 %v7784_v42, %v7771_v63 }
 0x482   :  { %8101 = vmatpush.bf16.msrb.mxu1 %v11909_v44  ;;  %8128 = vmatpush.bf16.msrb.mxu3 %v12181_v34  ;;  %v7825_v29 = vadd.f32 %v7824_v8, %v7811_v31  ;;  %v7840_v55 = vpop.f32.mrf.mxu2  ;;  %v7799_v52 = vadd.f32 %v7798_v17, %v7785_v12  ;;  %v4676_v34 = vperm.slane %v14184_v38, 3 }
 0x484   :  { %8115 = vmatpush.bf16.msrb.mxu2 %v12037_v22  ;;  %8088 = vmatpush.bf16.msrb.mxu0 %v11765_v9  ;;  %v7839_v5 = vadd.f32 %v7838_v36, %v7825_v29  ;;  %v7866_v26 = vpop.f32.mrf.mxu0  ;;  %v7813_v62 = vadd.f32 %v7812_v20, %v7799_v52 }
 0x486   :  { %8102 = vmatpush.bf16.msrb.mxu1 %v11893_v45  ;;  %8129 = vmatpush.bf16.msrb.mxu3 %v12165_v47  ;;  %v7853_v57 = vadd.f32 %v7852_v59, %v7839_v5  ;;  %v7880_v39 = vpop.f32.mrf.mxu1 }
 0x487   :  { %8089 = vmatmul.bf16.vlgmr.msrb.gmra.mxu0 %v13994_v2 }
 0x488   :  { %8116 = vmatpush.bf16.msrb.mxu2 %v12021_v61  ;;  %v7854_v21 = vpop.f32.mrf.mxu3  ;;  %v7867_v2 = vadd.f32 %v7866_v26, %v7853_v57 }
 0x489   :  { %8103 = vmatmul.bf16.vlgmr.msrb.gmra.mxu1 %v13998_v16  ;;  %v7827_v16 = vadd.f32 %v7826_v27, %v7813_v62 }
 0x48a   :  { %8130 = vmatpush.bf16.msrb.mxu3 %v12149_v10  ;;  %v7881_v51 = vadd.f32 %v7880_v39, %v7867_v2 }
 0x48b   :  { %8117 = vmatmul.bf16.vlgmr.msrb.gmra.mxu2 %v13996_v13  ;;  %v7841_v13 = vadd.f32 %v7840_v55, %v7827_v16 }
 0x48c   :  { %v7868_v32 = vpop.f32.mrf.mxu0 }
 0x48d   :  { %8131 = vmatmul.bf16.vlgmr.msrb.gmra.mxu3 %v14004_v18  ;;  %v7855_v58 = vadd.f32 %v7854_v21, %v7841_v13 }
 0x48e   :  { %v7894_v0 = vpop.f32.mrf.mxu2  ;;  %v7882_v33 = vpop.f32.mrf.mxu1 }
 0x48f   :  { %v7895_v1 = vadd.f32 %v7894_v0, %v7881_v51  ;;  %v7869_v50 = vadd.f32 %v7868_v32, %v7855_v58 }
 0x490   :  { %v7908_v42 = vpop.f32.mrf.mxu3 }
 0x491   :  { %v7909_v24 = vadd.f32 %v7908_v42, %v7895_v1  ;;  %v7883_v18 = vadd.f32 %v7882_v33, %v7869_v50 }
 0x493   :  { %8139 = vst [vmem:[#allocation11 + $0x10] sm:$0xff] %v7909_v24 }
 0x496   :  { %v7896_v11 = vpop.f32.mrf.mxu2 }
 0x497   :  { %v7897_v35 = vadd.f32 %v7896_v11, %v7883_v18 }
 0x498   :  { %v7910_v28 = vpop.f32.mrf.mxu3 }
 0x499   :  { %v7911_v4 = vadd.f32 %v7910_v28, %v7897_v35 }
 0x49b   :  { %8143 = vst [vmem:[#allocation11 + $0x30] sm:$0xff] %v7911_v4 }
 0x4a4   :  { %v7922_v46 = vpop.f32.mrf.mxu0 }
 0x4a5   :  { %v7923_v43 = vadd.f32 %v7922_v46, %v4676_v34 }
 0x4a6   :  { %v7936_v7 = vpop.f32.mrf.mxu1 }
 0x4a7   :  { %v7937_v60 = vadd.f32 %v7936_v7, %v7923_v43 }
 0x4ac   :  { %v7924_v44 = vpop.f32.mrf.mxu0 }
 0x4ad   :  { %v7925_v45 = vadd.f32 %v7924_v44, %v4676_v34 }
 0x4ae   :  { %v7950_v40 = vpop.f32.mrf.mxu2  ;;  %v7938_v53 = vpop.f32.mrf.mxu1 }
 0x4af   :  { %v7951_v8 = vadd.f32 %v7950_v40, %v7937_v60  ;;  %v7939_v14 = vadd.f32 %v7938_v53, %v7925_v45 }
 0x4b0   :  { %v7964_v22 = vpop.f32.mrf.mxu3 }
 0x4b1   :  { %v7965_v61 = vadd.f32 %v7964_v22, %v7951_v8 }
 0x4b6   :  { %v7952_v48 = vpop.f32.mrf.mxu2 }
 0x4b7   :  { %v7953_v15 = vadd.f32 %v7952_v48, %v7939_v14 }
 0x4b8   :  { %v7966_v49 = vpop.f32.mrf.mxu3 }
 0x4b9   :  { %v7967_v54 = vadd.f32 %v7966_v49, %v7953_v15 }
 0x4c4   :  { %v7978_v19 = vpop.f32.mrf.mxu0 }
 0x4c5   :  { %v7979_v36 = vadd.f32 %v7978_v19, %v7965_v61 }
 0x4c6   :  { %v7992_v17 = vpop.f32.mrf.mxu1 }
 0x4c7   :  { %v7993_v30 = vadd.f32 %v7992_v17, %v7979_v36 }
 0x4cc   :  { %v7980_v6 = vpop.f32.mrf.mxu0 }
 0x4cd   :  { %v7981_v59 = vadd.f32 %v7980_v6, %v7967_v54 }
 0x4ce   :  { %v8006_v3 = vpop.f32.mrf.mxu2  ;;  %v7994_v25 = vpop.f32.mrf.mxu1 }
 0x4cf   :  { %v8007_v38 = vadd.f32 %v8006_v3, %v7993_v30  ;;  %v7995_v27 = vadd.f32 %v7994_v25, %v7981_v59 }
 0x4d0   :  { %v8020_v56 = vpop.f32.mrf.mxu3 }
 0x4d1   :  { %v8021_v10 = vadd.f32 %v8020_v56, %v8007_v38 }
 0x4d6   :  { %v8008_v9 = vpop.f32.mrf.mxu2 }
 0x4d7   :  { %v8009_v29 = vadd.f32 %v8008_v9, %v7995_v27 }
 0x4d8   :  { %v8022_v47 = vpop.f32.mrf.mxu3 }
 0x4d9   :  { %v8023_v26 = vadd.f32 %v8022_v47, %v8009_v29 }
 0x4e4   :  { %v8034_v41 = vpop.f32.mrf.mxu0 }
 0x4e5   :  { %v8035_v63 = vadd.f32 %v8034_v41, %v8021_v10 }
 0x4e6   :  { %v8048_v23 = vpop.f32.mrf.mxu1 }
 0x4e7   :  { %v8049_v55 = vadd.f32 %v8048_v23, %v8035_v63 }
 0x4ec   :  { %v8036_v20 = vpop.f32.mrf.mxu0 }
 0x4ed   :  { %v8037_v57 = vadd.f32 %v8036_v20, %v8023_v26 }
 0x4ee   :  { %v8062_v37 = vpop.f32.mrf.mxu2  ;;  %v8050_v12 = vpop.f32.mrf.mxu1 }
 0x4ef   :  { %v8063_v62 = vadd.f32 %v8062_v37, %v8049_v55  ;;  %v8051_v0 = vadd.f32 %v8050_v12, %v8037_v57 }
 0x4f0   :  { %v8076_v31 = vpop.f32.mrf.mxu3 }
 0x4f1   :  { %v8077_v21 = vadd.f32 %v8076_v31, %v8063_v62 }
 0x4f6   :  { %v8064_v52 = vpop.f32.mrf.mxu2 }
 0x4f7   :  { %v8065_v51 = vadd.f32 %v8064_v52, %v8051_v0 }
 0x4f8   :  { %v8078_v2 = vpop.f32.mrf.mxu3 }
 0x4f9   :  { %v8079_v1 = vadd.f32 %v8078_v2, %v8065_v51 }
 0x504   :  { %v8090_v5 = vpop.f32.mrf.mxu0 }
 0x505   :  { %v8091_v39 = vadd.f32 %v8090_v5, %v8077_v21 }
 0x506   :  { %v8104_v16 = vpop.f32.mrf.mxu1 }
 0x507   :  { %v8105_v32 = vadd.f32 %v8104_v16, %v8091_v39 }
 0x50c   :  { %v8092_v58 = vpop.f32.mrf.mxu0 }
 0x50d   :  { %v8093_v24 = vadd.f32 %v8092_v58, %v8079_v1 }
 0x50e   :  { %v8118_v13 = vpop.f32.mrf.mxu2  ;;  %v8106_v11 = vpop.f32.mrf.mxu1 }
 0x50f   :  { %v8119_v42 = vadd.f32 %v8118_v13, %v8105_v32  ;;  %v8107_v35 = vadd.f32 %v8106_v11, %v8093_v24 }
 0x510   :  { %v8132_v50 = vpop.f32.mrf.mxu3 }
 0x511   :  { %v8133_v33 = vadd.f32 %v8132_v50, %v8119_v42 }
 0x513   :  { %8140 = vst [vmem:[#allocation11 + $0x18] sm:$0xff] %v8133_v33 }
 0x516   :  { %v8120_v18 = vpop.f32.mrf.mxu2 }
 0x517   :  { %v8121_v28 = vadd.f32 %v8120_v18, %v8107_v35 }
 0x518   :  { %v8134_v4 = vpop.f32.mrf.mxu3 }
 0x519   :  { %v8135_v46 = vadd.f32 %v8134_v4, %v8121_v28 }
 0x51b   :  { %8144 = vst [vmem:[#allocation11 + $0x38] sm:$0xff] %v8135_v46 }
 0x51c   :  { %8157 = dma.vmem_to_hbm [thread:$0]  %s8150_s4, 1024, %s8152_s23, [#allocation4], %s13462_s13, %s13462_s13, %s13463_s14  }
 0x51d   :  { %13453 = dma.done.wait [#allocation4], 1024  }
 0x51e   :  { %13454 = vsyncadd [#allocation4], 4294966272 }
 0x51f   :  { %8162 = vsyncpa [#allocation3], 1 }
 0x520   :  { %8163 = vsyncpa [#allocation6], 1 }
 0x521   :  { %8164 = vsyncpa [#allocation9], 1 }
 0x522   :  { %8165 = vsyncpa [#allocation4], 1 }

</bundles_post_ra>
